<compile_context>
chip_gen: v7x
topology: tpu7x:2x2x1
jax: 0.10.0
libtpu: 0.0.40
codegen_flags: <defaults>
</compile_context>

<pallas_src>
import jax
import jax.numpy as jnp
import numpy as np
from jax.experimental import pallas as pl
from jax.experimental.pallas import tpu as pltpu

# ----------------------------- config (== args) -----------------------------
B = 2            # batch
N = 8            # number of utterances
EMB_DIM = 32     # args.emb_dim
HIDDEN = 32      # args.hidden_dim
GNN_LAYERS = 2   # args.gnn_layers
MLP_LAYERS = 2   # args.mlp_layers
NUM_CLASS = 6    # num_class

B_PAD = 8        # batch rows per utterance group, sublane-aligned
_MASK_BIG = 1e30

# slab index layout (shared by prepare_params and the kernel)
_W_FC1 = 0
_W_GRU0 = 1                       # 6 blocks / layer: wih_r,z,n, whh_r,z,n
_W_MLP0 = 1 + 6 * GNN_LAYERS      # first MLP weight: (GNN_LAYERS+2) row blocks
_B_FC1 = 0
_B_GRU0 = 1                       # 7 rows / layer: bih_r,z,n, bhh_r,z,n, w_k
_B_MLP0 = 1 + 7 * GNN_LAYERS


# ------------------------------ fused Pallas kernel --------------------------
def _dagerc_kernel(rel_d_ref,      # SMEM (L,)            f32   wr.(rel1-rel0) per layer
                   feats_ref,      # VMEM (N*BP, E)       f32
                   mask_ref,       # VMEM (2, N, N, BP)   f32   [s_mask, adj/future mask]
                   w_ref,          # VMEM (KW, D, D)      bf16  weight slab
                   b_ref,          # VMEM (KB, 1, D)      f32   bias / vector slab
                   out_ref,        # VMEM (N*BP, D)       f32
                   h_ref):         # scratch (L+1, N, BP, D) f32
    f32, bf16 = jnp.float32, jnp.bfloat16
    d = HIDDEN
    n, bp = N, B_PAD
    rows = n * bp

    def mm(x, wi):
        return jnp.dot(x.astype(bf16), w_ref[wi], preferred_element_type=f32)

    feats = feats_ref[...]                                   # (rows, E) f32

    # ---- H0 = relu(fc1(features)): one MXU matmul over all rows -------------
    h0 = jnp.maximum(mm(feats, _W_FC1) + b_ref[_B_FC1], 0.0)
    h_ref[0] = h0.reshape(n, bp, d)

    smask = mask_ref[0]                                      # (N_i, N_j, BP)
    adj_m = mask_ref[1]                                      # (adj-1)*BIG - (j>=i)*BIG

    # ------------------------------ GNN layers -------------------------------
    for l in range(GNN_LAYERS):
        wb = _W_GRU0 + 6 * l
        bb = _B_GRU0 + 7 * l
        base = rel_d_ref[l] * smask + adj_m                  # (N_i, N_j, BP) f32
        bhh_r, bhh_z, bhh_n = b_ref[bb + 3], b_ref[bb + 4], b_ref[bb + 5]
        wk = b_ref[bb + 6].reshape(1, 1, d)                  # (1, 1, D) f32

        h_prev = h_ref[l].reshape(rows, d)                   # (rows, D) f32
        # hoisted input-gate matmuls over every utterance/batch row
        gx_r = (mm(h_prev, wb + 0) + b_ref[bb + 0]).reshape(n, bp, d)
        gx_z = (mm(h_prev, wb + 1) + b_ref[bb + 1]).reshape(n, bp, d)
        gx_n = (mm(h_prev, wb + 2) + b_ref[bb + 2]).reshape(n, bp, d)

        def gru(i, h):
            # torch.nn.GRUCell with precomputed input gates; hidden gates on MXU.
            hb = h.astype(bf16)
            gh_r = jnp.dot(hb, w_ref[wb + 3], preferred_element_type=f32) + bhh_r
            gh_z = jnp.dot(hb, w_ref[wb + 4], preferred_element_type=f32) + bhh_z
            gh_n = jnp.dot(hb, w_ref[wb + 5], preferred_element_type=f32) + bhh_n
            r = jax.nn.sigmoid(gx_r[i] + gh_r)
            z = jax.nn.sigmoid(gx_z[i] + gh_z)
            cand = jnp.tanh(gx_n[i] + r * gh_n)
            return (1.0 - z) * cand + z * h

        # zero the layer history so the fixed-shape masked attention never
        # multiplies uninitialized scratch (attn for j>=i is exactly 0).
        h_ref[l + 1] = jnp.zeros((n, bp, d), f32)

        # i = 0: GRUCell with zero hidden state, no attention.
        r0 = jax.nn.sigmoid(gx_r[0] + bhh_r)
        z0 = jax.nn.sigmoid(gx_z[0] + bhh_z)
        c0 = jnp.tanh(gx_n[0] + r0 * bhh_n)
        h_ref[l + 1, 0] = (1.0 - z0) * c0

        # fully unrolled DAG recurrence, fixed-shape masked softmax per step.
        for i in range(1, n):
            hist = h_ref[l + 1]                              # (N_j, BP, D)
            kval = jnp.sum(hist * wk, axis=-1)               # (N_j, BP)  wk.H1[j]
            logits = base[i] + kval                          # (N_j, BP)
            m = jnp.max(logits, axis=0, keepdims=True)       # (1, BP)
            e = jnp.exp(logits - m)
            attn = e * pl.reciprocal(jnp.sum(e, axis=0, keepdims=True),
                                     approx=True)            # (N_j, BP)
            wgt = attn[:, :, None] * hist                    # (N_j, BP, D)
            m_agg = wgt[0]
            for j in range(1, n):
                m_agg = m_agg + wgt[j]                       # (BP, D)
            h_ref[l + 1, i] = gru(i, m_agg)

    # ---- out_mlp on [H0 | H1 | ... | HL | features] --------------------------
    # First MLP layer as a sum of (D,D) block matmuls -> no lane-axis concat.
    wi = _W_MLP0
    bi = _B_MLP0
    x = mm(feats, wi + GNN_LAYERS + 1)                       # features block
    for l in range(GNN_LAYERS + 1):
        x = x + mm(h_ref[l].reshape(rows, d), wi + l)
    x = jnp.maximum(x + b_ref[bi], 0.0)
    wi += GNN_LAYERS + 2
    bi += 1
    for _ in range(MLP_LAYERS - 1):
        x = jnp.maximum(mm(x, wi) + b_ref[bi], 0.0)
        wi += 1
        bi += 1
    x = mm(x, wi) + b_ref[bi]                                # lanes >= NUM_CLASS are 0
    out_ref[...] = x


# ------------------------------ params & packing -----------------------------
def init_params(key):
    keys = iter(jax.random.split(key, 64))

    def nrm(shape, scale):
        return jax.random.normal(next(keys), shape, jnp.float32) * scale

    d, e = HIDDEN, EMB_DIM
    in_dim = d * (GNN_LAYERS + 1) + e
    params = {
        'rel_emb': nrm((2, d), 0.3),
        'fc1_w': nrm((d, e), 1.0 / np.sqrt(e)),
        'fc1_b': nrm((d,), 0.05),
        'layers': [],
        'mlp': [],
    }
    for _ in range(GNN_LAYERS):
        params['layers'].append({
            'attn_w': nrm((1, 3 * d), 1.0 / np.sqrt(3 * d)),
            'attn_b': nrm((1,), 0.05),
            'w_ih': nrm((3 * d, d), 1.0 / np.sqrt(d)),
            'w_hh': nrm((3 * d, d), 1.0 / np.sqrt(d)),
            'b_ih': nrm((3 * d,), 0.05),
            'b_hh': nrm((3 * d,), 0.05),
        })
    params['mlp'].append((nrm((d, in_dim), 1.0 / np.sqrt(in_dim)), nrm((d,), 0.05)))
    for _ in range(MLP_LAYERS - 1):
        params['mlp'].append((nrm((d, d), 1.0 / np.sqrt(d)), nrm((d,), 0.05)))
    params['mlp'].append((nrm((NUM_CLASS, d), 1.0 / np.sqrt(d)), nrm((NUM_CLASS,), 0.05)))
    return params


def prepare_params(params):
    """One-time packing of ALL weights into a bf16 slab + an f32 slab + SMEM scalars."""
    f32, bf16 = jnp.float32, jnp.bfloat16
    d = HIDDEN
    assert EMB_DIM == HIDDEN, "slab packing assumes square (D, D) blocks"
    assert NUM_CLASS <= HIDDEN

    wblocks = [params['fc1_w'].T]                              # (E, D)
    bblocks = [params['fc1_b'].reshape(1, d)]
    rel_delta = params['rel_emb'][1] - params['rel_emb'][0]    # (D,)
    rel_d = []
    for p in params['layers']:
        for k in range(3):                                     # wih_r, wih_z, wih_n
            wblocks.append(p['w_ih'][k * d:(k + 1) * d, :].T)
        for k in range(3):                                     # whh_r, whh_z, whh_n
            wblocks.append(p['w_hh'][k * d:(k + 1) * d, :].T)
        for k in range(3):
            bblocks.append(p['b_ih'][k * d:(k + 1) * d].reshape(1, d))
        for k in range(3):
            bblocks.append(p['b_hh'][k * d:(k + 1) * d].reshape(1, d))
        attn_w = p['attn_w'].reshape(3 * d)                    # [wq | wk | wr]
        bblocks.append(attn_w[d:2 * d].reshape(1, d))          # w_k
        rel_d.append(jnp.sum(attn_w[2 * d:] * rel_delta))      # wr.(rel1-rel0)
        # wq, attn_b, wr.rel0 are constant along the softmax axis -> dropped.

    w0, b0 = params['mlp'][0]                                  # (D, in_dim), (D,)
    w0t = w0.T                                                 # (in_dim, D)
    for k in range(GNN_LAYERS + 2):                            # H0..HL, feats blocks
        wblocks.append(w0t[k * d:(k + 1) * d, :])
    bblocks.append(b0.reshape(1, d))
    for (w, bias) in params['mlp'][1:-1]:
        wblocks.append(w.T)
        bblocks.append(bias.reshape(1, d))
    w_last, b_last = params['mlp'][-1]                         # (C, D), (C,)
    wblocks.append(jnp.zeros((d, d), f32).at[:, :NUM_CLASS].set(w_last.T))
    bblocks.append(jnp.zeros((1, d), f32).at[:, :NUM_CLASS].set(b_last.reshape(1, -1)))

    return {
        'rel_d': jnp.stack(rel_d).astype(f32),                 # (L,)    -> SMEM
        'wslab': jnp.stack(wblocks).astype(bf16),              # (KW, D, D)
        'bslab': jnp.stack(bblocks).astype(f32),               # (KB, 1, D)
    }


@jax.jit
def dagerc_forward(features, adj, s_mask, packed):
    b, n, e = features.shape
    reps = (B_PAD + b - 1) // b
    f32 = jnp.float32

    # utterance-major rows, batch tiled to B_PAD (copies -> no masked garbage)
    feats = jnp.transpose(features, (1, 0, 2))                           # (N, B, E)
    feats = jnp.tile(feats, (1, reps, 1))[:, :B_PAD, :].reshape(n * B_PAD, e)
    smask_t = jnp.tile(jnp.transpose(s_mask.astype(f32), (1, 2, 0)),
                       (1, 1, reps))[:, :, :B_PAD]                       # (N_i, N_j, BP)
    adj_t = jnp.tile(jnp.transpose(adj.astype(f32), (1, 2, 0)),
                     (1, 1, reps))[:, :, :B_PAD]
    # adjacency mask + history-only (j < i) mask, matching the reference [:, :i] slice
    future = jnp.triu(jnp.ones((n, n), f32))[:, :, None]
    adj_mask = (adj_t - 1.0) * _MASK_BIG - future * _MASK_BIG
    mask_pack = jnp.stack([smask_t, adj_mask])                           # (2, N, N, BP)

    vmem = pltpu.MemorySpace.VMEM
    out = pl.pallas_call(
        _dagerc_kernel,
        out_shape=jax.ShapeDtypeStruct((n * B_PAD, HIDDEN), jnp.float32),
        in_specs=[pl.BlockSpec(memory_space=pltpu.MemorySpace.SMEM),
                  pl.BlockSpec(memory_space=vmem),
                  pl.BlockSpec(memory_space=vmem),
                  pl.BlockSpec(memory_space=vmem),
                  pl.BlockSpec(memory_space=vmem)],
        out_specs=pl.BlockSpec(memory_space=vmem),
        scratch_shapes=[pltpu.VMEM((GNN_LAYERS + 1, n, B_PAD, HIDDEN), jnp.float32)],
    )(packed['rel_d'], feats, mask_pack, packed['wslab'], packed['bslab'])

    out = out.reshape(n, B_PAD, HIDDEN)[:, :b, :NUM_CLASS]
    return jnp.transpose(out, (1, 0, 2))                                 # (B, N, C)


# ---------------------------- pure-JAX reference ----------------------------
def reference_forward(features, adj, s_mask, params):
    """f32 / highest-precision reference of DAGERC.forward."""
    HP = jax.lax.Precision.HIGHEST

    def mm(a, bm):
        return jnp.dot(a, bm, precision=HP)

    b, n, e = features.shape
    d = HIDDEN
    adjf = adj.astype(jnp.float32)
    rel_ft = params['rel_emb'][s_mask]                              # (B, N, N, D)

    def gru(p, x, h):
        gx = mm(x, p['w_ih'].T) + p['b_ih']
        gh = mm(h, p['w_hh'].T) + p['b_hh']
        r = jax.nn.sigmoid(gx[:, :d] + gh[:, :d])
        z = jax.nn.sigmoid(gx[:, d:2 * d] + gh[:, d:2 * d])
        nn_ = jnp.tanh(gx[:, 2 * d:] + r * gh[:, 2 * d:])
        return (1.0 - z) * nn_ + z * h

    h0 = jax.nn.relu(mm(features.reshape(b * n, e), params['fc1_w'].T)
                     + params['fc1_b']).reshape(b, n, d)
    hs = [h0]
    for l in range(GNN_LAYERS):
        p = params['layers'][l]
        hl = hs[l]
        h1 = gru(p, hl[:, 0, :], jnp.zeros((b, d), jnp.float32))[:, None, :]
        for i in range(1, n):
            q = hl[:, i, :]
            k = h1
            rel = rel_ft[:, i, :i, :]
            xcat = jnp.concatenate(
                [jnp.broadcast_to(q[:, None, :], (b, i, d)), k, rel], axis=2)
            alpha = mm(xcat, p['attn_w'].T)[:, :, 0] + p['attn_b'][0]   # (B, i)
            alpha = alpha - (1.0 - adjf[:, i, :i]) * _MASK_BIG
            attn = jax.nn.softmax(alpha, axis=1)
            m_agg = jnp.einsum('bi,bid->bd', attn, k, precision=HP)
            h1 = jnp.concatenate([h1, gru(p, q, m_agg)[:, None, :]], axis=1)
        hs.append(h1)
    hs.append(features)
    x = jnp.concatenate(hs, axis=2).reshape(b * n, -1)
    n_mlp = len(params['mlp'])
    for idx, (w, bias) in enumerate(params['mlp']):
        x = mm(x, w.T) + bias
        if idx < n_mlp - 1:
            x = jax.nn.relu(x)
    return x.reshape(b, n, NUM_CLASS)


# ----------------------------------- main ------------------------------------
if __name__ == "__main__":
    key = jax.random.PRNGKey(0)
    kf, ka, km, kp = jax.random.split(key, 4)

    features = jax.random.normal(kf, (B, N, EMB_DIM), jnp.float32)

    # DAG adjacency: each utterance attends to a random subset of earlier
    # utterances, always including its immediate predecessor.
    tri = np.tril(np.ones((N, N), np.float32), k=-1)
    rnd = np.asarray(jax.random.bernoulli(ka, 0.6, (B, N, N)), np.float32)
    adj_np = rnd * tri[None]
    for i in range(1, N):
        adj_np[:, i, i - 1] = 1.0
    adj = jnp.asarray(adj_np)

    s_mask = jax.random.randint(km, (B, N, N), 0, 2)        # same-speaker flag

    params = init_params(kp)
    packed = prepare_params(params)

    logits = dagerc_forward(features, adj, s_mask, packed)
    logits = jax.block_until_ready(logits)
    assert logits.shape == (B, N, NUM_CLASS)

    ref = reference_forward(features, adj, s_mask, params)
    # Tolerance covers bf16 MXU operands (f32 accumulation) vs. the f32
    # highest-precision reference.
    np.testing.assert_allclose(np.asarray(logits), np.asarray(ref),
                               rtol=5e-2, atol=5e-2)

    print("KERNEL_OK")
</pallas_src>

<mosaic_0001>
module attributes {stable_mosaic.version = 11 : i64} {
  func.func @_dagerc_kernel(%arg0: memref<2xf32, #tpu.memory_space<smem>>, %arg1: memref<64x32xf32, #tpu.memory_space<vmem>>, %arg2: memref<2x8x8x8xf32, #tpu.memory_space<vmem>>, %arg3: memref<19x32x32xbf16, #tpu.memory_space<vmem>>, %arg4: memref<18x1x32xf32, #tpu.memory_space<vmem>>, %arg5: memref<64x32xf32, #tpu.memory_space<vmem>>, %arg6: memref<3x8x8x32xf32, #tpu.memory_space<vmem>>) attributes {dimension_semantics = [], scalar_prefetch = 0 : i64, scratch_operands = 1 : i64, tpu.core_type = #tpu.core_type<tc>} {
    %c0 = arith.constant 0 : index
    %c0_0 = arith.constant 0 : index
    %0 = vector.load %arg1[%c0, %c0_0] : memref<64x32xf32, #tpu.memory_space<vmem>>, vector<64x32xf32>
    %1 = arith.truncf %0 : vector<64x32xf32> to vector<64x32xbf16>
    %c0_1 = arith.constant 0 : index
    %c0_2 = arith.constant 0 : index
    %c0_3 = arith.constant 0 : index
    %2 = vector.load %arg3[%c0_1, %c0_2, %c0_3] : memref<19x32x32xbf16, #tpu.memory_space<vmem>>, vector<1x32x32xbf16>
    %3 = vector.shape_cast %2 : vector<1x32x32xbf16> to vector<32x32xbf16>
    %cst = arith.constant dense<0.000000e+00> : vector<64x32xf32>
    %4 = tpu.matmul %1, %3, %cst {dimension_numbers = #tpu.dot_dimension_numbers<[1], [0], [0], [1], [0, 0, 1, 1], [], []>} : vector<64x32xbf16>, vector<32x32xbf16>, vector<64x32xf32> -> vector<64x32xf32>
    %c0_4 = arith.constant 0 : index
    %c0_5 = arith.constant 0 : index
    %c0_6 = arith.constant 0 : index
    %5 = vector.load %arg4[%c0_4, %c0_5, %c0_6] : memref<18x1x32xf32, #tpu.memory_space<vmem>>, vector<1x1x32xf32>
    %6 = vector.shape_cast %5 : vector<1x1x32xf32> to vector<1x32xf32>
    %7 = vector.broadcast %6 : vector<1x32xf32> to vector<64x32xf32>
    %8 = arith.addf %4, %7 : vector<64x32xf32>
    %cst_7 = arith.constant 0.000000e+00 : f32
    %9 = vector.broadcast %cst_7 : f32 to vector<64x32xf32>
    %10 = arith.maximumf %8, %9 : vector<64x32xf32>
    %11 = vector.shape_cast %10 : vector<64x32xf32> to vector<8x8x32xf32>
    %c0_8 = arith.constant 0 : index
    %c0_9 = arith.constant 0 : index
    %c0_10 = arith.constant 0 : index
    %c0_11 = arith.constant 0 : index
    %12 = vector.load %arg6[%c0_8, %c0_9, %c0_10, %c0_11] : memref<3x8x8x32xf32, #tpu.memory_space<vmem>>, vector<1x8x8x32xf32>
    %13 = vector.shape_cast %12 : vector<1x8x8x32xf32> to vector<8x8x32xf32>
    %14 = vector.shape_cast %11 : vector<8x8x32xf32> to vector<1x8x8x32xf32>
    tpu.vector_store %arg6[%c0_8, %c0_9, %c0_10, %c0_11], %14 {strides = array<i32>} : memref<3x8x8x32xf32, #tpu.memory_space<vmem>>, vector<1x8x8x32xf32>,
    %c0_12 = arith.constant 0 : index
    %c0_13 = arith.constant 0 : index
    %c0_14 = arith.constant 0 : index
    %c0_15 = arith.constant 0 : index
    %15 = vector.load %arg2[%c0_12, %c0_13, %c0_14, %c0_15] : memref<2x8x8x8xf32, #tpu.memory_space<vmem>>, vector<1x8x8x8xf32>
    %16 = vector.shape_cast %15 : vector<1x8x8x8xf32> to vector<8x8x8xf32>
    %c1 = arith.constant 1 : index
    %c0_16 = arith.constant 0 : index
    %c0_17 = arith.constant 0 : index
    %c0_18 = arith.constant 0 : index
    %17 = vector.load %arg2[%c1, %c0_16, %c0_17, %c0_18] : memref<2x8x8x8xf32, #tpu.memory_space<vmem>>, vector<1x8x8x8xf32>
    %18 = vector.shape_cast %17 : vector<1x8x8x8xf32> to vector<8x8x8xf32>
    %c0_19 = arith.constant 0 : index
    %19 = memref.load %arg0[%c0_19] : memref<2xf32, #tpu.memory_space<smem>>
    %20 = vector.broadcast %19 : f32 to vector<8x8x8xf32>
    %21 = arith.mulf %20, %16 : vector<8x8x8xf32>
    %22 = arith.addf %21, %18 : vector<8x8x8xf32>
    %c4 = arith.constant 4 : index
    %c0_20 = arith.constant 0 : index
    %c0_21 = arith.constant 0 : index
    %23 = vector.load %arg4[%c4, %c0_20, %c0_21] : memref<18x1x32xf32, #tpu.memory_space<vmem>>, vector<1x1x32xf32>
    %24 = vector.shape_cast %23 : vector<1x1x32xf32> to vector<1x32xf32>
    %c5 = arith.constant 5 : index
    %c0_22 = arith.constant 0 : index
    %c0_23 = arith.constant 0 : index
    %25 = vector.load %arg4[%c5, %c0_22, %c0_23] : memref<18x1x32xf32, #tpu.memory_space<vmem>>, vector<1x1x32xf32>
    %26 = vector.shape_cast %25 : vector<1x1x32xf32> to vector<1x32xf32>
    %c6 = arith.constant 6 : index
    %c0_24 = arith.constant 0 : index
    %c0_25 = arith.constant 0 : index
    %27 = vector.load %arg4[%c6, %c0_24, %c0_25] : memref<18x1x32xf32, #tpu.memory_space<vmem>>, vector<1x1x32xf32>
    %28 = vector.shape_cast %27 : vector<1x1x32xf32> to vector<1x32xf32>
    %c7 = arith.constant 7 : index
    %c0_26 = arith.constant 0 : index
    %c0_27 = arith.constant 0 : index
    %29 = vector.load %arg4[%c7, %c0_26, %c0_27] : memref<18x1x32xf32, #tpu.memory_space<vmem>>, vector<1x1x32xf32>
    %30 = vector.shape_cast %29 : vector<1x1x32xf32> to vector<1x32xf32>
    %31 = vector.shape_cast %30 : vector<1x32xf32> to vector<1x1x32xf32>
    %c0_28 = arith.constant 0 : index
    %c0_29 = arith.constant 0 : index
    %c0_30 = arith.constant 0 : index
    %c0_31 = arith.constant 0 : index
    %32 = vector.load %arg6[%c0_28, %c0_29, %c0_30, %c0_31] : memref<3x8x8x32xf32, #tpu.memory_space<vmem>>, vector<1x8x8x32xf32>
    %33 = vector.shape_cast %32 : vector<1x8x8x32xf32> to vector<8x8x32xf32>
    %34 = vector.shape_cast %33 : vector<8x8x32xf32> to vector<64x32xf32>
    %35 = arith.truncf %34 : vector<64x32xf32> to vector<64x32xbf16>
    %c1_32 = arith.constant 1 : index
    %c0_33 = arith.constant 0 : index
    %c0_34 = arith.constant 0 : index
    %36 = vector.load %arg3[%c1_32, %c0_33, %c0_34] : memref<19x32x32xbf16, #tpu.memory_space<vmem>>, vector<1x32x32xbf16>
    %37 = vector.shape_cast %36 : vector<1x32x32xbf16> to vector<32x32xbf16>
    %cst_35 = arith.constant dense<0.000000e+00> : vector<64x32xf32>
    %38 = tpu.matmul %35, %37, %cst_35 {dimension_numbers = #tpu.dot_dimension_numbers<[1], [0], [0], [1], [0, 0, 1, 1], [], []>} : vector<64x32xbf16>, vector<32x32xbf16>, vector<64x32xf32> -> vector<64x32xf32>
    %c1_36 = arith.constant 1 : index
    %c0_37 = arith.constant 0 : index
    %c0_38 = arith.constant 0 : index
    %39 = vector.load %arg4[%c1_36, %c0_37, %c0_38] : memref<18x1x32xf32, #tpu.memory_space<vmem>>, vector<1x1x32xf32>
    %40 = vector.shape_cast %39 : vector<1x1x32xf32> to vector<1x32xf32>
    %41 = vector.broadcast %40 : vector<1x32xf32> to vector<64x32xf32>
    %42 = arith.addf %38, %41 : vector<64x32xf32>
    %43 = vector.shape_cast %42 : vector<64x32xf32> to vector<8x8x32xf32>
    %44 = arith.truncf %34 : vector<64x32xf32> to vector<64x32xbf16>
    %c2 = arith.constant 2 : index
    %c0_39 = arith.constant 0 : index
    %c0_40 = arith.constant 0 : index
    %45 = vector.load %arg3[%c2, %c0_39, %c0_40] : memref<19x32x32xbf16, #tpu.memory_space<vmem>>, vector<1x32x32xbf16>
    %46 = vector.shape_cast %45 : vector<1x32x32xbf16> to vector<32x32xbf16>
    %cst_41 = arith.constant dense<0.000000e+00> : vector<64x32xf32>
    %47 = tpu.matmul %44, %46, %cst_41 {dimension_numbers = #tpu.dot_dimension_numbers<[1], [0], [0], [1], [0, 0, 1, 1], [], []>} : vector<64x32xbf16>, vector<32x32xbf16>, vector<64x32xf32> -> vector<64x32xf32>
    %c2_42 = arith.constant 2 : index
    %c0_43 = arith.constant 0 : index
    %c0_44 = arith.constant 0 : index
    %48 = vector.load %arg4[%c2_42, %c0_43, %c0_44] : memref<18x1x32xf32, #tpu.memory_space<vmem>>, vector<1x1x32xf32>
    %49 = vector.shape_cast %48 : vector<1x1x32xf32> to vector<1x32xf32>
    %50 = vector.broadcast %49 : vector<1x32xf32> to vector<64x32xf32>
    %51 = arith.addf %47, %50 : vector<64x32xf32>
    %52 = vector.shape_cast %51 : vector<64x32xf32> to vector<8x8x32xf32>
    %53 = arith.truncf %34 : vector<64x32xf32> to vector<64x32xbf16>
    %c3 = arith.constant 3 : index
    %c0_45 = arith.constant 0 : index
    %c0_46 = arith.constant 0 : index
    %54 = vector.load %arg3[%c3, %c0_45, %c0_46] : memref<19x32x32xbf16, #tpu.memory_space<vmem>>, vector<1x32x32xbf16>
    %55 = vector.shape_cast %54 : vector<1x32x32xbf16> to vector<32x32xbf16>
    %cst_47 = arith.constant dense<0.000000e+00> : vector<64x32xf32>
    %56 = tpu.matmul %53, %55, %cst_47 {dimension_numbers = #tpu.dot_dimension_numbers<[1], [0], [0], [1], [0, 0, 1, 1], [], []>} : vector<64x32xbf16>, vector<32x32xbf16>, vector<64x32xf32> -> vector<64x32xf32>
    %c3_48 = arith.constant 3 : index
    %c0_49 = arith.constant 0 : index
    %c0_50 = arith.constant 0 : index
    %57 = vector.load %arg4[%c3_48, %c0_49, %c0_50] : memref<18x1x32xf32, #tpu.memory_space<vmem>>, vector<1x1x32xf32>
    %58 = vector.shape_cast %57 : vector<1x1x32xf32> to vector<1x32xf32>
    %59 = vector.broadcast %58 : vector<1x32xf32> to vector<64x32xf32>
    %60 = arith.addf %56, %59 : vector<64x32xf32>
    %61 = vector.shape_cast %60 : vector<64x32xf32> to vector<8x8x32xf32>
    %cst_51 = arith.constant 0.000000e+00 : f32
    %62 = vector.broadcast %cst_51 : f32 to vector<8x8x32xf32>
    %c1_52 = arith.constant 1 : index
    %c0_53 = arith.constant 0 : index
    %c0_54 = arith.constant 0 : index
    %c0_55 = arith.constant 0 : index
    %63 = vector.load %arg6[%c1_52, %c0_53, %c0_54, %c0_55] : memref<3x8x8x32xf32, #tpu.memory_space<vmem>>, vector<1x8x8x32xf32>
    %64 = vector.shape_cast %63 : vector<1x8x8x32xf32> to vector<8x8x32xf32>
    %65 = vector.shape_cast %62 : vector<8x8x32xf32> to vector<1x8x8x32xf32>
    tpu.vector_store %arg6[%c1_52, %c0_53, %c0_54, %c0_55], %65 {strides = array<i32>} : memref<3x8x8x32xf32, #tpu.memory_space<vmem>>, vector<1x8x8x32xf32>,
    %66 = vector.extract_strided_slice %43 {offsets = [0, 0, 0], sizes = [1, 8, 32], strides = [1, 1, 1]} : vector<8x8x32xf32> to vector<1x8x32xf32>
    %67 = vector.shape_cast %66 : vector<1x8x32xf32> to vector<8x32xf32>
    %68 = vector.broadcast %24 : vector<1x32xf32> to vector<8x32xf32>
    %69 = arith.addf %67, %68 : vector<8x32xf32>
    %70 = arith.negf %69 : vector<8x32xf32>
    %71 = math.exp %70 : vector<8x32xf32>
    %cst_56 = arith.constant 1.000000e+00 : f32
    %72 = vector.broadcast %cst_56 : f32 to vector<8x32xf32>
    %73 = arith.addf %72, %71 : vector<8x32xf32>
    %74 = arith.divf %72, %73 : vector<8x32xf32>
    %75 = vector.extract_strided_slice %52 {offsets = [0, 0, 0], sizes = [1, 8, 32], strides = [1, 1, 1]} : vector<8x8x32xf32> to vector<1x8x32xf32>
    %76 = vector.shape_cast %75 : vector<1x8x32xf32> to vector<8x32xf32>
    %77 = vector.broadcast %26 : vector<1x32xf32> to vector<8x32xf32>
    %78 = arith.addf %76, %77 : vector<8x32xf32>
    %79 = arith.negf %78 : vector<8x32xf32>
    %80 = math.exp %79 : vector<8x32xf32>
    %cst_57 = arith.constant 1.000000e+00 : f32
    %81 = vector.broadcast %cst_57 : f32 to vector<8x32xf32>
    %82 = arith.addf %81, %80 : vector<8x32xf32>
    %83 = arith.divf %81, %82 : vector<8x32xf32>
    %84 = vector.extract_strided_slice %61 {offsets = [0, 0, 0], sizes = [1, 8, 32], strides = [1, 1, 1]} : vector<8x8x32xf32> to vector<1x8x32xf32>
    %85 = vector.shape_cast %84 : vector<1x8x32xf32> to vector<8x32xf32>
    %86 = vector.broadcast %28 : vector<1x32xf32> to vector<8x32xf32>
    %87 = arith.mulf %74, %86 : vector<8x32xf32>
    %88 = arith.addf %85, %87 : vector<8x32xf32>
    %89 = math.tanh %88 : vector<8x32xf32>
    %cst_58 = arith.constant 1.000000e+00 : f32
    %90 = vector.broadcast %cst_58 : f32 to vector<8x32xf32>
    %91 = arith.subf %90, %83 : vector<8x32xf32>
    %92 = arith.mulf %91, %89 : vector<8x32xf32>
    %c1_59 = arith.constant 1 : index
    %c0_60 = arith.constant 0 : index
    %c0_61 = arith.constant 0 : index
    %c0_62 = arith.constant 0 : index
    %93 = vector.load %arg6[%c1_59, %c0_60, %c0_61, %c0_62] : memref<3x8x8x32xf32, #tpu.memory_space<vmem>>, vector<1x1x8x32xf32>
    %94 = vector.shape_cast %93 : vector<1x1x8x32xf32> to vector<8x32xf32>
    %95 = vector.shape_cast %92 : vector<8x32xf32> to vector<1x1x8x32xf32>
    tpu.vector_store %arg6[%c1_59, %c0_60, %c0_61, %c0_62], %95 {strides = array<i32>} : memref<3x8x8x32xf32, #tpu.memory_space<vmem>>, vector<1x1x8x32xf32>,
    %c1_63 = arith.constant 1 : index
    %c0_64 = arith.constant 0 : index
    %c0_65 = arith.constant 0 : index
    %c0_66 = arith.constant 0 : index
    %96 = vector.load %arg6[%c1_63, %c0_64, %c0_65, %c0_66] : memref<3x8x8x32xf32, #tpu.memory_space<vmem>>, vector<1x8x8x32xf32>
    %97 = vector.shape_cast %96 : vector<1x8x8x32xf32> to vector<8x8x32xf32>
    %98 = vector.broadcast %31 : vector<1x1x32xf32> to vector<8x8x32xf32>
    %99 = arith.mulf %97, %98 : vector<8x8x32xf32>
    %cst_67 = arith.constant dense<0.000000e+00> : vector<8x8xf32>
    %100 = vector.multi_reduction <add>, %99, %cst_67 [2] : vector<8x8x32xf32> to vector<8x8xf32>
    %101 = vector.extract_strided_slice %22 {offsets = [1, 0, 0], sizes = [1, 8, 8], strides = [1, 1, 1]} : vector<8x8x8xf32> to vector<1x8x8xf32>
    %102 = vector.shape_cast %101 : vector<1x8x8xf32> to vector<8x8xf32>
    %103 = arith.addf %102, %100 : vector<8x8xf32>
    %cst_68 = arith.constant dense<0xFF800000> : vector<8xf32>
    %104 = vector.multi_reduction <maximumf>, %103, %cst_68 [0] : vector<8x8xf32> to vector<8xf32>
    %105 = vector.shape_cast %104 : vector<8xf32> to vector<1x8xf32>
    %106 = vector.broadcast %105 : vector<1x8xf32> to vector<8x8xf32>
    %107 = arith.subf %103, %106 : vector<8x8xf32>
    %108 = math.exp %107 : vector<8x8xf32>
    %cst_69 = arith.constant dense<0.000000e+00> : vector<8xf32>
    %109 = vector.multi_reduction <add>, %108, %cst_69 [0] : vector<8x8xf32> to vector<8xf32>
    %110 = vector.shape_cast %109 : vector<8xf32> to vector<1x8xf32>
    %111 = tpu.reciprocal %110 {approx = true} : vector<1x8xf32> -> vector<1x8xf32>
    %112 = vector.broadcast %111 : vector<1x8xf32> to vector<8x8xf32>
    %113 = arith.mulf %108, %112 : vector<8x8xf32>
    %114 = vector.shape_cast %113 : vector<8x8xf32> to vector<8x8x1xf32>
    %115 = vector.broadcast %114 : vector<8x8x1xf32> to vector<8x8x32xf32>
    %116 = arith.mulf %115, %97 : vector<8x8x32xf32>
    %117 = vector.extract_strided_slice %116 {offsets = [0, 0, 0], sizes = [1, 8, 32], strides = [1, 1, 1]} : vector<8x8x32xf32> to vector<1x8x32xf32>
    %118 = vector.shape_cast %117 : vector<1x8x32xf32> to vector<8x32xf32>
    %119 = vector.extract_strided_slice %116 {offsets = [1, 0, 0], sizes = [1, 8, 32], strides = [1, 1, 1]} : vector<8x8x32xf32> to vector<1x8x32xf32>
    %120 = vector.shape_cast %119 : vector<1x8x32xf32> to vector<8x32xf32>
    %121 = arith.addf %118, %120 : vector<8x32xf32>
    %122 = vector.extract_strided_slice %116 {offsets = [2, 0, 0], sizes = [1, 8, 32], strides = [1, 1, 1]} : vector<8x8x32xf32> to vector<1x8x32xf32>
    %123 = vector.shape_cast %122 : vector<1x8x32xf32> to vector<8x32xf32>
    %124 = arith.addf %121, %123 : vector<8x32xf32>
    %125 = vector.extract_strided_slice %116 {offsets = [3, 0, 0], sizes = [1, 8, 32], strides = [1, 1, 1]} : vector<8x8x32xf32> to vector<1x8x32xf32>
    %126 = vector.shape_cast %125 : vector<1x8x32xf32> to vector<8x32xf32>
    %127 = arith.addf %124, %126 : vector<8x32xf32>
    %128 = vector.extract_strided_slice %116 {offsets = [4, 0, 0], sizes = [1, 8, 32], strides = [1, 1, 1]} : vector<8x8x32xf32> to vector<1x8x32xf32>
    %129 = vector.shape_cast %128 : vector<1x8x32xf32> to vector<8x32xf32>
    %130 = arith.addf %127, %129 : vector<8x32xf32>
    %131 = vector.extract_strided_slice %116 {offsets = [5, 0, 0], sizes = [1, 8, 32], strides = [1, 1, 1]} : vector<8x8x32xf32> to vector<1x8x32xf32>
    %132 = vector.shape_cast %131 : vector<1x8x32xf32> to vector<8x32xf32>
    %133 = arith.addf %130, %132 : vector<8x32xf32>
    %134 = vector.extract_strided_slice %116 {offsets = [6, 0, 0], sizes = [1, 8, 32], strides = [1, 1, 1]} : vector<8x8x32xf32> to vector<1x8x32xf32>
    %135 = vector.shape_cast %134 : vector<1x8x32xf32> to vector<8x32xf32>
    %136 = arith.addf %133, %135 : vector<8x32xf32>
    %137 = vector.extract_strided_slice %116 {offsets = [7, 0, 0], sizes = [1, 8, 32], strides = [1, 1, 1]} : vector<8x8x32xf32> to vector<1x8x32xf32>
    %138 = vector.shape_cast %137 : vector<1x8x32xf32> to vector<8x32xf32>
    %139 = arith.addf %136, %138 : vector<8x32xf32>
    %140 = arith.truncf %139 : vector<8x32xf32> to vector<8x32xbf16>
    %c4_70 = arith.constant 4 : index
    %c0_71 = arith.constant 0 : index
    %c0_72 = arith.constant 0 : index
    %141 = vector.load %arg3[%c4_70, %c0_71, %c0_72] : memref<19x32x32xbf16, #tpu.memory_space<vmem>>, vector<1x32x32xbf16>
    %142 = vector.shape_cast %141 : vector<1x32x32xbf16> to vector<32x32xbf16>
    %cst_73 = arith.constant dense<0.000000e+00> : vector<8x32xf32>
    %143 = tpu.matmul %140, %142, %cst_73 {dimension_numbers = #tpu.dot_dimension_numbers<[1], [0], [0], [1], [0, 0, 1, 1], [], []>} : vector<8x32xbf16>, vector<32x32xbf16>, vector<8x32xf32> -> vector<8x32xf32>
    %144 = vector.broadcast %24 : vector<1x32xf32> to vector<8x32xf32>
    %145 = arith.addf %143, %144 : vector<8x32xf32>
    %c5_74 = arith.constant 5 : index
    %c0_75 = arith.constant 0 : index
    %c0_76 = arith.constant 0 : index
    %146 = vector.load %arg3[%c5_74, %c0_75, %c0_76] : memref<19x32x32xbf16, #tpu.memory_space<vmem>>, vector<1x32x32xbf16>
    %147 = vector.shape_cast %146 : vector<1x32x32xbf16> to vector<32x32xbf16>
    %cst_77 = arith.constant dense<0.000000e+00> : vector<8x32xf32>
    %148 = tpu.matmul %140, %147, %cst_77 {dimension_numbers = #tpu.dot_dimension_numbers<[1], [0], [0], [1], [0, 0, 1, 1], [], []>} : vector<8x32xbf16>, vector<32x32xbf16>, vector<8x32xf32> -> vector<8x32xf32>
    %149 = vector.broadcast %26 : vector<1x32xf32> to vector<8x32xf32>
    %150 = arith.addf %148, %149 : vector<8x32xf32>
    %c6_78 = arith.constant 6 : index
    %c0_79 = arith.constant 0 : index
    %c0_80 = arith.constant 0 : index
    %151 = vector.load %arg3[%c6_78, %c0_79, %c0_80] : memref<19x32x32xbf16, #tpu.memory_space<vmem>>, vector<1x32x32xbf16>
    %152 = vector.shape_cast %151 : vector<1x32x32xbf16> to vector<32x32xbf16>
    %cst_81 = arith.constant dense<0.000000e+00> : vector<8x32xf32>
    %153 = tpu.matmul %140, %152, %cst_81 {dimension_numbers = #tpu.dot_dimension_numbers<[1], [0], [0], [1], [0, 0, 1, 1], [], []>} : vector<8x32xbf16>, vector<32x32xbf16>, vector<8x32xf32> -> vector<8x32xf32>
    %154 = vector.broadcast %28 : vector<1x32xf32> to vector<8x32xf32>
    %155 = arith.addf %153, %154 : vector<8x32xf32>
    %156 = vector.extract_strided_slice %43 {offsets = [1, 0, 0], sizes = [1, 8, 32], strides = [1, 1, 1]} : vector<8x8x32xf32> to vector<1x8x32xf32>
    %157 = vector.shape_cast %156 : vector<1x8x32xf32> to vector<8x32xf32>
    %158 = arith.addf %157, %145 : vector<8x32xf32>
    %159 = arith.negf %158 : vector<8x32xf32>
    %160 = math.exp %159 : vector<8x32xf32>
    %cst_82 = arith.constant 1.000000e+00 : f32
    %161 = vector.broadcast %cst_82 : f32 to vector<8x32xf32>
    %162 = arith.addf %161, %160 : vector<8x32xf32>
    %163 = arith.divf %161, %162 : vector<8x32xf32>
    %164 = vector.extract_strided_slice %52 {offsets = [1, 0, 0], sizes = [1, 8, 32], strides = [1, 1, 1]} : vector<8x8x32xf32> to vector<1x8x32xf32>
    %165 = vector.shape_cast %164 : vector<1x8x32xf32> to vector<8x32xf32>
    %166 = arith.addf %165, %150 : vector<8x32xf32>
    %167 = arith.negf %166 : vector<8x32xf32>
    %168 = math.exp %167 : vector<8x32xf32>
    %cst_83 = arith.constant 1.000000e+00 : f32
    %169 = vector.broadcast %cst_83 : f32 to vector<8x32xf32>
    %170 = arith.addf %169, %168 : vector<8x32xf32>
    %171 = arith.divf %169, %170 : vector<8x32xf32>
    %172 = vector.extract_strided_slice %61 {offsets = [1, 0, 0], sizes = [1, 8, 32], strides = [1, 1, 1]} : vector<8x8x32xf32> to vector<1x8x32xf32>
    %173 = vector.shape_cast %172 : vector<1x8x32xf32> to vector<8x32xf32>
    %174 = arith.mulf %163, %155 : vector<8x32xf32>
    %175 = arith.addf %173, %174 : vector<8x32xf32>
    %176 = math.tanh %175 : vector<8x32xf32>
    %cst_84 = arith.constant 1.000000e+00 : f32
    %177 = vector.broadcast %cst_84 : f32 to vector<8x32xf32>
    %178 = arith.subf %177, %171 : vector<8x32xf32>
    %179 = arith.mulf %178, %176 : vector<8x32xf32>
    %180 = arith.mulf %171, %139 : vector<8x32xf32>
    %181 = arith.addf %179, %180 : vector<8x32xf32>
    %c1_85 = arith.constant 1 : index
    %c1_86 = arith.constant 1 : index
    %c0_87 = arith.constant 0 : index
    %c0_88 = arith.constant 0 : index
    %182 = vector.load %arg6[%c1_85, %c1_86, %c0_87, %c0_88] : memref<3x8x8x32xf32, #tpu.memory_space<vmem>>, vector<1x1x8x32xf32>
    %183 = vector.shape_cast %182 : vector<1x1x8x32xf32> to vector<8x32xf32>
    %184 = vector.shape_cast %181 : vector<8x32xf32> to vector<1x1x8x32xf32>
    tpu.vector_store %arg6[%c1_85, %c1_86, %c0_87, %c0_88], %184 {strides = array<i32>} : memref<3x8x8x32xf32, #tpu.memory_space<vmem>>, vector<1x1x8x32xf32>,
    %c1_89 = arith.constant 1 : index
    %c0_90 = arith.constant 0 : index
    %c0_91 = arith.constant 0 : index
    %c0_92 = arith.constant 0 : index
    %185 = vector.load %arg6[%c1_89, %c0_90, %c0_91, %c0_92] : memref<3x8x8x32xf32, #tpu.memory_space<vmem>>, vector<1x8x8x32xf32>
    %186 = vector.shape_cast %185 : vector<1x8x8x32xf32> to vector<8x8x32xf32>
    %187 = vector.broadcast %31 : vector<1x1x32xf32> to vector<8x8x32xf32>
    %188 = arith.mulf %186, %187 : vector<8x8x32xf32>
    %cst_93 = arith.constant dense<0.000000e+00> : vector<8x8xf32>
    %189 = vector.multi_reduction <add>, %188, %cst_93 [2] : vector<8x8x32xf32> to vector<8x8xf32>
    %190 = vector.extract_strided_slice %22 {offsets = [2, 0, 0], sizes = [1, 8, 8], strides = [1, 1, 1]} : vector<8x8x8xf32> to vector<1x8x8xf32>
    %191 = vector.shape_cast %190 : vector<1x8x8xf32> to vector<8x8xf32>
    %192 = arith.addf %191, %189 : vector<8x8xf32>
    %cst_94 = arith.constant dense<0xFF800000> : vector<8xf32>
    %193 = vector.multi_reduction <maximumf>, %192, %cst_94 [0] : vector<8x8xf32> to vector<8xf32>
    %194 = vector.shape_cast %193 : vector<8xf32> to vector<1x8xf32>
    %195 = vector.broadcast %194 : vector<1x8xf32> to vector<8x8xf32>
    %196 = arith.subf %192, %195 : vector<8x8xf32>
    %197 = math.exp %196 : vector<8x8xf32>
    %cst_95 = arith.constant dense<0.000000e+00> : vector<8xf32>
    %198 = vector.multi_reduction <add>, %197, %cst_95 [0] : vector<8x8xf32> to vector<8xf32>
    %199 = vector.shape_cast %198 : vector<8xf32> to vector<1x8xf32>
    %200 = tpu.reciprocal %199 {approx = true} : vector<1x8xf32> -> vector<1x8xf32>
    %201 = vector.broadcast %200 : vector<1x8xf32> to vector<8x8xf32>
    %202 = arith.mulf %197, %201 : vector<8x8xf32>
    %203 = vector.shape_cast %202 : vector<8x8xf32> to vector<8x8x1xf32>
    %204 = vector.broadcast %203 : vector<8x8x1xf32> to vector<8x8x32xf32>
    %205 = arith.mulf %204, %186 : vector<8x8x32xf32>
    %206 = vector.extract_strided_slice %205 {offsets = [0, 0, 0], sizes = [1, 8, 32], strides = [1, 1, 1]} : vector<8x8x32xf32> to vector<1x8x32xf32>
    %207 = vector.shape_cast %206 : vector<1x8x32xf32> to vector<8x32xf32>
    %208 = vector.extract_strided_slice %205 {offsets = [1, 0, 0], sizes = [1, 8, 32], strides = [1, 1, 1]} : vector<8x8x32xf32> to vector<1x8x32xf32>
    %209 = vector.shape_cast %208 : vector<1x8x32xf32> to vector<8x32xf32>
    %210 = arith.addf %207, %209 : vector<8x32xf32>
    %211 = vector.extract_strided_slice %205 {offsets = [2, 0, 0], sizes = [1, 8, 32], strides = [1, 1, 1]} : vector<8x8x32xf32> to vector<1x8x32xf32>
    %212 = vector.shape_cast %211 : vector<1x8x32xf32> to vector<8x32xf32>
    %213 = arith.addf %210, %212 : vector<8x32xf32>
    %214 = vector.extract_strided_slice %205 {offsets = [3, 0, 0], sizes = [1, 8, 32], strides = [1, 1, 1]} : vector<8x8x32xf32> to vector<1x8x32xf32>
    %215 = vector.shape_cast %214 : vector<1x8x32xf32> to vector<8x32xf32>
    %216 = arith.addf %213, %215 : vector<8x32xf32>
    %217 = vector.extract_strided_slice %205 {offsets = [4, 0, 0], sizes = [1, 8, 32], strides = [1, 1, 1]} : vector<8x8x32xf32> to vector<1x8x32xf32>
    %218 = vector.shape_cast %217 : vector<1x8x32xf32> to vector<8x32xf32>
    %219 = arith.addf %216, %218 : vector<8x32xf32>
    %220 = vector.extract_strided_slice %205 {offsets = [5, 0, 0], sizes = [1, 8, 32], strides = [1, 1, 1]} : vector<8x8x32xf32> to vector<1x8x32xf32>
    %221 = vector.shape_cast %220 : vector<1x8x32xf32> to vector<8x32xf32>
    %222 = arith.addf %219, %221 : vector<8x32xf32>
    %223 = vector.extract_strided_slice %205 {offsets = [6, 0, 0], sizes = [1, 8, 32], strides = [1, 1, 1]} : vector<8x8x32xf32> to vector<1x8x32xf32>
    %224 = vector.shape_cast %223 : vector<1x8x32xf32> to vector<8x32xf32>
    %225 = arith.addf %222, %224 : vector<8x32xf32>
    %226 = vector.extract_strided_slice %205 {offsets = [7, 0, 0], sizes = [1, 8, 32], strides = [1, 1, 1]} : vector<8x8x32xf32> to vector<1x8x32xf32>
    %227 = vector.shape_cast %226 : vector<1x8x32xf32> to vector<8x32xf32>
    %228 = arith.addf %225, %227 : vector<8x32xf32>
    %229 = arith.truncf %228 : vector<8x32xf32> to vector<8x32xbf16>
    %c4_96 = arith.constant 4 : index
    %c0_97 = arith.constant 0 : index
    %c0_98 = arith.constant 0 : index
    %230 = vector.load %arg3[%c4_96, %c0_97, %c0_98] : memref<19x32x32xbf16, #tpu.memory_space<vmem>>, vector<1x32x32xbf16>
    %231 = vector.shape_cast %230 : vector<1x32x32xbf16> to vector<32x32xbf16>
    %cst_99 = arith.constant dense<0.000000e+00> : vector<8x32xf32>
    %232 = tpu.matmul %229, %231, %cst_99 {dimension_numbers = #tpu.dot_dimension_numbers<[1], [0], [0], [1], [0, 0, 1, 1], [], []>} : vector<8x32xbf16>, vector<32x32xbf16>, vector<8x32xf32> -> vector<8x32xf32>
    %233 = vector.broadcast %24 : vector<1x32xf32> to vector<8x32xf32>
    %234 = arith.addf %232, %233 : vector<8x32xf32>
    %c5_100 = arith.constant 5 : index
    %c0_101 = arith.constant 0 : index
    %c0_102 = arith.constant 0 : index
    %235 = vector.load %arg3[%c5_100, %c0_101, %c0_102] : memref<19x32x32xbf16, #tpu.memory_space<vmem>>, vector<1x32x32xbf16>
    %236 = vector.shape_cast %235 : vector<1x32x32xbf16> to vector<32x32xbf16>
    %cst_103 = arith.constant dense<0.000000e+00> : vector<8x32xf32>
    %237 = tpu.matmul %229, %236, %cst_103 {dimension_numbers = #tpu.dot_dimension_numbers<[1], [0], [0], [1], [0, 0, 1, 1], [], []>} : vector<8x32xbf16>, vector<32x32xbf16>, vector<8x32xf32> -> vector<8x32xf32>
    %238 = vector.broadcast %26 : vector<1x32xf32> to vector<8x32xf32>
    %239 = arith.addf %237, %238 : vector<8x32xf32>
    %c6_104 = arith.constant 6 : index
    %c0_105 = arith.constant 0 : index
    %c0_106 = arith.constant 0 : index
    %240 = vector.load %arg3[%c6_104, %c0_105, %c0_106] : memref<19x32x32xbf16, #tpu.memory_space<vmem>>, vector<1x32x32xbf16>
    %241 = vector.shape_cast %240 : vector<1x32x32xbf16> to vector<32x32xbf16>
    %cst_107 = arith.constant dense<0.000000e+00> : vector<8x32xf32>
    %242 = tpu.matmul %229, %241, %cst_107 {dimension_numbers = #tpu.dot_dimension_numbers<[1], [0], [0], [1], [0, 0, 1, 1], [], []>} : vector<8x32xbf16>, vector<32x32xbf16>, vector<8x32xf32> -> vector<8x32xf32>
    %243 = vector.broadcast %28 : vector<1x32xf32> to vector<8x32xf32>
    %244 = arith.addf %242, %243 : vector<8x32xf32>
    %245 = vector.extract_strided_slice %43 {offsets = [2, 0, 0], sizes = [1, 8, 32], strides = [1, 1, 1]} : vector<8x8x32xf32> to vector<1x8x32xf32>
    %246 = vector.shape_cast %245 : vector<1x8x32xf32> to vector<8x32xf32>
    %247 = arith.addf %246, %234 : vector<8x32xf32>
    %248 = arith.negf %247 : vector<8x32xf32>
    %249 = math.exp %248 : vector<8x32xf32>
    %cst_108 = arith.constant 1.000000e+00 : f32
    %250 = vector.broadcast %cst_108 : f32 to vector<8x32xf32>
    %251 = arith.addf %250, %249 : vector<8x32xf32>
    %252 = arith.divf %250, %251 : vector<8x32xf32>
    %253 = vector.extract_strided_slice %52 {offsets = [2, 0, 0], sizes = [1, 8, 32], strides = [1, 1, 1]} : vector<8x8x32xf32> to vector<1x8x32xf32>
    %254 = vector.shape_cast %253 : vector<1x8x32xf32> to vector<8x32xf32>
    %255 = arith.addf %254, %239 : vector<8x32xf32>
    %256 = arith.negf %255 : vector<8x32xf32>
    %257 = math.exp %256 : vector<8x32xf32>
    %cst_109 = arith.constant 1.000000e+00 : f32
    %258 = vector.broadcast %cst_109 : f32 to vector<8x32xf32>
    %259 = arith.addf %258, %257 : vector<8x32xf32>
    %260 = arith.divf %258, %259 : vector<8x32xf32>
    %261 = vector.extract_strided_slice %61 {offsets = [2, 0, 0], sizes = [1, 8, 32], strides = [1, 1, 1]} : vector<8x8x32xf32> to vector<1x8x32xf32>
    %262 = vector.shape_cast %261 : vector<1x8x32xf32> to vector<8x32xf32>
    %263 = arith.mulf %252, %244 : vector<8x32xf32>
    %264 = arith.addf %262, %263 : vector<8x32xf32>
    %265 = math.tanh %264 : vector<8x32xf32>
    %cst_110 = arith.constant 1.000000e+00 : f32
    %266 = vector.broadcast %cst_110 : f32 to vector<8x32xf32>
    %267 = arith.subf %266, %260 : vector<8x32xf32>
    %268 = arith.mulf %267, %265 : vector<8x32xf32>
    %269 = arith.mulf %260, %228 : vector<8x32xf32>
    %270 = arith.addf %268, %269 : vector<8x32xf32>
    %c1_111 = arith.constant 1 : index
    %c2_112 = arith.constant 2 : index
    %c0_113 = arith.constant 0 : index
    %c0_114 = arith.constant 0 : index
    %271 = vector.load %arg6[%c1_111, %c2_112, %c0_113, %c0_114] : memref<3x8x8x32xf32, #tpu.memory_space<vmem>>, vector<1x1x8x32xf32>
    %272 = vector.shape_cast %271 : vector<1x1x8x32xf32> to vector<8x32xf32>
    %273 = vector.shape_cast %270 : vector<8x32xf32> to vector<1x1x8x32xf32>
    tpu.vector_store %arg6[%c1_111, %c2_112, %c0_113, %c0_114], %273 {strides = array<i32>} : memref<3x8x8x32xf32, #tpu.memory_space<vmem>>, vector<1x1x8x32xf32>,
    %c1_115 = arith.constant 1 : index
    %c0_116 = arith.constant 0 : index
    %c0_117 = arith.constant 0 : index
    %c0_118 = arith.constant 0 : index
    %274 = vector.load %arg6[%c1_115, %c0_116, %c0_117, %c0_118] : memref<3x8x8x32xf32, #tpu.memory_space<vmem>>, vector<1x8x8x32xf32>
    %275 = vector.shape_cast %274 : vector<1x8x8x32xf32> to vector<8x8x32xf32>
    %276 = vector.broadcast %31 : vector<1x1x32xf32> to vector<8x8x32xf32>
    %277 = arith.mulf %275, %276 : vector<8x8x32xf32>
    %cst_119 = arith.constant dense<0.000000e+00> : vector<8x8xf32>
    %278 = vector.multi_reduction <add>, %277, %cst_119 [2] : vector<8x8x32xf32> to vector<8x8xf32>
    %279 = vector.extract_strided_slice %22 {offsets = [3, 0, 0], sizes = [1, 8, 8], strides = [1, 1, 1]} : vector<8x8x8xf32> to vector<1x8x8xf32>
    %280 = vector.shape_cast %279 : vector<1x8x8xf32> to vector<8x8xf32>
    %281 = arith.addf %280, %278 : vector<8x8xf32>
    %cst_120 = arith.constant dense<0xFF800000> : vector<8xf32>
    %282 = vector.multi_reduction <maximumf>, %281, %cst_120 [0] : vector<8x8xf32> to vector<8xf32>
    %283 = vector.shape_cast %282 : vector<8xf32> to vector<1x8xf32>
    %284 = vector.broadcast %283 : vector<1x8xf32> to vector<8x8xf32>
    %285 = arith.subf %281, %284 : vector<8x8xf32>
    %286 = math.exp %285 : vector<8x8xf32>
    %cst_121 = arith.constant dense<0.000000e+00> : vector<8xf32>
    %287 = vector.multi_reduction <add>, %286, %cst_121 [0] : vector<8x8xf32> to vector<8xf32>
    %288 = vector.shape_cast %287 : vector<8xf32> to vector<1x8xf32>
    %289 = tpu.reciprocal %288 {approx = true} : vector<1x8xf32> -> vector<1x8xf32>
    %290 = vector.broadcast %289 : vector<1x8xf32> to vector<8x8xf32>
    %291 = arith.mulf %286, %290 : vector<8x8xf32>
    %292 = vector.shape_cast %291 : vector<8x8xf32> to vector<8x8x1xf32>
    %293 = vector.broadcast %292 : vector<8x8x1xf32> to vector<8x8x32xf32>
    %294 = arith.mulf %293, %275 : vector<8x8x32xf32>
    %295 = vector.extract_strided_slice %294 {offsets = [0, 0, 0], sizes = [1, 8, 32], strides = [1, 1, 1]} : vector<8x8x32xf32> to vector<1x8x32xf32>
    %296 = vector.shape_cast %295 : vector<1x8x32xf32> to vector<8x32xf32>
    %297 = vector.extract_strided_slice %294 {offsets = [1, 0, 0], sizes = [1, 8, 32], strides = [1, 1, 1]} : vector<8x8x32xf32> to vector<1x8x32xf32>
    %298 = vector.shape_cast %297 : vector<1x8x32xf32> to vector<8x32xf32>
    %299 = arith.addf %296, %298 : vector<8x32xf32>
    %300 = vector.extract_strided_slice %294 {offsets = [2, 0, 0], sizes = [1, 8, 32], strides = [1, 1, 1]} : vector<8x8x32xf32> to vector<1x8x32xf32>
    %301 = vector.shape_cast %300 : vector<1x8x32xf32> to vector<8x32xf32>
    %302 = arith.addf %299, %301 : vector<8x32xf32>
    %303 = vector.extract_strided_slice %294 {offsets = [3, 0, 0], sizes = [1, 8, 32], strides = [1, 1, 1]} : vector<8x8x32xf32> to vector<1x8x32xf32>
    %304 = vector.shape_cast %303 : vector<1x8x32xf32> to vector<8x32xf32>
    %305 = arith.addf %302, %304 : vector<8x32xf32>
    %306 = vector.extract_strided_slice %294 {offsets = [4, 0, 0], sizes = [1, 8, 32], strides = [1, 1, 1]} : vector<8x8x32xf32> to vector<1x8x32xf32>
    %307 = vector.shape_cast %306 : vector<1x8x32xf32> to vector<8x32xf32>
    %308 = arith.addf %305, %307 : vector<8x32xf32>
    %309 = vector.extract_strided_slice %294 {offsets = [5, 0, 0], sizes = [1, 8, 32], strides = [1, 1, 1]} : vector<8x8x32xf32> to vector<1x8x32xf32>
    %310 = vector.shape_cast %309 : vector<1x8x32xf32> to vector<8x32xf32>
    %311 = arith.addf %308, %310 : vector<8x32xf32>
    %312 = vector.extract_strided_slice %294 {offsets = [6, 0, 0], sizes = [1, 8, 32], strides = [1, 1, 1]} : vector<8x8x32xf32> to vector<1x8x32xf32>
    %313 = vector.shape_cast %312 : vector<1x8x32xf32> to vector<8x32xf32>
    %314 = arith.addf %311, %313 : vector<8x32xf32>
    %315 = vector.extract_strided_slice %294 {offsets = [7, 0, 0], sizes = [1, 8, 32], strides = [1, 1, 1]} : vector<8x8x32xf32> to vector<1x8x32xf32>
    %316 = vector.shape_cast %315 : vector<1x8x32xf32> to vector<8x32xf32>
    %317 = arith.addf %314, %316 : vector<8x32xf32>
    %318 = arith.truncf %317 : vector<8x32xf32> to vector<8x32xbf16>
    %c4_122 = arith.constant 4 : index
    %c0_123 = arith.constant 0 : index
    %c0_124 = arith.constant 0 : index
    %319 = vector.load %arg3[%c4_122, %c0_123, %c0_124] : memref<19x32x32xbf16, #tpu.memory_space<vmem>>, vector<1x32x32xbf16>
    %320 = vector.shape_cast %319 : vector<1x32x32xbf16> to vector<32x32xbf16>
    %cst_125 = arith.constant dense<0.000000e+00> : vector<8x32xf32>
    %321 = tpu.matmul %318, %320, %cst_125 {dimension_numbers = #tpu.dot_dimension_numbers<[1], [0], [0], [1], [0, 0, 1, 1], [], []>} : vector<8x32xbf16>, vector<32x32xbf16>, vector<8x32xf32> -> vector<8x32xf32>
    %322 = vector.broadcast %24 : vector<1x32xf32> to vector<8x32xf32>
    %323 = arith.addf %321, %322 : vector<8x32xf32>
    %c5_126 = arith.constant 5 : index
    %c0_127 = arith.constant 0 : index
    %c0_128 = arith.constant 0 : index
    %324 = vector.load %arg3[%c5_126, %c0_127, %c0_128] : memref<19x32x32xbf16, #tpu.memory_space<vmem>>, vector<1x32x32xbf16>
    %325 = vector.shape_cast %324 : vector<1x32x32xbf16> to vector<32x32xbf16>
    %cst_129 = arith.constant dense<0.000000e+00> : vector<8x32xf32>
    %326 = tpu.matmul %318, %325, %cst_129 {dimension_numbers = #tpu.dot_dimension_numbers<[1], [0], [0], [1], [0, 0, 1, 1], [], []>} : vector<8x32xbf16>, vector<32x32xbf16>, vector<8x32xf32> -> vector<8x32xf32>
    %327 = vector.broadcast %26 : vector<1x32xf32> to vector<8x32xf32>
    %328 = arith.addf %326, %327 : vector<8x32xf32>
    %c6_130 = arith.constant 6 : index
    %c0_131 = arith.constant 0 : index
    %c0_132 = arith.constant 0 : index
    %329 = vector.load %arg3[%c6_130, %c0_131, %c0_132] : memref<19x32x32xbf16, #tpu.memory_space<vmem>>, vector<1x32x32xbf16>
    %330 = vector.shape_cast %329 : vector<1x32x32xbf16> to vector<32x32xbf16>
    %cst_133 = arith.constant dense<0.000000e+00> : vector<8x32xf32>
    %331 = tpu.matmul %318, %330, %cst_133 {dimension_numbers = #tpu.dot_dimension_numbers<[1], [0], [0], [1], [0, 0, 1, 1], [], []>} : vector<8x32xbf16>, vector<32x32xbf16>, vector<8x32xf32> -> vector<8x32xf32>
    %332 = vector.broadcast %28 : vector<1x32xf32> to vector<8x32xf32>
    %333 = arith.addf %331, %332 : vector<8x32xf32>
    %334 = vector.extract_strided_slice %43 {offsets = [3, 0, 0], sizes = [1, 8, 32], strides = [1, 1, 1]} : vector<8x8x32xf32> to vector<1x8x32xf32>
    %335 = vector.shape_cast %334 : vector<1x8x32xf32> to vector<8x32xf32>
    %336 = arith.addf %335, %323 : vector<8x32xf32>
    %337 = arith.negf %336 : vector<8x32xf32>
    %338 = math.exp %337 : vector<8x32xf32>
    %cst_134 = arith.constant 1.000000e+00 : f32
    %339 = vector.broadcast %cst_134 : f32 to vector<8x32xf32>
    %340 = arith.addf %339, %338 : vector<8x32xf32>
    %341 = arith.divf %339, %340 : vector<8x32xf32>
    %342 = vector.extract_strided_slice %52 {offsets = [3, 0, 0], sizes = [1, 8, 32], strides = [1, 1, 1]} : vector<8x8x32xf32> to vector<1x8x32xf32>
    %343 = vector.shape_cast %342 : vector<1x8x32xf32> to vector<8x32xf32>
    %344 = arith.addf %343, %328 : vector<8x32xf32>
    %345 = arith.negf %344 : vector<8x32xf32>
    %346 = math.exp %345 : vector<8x32xf32>
    %cst_135 = arith.constant 1.000000e+00 : f32
    %347 = vector.broadcast %cst_135 : f32 to vector<8x32xf32>
    %348 = arith.addf %347, %346 : vector<8x32xf32>
    %349 = arith.divf %347, %348 : vector<8x32xf32>
    %350 = vector.extract_strided_slice %61 {offsets = [3, 0, 0], sizes = [1, 8, 32], strides = [1, 1, 1]} : vector<8x8x32xf32> to vector<1x8x32xf32>
    %351 = vector.shape_cast %350 : vector<1x8x32xf32> to vector<8x32xf32>
    %352 = arith.mulf %341, %333 : vector<8x32xf32>
    %353 = arith.addf %351, %352 : vector<8x32xf32>
    %354 = math.tanh %353 : vector<8x32xf32>
    %cst_136 = arith.constant 1.000000e+00 : f32
    %355 = vector.broadcast %cst_136 : f32 to vector<8x32xf32>
    %356 = arith.subf %355, %349 : vector<8x32xf32>
    %357 = arith.mulf %356, %354 : vector<8x32xf32>
    %358 = arith.mulf %349, %317 : vector<8x32xf32>
    %359 = arith.addf %357, %358 : vector<8x32xf32>
    %c1_137 = arith.constant 1 : index
    %c3_138 = arith.constant 3 : index
    %c0_139 = arith.constant 0 : index
    %c0_140 = arith.constant 0 : index
    %360 = vector.load %arg6[%c1_137, %c3_138, %c0_139, %c0_140] : memref<3x8x8x32xf32, #tpu.memory_space<vmem>>, vector<1x1x8x32xf32>
    %361 = vector.shape_cast %360 : vector<1x1x8x32xf32> to vector<8x32xf32>
    %362 = vector.shape_cast %359 : vector<8x32xf32> to vector<1x1x8x32xf32>
    tpu.vector_store %arg6[%c1_137, %c3_138, %c0_139, %c0_140], %362 {strides = array<i32>} : memref<3x8x8x32xf32, #tpu.memory_space<vmem>>, vector<1x1x8x32xf32>,
    %c1_141 = arith.constant 1 : index
    %c0_142 = arith.constant 0 : index
    %c0_143 = arith.constant 0 : index
    %c0_144 = arith.constant 0 : index
    %363 = vector.load %arg6[%c1_141, %c0_142, %c0_143, %c0_144] : memref<3x8x8x32xf32, #tpu.memory_space<vmem>>, vector<1x8x8x32xf32>
    %364 = vector.shape_cast %363 : vector<1x8x8x32xf32> to vector<8x8x32xf32>
    %365 = vector.broadcast %31 : vector<1x1x32xf32> to vector<8x8x32xf32>
    %366 = arith.mulf %364, %365 : vector<8x8x32xf32>
    %cst_145 = arith.constant dense<0.000000e+00> : vector<8x8xf32>
    %367 = vector.multi_reduction <add>, %366, %cst_145 [2] : vector<8x8x32xf32> to vector<8x8xf32>
    %368 = vector.extract_strided_slice %22 {offsets = [4, 0, 0], sizes = [1, 8, 8], strides = [1, 1, 1]} : vector<8x8x8xf32> to vector<1x8x8xf32>
    %369 = vector.shape_cast %368 : vector<1x8x8xf32> to vector<8x8xf32>
    %370 = arith.addf %369, %367 : vector<8x8xf32>
    %cst_146 = arith.constant dense<0xFF800000> : vector<8xf32>
    %371 = vector.multi_reduction <maximumf>, %370, %cst_146 [0] : vector<8x8xf32> to vector<8xf32>
    %372 = vector.shape_cast %371 : vector<8xf32> to vector<1x8xf32>
    %373 = vector.broadcast %372 : vector<1x8xf32> to vector<8x8xf32>
    %374 = arith.subf %370, %373 : vector<8x8xf32>
    %375 = math.exp %374 : vector<8x8xf32>
    %cst_147 = arith.constant dense<0.000000e+00> : vector<8xf32>
    %376 = vector.multi_reduction <add>, %375, %cst_147 [0] : vector<8x8xf32> to vector<8xf32>
    %377 = vector.shape_cast %376 : vector<8xf32> to vector<1x8xf32>
    %378 = tpu.reciprocal %377 {approx = true} : vector<1x8xf32> -> vector<1x8xf32>
    %379 = vector.broadcast %378 : vector<1x8xf32> to vector<8x8xf32>
    %380 = arith.mulf %375, %379 : vector<8x8xf32>
    %381 = vector.shape_cast %380 : vector<8x8xf32> to vector<8x8x1xf32>
    %382 = vector.broadcast %381 : vector<8x8x1xf32> to vector<8x8x32xf32>
    %383 = arith.mulf %382, %364 : vector<8x8x32xf32>
    %384 = vector.extract_strided_slice %383 {offsets = [0, 0, 0], sizes = [1, 8, 32], strides = [1, 1, 1]} : vector<8x8x32xf32> to vector<1x8x32xf32>
    %385 = vector.shape_cast %384 : vector<1x8x32xf32> to vector<8x32xf32>
    %386 = vector.extract_strided_slice %383 {offsets = [1, 0, 0], sizes = [1, 8, 32], strides = [1, 1, 1]} : vector<8x8x32xf32> to vector<1x8x32xf32>
    %387 = vector.shape_cast %386 : vector<1x8x32xf32> to vector<8x32xf32>
    %388 = arith.addf %385, %387 : vector<8x32xf32>
    %389 = vector.extract_strided_slice %383 {offsets = [2, 0, 0], sizes = [1, 8, 32], strides = [1, 1, 1]} : vector<8x8x32xf32> to vector<1x8x32xf32>
    %390 = vector.shape_cast %389 : vector<1x8x32xf32> to vector<8x32xf32>
    %391 = arith.addf %388, %390 : vector<8x32xf32>
    %392 = vector.extract_strided_slice %383 {offsets = [3, 0, 0], sizes = [1, 8, 32], strides = [1, 1, 1]} : vector<8x8x32xf32> to vector<1x8x32xf32>
    %393 = vector.shape_cast %392 : vector<1x8x32xf32> to vector<8x32xf32>
    %394 = arith.addf %391, %393 : vector<8x32xf32>
    %395 = vector.extract_strided_slice %383 {offsets = [4, 0, 0], sizes = [1, 8, 32], strides = [1, 1, 1]} : vector<8x8x32xf32> to vector<1x8x32xf32>
    %396 = vector.shape_cast %395 : vector<1x8x32xf32> to vector<8x32xf32>
    %397 = arith.addf %394, %396 : vector<8x32xf32>
    %398 = vector.extract_strided_slice %383 {offsets = [5, 0, 0], sizes = [1, 8, 32], strides = [1, 1, 1]} : vector<8x8x32xf32> to vector<1x8x32xf32>
    %399 = vector.shape_cast %398 : vector<1x8x32xf32> to vector<8x32xf32>
    %400 = arith.addf %397, %399 : vector<8x32xf32>
    %401 = vector.extract_strided_slice %383 {offsets = [6, 0, 0], sizes = [1, 8, 32], strides = [1, 1, 1]} : vector<8x8x32xf32> to vector<1x8x32xf32>
    %402 = vector.shape_cast %401 : vector<1x8x32xf32> to vector<8x32xf32>
    %403 = arith.addf %400, %402 : vector<8x32xf32>
    %404 = vector.extract_strided_slice %383 {offsets = [7, 0, 0], sizes = [1, 8, 32], strides = [1, 1, 1]} : vector<8x8x32xf32> to vector<1x8x32xf32>
    %405 = vector.shape_cast %404 : vector<1x8x32xf32> to vector<8x32xf32>
    %406 = arith.addf %403, %405 : vector<8x32xf32>
    %407 = arith.truncf %406 : vector<8x32xf32> to vector<8x32xbf16>
    %c4_148 = arith.constant 4 : index
    %c0_149 = arith.constant 0 : index
    %c0_150 = arith.constant 0 : index
    %408 = vector.load %arg3[%c4_148, %c0_149, %c0_150] : memref<19x32x32xbf16, #tpu.memory_space<vmem>>, vector<1x32x32xbf16>
    %409 = vector.shape_cast %408 : vector<1x32x32xbf16> to vector<32x32xbf16>
    %cst_151 = arith.constant dense<0.000000e+00> : vector<8x32xf32>
    %410 = tpu.matmul %407, %409, %cst_151 {dimension_numbers = #tpu.dot_dimension_numbers<[1], [0], [0], [1], [0, 0, 1, 1], [], []>} : vector<8x32xbf16>, vector<32x32xbf16>, vector<8x32xf32> -> vector<8x32xf32>
    %411 = vector.broadcast %24 : vector<1x32xf32> to vector<8x32xf32>
    %412 = arith.addf %410, %411 : vector<8x32xf32>
    %c5_152 = arith.constant 5 : index
    %c0_153 = arith.constant 0 : index
    %c0_154 = arith.constant 0 : index
    %413 = vector.load %arg3[%c5_152, %c0_153, %c0_154] : memref<19x32x32xbf16, #tpu.memory_space<vmem>>, vector<1x32x32xbf16>
    %414 = vector.shape_cast %413 : vector<1x32x32xbf16> to vector<32x32xbf16>
    %cst_155 = arith.constant dense<0.000000e+00> : vector<8x32xf32>
    %415 = tpu.matmul %407, %414, %cst_155 {dimension_numbers = #tpu.dot_dimension_numbers<[1], [0], [0], [1], [0, 0, 1, 1], [], []>} : vector<8x32xbf16>, vector<32x32xbf16>, vector<8x32xf32> -> vector<8x32xf32>
    %416 = vector.broadcast %26 : vector<1x32xf32> to vector<8x32xf32>
    %417 = arith.addf %415, %416 : vector<8x32xf32>
    %c6_156 = arith.constant 6 : index
    %c0_157 = arith.constant 0 : index
    %c0_158 = arith.constant 0 : index
    %418 = vector.load %arg3[%c6_156, %c0_157, %c0_158] : memref<19x32x32xbf16, #tpu.memory_space<vmem>>, vector<1x32x32xbf16>
    %419 = vector.shape_cast %418 : vector<1x32x32xbf16> to vector<32x32xbf16>
    %cst_159 = arith.constant dense<0.000000e+00> : vector<8x32xf32>
    %420 = tpu.matmul %407, %419, %cst_159 {dimension_numbers = #tpu.dot_dimension_numbers<[1], [0], [0], [1], [0, 0, 1, 1], [], []>} : vector<8x32xbf16>, vector<32x32xbf16>, vector<8x32xf32> -> vector<8x32xf32>
    %421 = vector.broadcast %28 : vector<1x32xf32> to vector<8x32xf32>
    %422 = arith.addf %420, %421 : vector<8x32xf32>
    %423 = vector.extract_strided_slice %43 {offsets = [4, 0, 0], sizes = [1, 8, 32], strides = [1, 1, 1]} : vector<8x8x32xf32> to vector<1x8x32xf32>
    %424 = vector.shape_cast %423 : vector<1x8x32xf32> to vector<8x32xf32>
    %425 = arith.addf %424, %412 : vector<8x32xf32>
    %426 = arith.negf %425 : vector<8x32xf32>
    %427 = math.exp %426 : vector<8x32xf32>
    %cst_160 = arith.constant 1.000000e+00 : f32
    %428 = vector.broadcast %cst_160 : f32 to vector<8x32xf32>
    %429 = arith.addf %428, %427 : vector<8x32xf32>
    %430 = arith.divf %428, %429 : vector<8x32xf32>
    %431 = vector.extract_strided_slice %52 {offsets = [4, 0, 0], sizes = [1, 8, 32], strides = [1, 1, 1]} : vector<8x8x32xf32> to vector<1x8x32xf32>
    %432 = vector.shape_cast %431 : vector<1x8x32xf32> to vector<8x32xf32>
    %433 = arith.addf %432, %417 : vector<8x32xf32>
    %434 = arith.negf %433 : vector<8x32xf32>
    %435 = math.exp %434 : vector<8x32xf32>
    %cst_161 = arith.constant 1.000000e+00 : f32
    %436 = vector.broadcast %cst_161 : f32 to vector<8x32xf32>
    %437 = arith.addf %436, %435 : vector<8x32xf32>
    %438 = arith.divf %436, %437 : vector<8x32xf32>
    %439 = vector.extract_strided_slice %61 {offsets = [4, 0, 0], sizes = [1, 8, 32], strides = [1, 1, 1]} : vector<8x8x32xf32> to vector<1x8x32xf32>
    %440 = vector.shape_cast %439 : vector<1x8x32xf32> to vector<8x32xf32>
    %441 = arith.mulf %430, %422 : vector<8x32xf32>
    %442 = arith.addf %440, %441 : vector<8x32xf32>
    %443 = math.tanh %442 : vector<8x32xf32>
    %cst_162 = arith.constant 1.000000e+00 : f32
    %444 = vector.broadcast %cst_162 : f32 to vector<8x32xf32>
    %445 = arith.subf %444, %438 : vector<8x32xf32>
    %446 = arith.mulf %445, %443 : vector<8x32xf32>
    %447 = arith.mulf %438, %406 : vector<8x32xf32>
    %448 = arith.addf %446, %447 : vector<8x32xf32>
    %c1_163 = arith.constant 1 : index
    %c4_164 = arith.constant 4 : index
    %c0_165 = arith.constant 0 : index
    %c0_166 = arith.constant 0 : index
    %449 = vector.load %arg6[%c1_163, %c4_164, %c0_165, %c0_166] : memref<3x8x8x32xf32, #tpu.memory_space<vmem>>, vector<1x1x8x32xf32>
    %450 = vector.shape_cast %449 : vector<1x1x8x32xf32> to vector<8x32xf32>
    %451 = vector.shape_cast %448 : vector<8x32xf32> to vector<1x1x8x32xf32>
    tpu.vector_store %arg6[%c1_163, %c4_164, %c0_165, %c0_166], %451 {strides = array<i32>} : memref<3x8x8x32xf32, #tpu.memory_space<vmem>>, vector<1x1x8x32xf32>,
    %c1_167 = arith.constant 1 : index
    %c0_168 = arith.constant 0 : index
    %c0_169 = arith.constant 0 : index
    %c0_170 = arith.constant 0 : index
    %452 = vector.load %arg6[%c1_167, %c0_168, %c0_169, %c0_170] : memref<3x8x8x32xf32, #tpu.memory_space<vmem>>, vector<1x8x8x32xf32>
    %453 = vector.shape_cast %452 : vector<1x8x8x32xf32> to vector<8x8x32xf32>
    %454 = vector.broadcast %31 : vector<1x1x32xf32> to vector<8x8x32xf32>
    %455 = arith.mulf %453, %454 : vector<8x8x32xf32>
    %cst_171 = arith.constant dense<0.000000e+00> : vector<8x8xf32>
    %456 = vector.multi_reduction <add>, %455, %cst_171 [2] : vector<8x8x32xf32> to vector<8x8xf32>
    %457 = vector.extract_strided_slice %22 {offsets = [5, 0, 0], sizes = [1, 8, 8], strides = [1, 1, 1]} : vector<8x8x8xf32> to vector<1x8x8xf32>
    %458 = vector.shape_cast %457 : vector<1x8x8xf32> to vector<8x8xf32>
    %459 = arith.addf %458, %456 : vector<8x8xf32>
    %cst_172 = arith.constant dense<0xFF800000> : vector<8xf32>
    %460 = vector.multi_reduction <maximumf>, %459, %cst_172 [0] : vector<8x8xf32> to vector<8xf32>
    %461 = vector.shape_cast %460 : vector<8xf32> to vector<1x8xf32>
    %462 = vector.broadcast %461 : vector<1x8xf32> to vector<8x8xf32>
    %463 = arith.subf %459, %462 : vector<8x8xf32>
    %464 = math.exp %463 : vector<8x8xf32>
    %cst_173 = arith.constant dense<0.000000e+00> : vector<8xf32>
    %465 = vector.multi_reduction <add>, %464, %cst_173 [0] : vector<8x8xf32> to vector<8xf32>
    %466 = vector.shape_cast %465 : vector<8xf32> to vector<1x8xf32>
    %467 = tpu.reciprocal %466 {approx = true} : vector<1x8xf32> -> vector<1x8xf32>
    %468 = vector.broadcast %467 : vector<1x8xf32> to vector<8x8xf32>
    %469 = arith.mulf %464, %468 : vector<8x8xf32>
    %470 = vector.shape_cast %469 : vector<8x8xf32> to vector<8x8x1xf32>
    %471 = vector.broadcast %470 : vector<8x8x1xf32> to vector<8x8x32xf32>
    %472 = arith.mulf %471, %453 : vector<8x8x32xf32>
    %473 = vector.extract_strided_slice %472 {offsets = [0, 0, 0], sizes = [1, 8, 32], strides = [1, 1, 1]} : vector<8x8x32xf32> to vector<1x8x32xf32>
    %474 = vector.shape_cast %473 : vector<1x8x32xf32> to vector<8x32xf32>
    %475 = vector.extract_strided_slice %472 {offsets = [1, 0, 0], sizes = [1, 8, 32], strides = [1, 1, 1]} : vector<8x8x32xf32> to vector<1x8x32xf32>
    %476 = vector.shape_cast %475 : vector<1x8x32xf32> to vector<8x32xf32>
    %477 = arith.addf %474, %476 : vector<8x32xf32>
    %478 = vector.extract_strided_slice %472 {offsets = [2, 0, 0], sizes = [1, 8, 32], strides = [1, 1, 1]} : vector<8x8x32xf32> to vector<1x8x32xf32>
    %479 = vector.shape_cast %478 : vector<1x8x32xf32> to vector<8x32xf32>
    %480 = arith.addf %477, %479 : vector<8x32xf32>
    %481 = vector.extract_strided_slice %472 {offsets = [3, 0, 0], sizes = [1, 8, 32], strides = [1, 1, 1]} : vector<8x8x32xf32> to vector<1x8x32xf32>
    %482 = vector.shape_cast %481 : vector<1x8x32xf32> to vector<8x32xf32>
    %483 = arith.addf %480, %482 : vector<8x32xf32>
    %484 = vector.extract_strided_slice %472 {offsets = [4, 0, 0], sizes = [1, 8, 32], strides = [1, 1, 1]} : vector<8x8x32xf32> to vector<1x8x32xf32>
    %485 = vector.shape_cast %484 : vector<1x8x32xf32> to vector<8x32xf32>
    %486 = arith.addf %483, %485 : vector<8x32xf32>
    %487 = vector.extract_strided_slice %472 {offsets = [5, 0, 0], sizes = [1, 8, 32], strides = [1, 1, 1]} : vector<8x8x32xf32> to vector<1x8x32xf32>
    %488 = vector.shape_cast %487 : vector<1x8x32xf32> to vector<8x32xf32>
    %489 = arith.addf %486, %488 : vector<8x32xf32>
    %490 = vector.extract_strided_slice %472 {offsets = [6, 0, 0], sizes = [1, 8, 32], strides = [1, 1, 1]} : vector<8x8x32xf32> to vector<1x8x32xf32>
    %491 = vector.shape_cast %490 : vector<1x8x32xf32> to vector<8x32xf32>
    %492 = arith.addf %489, %491 : vector<8x32xf32>
    %493 = vector.extract_strided_slice %472 {offsets = [7, 0, 0], sizes = [1, 8, 32], strides = [1, 1, 1]} : vector<8x8x32xf32> to vector<1x8x32xf32>
    %494 = vector.shape_cast %493 : vector<1x8x32xf32> to vector<8x32xf32>
    %495 = arith.addf %492, %494 : vector<8x32xf32>
    %496 = arith.truncf %495 : vector<8x32xf32> to vector<8x32xbf16>
    %c4_174 = arith.constant 4 : index
    %c0_175 = arith.constant 0 : index
    %c0_176 = arith.constant 0 : index
    %497 = vector.load %arg3[%c4_174, %c0_175, %c0_176] : memref<19x32x32xbf16, #tpu.memory_space<vmem>>, vector<1x32x32xbf16>
    %498 = vector.shape_cast %497 : vector<1x32x32xbf16> to vector<32x32xbf16>
    %cst_177 = arith.constant dense<0.000000e+00> : vector<8x32xf32>
    %499 = tpu.matmul %496, %498, %cst_177 {dimension_numbers = #tpu.dot_dimension_numbers<[1], [0], [0], [1], [0, 0, 1, 1], [], []>} : vector<8x32xbf16>, vector<32x32xbf16>, vector<8x32xf32> -> vector<8x32xf32>
    %500 = vector.broadcast %24 : vector<1x32xf32> to vector<8x32xf32>
    %501 = arith.addf %499, %500 : vector<8x32xf32>
    %c5_178 = arith.constant 5 : index
    %c0_179 = arith.constant 0 : index
    %c0_180 = arith.constant 0 : index
    %502 = vector.load %arg3[%c5_178, %c0_179, %c0_180] : memref<19x32x32xbf16, #tpu.memory_space<vmem>>, vector<1x32x32xbf16>
    %503 = vector.shape_cast %502 : vector<1x32x32xbf16> to vector<32x32xbf16>
    %cst_181 = arith.constant dense<0.000000e+00> : vector<8x32xf32>
    %504 = tpu.matmul %496, %503, %cst_181 {dimension_numbers = #tpu.dot_dimension_numbers<[1], [0], [0], [1], [0, 0, 1, 1], [], []>} : vector<8x32xbf16>, vector<32x32xbf16>, vector<8x32xf32> -> vector<8x32xf32>
    %505 = vector.broadcast %26 : vector<1x32xf32> to vector<8x32xf32>
    %506 = arith.addf %504, %505 : vector<8x32xf32>
    %c6_182 = arith.constant 6 : index
    %c0_183 = arith.constant 0 : index
    %c0_184 = arith.constant 0 : index
    %507 = vector.load %arg3[%c6_182, %c0_183, %c0_184] : memref<19x32x32xbf16, #tpu.memory_space<vmem>>, vector<1x32x32xbf16>
    %508 = vector.shape_cast %507 : vector<1x32x32xbf16> to vector<32x32xbf16>
    %cst_185 = arith.constant dense<0.000000e+00> : vector<8x32xf32>
    %509 = tpu.matmul %496, %508, %cst_185 {dimension_numbers = #tpu.dot_dimension_numbers<[1], [0], [0], [1], [0, 0, 1, 1], [], []>} : vector<8x32xbf16>, vector<32x32xbf16>, vector<8x32xf32> -> vector<8x32xf32>
    %510 = vector.broadcast %28 : vector<1x32xf32> to vector<8x32xf32>
    %511 = arith.addf %509, %510 : vector<8x32xf32>
    %512 = vector.extract_strided_slice %43 {offsets = [5, 0, 0], sizes = [1, 8, 32], strides = [1, 1, 1]} : vector<8x8x32xf32> to vector<1x8x32xf32>
    %513 = vector.shape_cast %512 : vector<1x8x32xf32> to vector<8x32xf32>
    %514 = arith.addf %513, %501 : vector<8x32xf32>
    %515 = arith.negf %514 : vector<8x32xf32>
    %516 = math.exp %515 : vector<8x32xf32>
    %cst_186 = arith.constant 1.000000e+00 : f32
    %517 = vector.broadcast %cst_186 : f32 to vector<8x32xf32>
    %518 = arith.addf %517, %516 : vector<8x32xf32>
    %519 = arith.divf %517, %518 : vector<8x32xf32>
    %520 = vector.extract_strided_slice %52 {offsets = [5, 0, 0], sizes = [1, 8, 32], strides = [1, 1, 1]} : vector<8x8x32xf32> to vector<1x8x32xf32>
    %521 = vector.shape_cast %520 : vector<1x8x32xf32> to vector<8x32xf32>
    %522 = arith.addf %521, %506 : vector<8x32xf32>
    %523 = arith.negf %522 : vector<8x32xf32>
    %524 = math.exp %523 : vector<8x32xf32>
    %cst_187 = arith.constant 1.000000e+00 : f32
    %525 = vector.broadcast %cst_187 : f32 to vector<8x32xf32>
    %526 = arith.addf %525, %524 : vector<8x32xf32>
    %527 = arith.divf %525, %526 : vector<8x32xf32>
    %528 = vector.extract_strided_slice %61 {offsets = [5, 0, 0], sizes = [1, 8, 32], strides = [1, 1, 1]} : vector<8x8x32xf32> to vector<1x8x32xf32>
    %529 = vector.shape_cast %528 : vector<1x8x32xf32> to vector<8x32xf32>
    %530 = arith.mulf %519, %511 : vector<8x32xf32>
    %531 = arith.addf %529, %530 : vector<8x32xf32>
    %532 = math.tanh %531 : vector<8x32xf32>
    %cst_188 = arith.constant 1.000000e+00 : f32
    %533 = vector.broadcast %cst_188 : f32 to vector<8x32xf32>
    %534 = arith.subf %533, %527 : vector<8x32xf32>
    %535 = arith.mulf %534, %532 : vector<8x32xf32>
    %536 = arith.mulf %527, %495 : vector<8x32xf32>
    %537 = arith.addf %535, %536 : vector<8x32xf32>
    %c1_189 = arith.constant 1 : index
    %c5_190 = arith.constant 5 : index
    %c0_191 = arith.constant 0 : index
    %c0_192 = arith.constant 0 : index
    %538 = vector.load %arg6[%c1_189, %c5_190, %c0_191, %c0_192] : memref<3x8x8x32xf32, #tpu.memory_space<vmem>>, vector<1x1x8x32xf32>
    %539 = vector.shape_cast %538 : vector<1x1x8x32xf32> to vector<8x32xf32>
    %540 = vector.shape_cast %537 : vector<8x32xf32> to vector<1x1x8x32xf32>
    tpu.vector_store %arg6[%c1_189, %c5_190, %c0_191, %c0_192], %540 {strides = array<i32>} : memref<3x8x8x32xf32, #tpu.memory_space<vmem>>, vector<1x1x8x32xf32>,
    %c1_193 = arith.constant 1 : index
    %c0_194 = arith.constant 0 : index
    %c0_195 = arith.constant 0 : index
    %c0_196 = arith.constant 0 : index
    %541 = vector.load %arg6[%c1_193, %c0_194, %c0_195, %c0_196] : memref<3x8x8x32xf32, #tpu.memory_space<vmem>>, vector<1x8x8x32xf32>
    %542 = vector.shape_cast %541 : vector<1x8x8x32xf32> to vector<8x8x32xf32>
    %543 = vector.broadcast %31 : vector<1x1x32xf32> to vector<8x8x32xf32>
    %544 = arith.mulf %542, %543 : vector<8x8x32xf32>
    %cst_197 = arith.constant dense<0.000000e+00> : vector<8x8xf32>
    %545 = vector.multi_reduction <add>, %544, %cst_197 [2] : vector<8x8x32xf32> to vector<8x8xf32>
    %546 = vector.extract_strided_slice %22 {offsets = [6, 0, 0], sizes = [1, 8, 8], strides = [1, 1, 1]} : vector<8x8x8xf32> to vector<1x8x8xf32>
    %547 = vector.shape_cast %546 : vector<1x8x8xf32> to vector<8x8xf32>
    %548 = arith.addf %547, %545 : vector<8x8xf32>
    %cst_198 = arith.constant dense<0xFF800000> : vector<8xf32>
    %549 = vector.multi_reduction <maximumf>, %548, %cst_198 [0] : vector<8x8xf32> to vector<8xf32>
    %550 = vector.shape_cast %549 : vector<8xf32> to vector<1x8xf32>
    %551 = vector.broadcast %550 : vector<1x8xf32> to vector<8x8xf32>
    %552 = arith.subf %548, %551 : vector<8x8xf32>
    %553 = math.exp %552 : vector<8x8xf32>
    %cst_199 = arith.constant dense<0.000000e+00> : vector<8xf32>
    %554 = vector.multi_reduction <add>, %553, %cst_199 [0] : vector<8x8xf32> to vector<8xf32>
    %555 = vector.shape_cast %554 : vector<8xf32> to vector<1x8xf32>
    %556 = tpu.reciprocal %555 {approx = true} : vector<1x8xf32> -> vector<1x8xf32>
    %557 = vector.broadcast %556 : vector<1x8xf32> to vector<8x8xf32>
    %558 = arith.mulf %553, %557 : vector<8x8xf32>
    %559 = vector.shape_cast %558 : vector<8x8xf32> to vector<8x8x1xf32>
    %560 = vector.broadcast %559 : vector<8x8x1xf32> to vector<8x8x32xf32>
    %561 = arith.mulf %560, %542 : vector<8x8x32xf32>
    %562 = vector.extract_strided_slice %561 {offsets = [0, 0, 0], sizes = [1, 8, 32], strides = [1, 1, 1]} : vector<8x8x32xf32> to vector<1x8x32xf32>
    %563 = vector.shape_cast %562 : vector<1x8x32xf32> to vector<8x32xf32>
    %564 = vector.extract_strided_slice %561 {offsets = [1, 0, 0], sizes = [1, 8, 32], strides = [1, 1, 1]} : vector<8x8x32xf32> to vector<1x8x32xf32>
    %565 = vector.shape_cast %564 : vector<1x8x32xf32> to vector<8x32xf32>
    %566 = arith.addf %563, %565 : vector<8x32xf32>
    %567 = vector.extract_strided_slice %561 {offsets = [2, 0, 0], sizes = [1, 8, 32], strides = [1, 1, 1]} : vector<8x8x32xf32> to vector<1x8x32xf32>
    %568 = vector.shape_cast %567 : vector<1x8x32xf32> to vector<8x32xf32>
    %569 = arith.addf %566, %568 : vector<8x32xf32>
    %570 = vector.extract_strided_slice %561 {offsets = [3, 0, 0], sizes = [1, 8, 32], strides = [1, 1, 1]} : vector<8x8x32xf32> to vector<1x8x32xf32>
    %571 = vector.shape_cast %570 : vector<1x8x32xf32> to vector<8x32xf32>
    %572 = arith.addf %569, %571 : vector<8x32xf32>
    %573 = vector.extract_strided_slice %561 {offsets = [4, 0, 0], sizes = [1, 8, 32], strides = [1, 1, 1]} : vector<8x8x32xf32> to vector<1x8x32xf32>
    %574 = vector.shape_cast %573 : vector<1x8x32xf32> to vector<8x32xf32>
    %575 = arith.addf %572, %574 : vector<8x32xf32>
    %576 = vector.extract_strided_slice %561 {offsets = [5, 0, 0], sizes = [1, 8, 32], strides = [1, 1, 1]} : vector<8x8x32xf32> to vector<1x8x32xf32>
    %577 = vector.shape_cast %576 : vector<1x8x32xf32> to vector<8x32xf32>
    %578 = arith.addf %575, %577 : vector<8x32xf32>
    %579 = vector.extract_strided_slice %561 {offsets = [6, 0, 0], sizes = [1, 8, 32], strides = [1, 1, 1]} : vector<8x8x32xf32> to vector<1x8x32xf32>
    %580 = vector.shape_cast %579 : vector<1x8x32xf32> to vector<8x32xf32>
    %581 = arith.addf %578, %580 : vector<8x32xf32>
    %582 = vector.extract_strided_slice %561 {offsets = [7, 0, 0], sizes = [1, 8, 32], strides = [1, 1, 1]} : vector<8x8x32xf32> to vector<1x8x32xf32>
    %583 = vector.shape_cast %582 : vector<1x8x32xf32> to vector<8x32xf32>
    %584 = arith.addf %581, %583 : vector<8x32xf32>
    %585 = arith.truncf %584 : vector<8x32xf32> to vector<8x32xbf16>
    %c4_200 = arith.constant 4 : index
    %c0_201 = arith.constant 0 : index
    %c0_202 = arith.constant 0 : index
    %586 = vector.load %arg3[%c4_200, %c0_201, %c0_202] : memref<19x32x32xbf16, #tpu.memory_space<vmem>>, vector<1x32x32xbf16>
    %587 = vector.shape_cast %586 : vector<1x32x32xbf16> to vector<32x32xbf16>
    %cst_203 = arith.constant dense<0.000000e+00> : vector<8x32xf32>
    %588 = tpu.matmul %585, %587, %cst_203 {dimension_numbers = #tpu.dot_dimension_numbers<[1], [0], [0], [1], [0, 0, 1, 1], [], []>} : vector<8x32xbf16>, vector<32x32xbf16>, vector<8x32xf32> -> vector<8x32xf32>
    %589 = vector.broadcast %24 : vector<1x32xf32> to vector<8x32xf32>
    %590 = arith.addf %588, %589 : vector<8x32xf32>
    %c5_204 = arith.constant 5 : index
    %c0_205 = arith.constant 0 : index
    %c0_206 = arith.constant 0 : index
    %591 = vector.load %arg3[%c5_204, %c0_205, %c0_206] : memref<19x32x32xbf16, #tpu.memory_space<vmem>>, vector<1x32x32xbf16>
    %592 = vector.shape_cast %591 : vector<1x32x32xbf16> to vector<32x32xbf16>
    %cst_207 = arith.constant dense<0.000000e+00> : vector<8x32xf32>
    %593 = tpu.matmul %585, %592, %cst_207 {dimension_numbers = #tpu.dot_dimension_numbers<[1], [0], [0], [1], [0, 0, 1, 1], [], []>} : vector<8x32xbf16>, vector<32x32xbf16>, vector<8x32xf32> -> vector<8x32xf32>
    %594 = vector.broadcast %26 : vector<1x32xf32> to vector<8x32xf32>
    %595 = arith.addf %593, %594 : vector<8x32xf32>
    %c6_208 = arith.constant 6 : index
    %c0_209 = arith.constant 0 : index
    %c0_210 = arith.constant 0 : index
    %596 = vector.load %arg3[%c6_208, %c0_209, %c0_210] : memref<19x32x32xbf16, #tpu.memory_space<vmem>>, vector<1x32x32xbf16>
    %597 = vector.shape_cast %596 : vector<1x32x32xbf16> to vector<32x32xbf16>
    %cst_211 = arith.constant dense<0.000000e+00> : vector<8x32xf32>
    %598 = tpu.matmul %585, %597, %cst_211 {dimension_numbers = #tpu.dot_dimension_numbers<[1], [0], [0], [1], [0, 0, 1, 1], [], []>} : vector<8x32xbf16>, vector<32x32xbf16>, vector<8x32xf32> -> vector<8x32xf32>
    %599 = vector.broadcast %28 : vector<1x32xf32> to vector<8x32xf32>
    %600 = arith.addf %598, %599 : vector<8x32xf32>
    %601 = vector.extract_strided_slice %43 {offsets = [6, 0, 0], sizes = [1, 8, 32], strides = [1, 1, 1]} : vector<8x8x32xf32> to vector<1x8x32xf32>
    %602 = vector.shape_cast %601 : vector<1x8x32xf32> to vector<8x32xf32>
    %603 = arith.addf %602, %590 : vector<8x32xf32>
    %604 = arith.negf %603 : vector<8x32xf32>
    %605 = math.exp %604 : vector<8x32xf32>
    %cst_212 = arith.constant 1.000000e+00 : f32
    %606 = vector.broadcast %cst_212 : f32 to vector<8x32xf32>
    %607 = arith.addf %606, %605 : vector<8x32xf32>
    %608 = arith.divf %606, %607 : vector<8x32xf32>
    %609 = vector.extract_strided_slice %52 {offsets = [6, 0, 0], sizes = [1, 8, 32], strides = [1, 1, 1]} : vector<8x8x32xf32> to vector<1x8x32xf32>
    %610 = vector.shape_cast %609 : vector<1x8x32xf32> to vector<8x32xf32>
    %611 = arith.addf %610, %595 : vector<8x32xf32>
    %612 = arith.negf %611 : vector<8x32xf32>
    %613 = math.exp %612 : vector<8x32xf32>
    %cst_213 = arith.constant 1.000000e+00 : f32
    %614 = vector.broadcast %cst_213 : f32 to vector<8x32xf32>
    %615 = arith.addf %614, %613 : vector<8x32xf32>
    %616 = arith.divf %614, %615 : vector<8x32xf32>
    %617 = vector.extract_strided_slice %61 {offsets = [6, 0, 0], sizes = [1, 8, 32], strides = [1, 1, 1]} : vector<8x8x32xf32> to vector<1x8x32xf32>
    %618 = vector.shape_cast %617 : vector<1x8x32xf32> to vector<8x32xf32>
    %619 = arith.mulf %608, %600 : vector<8x32xf32>
    %620 = arith.addf %618, %619 : vector<8x32xf32>
    %621 = math.tanh %620 : vector<8x32xf32>
    %cst_214 = arith.constant 1.000000e+00 : f32
    %622 = vector.broadcast %cst_214 : f32 to vector<8x32xf32>
    %623 = arith.subf %622, %616 : vector<8x32xf32>
    %624 = arith.mulf %623, %621 : vector<8x32xf32>
    %625 = arith.mulf %616, %584 : vector<8x32xf32>
    %626 = arith.addf %624, %625 : vector<8x32xf32>
    %c1_215 = arith.constant 1 : index
    %c6_216 = arith.constant 6 : index
    %c0_217 = arith.constant 0 : index
    %c0_218 = arith.constant 0 : index
    %627 = vector.load %arg6[%c1_215, %c6_216, %c0_217, %c0_218] : memref<3x8x8x32xf32, #tpu.memory_space<vmem>>, vector<1x1x8x32xf32>
    %628 = vector.shape_cast %627 : vector<1x1x8x32xf32> to vector<8x32xf32>
    %629 = vector.shape_cast %626 : vector<8x32xf32> to vector<1x1x8x32xf32>
    tpu.vector_store %arg6[%c1_215, %c6_216, %c0_217, %c0_218], %629 {strides = array<i32>} : memref<3x8x8x32xf32, #tpu.memory_space<vmem>>, vector<1x1x8x32xf32>,
    %c1_219 = arith.constant 1 : index
    %c0_220 = arith.constant 0 : index
    %c0_221 = arith.constant 0 : index
    %c0_222 = arith.constant 0 : index
    %630 = vector.load %arg6[%c1_219, %c0_220, %c0_221, %c0_222] : memref<3x8x8x32xf32, #tpu.memory_space<vmem>>, vector<1x8x8x32xf32>
    %631 = vector.shape_cast %630 : vector<1x8x8x32xf32> to vector<8x8x32xf32>
    %632 = vector.broadcast %31 : vector<1x1x32xf32> to vector<8x8x32xf32>
    %633 = arith.mulf %631, %632 : vector<8x8x32xf32>
    %cst_223 = arith.constant dense<0.000000e+00> : vector<8x8xf32>
    %634 = vector.multi_reduction <add>, %633, %cst_223 [2] : vector<8x8x32xf32> to vector<8x8xf32>
    %635 = vector.extract_strided_slice %22 {offsets = [7, 0, 0], sizes = [1, 8, 8], strides = [1, 1, 1]} : vector<8x8x8xf32> to vector<1x8x8xf32>
    %636 = vector.shape_cast %635 : vector<1x8x8xf32> to vector<8x8xf32>
    %637 = arith.addf %636, %634 : vector<8x8xf32>
    %cst_224 = arith.constant dense<0xFF800000> : vector<8xf32>
    %638 = vector.multi_reduction <maximumf>, %637, %cst_224 [0] : vector<8x8xf32> to vector<8xf32>
    %639 = vector.shape_cast %638 : vector<8xf32> to vector<1x8xf32>
    %640 = vector.broadcast %639 : vector<1x8xf32> to vector<8x8xf32>
    %641 = arith.subf %637, %640 : vector<8x8xf32>
    %642 = math.exp %641 : vector<8x8xf32>
    %cst_225 = arith.constant dense<0.000000e+00> : vector<8xf32>
    %643 = vector.multi_reduction <add>, %642, %cst_225 [0] : vector<8x8xf32> to vector<8xf32>
    %644 = vector.shape_cast %643 : vector<8xf32> to vector<1x8xf32>
    %645 = tpu.reciprocal %644 {approx = true} : vector<1x8xf32> -> vector<1x8xf32>
    %646 = vector.broadcast %645 : vector<1x8xf32> to vector<8x8xf32>
    %647 = arith.mulf %642, %646 : vector<8x8xf32>
    %648 = vector.shape_cast %647 : vector<8x8xf32> to vector<8x8x1xf32>
    %649 = vector.broadcast %648 : vector<8x8x1xf32> to vector<8x8x32xf32>
    %650 = arith.mulf %649, %631 : vector<8x8x32xf32>
    %651 = vector.extract_strided_slice %650 {offsets = [0, 0, 0], sizes = [1, 8, 32], strides = [1, 1, 1]} : vector<8x8x32xf32> to vector<1x8x32xf32>
    %652 = vector.shape_cast %651 : vector<1x8x32xf32> to vector<8x32xf32>
    %653 = vector.extract_strided_slice %650 {offsets = [1, 0, 0], sizes = [1, 8, 32], strides = [1, 1, 1]} : vector<8x8x32xf32> to vector<1x8x32xf32>
    %654 = vector.shape_cast %653 : vector<1x8x32xf32> to vector<8x32xf32>
    %655 = arith.addf %652, %654 : vector<8x32xf32>
    %656 = vector.extract_strided_slice %650 {offsets = [2, 0, 0], sizes = [1, 8, 32], strides = [1, 1, 1]} : vector<8x8x32xf32> to vector<1x8x32xf32>
    %657 = vector.shape_cast %656 : vector<1x8x32xf32> to vector<8x32xf32>
    %658 = arith.addf %655, %657 : vector<8x32xf32>
    %659 = vector.extract_strided_slice %650 {offsets = [3, 0, 0], sizes = [1, 8, 32], strides = [1, 1, 1]} : vector<8x8x32xf32> to vector<1x8x32xf32>
    %660 = vector.shape_cast %659 : vector<1x8x32xf32> to vector<8x32xf32>
    %661 = arith.addf %658, %660 : vector<8x32xf32>
    %662 = vector.extract_strided_slice %650 {offsets = [4, 0, 0], sizes = [1, 8, 32], strides = [1, 1, 1]} : vector<8x8x32xf32> to vector<1x8x32xf32>
    %663 = vector.shape_cast %662 : vector<1x8x32xf32> to vector<8x32xf32>
    %664 = arith.addf %661, %663 : vector<8x32xf32>
    %665 = vector.extract_strided_slice %650 {offsets = [5, 0, 0], sizes = [1, 8, 32], strides = [1, 1, 1]} : vector<8x8x32xf32> to vector<1x8x32xf32>
    %666 = vector.shape_cast %665 : vector<1x8x32xf32> to vector<8x32xf32>
    %667 = arith.addf %664, %666 : vector<8x32xf32>
    %668 = vector.extract_strided_slice %650 {offsets = [6, 0, 0], sizes = [1, 8, 32], strides = [1, 1, 1]} : vector<8x8x32xf32> to vector<1x8x32xf32>
    %669 = vector.shape_cast %668 : vector<1x8x32xf32> to vector<8x32xf32>
    %670 = arith.addf %667, %669 : vector<8x32xf32>
    %671 = vector.extract_strided_slice %650 {offsets = [7, 0, 0], sizes = [1, 8, 32], strides = [1, 1, 1]} : vector<8x8x32xf32> to vector<1x8x32xf32>
    %672 = vector.shape_cast %671 : vector<1x8x32xf32> to vector<8x32xf32>
    %673 = arith.addf %670, %672 : vector<8x32xf32>
    %674 = arith.truncf %673 : vector<8x32xf32> to vector<8x32xbf16>
    %c4_226 = arith.constant 4 : index
    %c0_227 = arith.constant 0 : index
    %c0_228 = arith.constant 0 : index
    %675 = vector.load %arg3[%c4_226, %c0_227, %c0_228] : memref<19x32x32xbf16, #tpu.memory_space<vmem>>, vector<1x32x32xbf16>
    %676 = vector.shape_cast %675 : vector<1x32x32xbf16> to vector<32x32xbf16>
    %cst_229 = arith.constant dense<0.000000e+00> : vector<8x32xf32>
    %677 = tpu.matmul %674, %676, %cst_229 {dimension_numbers = #tpu.dot_dimension_numbers<[1], [0], [0], [1], [0, 0, 1, 1], [], []>} : vector<8x32xbf16>, vector<32x32xbf16>, vector<8x32xf32> -> vector<8x32xf32>
    %678 = vector.broadcast %24 : vector<1x32xf32> to vector<8x32xf32>
    %679 = arith.addf %677, %678 : vector<8x32xf32>
    %c5_230 = arith.constant 5 : index
    %c0_231 = arith.constant 0 : index
    %c0_232 = arith.constant 0 : index
    %680 = vector.load %arg3[%c5_230, %c0_231, %c0_232] : memref<19x32x32xbf16, #tpu.memory_space<vmem>>, vector<1x32x32xbf16>
    %681 = vector.shape_cast %680 : vector<1x32x32xbf16> to vector<32x32xbf16>
    %cst_233 = arith.constant dense<0.000000e+00> : vector<8x32xf32>
    %682 = tpu.matmul %674, %681, %cst_233 {dimension_numbers = #tpu.dot_dimension_numbers<[1], [0], [0], [1], [0, 0, 1, 1], [], []>} : vector<8x32xbf16>, vector<32x32xbf16>, vector<8x32xf32> -> vector<8x32xf32>
    %683 = vector.broadcast %26 : vector<1x32xf32> to vector<8x32xf32>
    %684 = arith.addf %682, %683 : vector<8x32xf32>
    %c6_234 = arith.constant 6 : index
    %c0_235 = arith.constant 0 : index
    %c0_236 = arith.constant 0 : index
    %685 = vector.load %arg3[%c6_234, %c0_235, %c0_236] : memref<19x32x32xbf16, #tpu.memory_space<vmem>>, vector<1x32x32xbf16>
    %686 = vector.shape_cast %685 : vector<1x32x32xbf16> to vector<32x32xbf16>
    %cst_237 = arith.constant dense<0.000000e+00> : vector<8x32xf32>
    %687 = tpu.matmul %674, %686, %cst_237 {dimension_numbers = #tpu.dot_dimension_numbers<[1], [0], [0], [1], [0, 0, 1, 1], [], []>} : vector<8x32xbf16>, vector<32x32xbf16>, vector<8x32xf32> -> vector<8x32xf32>
    %688 = vector.broadcast %28 : vector<1x32xf32> to vector<8x32xf32>
    %689 = arith.addf %687, %688 : vector<8x32xf32>
    %690 = vector.extract_strided_slice %43 {offsets = [7, 0, 0], sizes = [1, 8, 32], strides = [1, 1, 1]} : vector<8x8x32xf32> to vector<1x8x32xf32>
    %691 = vector.shape_cast %690 : vector<1x8x32xf32> to vector<8x32xf32>
    %692 = arith.addf %691, %679 : vector<8x32xf32>
    %693 = arith.negf %692 : vector<8x32xf32>
    %694 = math.exp %693 : vector<8x32xf32>
    %cst_238 = arith.constant 1.000000e+00 : f32
    %695 = vector.broadcast %cst_238 : f32 to vector<8x32xf32>
    %696 = arith.addf %695, %694 : vector<8x32xf32>
    %697 = arith.divf %695, %696 : vector<8x32xf32>
    %698 = vector.extract_strided_slice %52 {offsets = [7, 0, 0], sizes = [1, 8, 32], strides = [1, 1, 1]} : vector<8x8x32xf32> to vector<1x8x32xf32>
    %699 = vector.shape_cast %698 : vector<1x8x32xf32> to vector<8x32xf32>
    %700 = arith.addf %699, %684 : vector<8x32xf32>
    %701 = arith.negf %700 : vector<8x32xf32>
    %702 = math.exp %701 : vector<8x32xf32>
    %cst_239 = arith.constant 1.000000e+00 : f32
    %703 = vector.broadcast %cst_239 : f32 to vector<8x32xf32>
    %704 = arith.addf %703, %702 : vector<8x32xf32>
    %705 = arith.divf %703, %704 : vector<8x32xf32>
    %706 = vector.extract_strided_slice %61 {offsets = [7, 0, 0], sizes = [1, 8, 32], strides = [1, 1, 1]} : vector<8x8x32xf32> to vector<1x8x32xf32>
    %707 = vector.shape_cast %706 : vector<1x8x32xf32> to vector<8x32xf32>
    %708 = arith.mulf %697, %689 : vector<8x32xf32>
    %709 = arith.addf %707, %708 : vector<8x32xf32>
    %710 = math.tanh %709 : vector<8x32xf32>
    %cst_240 = arith.constant 1.000000e+00 : f32
    %711 = vector.broadcast %cst_240 : f32 to vector<8x32xf32>
    %712 = arith.subf %711, %705 : vector<8x32xf32>
    %713 = arith.mulf %712, %710 : vector<8x32xf32>
    %714 = arith.mulf %705, %673 : vector<8x32xf32>
    %715 = arith.addf %713, %714 : vector<8x32xf32>
    %c1_241 = arith.constant 1 : index
    %c7_242 = arith.constant 7 : index
    %c0_243 = arith.constant 0 : index
    %c0_244 = arith.constant 0 : index
    %716 = vector.load %arg6[%c1_241, %c7_242, %c0_243, %c0_244] : memref<3x8x8x32xf32, #tpu.memory_space<vmem>>, vector<1x1x8x32xf32>
    %717 = vector.shape_cast %716 : vector<1x1x8x32xf32> to vector<8x32xf32>
    %718 = vector.shape_cast %715 : vector<8x32xf32> to vector<1x1x8x32xf32>
    tpu.vector_store %arg6[%c1_241, %c7_242, %c0_243, %c0_244], %718 {strides = array<i32>} : memref<3x8x8x32xf32, #tpu.memory_space<vmem>>, vector<1x1x8x32xf32>,
    %c1_245 = arith.constant 1 : index
    %719 = memref.load %arg0[%c1_245] : memref<2xf32, #tpu.memory_space<smem>>
    %720 = vector.broadcast %719 : f32 to vector<8x8x8xf32>
    %721 = arith.mulf %720, %16 : vector<8x8x8xf32>
    %722 = arith.addf %721, %18 : vector<8x8x8xf32>
    %c11 = arith.constant 11 : index
    %c0_246 = arith.constant 0 : index
    %c0_247 = arith.constant 0 : index
    %723 = vector.load %arg4[%c11, %c0_246, %c0_247] : memref<18x1x32xf32, #tpu.memory_space<vmem>>, vector<1x1x32xf32>
    %724 = vector.shape_cast %723 : vector<1x1x32xf32> to vector<1x32xf32>
    %c12 = arith.constant 12 : index
    %c0_248 = arith.constant 0 : index
    %c0_249 = arith.constant 0 : index
    %725 = vector.load %arg4[%c12, %c0_248, %c0_249] : memref<18x1x32xf32, #tpu.memory_space<vmem>>, vector<1x1x32xf32>
    %726 = vector.shape_cast %725 : vector<1x1x32xf32> to vector<1x32xf32>
    %c13 = arith.constant 13 : index
    %c0_250 = arith.constant 0 : index
    %c0_251 = arith.constant 0 : index
    %727 = vector.load %arg4[%c13, %c0_250, %c0_251] : memref<18x1x32xf32, #tpu.memory_space<vmem>>, vector<1x1x32xf32>
    %728 = vector.shape_cast %727 : vector<1x1x32xf32> to vector<1x32xf32>
    %c14 = arith.constant 14 : index
    %c0_252 = arith.constant 0 : index
    %c0_253 = arith.constant 0 : index
    %729 = vector.load %arg4[%c14, %c0_252, %c0_253] : memref<18x1x32xf32, #tpu.memory_space<vmem>>, vector<1x1x32xf32>
    %730 = vector.shape_cast %729 : vector<1x1x32xf32> to vector<1x32xf32>
    %731 = vector.shape_cast %730 : vector<1x32xf32> to vector<1x1x32xf32>
    %c1_254 = arith.constant 1 : index
    %c0_255 = arith.constant 0 : index
    %c0_256 = arith.constant 0 : index
    %c0_257 = arith.constant 0 : index
    %732 = vector.load %arg6[%c1_254, %c0_255, %c0_256, %c0_257] : memref<3x8x8x32xf32, #tpu.memory_space<vmem>>, vector<1x8x8x32xf32>
    %733 = vector.shape_cast %732 : vector<1x8x8x32xf32> to vector<8x8x32xf32>
    %734 = vector.shape_cast %733 : vector<8x8x32xf32> to vector<64x32xf32>
    %735 = arith.truncf %734 : vector<64x32xf32> to vector<64x32xbf16>
    %c7_258 = arith.constant 7 : index
    %c0_259 = arith.constant 0 : index
    %c0_260 = arith.constant 0 : index
    %736 = vector.load %arg3[%c7_258, %c0_259, %c0_260] : memref<19x32x32xbf16, #tpu.memory_space<vmem>>, vector<1x32x32xbf16>
    %737 = vector.shape_cast %736 : vector<1x32x32xbf16> to vector<32x32xbf16>
    %cst_261 = arith.constant dense<0.000000e+00> : vector<64x32xf32>
    %738 = tpu.matmul %735, %737, %cst_261 {dimension_numbers = #tpu.dot_dimension_numbers<[1], [0], [0], [1], [0, 0, 1, 1], [], []>} : vector<64x32xbf16>, vector<32x32xbf16>, vector<64x32xf32> -> vector<64x32xf32>
    %c8 = arith.constant 8 : index
    %c0_262 = arith.constant 0 : index
    %c0_263 = arith.constant 0 : index
    %739 = vector.load %arg4[%c8, %c0_262, %c0_263] : memref<18x1x32xf32, #tpu.memory_space<vmem>>, vector<1x1x32xf32>
    %740 = vector.shape_cast %739 : vector<1x1x32xf32> to vector<1x32xf32>
    %741 = vector.broadcast %740 : vector<1x32xf32> to vector<64x32xf32>
    %742 = arith.addf %738, %741 : vector<64x32xf32>
    %743 = vector.shape_cast %742 : vector<64x32xf32> to vector<8x8x32xf32>
    %744 = arith.truncf %734 : vector<64x32xf32> to vector<64x32xbf16>
    %c8_264 = arith.constant 8 : index
    %c0_265 = arith.constant 0 : index
    %c0_266 = arith.constant 0 : index
    %745 = vector.load %arg3[%c8_264, %c0_265, %c0_266] : memref<19x32x32xbf16, #tpu.memory_space<vmem>>, vector<1x32x32xbf16>
    %746 = vector.shape_cast %745 : vector<1x32x32xbf16> to vector<32x32xbf16>
    %cst_267 = arith.constant dense<0.000000e+00> : vector<64x32xf32>
    %747 = tpu.matmul %744, %746, %cst_267 {dimension_numbers = #tpu.dot_dimension_numbers<[1], [0], [0], [1], [0, 0, 1, 1], [], []>} : vector<64x32xbf16>, vector<32x32xbf16>, vector<64x32xf32> -> vector<64x32xf32>
    %c9 = arith.constant 9 : index
    %c0_268 = arith.constant 0 : index
    %c0_269 = arith.constant 0 : index
    %748 = vector.load %arg4[%c9, %c0_268, %c0_269] : memref<18x1x32xf32, #tpu.memory_space<vmem>>, vector<1x1x32xf32>
    %749 = vector.shape_cast %748 : vector<1x1x32xf32> to vector<1x32xf32>
    %750 = vector.broadcast %749 : vector<1x32xf32> to vector<64x32xf32>
    %751 = arith.addf %747, %750 : vector<64x32xf32>
    %752 = vector.shape_cast %751 : vector<64x32xf32> to vector<8x8x32xf32>
    %753 = arith.truncf %734 : vector<64x32xf32> to vector<64x32xbf16>
    %c9_270 = arith.constant 9 : index
    %c0_271 = arith.constant 0 : index
    %c0_272 = arith.constant 0 : index
    %754 = vector.load %arg3[%c9_270, %c0_271, %c0_272] : memref<19x32x32xbf16, #tpu.memory_space<vmem>>, vector<1x32x32xbf16>
    %755 = vector.shape_cast %754 : vector<1x32x32xbf16> to vector<32x32xbf16>
    %cst_273 = arith.constant dense<0.000000e+00> : vector<64x32xf32>
    %756 = tpu.matmul %753, %755, %cst_273 {dimension_numbers = #tpu.dot_dimension_numbers<[1], [0], [0], [1], [0, 0, 1, 1], [], []>} : vector<64x32xbf16>, vector<32x32xbf16>, vector<64x32xf32> -> vector<64x32xf32>
    %c10 = arith.constant 10 : index
    %c0_274 = arith.constant 0 : index
    %c0_275 = arith.constant 0 : index
    %757 = vector.load %arg4[%c10, %c0_274, %c0_275] : memref<18x1x32xf32, #tpu.memory_space<vmem>>, vector<1x1x32xf32>
    %758 = vector.shape_cast %757 : vector<1x1x32xf32> to vector<1x32xf32>
    %759 = vector.broadcast %758 : vector<1x32xf32> to vector<64x32xf32>
    %760 = arith.addf %756, %759 : vector<64x32xf32>
    %761 = vector.shape_cast %760 : vector<64x32xf32> to vector<8x8x32xf32>
    %cst_276 = arith.constant 0.000000e+00 : f32
    %762 = vector.broadcast %cst_276 : f32 to vector<8x8x32xf32>
    %c2_277 = arith.constant 2 : index
    %c0_278 = arith.constant 0 : index
    %c0_279 = arith.constant 0 : index
    %c0_280 = arith.constant 0 : index
    %763 = vector.load %arg6[%c2_277, %c0_278, %c0_279, %c0_280] : memref<3x8x8x32xf32, #tpu.memory_space<vmem>>, vector<1x8x8x32xf32>
    %764 = vector.shape_cast %763 : vector<1x8x8x32xf32> to vector<8x8x32xf32>
    %765 = vector.shape_cast %762 : vector<8x8x32xf32> to vector<1x8x8x32xf32>
    tpu.vector_store %arg6[%c2_277, %c0_278, %c0_279, %c0_280], %765 {strides = array<i32>} : memref<3x8x8x32xf32, #tpu.memory_space<vmem>>, vector<1x8x8x32xf32>,
    %766 = vector.extract_strided_slice %743 {offsets = [0, 0, 0], sizes = [1, 8, 32], strides = [1, 1, 1]} : vector<8x8x32xf32> to vector<1x8x32xf32>
    %767 = vector.shape_cast %766 : vector<1x8x32xf32> to vector<8x32xf32>
    %768 = vector.broadcast %724 : vector<1x32xf32> to vector<8x32xf32>
    %769 = arith.addf %767, %768 : vector<8x32xf32>
    %770 = arith.negf %769 : vector<8x32xf32>
    %771 = math.exp %770 : vector<8x32xf32>
    %cst_281 = arith.constant 1.000000e+00 : f32
    %772 = vector.broadcast %cst_281 : f32 to vector<8x32xf32>
    %773 = arith.addf %772, %771 : vector<8x32xf32>
    %774 = arith.divf %772, %773 : vector<8x32xf32>
    %775 = vector.extract_strided_slice %752 {offsets = [0, 0, 0], sizes = [1, 8, 32], strides = [1, 1, 1]} : vector<8x8x32xf32> to vector<1x8x32xf32>
    %776 = vector.shape_cast %775 : vector<1x8x32xf32> to vector<8x32xf32>
    %777 = vector.broadcast %726 : vector<1x32xf32> to vector<8x32xf32>
    %778 = arith.addf %776, %777 : vector<8x32xf32>
    %779 = arith.negf %778 : vector<8x32xf32>
    %780 = math.exp %779 : vector<8x32xf32>
    %cst_282 = arith.constant 1.000000e+00 : f32
    %781 = vector.broadcast %cst_282 : f32 to vector<8x32xf32>
    %782 = arith.addf %781, %780 : vector<8x32xf32>
    %783 = arith.divf %781, %782 : vector<8x32xf32>
    %784 = vector.extract_strided_slice %761 {offsets = [0, 0, 0], sizes = [1, 8, 32], strides = [1, 1, 1]} : vector<8x8x32xf32> to vector<1x8x32xf32>
    %785 = vector.shape_cast %784 : vector<1x8x32xf32> to vector<8x32xf32>
    %786 = vector.broadcast %728 : vector<1x32xf32> to vector<8x32xf32>
    %787 = arith.mulf %774, %786 : vector<8x32xf32>
    %788 = arith.addf %785, %787 : vector<8x32xf32>
    %789 = math.tanh %788 : vector<8x32xf32>
    %cst_283 = arith.constant 1.000000e+00 : f32
    %790 = vector.broadcast %cst_283 : f32 to vector<8x32xf32>
    %791 = arith.subf %790, %783 : vector<8x32xf32>
    %792 = arith.mulf %791, %789 : vector<8x32xf32>
    %c2_284 = arith.constant 2 : index
    %c0_285 = arith.constant 0 : index
    %c0_286 = arith.constant 0 : index
    %c0_287 = arith.constant 0 : index
    %793 = vector.load %arg6[%c2_284, %c0_285, %c0_286, %c0_287] : memref<3x8x8x32xf32, #tpu.memory_space<vmem>>, vector<1x1x8x32xf32>
    %794 = vector.shape_cast %793 : vector<1x1x8x32xf32> to vector<8x32xf32>
    %795 = vector.shape_cast %792 : vector<8x32xf32> to vector<1x1x8x32xf32>
    tpu.vector_store %arg6[%c2_284, %c0_285, %c0_286, %c0_287], %795 {strides = array<i32>} : memref<3x8x8x32xf32, #tpu.memory_space<vmem>>, vector<1x1x8x32xf32>,
    %c2_288 = arith.constant 2 : index
    %c0_289 = arith.constant 0 : index
    %c0_290 = arith.constant 0 : index
    %c0_291 = arith.constant 0 : index
    %796 = vector.load %arg6[%c2_288, %c0_289, %c0_290, %c0_291] : memref<3x8x8x32xf32, #tpu.memory_space<vmem>>, vector<1x8x8x32xf32>
    %797 = vector.shape_cast %796 : vector<1x8x8x32xf32> to vector<8x8x32xf32>
    %798 = vector.broadcast %731 : vector<1x1x32xf32> to vector<8x8x32xf32>
    %799 = arith.mulf %797, %798 : vector<8x8x32xf32>
    %cst_292 = arith.constant dense<0.000000e+00> : vector<8x8xf32>
    %800 = vector.multi_reduction <add>, %799, %cst_292 [2] : vector<8x8x32xf32> to vector<8x8xf32>
    %801 = vector.extract_strided_slice %722 {offsets = [1, 0, 0], sizes = [1, 8, 8], strides = [1, 1, 1]} : vector<8x8x8xf32> to vector<1x8x8xf32>
    %802 = vector.shape_cast %801 : vector<1x8x8xf32> to vector<8x8xf32>
    %803 = arith.addf %802, %800 : vector<8x8xf32>
    %cst_293 = arith.constant dense<0xFF800000> : vector<8xf32>
    %804 = vector.multi_reduction <maximumf>, %803, %cst_293 [0] : vector<8x8xf32> to vector<8xf32>
    %805 = vector.shape_cast %804 : vector<8xf32> to vector<1x8xf32>
    %806 = vector.broadcast %805 : vector<1x8xf32> to vector<8x8xf32>
    %807 = arith.subf %803, %806 : vector<8x8xf32>
    %808 = math.exp %807 : vector<8x8xf32>
    %cst_294 = arith.constant dense<0.000000e+00> : vector<8xf32>
    %809 = vector.multi_reduction <add>, %808, %cst_294 [0] : vector<8x8xf32> to vector<8xf32>
    %810 = vector.shape_cast %809 : vector<8xf32> to vector<1x8xf32>
    %811 = tpu.reciprocal %810 {approx = true} : vector<1x8xf32> -> vector<1x8xf32>
    %812 = vector.broadcast %811 : vector<1x8xf32> to vector<8x8xf32>
    %813 = arith.mulf %808, %812 : vector<8x8xf32>
    %814 = vector.shape_cast %813 : vector<8x8xf32> to vector<8x8x1xf32>
    %815 = vector.broadcast %814 : vector<8x8x1xf32> to vector<8x8x32xf32>
    %816 = arith.mulf %815, %797 : vector<8x8x32xf32>
    %817 = vector.extract_strided_slice %816 {offsets = [0, 0, 0], sizes = [1, 8, 32], strides = [1, 1, 1]} : vector<8x8x32xf32> to vector<1x8x32xf32>
    %818 = vector.shape_cast %817 : vector<1x8x32xf32> to vector<8x32xf32>
    %819 = vector.extract_strided_slice %816 {offsets = [1, 0, 0], sizes = [1, 8, 32], strides = [1, 1, 1]} : vector<8x8x32xf32> to vector<1x8x32xf32>
    %820 = vector.shape_cast %819 : vector<1x8x32xf32> to vector<8x32xf32>
    %821 = arith.addf %818, %820 : vector<8x32xf32>
    %822 = vector.extract_strided_slice %816 {offsets = [2, 0, 0], sizes = [1, 8, 32], strides = [1, 1, 1]} : vector<8x8x32xf32> to vector<1x8x32xf32>
    %823 = vector.shape_cast %822 : vector<1x8x32xf32> to vector<8x32xf32>
    %824 = arith.addf %821, %823 : vector<8x32xf32>
    %825 = vector.extract_strided_slice %816 {offsets = [3, 0, 0], sizes = [1, 8, 32], strides = [1, 1, 1]} : vector<8x8x32xf32> to vector<1x8x32xf32>
    %826 = vector.shape_cast %825 : vector<1x8x32xf32> to vector<8x32xf32>
    %827 = arith.addf %824, %826 : vector<8x32xf32>
    %828 = vector.extract_strided_slice %816 {offsets = [4, 0, 0], sizes = [1, 8, 32], strides = [1, 1, 1]} : vector<8x8x32xf32> to vector<1x8x32xf32>
    %829 = vector.shape_cast %828 : vector<1x8x32xf32> to vector<8x32xf32>
    %830 = arith.addf %827, %829 : vector<8x32xf32>
    %831 = vector.extract_strided_slice %816 {offsets = [5, 0, 0], sizes = [1, 8, 32], strides = [1, 1, 1]} : vector<8x8x32xf32> to vector<1x8x32xf32>
    %832 = vector.shape_cast %831 : vector<1x8x32xf32> to vector<8x32xf32>
    %833 = arith.addf %830, %832 : vector<8x32xf32>
    %834 = vector.extract_strided_slice %816 {offsets = [6, 0, 0], sizes = [1, 8, 32], strides = [1, 1, 1]} : vector<8x8x32xf32> to vector<1x8x32xf32>
    %835 = vector.shape_cast %834 : vector<1x8x32xf32> to vector<8x32xf32>
    %836 = arith.addf %833, %835 : vector<8x32xf32>
    %837 = vector.extract_strided_slice %816 {offsets = [7, 0, 0], sizes = [1, 8, 32], strides = [1, 1, 1]} : vector<8x8x32xf32> to vector<1x8x32xf32>
    %838 = vector.shape_cast %837 : vector<1x8x32xf32> to vector<8x32xf32>
    %839 = arith.addf %836, %838 : vector<8x32xf32>
    %840 = arith.truncf %839 : vector<8x32xf32> to vector<8x32xbf16>
    %c10_295 = arith.constant 10 : index
    %c0_296 = arith.constant 0 : index
    %c0_297 = arith.constant 0 : index
    %841 = vector.load %arg3[%c10_295, %c0_296, %c0_297] : memref<19x32x32xbf16, #tpu.memory_space<vmem>>, vector<1x32x32xbf16>
    %842 = vector.shape_cast %841 : vector<1x32x32xbf16> to vector<32x32xbf16>
    %cst_298 = arith.constant dense<0.000000e+00> : vector<8x32xf32>
    %843 = tpu.matmul %840, %842, %cst_298 {dimension_numbers = #tpu.dot_dimension_numbers<[1], [0], [0], [1], [0, 0, 1, 1], [], []>} : vector<8x32xbf16>, vector<32x32xbf16>, vector<8x32xf32> -> vector<8x32xf32>
    %844 = vector.broadcast %724 : vector<1x32xf32> to vector<8x32xf32>
    %845 = arith.addf %843, %844 : vector<8x32xf32>
    %c11_299 = arith.constant 11 : index
    %c0_300 = arith.constant 0 : index
    %c0_301 = arith.constant 0 : index
    %846 = vector.load %arg3[%c11_299, %c0_300, %c0_301] : memref<19x32x32xbf16, #tpu.memory_space<vmem>>, vector<1x32x32xbf16>
    %847 = vector.shape_cast %846 : vector<1x32x32xbf16> to vector<32x32xbf16>
    %cst_302 = arith.constant dense<0.000000e+00> : vector<8x32xf32>
    %848 = tpu.matmul %840, %847, %cst_302 {dimension_numbers = #tpu.dot_dimension_numbers<[1], [0], [0], [1], [0, 0, 1, 1], [], []>} : vector<8x32xbf16>, vector<32x32xbf16>, vector<8x32xf32> -> vector<8x32xf32>
    %849 = vector.broadcast %726 : vector<1x32xf32> to vector<8x32xf32>
    %850 = arith.addf %848, %849 : vector<8x32xf32>
    %c12_303 = arith.constant 12 : index
    %c0_304 = arith.constant 0 : index
    %c0_305 = arith.constant 0 : index
    %851 = vector.load %arg3[%c12_303, %c0_304, %c0_305] : memref<19x32x32xbf16, #tpu.memory_space<vmem>>, vector<1x32x32xbf16>
    %852 = vector.shape_cast %851 : vector<1x32x32xbf16> to vector<32x32xbf16>
    %cst_306 = arith.constant dense<0.000000e+00> : vector<8x32xf32>
    %853 = tpu.matmul %840, %852, %cst_306 {dimension_numbers = #tpu.dot_dimension_numbers<[1], [0], [0], [1], [0, 0, 1, 1], [], []>} : vector<8x32xbf16>, vector<32x32xbf16>, vector<8x32xf32> -> vector<8x32xf32>
    %854 = vector.broadcast %728 : vector<1x32xf32> to vector<8x32xf32>
    %855 = arith.addf %853, %854 : vector<8x32xf32>
    %856 = vector.extract_strided_slice %743 {offsets = [1, 0, 0], sizes = [1, 8, 32], strides = [1, 1, 1]} : vector<8x8x32xf32> to vector<1x8x32xf32>
    %857 = vector.shape_cast %856 : vector<1x8x32xf32> to vector<8x32xf32>
    %858 = arith.addf %857, %845 : vector<8x32xf32>
    %859 = arith.negf %858 : vector<8x32xf32>
    %860 = math.exp %859 : vector<8x32xf32>
    %cst_307 = arith.constant 1.000000e+00 : f32
    %861 = vector.broadcast %cst_307 : f32 to vector<8x32xf32>
    %862 = arith.addf %861, %860 : vector<8x32xf32>
    %863 = arith.divf %861, %862 : vector<8x32xf32>
    %864 = vector.extract_strided_slice %752 {offsets = [1, 0, 0], sizes = [1, 8, 32], strides = [1, 1, 1]} : vector<8x8x32xf32> to vector<1x8x32xf32>
    %865 = vector.shape_cast %864 : vector<1x8x32xf32> to vector<8x32xf32>
    %866 = arith.addf %865, %850 : vector<8x32xf32>
    %867 = arith.negf %866 : vector<8x32xf32>
    %868 = math.exp %867 : vector<8x32xf32>
    %cst_308 = arith.constant 1.000000e+00 : f32
    %869 = vector.broadcast %cst_308 : f32 to vector<8x32xf32>
    %870 = arith.addf %869, %868 : vector<8x32xf32>
    %871 = arith.divf %869, %870 : vector<8x32xf32>
    %872 = vector.extract_strided_slice %761 {offsets = [1, 0, 0], sizes = [1, 8, 32], strides = [1, 1, 1]} : vector<8x8x32xf32> to vector<1x8x32xf32>
    %873 = vector.shape_cast %872 : vector<1x8x32xf32> to vector<8x32xf32>
    %874 = arith.mulf %863, %855 : vector<8x32xf32>
    %875 = arith.addf %873, %874 : vector<8x32xf32>
    %876 = math.tanh %875 : vector<8x32xf32>
    %cst_309 = arith.constant 1.000000e+00 : f32
    %877 = vector.broadcast %cst_309 : f32 to vector<8x32xf32>
    %878 = arith.subf %877, %871 : vector<8x32xf32>
    %879 = arith.mulf %878, %876 : vector<8x32xf32>
    %880 = arith.mulf %871, %839 : vector<8x32xf32>
    %881 = arith.addf %879, %880 : vector<8x32xf32>
    %c2_310 = arith.constant 2 : index
    %c1_311 = arith.constant 1 : index
    %c0_312 = arith.constant 0 : index
    %c0_313 = arith.constant 0 : index
    %882 = vector.load %arg6[%c2_310, %c1_311, %c0_312, %c0_313] : memref<3x8x8x32xf32, #tpu.memory_space<vmem>>, vector<1x1x8x32xf32>
    %883 = vector.shape_cast %882 : vector<1x1x8x32xf32> to vector<8x32xf32>
    %884 = vector.shape_cast %881 : vector<8x32xf32> to vector<1x1x8x32xf32>
    tpu.vector_store %arg6[%c2_310, %c1_311, %c0_312, %c0_313], %884 {strides = array<i32>} : memref<3x8x8x32xf32, #tpu.memory_space<vmem>>, vector<1x1x8x32xf32>,
    %c2_314 = arith.constant 2 : index
    %c0_315 = arith.constant 0 : index
    %c0_316 = arith.constant 0 : index
    %c0_317 = arith.constant 0 : index
    %885 = vector.load %arg6[%c2_314, %c0_315, %c0_316, %c0_317] : memref<3x8x8x32xf32, #tpu.memory_space<vmem>>, vector<1x8x8x32xf32>
    %886 = vector.shape_cast %885 : vector<1x8x8x32xf32> to vector<8x8x32xf32>
    %887 = vector.broadcast %731 : vector<1x1x32xf32> to vector<8x8x32xf32>
    %888 = arith.mulf %886, %887 : vector<8x8x32xf32>
    %cst_318 = arith.constant dense<0.000000e+00> : vector<8x8xf32>
    %889 = vector.multi_reduction <add>, %888, %cst_318 [2] : vector<8x8x32xf32> to vector<8x8xf32>
    %890 = vector.extract_strided_slice %722 {offsets = [2, 0, 0], sizes = [1, 8, 8], strides = [1, 1, 1]} : vector<8x8x8xf32> to vector<1x8x8xf32>
    %891 = vector.shape_cast %890 : vector<1x8x8xf32> to vector<8x8xf32>
    %892 = arith.addf %891, %889 : vector<8x8xf32>
    %cst_319 = arith.constant dense<0xFF800000> : vector<8xf32>
    %893 = vector.multi_reduction <maximumf>, %892, %cst_319 [0] : vector<8x8xf32> to vector<8xf32>
    %894 = vector.shape_cast %893 : vector<8xf32> to vector<1x8xf32>
    %895 = vector.broadcast %894 : vector<1x8xf32> to vector<8x8xf32>
    %896 = arith.subf %892, %895 : vector<8x8xf32>
    %897 = math.exp %896 : vector<8x8xf32>
    %cst_320 = arith.constant dense<0.000000e+00> : vector<8xf32>
    %898 = vector.multi_reduction <add>, %897, %cst_320 [0] : vector<8x8xf32> to vector<8xf32>
    %899 = vector.shape_cast %898 : vector<8xf32> to vector<1x8xf32>
    %900 = tpu.reciprocal %899 {approx = true} : vector<1x8xf32> -> vector<1x8xf32>
    %901 = vector.broadcast %900 : vector<1x8xf32> to vector<8x8xf32>
    %902 = arith.mulf %897, %901 : vector<8x8xf32>
    %903 = vector.shape_cast %902 : vector<8x8xf32> to vector<8x8x1xf32>
    %904 = vector.broadcast %903 : vector<8x8x1xf32> to vector<8x8x32xf32>
    %905 = arith.mulf %904, %886 : vector<8x8x32xf32>
    %906 = vector.extract_strided_slice %905 {offsets = [0, 0, 0], sizes = [1, 8, 32], strides = [1, 1, 1]} : vector<8x8x32xf32> to vector<1x8x32xf32>
    %907 = vector.shape_cast %906 : vector<1x8x32xf32> to vector<8x32xf32>
    %908 = vector.extract_strided_slice %905 {offsets = [1, 0, 0], sizes = [1, 8, 32], strides = [1, 1, 1]} : vector<8x8x32xf32> to vector<1x8x32xf32>
    %909 = vector.shape_cast %908 : vector<1x8x32xf32> to vector<8x32xf32>
    %910 = arith.addf %907, %909 : vector<8x32xf32>
    %911 = vector.extract_strided_slice %905 {offsets = [2, 0, 0], sizes = [1, 8, 32], strides = [1, 1, 1]} : vector<8x8x32xf32> to vector<1x8x32xf32>
    %912 = vector.shape_cast %911 : vector<1x8x32xf32> to vector<8x32xf32>
    %913 = arith.addf %910, %912 : vector<8x32xf32>
    %914 = vector.extract_strided_slice %905 {offsets = [3, 0, 0], sizes = [1, 8, 32], strides = [1, 1, 1]} : vector<8x8x32xf32> to vector<1x8x32xf32>
    %915 = vector.shape_cast %914 : vector<1x8x32xf32> to vector<8x32xf32>
    %916 = arith.addf %913, %915 : vector<8x32xf32>
    %917 = vector.extract_strided_slice %905 {offsets = [4, 0, 0], sizes = [1, 8, 32], strides = [1, 1, 1]} : vector<8x8x32xf32> to vector<1x8x32xf32>
    %918 = vector.shape_cast %917 : vector<1x8x32xf32> to vector<8x32xf32>
    %919 = arith.addf %916, %918 : vector<8x32xf32>
    %920 = vector.extract_strided_slice %905 {offsets = [5, 0, 0], sizes = [1, 8, 32], strides = [1, 1, 1]} : vector<8x8x32xf32> to vector<1x8x32xf32>
    %921 = vector.shape_cast %920 : vector<1x8x32xf32> to vector<8x32xf32>
    %922 = arith.addf %919, %921 : vector<8x32xf32>
    %923 = vector.extract_strided_slice %905 {offsets = [6, 0, 0], sizes = [1, 8, 32], strides = [1, 1, 1]} : vector<8x8x32xf32> to vector<1x8x32xf32>
    %924 = vector.shape_cast %923 : vector<1x8x32xf32> to vector<8x32xf32>
    %925 = arith.addf %922, %924 : vector<8x32xf32>
    %926 = vector.extract_strided_slice %905 {offsets = [7, 0, 0], sizes = [1, 8, 32], strides = [1, 1, 1]} : vector<8x8x32xf32> to vector<1x8x32xf32>
    %927 = vector.shape_cast %926 : vector<1x8x32xf32> to vector<8x32xf32>
    %928 = arith.addf %925, %927 : vector<8x32xf32>
    %929 = arith.truncf %928 : vector<8x32xf32> to vector<8x32xbf16>
    %c10_321 = arith.constant 10 : index
    %c0_322 = arith.constant 0 : index
    %c0_323 = arith.constant 0 : index
    %930 = vector.load %arg3[%c10_321, %c0_322, %c0_323] : memref<19x32x32xbf16, #tpu.memory_space<vmem>>, vector<1x32x32xbf16>
    %931 = vector.shape_cast %930 : vector<1x32x32xbf16> to vector<32x32xbf16>
    %cst_324 = arith.constant dense<0.000000e+00> : vector<8x32xf32>
    %932 = tpu.matmul %929, %931, %cst_324 {dimension_numbers = #tpu.dot_dimension_numbers<[1], [0], [0], [1], [0, 0, 1, 1], [], []>} : vector<8x32xbf16>, vector<32x32xbf16>, vector<8x32xf32> -> vector<8x32xf32>
    %933 = vector.broadcast %724 : vector<1x32xf32> to vector<8x32xf32>
    %934 = arith.addf %932, %933 : vector<8x32xf32>
    %c11_325 = arith.constant 11 : index
    %c0_326 = arith.constant 0 : index
    %c0_327 = arith.constant 0 : index
    %935 = vector.load %arg3[%c11_325, %c0_326, %c0_327] : memref<19x32x32xbf16, #tpu.memory_space<vmem>>, vector<1x32x32xbf16>
    %936 = vector.shape_cast %935 : vector<1x32x32xbf16> to vector<32x32xbf16>
    %cst_328 = arith.constant dense<0.000000e+00> : vector<8x32xf32>
    %937 = tpu.matmul %929, %936, %cst_328 {dimension_numbers = #tpu.dot_dimension_numbers<[1], [0], [0], [1], [0, 0, 1, 1], [], []>} : vector<8x32xbf16>, vector<32x32xbf16>, vector<8x32xf32> -> vector<8x32xf32>
    %938 = vector.broadcast %726 : vector<1x32xf32> to vector<8x32xf32>
    %939 = arith.addf %937, %938 : vector<8x32xf32>
    %c12_329 = arith.constant 12 : index
    %c0_330 = arith.constant 0 : index
    %c0_331 = arith.constant 0 : index
    %940 = vector.load %arg3[%c12_329, %c0_330, %c0_331] : memref<19x32x32xbf16, #tpu.memory_space<vmem>>, vector<1x32x32xbf16>
    %941 = vector.shape_cast %940 : vector<1x32x32xbf16> to vector<32x32xbf16>
    %cst_332 = arith.constant dense<0.000000e+00> : vector<8x32xf32>
    %942 = tpu.matmul %929, %941, %cst_332 {dimension_numbers = #tpu.dot_dimension_numbers<[1], [0], [0], [1], [0, 0, 1, 1], [], []>} : vector<8x32xbf16>, vector<32x32xbf16>, vector<8x32xf32> -> vector<8x32xf32>
    %943 = vector.broadcast %728 : vector<1x32xf32> to vector<8x32xf32>
    %944 = arith.addf %942, %943 : vector<8x32xf32>
    %945 = vector.extract_strided_slice %743 {offsets = [2, 0, 0], sizes = [1, 8, 32], strides = [1, 1, 1]} : vector<8x8x32xf32> to vector<1x8x32xf32>
    %946 = vector.shape_cast %945 : vector<1x8x32xf32> to vector<8x32xf32>
    %947 = arith.addf %946, %934 : vector<8x32xf32>
    %948 = arith.negf %947 : vector<8x32xf32>
    %949 = math.exp %948 : vector<8x32xf32>
    %cst_333 = arith.constant 1.000000e+00 : f32
    %950 = vector.broadcast %cst_333 : f32 to vector<8x32xf32>
    %951 = arith.addf %950, %949 : vector<8x32xf32>
    %952 = arith.divf %950, %951 : vector<8x32xf32>
    %953 = vector.extract_strided_slice %752 {offsets = [2, 0, 0], sizes = [1, 8, 32], strides = [1, 1, 1]} : vector<8x8x32xf32> to vector<1x8x32xf32>
    %954 = vector.shape_cast %953 : vector<1x8x32xf32> to vector<8x32xf32>
    %955 = arith.addf %954, %939 : vector<8x32xf32>
    %956 = arith.negf %955 : vector<8x32xf32>
    %957 = math.exp %956 : vector<8x32xf32>
    %cst_334 = arith.constant 1.000000e+00 : f32
    %958 = vector.broadcast %cst_334 : f32 to vector<8x32xf32>
    %959 = arith.addf %958, %957 : vector<8x32xf32>
    %960 = arith.divf %958, %959 : vector<8x32xf32>
    %961 = vector.extract_strided_slice %761 {offsets = [2, 0, 0], sizes = [1, 8, 32], strides = [1, 1, 1]} : vector<8x8x32xf32> to vector<1x8x32xf32>
    %962 = vector.shape_cast %961 : vector<1x8x32xf32> to vector<8x32xf32>
    %963 = arith.mulf %952, %944 : vector<8x32xf32>
    %964 = arith.addf %962, %963 : vector<8x32xf32>
    %965 = math.tanh %964 : vector<8x32xf32>
    %cst_335 = arith.constant 1.000000e+00 : f32
    %966 = vector.broadcast %cst_335 : f32 to vector<8x32xf32>
    %967 = arith.subf %966, %960 : vector<8x32xf32>
    %968 = arith.mulf %967, %965 : vector<8x32xf32>
    %969 = arith.mulf %960, %928 : vector<8x32xf32>
    %970 = arith.addf %968, %969 : vector<8x32xf32>
    %c2_336 = arith.constant 2 : index
    %c2_337 = arith.constant 2 : index
    %c0_338 = arith.constant 0 : index
    %c0_339 = arith.constant 0 : index
    %971 = vector.load %arg6[%c2_336, %c2_337, %c0_338, %c0_339] : memref<3x8x8x32xf32, #tpu.memory_space<vmem>>, vector<1x1x8x32xf32>
    %972 = vector.shape_cast %971 : vector<1x1x8x32xf32> to vector<8x32xf32>
    %973 = vector.shape_cast %970 : vector<8x32xf32> to vector<1x1x8x32xf32>
    tpu.vector_store %arg6[%c2_336, %c2_337, %c0_338, %c0_339], %973 {strides = array<i32>} : memref<3x8x8x32xf32, #tpu.memory_space<vmem>>, vector<1x1x8x32xf32>,
    %c2_340 = arith.constant 2 : index
    %c0_341 = arith.constant 0 : index
    %c0_342 = arith.constant 0 : index
    %c0_343 = arith.constant 0 : index
    %974 = vector.load %arg6[%c2_340, %c0_341, %c0_342, %c0_343] : memref<3x8x8x32xf32, #tpu.memory_space<vmem>>, vector<1x8x8x32xf32>
    %975 = vector.shape_cast %974 : vector<1x8x8x32xf32> to vector<8x8x32xf32>
    %976 = vector.broadcast %731 : vector<1x1x32xf32> to vector<8x8x32xf32>
    %977 = arith.mulf %975, %976 : vector<8x8x32xf32>
    %cst_344 = arith.constant dense<0.000000e+00> : vector<8x8xf32>
    %978 = vector.multi_reduction <add>, %977, %cst_344 [2] : vector<8x8x32xf32> to vector<8x8xf32>
    %979 = vector.extract_strided_slice %722 {offsets = [3, 0, 0], sizes = [1, 8, 8], strides = [1, 1, 1]} : vector<8x8x8xf32> to vector<1x8x8xf32>
    %980 = vector.shape_cast %979 : vector<1x8x8xf32> to vector<8x8xf32>
    %981 = arith.addf %980, %978 : vector<8x8xf32>
    %cst_345 = arith.constant dense<0xFF800000> : vector<8xf32>
    %982 = vector.multi_reduction <maximumf>, %981, %cst_345 [0] : vector<8x8xf32> to vector<8xf32>
    %983 = vector.shape_cast %982 : vector<8xf32> to vector<1x8xf32>
    %984 = vector.broadcast %983 : vector<1x8xf32> to vector<8x8xf32>
    %985 = arith.subf %981, %984 : vector<8x8xf32>
    %986 = math.exp %985 : vector<8x8xf32>
    %cst_346 = arith.constant dense<0.000000e+00> : vector<8xf32>
    %987 = vector.multi_reduction <add>, %986, %cst_346 [0] : vector<8x8xf32> to vector<8xf32>
    %988 = vector.shape_cast %987 : vector<8xf32> to vector<1x8xf32>
    %989 = tpu.reciprocal %988 {approx = true} : vector<1x8xf32> -> vector<1x8xf32>
    %990 = vector.broadcast %989 : vector<1x8xf32> to vector<8x8xf32>
    %991 = arith.mulf %986, %990 : vector<8x8xf32>
    %992 = vector.shape_cast %991 : vector<8x8xf32> to vector<8x8x1xf32>
    %993 = vector.broadcast %992 : vector<8x8x1xf32> to vector<8x8x32xf32>
    %994 = arith.mulf %993, %975 : vector<8x8x32xf32>
    %995 = vector.extract_strided_slice %994 {offsets = [0, 0, 0], sizes = [1, 8, 32], strides = [1, 1, 1]} : vector<8x8x32xf32> to vector<1x8x32xf32>
    %996 = vector.shape_cast %995 : vector<1x8x32xf32> to vector<8x32xf32>
    %997 = vector.extract_strided_slice %994 {offsets = [1, 0, 0], sizes = [1, 8, 32], strides = [1, 1, 1]} : vector<8x8x32xf32> to vector<1x8x32xf32>
    %998 = vector.shape_cast %997 : vector<1x8x32xf32> to vector<8x32xf32>
    %999 = arith.addf %996, %998 : vector<8x32xf32>
    %1000 = vector.extract_strided_slice %994 {offsets = [2, 0, 0], sizes = [1, 8, 32], strides = [1, 1, 1]} : vector<8x8x32xf32> to vector<1x8x32xf32>
    %1001 = vector.shape_cast %1000 : vector<1x8x32xf32> to vector<8x32xf32>
    %1002 = arith.addf %999, %1001 : vector<8x32xf32>
    %1003 = vector.extract_strided_slice %994 {offsets = [3, 0, 0], sizes = [1, 8, 32], strides = [1, 1, 1]} : vector<8x8x32xf32> to vector<1x8x32xf32>
    %1004 = vector.shape_cast %1003 : vector<1x8x32xf32> to vector<8x32xf32>
    %1005 = arith.addf %1002, %1004 : vector<8x32xf32>
    %1006 = vector.extract_strided_slice %994 {offsets = [4, 0, 0], sizes = [1, 8, 32], strides = [1, 1, 1]} : vector<8x8x32xf32> to vector<1x8x32xf32>
    %1007 = vector.shape_cast %1006 : vector<1x8x32xf32> to vector<8x32xf32>
    %1008 = arith.addf %1005, %1007 : vector<8x32xf32>
    %1009 = vector.extract_strided_slice %994 {offsets = [5, 0, 0], sizes = [1, 8, 32], strides = [1, 1, 1]} : vector<8x8x32xf32> to vector<1x8x32xf32>
    %1010 = vector.shape_cast %1009 : vector<1x8x32xf32> to vector<8x32xf32>
    %1011 = arith.addf %1008, %1010 : vector<8x32xf32>
    %1012 = vector.extract_strided_slice %994 {offsets = [6, 0, 0], sizes = [1, 8, 32], strides = [1, 1, 1]} : vector<8x8x32xf32> to vector<1x8x32xf32>
    %1013 = vector.shape_cast %1012 : vector<1x8x32xf32> to vector<8x32xf32>
    %1014 = arith.addf %1011, %1013 : vector<8x32xf32>
    %1015 = vector.extract_strided_slice %994 {offsets = [7, 0, 0], sizes = [1, 8, 32], strides = [1, 1, 1]} : vector<8x8x32xf32> to vector<1x8x32xf32>
    %1016 = vector.shape_cast %1015 : vector<1x8x32xf32> to vector<8x32xf32>
    %1017 = arith.addf %1014, %1016 : vector<8x32xf32>
    %1018 = arith.truncf %1017 : vector<8x32xf32> to vector<8x32xbf16>
    %c10_347 = arith.constant 10 : index
    %c0_348 = arith.constant 0 : index
    %c0_349 = arith.constant 0 : index
    %1019 = vector.load %arg3[%c10_347, %c0_348, %c0_349] : memref<19x32x32xbf16, #tpu.memory_space<vmem>>, vector<1x32x32xbf16>
    %1020 = vector.shape_cast %1019 : vector<1x32x32xbf16> to vector<32x32xbf16>
    %cst_350 = arith.constant dense<0.000000e+00> : vector<8x32xf32>
    %1021 = tpu.matmul %1018, %1020, %cst_350 {dimension_numbers = #tpu.dot_dimension_numbers<[1], [0], [0], [1], [0, 0, 1, 1], [], []>} : vector<8x32xbf16>, vector<32x32xbf16>, vector<8x32xf32> -> vector<8x32xf32>
    %1022 = vector.broadcast %724 : vector<1x32xf32> to vector<8x32xf32>
    %1023 = arith.addf %1021, %1022 : vector<8x32xf32>
    %c11_351 = arith.constant 11 : index
    %c0_352 = arith.constant 0 : index
    %c0_353 = arith.constant 0 : index
    %1024 = vector.load %arg3[%c11_351, %c0_352, %c0_353] : memref<19x32x32xbf16, #tpu.memory_space<vmem>>, vector<1x32x32xbf16>
    %1025 = vector.shape_cast %1024 : vector<1x32x32xbf16> to vector<32x32xbf16>
    %cst_354 = arith.constant dense<0.000000e+00> : vector<8x32xf32>
    %1026 = tpu.matmul %1018, %1025, %cst_354 {dimension_numbers = #tpu.dot_dimension_numbers<[1], [0], [0], [1], [0, 0, 1, 1], [], []>} : vector<8x32xbf16>, vector<32x32xbf16>, vector<8x32xf32> -> vector<8x32xf32>
    %1027 = vector.broadcast %726 : vector<1x32xf32> to vector<8x32xf32>
    %1028 = arith.addf %1026, %1027 : vector<8x32xf32>
    %c12_355 = arith.constant 12 : index
    %c0_356 = arith.constant 0 : index
    %c0_357 = arith.constant 0 : index
    %1029 = vector.load %arg3[%c12_355, %c0_356, %c0_357] : memref<19x32x32xbf16, #tpu.memory_space<vmem>>, vector<1x32x32xbf16>
    %1030 = vector.shape_cast %1029 : vector<1x32x32xbf16> to vector<32x32xbf16>
    %cst_358 = arith.constant dense<0.000000e+00> : vector<8x32xf32>
    %1031 = tpu.matmul %1018, %1030, %cst_358 {dimension_numbers = #tpu.dot_dimension_numbers<[1], [0], [0], [1], [0, 0, 1, 1], [], []>} : vector<8x32xbf16>, vector<32x32xbf16>, vector<8x32xf32> -> vector<8x32xf32>
    %1032 = vector.broadcast %728 : vector<1x32xf32> to vector<8x32xf32>
    %1033 = arith.addf %1031, %1032 : vector<8x32xf32>
    %1034 = vector.extract_strided_slice %743 {offsets = [3, 0, 0], sizes = [1, 8, 32], strides = [1, 1, 1]} : vector<8x8x32xf32> to vector<1x8x32xf32>
    %1035 = vector.shape_cast %1034 : vector<1x8x32xf32> to vector<8x32xf32>
    %1036 = arith.addf %1035, %1023 : vector<8x32xf32>
    %1037 = arith.negf %1036 : vector<8x32xf32>
    %1038 = math.exp %1037 : vector<8x32xf32>
    %cst_359 = arith.constant 1.000000e+00 : f32
    %1039 = vector.broadcast %cst_359 : f32 to vector<8x32xf32>
    %1040 = arith.addf %1039, %1038 : vector<8x32xf32>
    %1041 = arith.divf %1039, %1040 : vector<8x32xf32>
    %1042 = vector.extract_strided_slice %752 {offsets = [3, 0, 0], sizes = [1, 8, 32], strides = [1, 1, 1]} : vector<8x8x32xf32> to vector<1x8x32xf32>
    %1043 = vector.shape_cast %1042 : vector<1x8x32xf32> to vector<8x32xf32>
    %1044 = arith.addf %1043, %1028 : vector<8x32xf32>
    %1045 = arith.negf %1044 : vector<8x32xf32>
    %1046 = math.exp %1045 : vector<8x32xf32>
    %cst_360 = arith.constant 1.000000e+00 : f32
    %1047 = vector.broadcast %cst_360 : f32 to vector<8x32xf32>
    %1048 = arith.addf %1047, %1046 : vector<8x32xf32>
    %1049 = arith.divf %1047, %1048 : vector<8x32xf32>
    %1050 = vector.extract_strided_slice %761 {offsets = [3, 0, 0], sizes = [1, 8, 32], strides = [1, 1, 1]} : vector<8x8x32xf32> to vector<1x8x32xf32>
    %1051 = vector.shape_cast %1050 : vector<1x8x32xf32> to vector<8x32xf32>
    %1052 = arith.mulf %1041, %1033 : vector<8x32xf32>
    %1053 = arith.addf %1051, %1052 : vector<8x32xf32>
    %1054 = math.tanh %1053 : vector<8x32xf32>
    %cst_361 = arith.constant 1.000000e+00 : f32
    %1055 = vector.broadcast %cst_361 : f32 to vector<8x32xf32>
    %1056 = arith.subf %1055, %1049 : vector<8x32xf32>
    %1057 = arith.mulf %1056, %1054 : vector<8x32xf32>
    %1058 = arith.mulf %1049, %1017 : vector<8x32xf32>
    %1059 = arith.addf %1057, %1058 : vector<8x32xf32>
    %c2_362 = arith.constant 2 : index
    %c3_363 = arith.constant 3 : index
    %c0_364 = arith.constant 0 : index
    %c0_365 = arith.constant 0 : index
    %1060 = vector.load %arg6[%c2_362, %c3_363, %c0_364, %c0_365] : memref<3x8x8x32xf32, #tpu.memory_space<vmem>>, vector<1x1x8x32xf32>
    %1061 = vector.shape_cast %1060 : vector<1x1x8x32xf32> to vector<8x32xf32>
    %1062 = vector.shape_cast %1059 : vector<8x32xf32> to vector<1x1x8x32xf32>
    tpu.vector_store %arg6[%c2_362, %c3_363, %c0_364, %c0_365], %1062 {strides = array<i32>} : memref<3x8x8x32xf32, #tpu.memory_space<vmem>>, vector<1x1x8x32xf32>,
    %c2_366 = arith.constant 2 : index
    %c0_367 = arith.constant 0 : index
    %c0_368 = arith.constant 0 : index
    %c0_369 = arith.constant 0 : index
    %1063 = vector.load %arg6[%c2_366, %c0_367, %c0_368, %c0_369] : memref<3x8x8x32xf32, #tpu.memory_space<vmem>>, vector<1x8x8x32xf32>
    %1064 = vector.shape_cast %1063 : vector<1x8x8x32xf32> to vector<8x8x32xf32>
    %1065 = vector.broadcast %731 : vector<1x1x32xf32> to vector<8x8x32xf32>
    %1066 = arith.mulf %1064, %1065 : vector<8x8x32xf32>
    %cst_370 = arith.constant dense<0.000000e+00> : vector<8x8xf32>
    %1067 = vector.multi_reduction <add>, %1066, %cst_370 [2] : vector<8x8x32xf32> to vector<8x8xf32>
    %1068 = vector.extract_strided_slice %722 {offsets = [4, 0, 0], sizes = [1, 8, 8], strides = [1, 1, 1]} : vector<8x8x8xf32> to vector<1x8x8xf32>
    %1069 = vector.shape_cast %1068 : vector<1x8x8xf32> to vector<8x8xf32>
    %1070 = arith.addf %1069, %1067 : vector<8x8xf32>
    %cst_371 = arith.constant dense<0xFF800000> : vector<8xf32>
    %1071 = vector.multi_reduction <maximumf>, %1070, %cst_371 [0] : vector<8x8xf32> to vector<8xf32>
    %1072 = vector.shape_cast %1071 : vector<8xf32> to vector<1x8xf32>
    %1073 = vector.broadcast %1072 : vector<1x8xf32> to vector<8x8xf32>
    %1074 = arith.subf %1070, %1073 : vector<8x8xf32>
    %1075 = math.exp %1074 : vector<8x8xf32>
    %cst_372 = arith.constant dense<0.000000e+00> : vector<8xf32>
    %1076 = vector.multi_reduction <add>, %1075, %cst_372 [0] : vector<8x8xf32> to vector<8xf32>
    %1077 = vector.shape_cast %1076 : vector<8xf32> to vector<1x8xf32>
    %1078 = tpu.reciprocal %1077 {approx = true} : vector<1x8xf32> -> vector<1x8xf32>
    %1079 = vector.broadcast %1078 : vector<1x8xf32> to vector<8x8xf32>
    %1080 = arith.mulf %1075, %1079 : vector<8x8xf32>
    %1081 = vector.shape_cast %1080 : vector<8x8xf32> to vector<8x8x1xf32>
    %1082 = vector.broadcast %1081 : vector<8x8x1xf32> to vector<8x8x32xf32>
    %1083 = arith.mulf %1082, %1064 : vector<8x8x32xf32>
    %1084 = vector.extract_strided_slice %1083 {offsets = [0, 0, 0], sizes = [1, 8, 32], strides = [1, 1, 1]} : vector<8x8x32xf32> to vector<1x8x32xf32>
    %1085 = vector.shape_cast %1084 : vector<1x8x32xf32> to vector<8x32xf32>
    %1086 = vector.extract_strided_slice %1083 {offsets = [1, 0, 0], sizes = [1, 8, 32], strides = [1, 1, 1]} : vector<8x8x32xf32> to vector<1x8x32xf32>
    %1087 = vector.shape_cast %1086 : vector<1x8x32xf32> to vector<8x32xf32>
    %1088 = arith.addf %1085, %1087 : vector<8x32xf32>
    %1089 = vector.extract_strided_slice %1083 {offsets = [2, 0, 0], sizes = [1, 8, 32], strides = [1, 1, 1]} : vector<8x8x32xf32> to vector<1x8x32xf32>
    %1090 = vector.shape_cast %1089 : vector<1x8x32xf32> to vector<8x32xf32>
    %1091 = arith.addf %1088, %1090 : vector<8x32xf32>
    %1092 = vector.extract_strided_slice %1083 {offsets = [3, 0, 0], sizes = [1, 8, 32], strides = [1, 1, 1]} : vector<8x8x32xf32> to vector<1x8x32xf32>
    %1093 = vector.shape_cast %1092 : vector<1x8x32xf32> to vector<8x32xf32>
    %1094 = arith.addf %1091, %1093 : vector<8x32xf32>
    %1095 = vector.extract_strided_slice %1083 {offsets = [4, 0, 0], sizes = [1, 8, 32], strides = [1, 1, 1]} : vector<8x8x32xf32> to vector<1x8x32xf32>
    %1096 = vector.shape_cast %1095 : vector<1x8x32xf32> to vector<8x32xf32>
    %1097 = arith.addf %1094, %1096 : vector<8x32xf32>
    %1098 = vector.extract_strided_slice %1083 {offsets = [5, 0, 0], sizes = [1, 8, 32], strides = [1, 1, 1]} : vector<8x8x32xf32> to vector<1x8x32xf32>
    %1099 = vector.shape_cast %1098 : vector<1x8x32xf32> to vector<8x32xf32>
    %1100 = arith.addf %1097, %1099 : vector<8x32xf32>
    %1101 = vector.extract_strided_slice %1083 {offsets = [6, 0, 0], sizes = [1, 8, 32], strides = [1, 1, 1]} : vector<8x8x32xf32> to vector<1x8x32xf32>
    %1102 = vector.shape_cast %1101 : vector<1x8x32xf32> to vector<8x32xf32>
    %1103 = arith.addf %1100, %1102 : vector<8x32xf32>
    %1104 = vector.extract_strided_slice %1083 {offsets = [7, 0, 0], sizes = [1, 8, 32], strides = [1, 1, 1]} : vector<8x8x32xf32> to vector<1x8x32xf32>
    %1105 = vector.shape_cast %1104 : vector<1x8x32xf32> to vector<8x32xf32>
    %1106 = arith.addf %1103, %1105 : vector<8x32xf32>
    %1107 = arith.truncf %1106 : vector<8x32xf32> to vector<8x32xbf16>
    %c10_373 = arith.constant 10 : index
    %c0_374 = arith.constant 0 : index
    %c0_375 = arith.constant 0 : index
    %1108 = vector.load %arg3[%c10_373, %c0_374, %c0_375] : memref<19x32x32xbf16, #tpu.memory_space<vmem>>, vector<1x32x32xbf16>
    %1109 = vector.shape_cast %1108 : vector<1x32x32xbf16> to vector<32x32xbf16>
    %cst_376 = arith.constant dense<0.000000e+00> : vector<8x32xf32>
    %1110 = tpu.matmul %1107, %1109, %cst_376 {dimension_numbers = #tpu.dot_dimension_numbers<[1], [0], [0], [1], [0, 0, 1, 1], [], []>} : vector<8x32xbf16>, vector<32x32xbf16>, vector<8x32xf32> -> vector<8x32xf32>
    %1111 = vector.broadcast %724 : vector<1x32xf32> to vector<8x32xf32>
    %1112 = arith.addf %1110, %1111 : vector<8x32xf32>
    %c11_377 = arith.constant 11 : index
    %c0_378 = arith.constant 0 : index
    %c0_379 = arith.constant 0 : index
    %1113 = vector.load %arg3[%c11_377, %c0_378, %c0_379] : memref<19x32x32xbf16, #tpu.memory_space<vmem>>, vector<1x32x32xbf16>
    %1114 = vector.shape_cast %1113 : vector<1x32x32xbf16> to vector<32x32xbf16>
    %cst_380 = arith.constant dense<0.000000e+00> : vector<8x32xf32>
    %1115 = tpu.matmul %1107, %1114, %cst_380 {dimension_numbers = #tpu.dot_dimension_numbers<[1], [0], [0], [1], [0, 0, 1, 1], [], []>} : vector<8x32xbf16>, vector<32x32xbf16>, vector<8x32xf32> -> vector<8x32xf32>
    %1116 = vector.broadcast %726 : vector<1x32xf32> to vector<8x32xf32>
    %1117 = arith.addf %1115, %1116 : vector<8x32xf32>
    %c12_381 = arith.constant 12 : index
    %c0_382 = arith.constant 0 : index
    %c0_383 = arith.constant 0 : index
    %1118 = vector.load %arg3[%c12_381, %c0_382, %c0_383] : memref<19x32x32xbf16, #tpu.memory_space<vmem>>, vector<1x32x32xbf16>
    %1119 = vector.shape_cast %1118 : vector<1x32x32xbf16> to vector<32x32xbf16>
    %cst_384 = arith.constant dense<0.000000e+00> : vector<8x32xf32>
    %1120 = tpu.matmul %1107, %1119, %cst_384 {dimension_numbers = #tpu.dot_dimension_numbers<[1], [0], [0], [1], [0, 0, 1, 1], [], []>} : vector<8x32xbf16>, vector<32x32xbf16>, vector<8x32xf32> -> vector<8x32xf32>
    %1121 = vector.broadcast %728 : vector<1x32xf32> to vector<8x32xf32>
    %1122 = arith.addf %1120, %1121 : vector<8x32xf32>
    %1123 = vector.extract_strided_slice %743 {offsets = [4, 0, 0], sizes = [1, 8, 32], strides = [1, 1, 1]} : vector<8x8x32xf32> to vector<1x8x32xf32>
    %1124 = vector.shape_cast %1123 : vector<1x8x32xf32> to vector<8x32xf32>
    %1125 = arith.addf %1124, %1112 : vector<8x32xf32>
    %1126 = arith.negf %1125 : vector<8x32xf32>
    %1127 = math.exp %1126 : vector<8x32xf32>
    %cst_385 = arith.constant 1.000000e+00 : f32
    %1128 = vector.broadcast %cst_385 : f32 to vector<8x32xf32>
    %1129 = arith.addf %1128, %1127 : vector<8x32xf32>
    %1130 = arith.divf %1128, %1129 : vector<8x32xf32>
    %1131 = vector.extract_strided_slice %752 {offsets = [4, 0, 0], sizes = [1, 8, 32], strides = [1, 1, 1]} : vector<8x8x32xf32> to vector<1x8x32xf32>
    %1132 = vector.shape_cast %1131 : vector<1x8x32xf32> to vector<8x32xf32>
    %1133 = arith.addf %1132, %1117 : vector<8x32xf32>
    %1134 = arith.negf %1133 : vector<8x32xf32>
    %1135 = math.exp %1134 : vector<8x32xf32>
    %cst_386 = arith.constant 1.000000e+00 : f32
    %1136 = vector.broadcast %cst_386 : f32 to vector<8x32xf32>
    %1137 = arith.addf %1136, %1135 : vector<8x32xf32>
    %1138 = arith.divf %1136, %1137 : vector<8x32xf32>
    %1139 = vector.extract_strided_slice %761 {offsets = [4, 0, 0], sizes = [1, 8, 32], strides = [1, 1, 1]} : vector<8x8x32xf32> to vector<1x8x32xf32>
    %1140 = vector.shape_cast %1139 : vector<1x8x32xf32> to vector<8x32xf32>
    %1141 = arith.mulf %1130, %1122 : vector<8x32xf32>
    %1142 = arith.addf %1140, %1141 : vector<8x32xf32>
    %1143 = math.tanh %1142 : vector<8x32xf32>
    %cst_387 = arith.constant 1.000000e+00 : f32
    %1144 = vector.broadcast %cst_387 : f32 to vector<8x32xf32>
    %1145 = arith.subf %1144, %1138 : vector<8x32xf32>
    %1146 = arith.mulf %1145, %1143 : vector<8x32xf32>
    %1147 = arith.mulf %1138, %1106 : vector<8x32xf32>
    %1148 = arith.addf %1146, %1147 : vector<8x32xf32>
    %c2_388 = arith.constant 2 : index
    %c4_389 = arith.constant 4 : index
    %c0_390 = arith.constant 0 : index
    %c0_391 = arith.constant 0 : index
    %1149 = vector.load %arg6[%c2_388, %c4_389, %c0_390, %c0_391] : memref<3x8x8x32xf32, #tpu.memory_space<vmem>>, vector<1x1x8x32xf32>
    %1150 = vector.shape_cast %1149 : vector<1x1x8x32xf32> to vector<8x32xf32>
    %1151 = vector.shape_cast %1148 : vector<8x32xf32> to vector<1x1x8x32xf32>
    tpu.vector_store %arg6[%c2_388, %c4_389, %c0_390, %c0_391], %1151 {strides = array<i32>} : memref<3x8x8x32xf32, #tpu.memory_space<vmem>>, vector<1x1x8x32xf32>,
    %c2_392 = arith.constant 2 : index
    %c0_393 = arith.constant 0 : index
    %c0_394 = arith.constant 0 : index
    %c0_395 = arith.constant 0 : index
    %1152 = vector.load %arg6[%c2_392, %c0_393, %c0_394, %c0_395] : memref<3x8x8x32xf32, #tpu.memory_space<vmem>>, vector<1x8x8x32xf32>
    %1153 = vector.shape_cast %1152 : vector<1x8x8x32xf32> to vector<8x8x32xf32>
    %1154 = vector.broadcast %731 : vector<1x1x32xf32> to vector<8x8x32xf32>
    %1155 = arith.mulf %1153, %1154 : vector<8x8x32xf32>
    %cst_396 = arith.constant dense<0.000000e+00> : vector<8x8xf32>
    %1156 = vector.multi_reduction <add>, %1155, %cst_396 [2] : vector<8x8x32xf32> to vector<8x8xf32>
    %1157 = vector.extract_strided_slice %722 {offsets = [5, 0, 0], sizes = [1, 8, 8], strides = [1, 1, 1]} : vector<8x8x8xf32> to vector<1x8x8xf32>
    %1158 = vector.shape_cast %1157 : vector<1x8x8xf32> to vector<8x8xf32>
    %1159 = arith.addf %1158, %1156 : vector<8x8xf32>
    %cst_397 = arith.constant dense<0xFF800000> : vector<8xf32>
    %1160 = vector.multi_reduction <maximumf>, %1159, %cst_397 [0] : vector<8x8xf32> to vector<8xf32>
    %1161 = vector.shape_cast %1160 : vector<8xf32> to vector<1x8xf32>
    %1162 = vector.broadcast %1161 : vector<1x8xf32> to vector<8x8xf32>
    %1163 = arith.subf %1159, %1162 : vector<8x8xf32>
    %1164 = math.exp %1163 : vector<8x8xf32>
    %cst_398 = arith.constant dense<0.000000e+00> : vector<8xf32>
    %1165 = vector.multi_reduction <add>, %1164, %cst_398 [0] : vector<8x8xf32> to vector<8xf32>
    %1166 = vector.shape_cast %1165 : vector<8xf32> to vector<1x8xf32>
    %1167 = tpu.reciprocal %1166 {approx = true} : vector<1x8xf32> -> vector<1x8xf32>
    %1168 = vector.broadcast %1167 : vector<1x8xf32> to vector<8x8xf32>
    %1169 = arith.mulf %1164, %1168 : vector<8x8xf32>
    %1170 = vector.shape_cast %1169 : vector<8x8xf32> to vector<8x8x1xf32>
    %1171 = vector.broadcast %1170 : vector<8x8x1xf32> to vector<8x8x32xf32>
    %1172 = arith.mulf %1171, %1153 : vector<8x8x32xf32>
    %1173 = vector.extract_strided_slice %1172 {offsets = [0, 0, 0], sizes = [1, 8, 32], strides = [1, 1, 1]} : vector<8x8x32xf32> to vector<1x8x32xf32>
    %1174 = vector.shape_cast %1173 : vector<1x8x32xf32> to vector<8x32xf32>
    %1175 = vector.extract_strided_slice %1172 {offsets = [1, 0, 0], sizes = [1, 8, 32], strides = [1, 1, 1]} : vector<8x8x32xf32> to vector<1x8x32xf32>
    %1176 = vector.shape_cast %1175 : vector<1x8x32xf32> to vector<8x32xf32>
    %1177 = arith.addf %1174, %1176 : vector<8x32xf32>
    %1178 = vector.extract_strided_slice %1172 {offsets = [2, 0, 0], sizes = [1, 8, 32], strides = [1, 1, 1]} : vector<8x8x32xf32> to vector<1x8x32xf32>
    %1179 = vector.shape_cast %1178 : vector<1x8x32xf32> to vector<8x32xf32>
    %1180 = arith.addf %1177, %1179 : vector<8x32xf32>
    %1181 = vector.extract_strided_slice %1172 {offsets = [3, 0, 0], sizes = [1, 8, 32], strides = [1, 1, 1]} : vector<8x8x32xf32> to vector<1x8x32xf32>
    %1182 = vector.shape_cast %1181 : vector<1x8x32xf32> to vector<8x32xf32>
    %1183 = arith.addf %1180, %1182 : vector<8x32xf32>
    %1184 = vector.extract_strided_slice %1172 {offsets = [4, 0, 0], sizes = [1, 8, 32], strides = [1, 1, 1]} : vector<8x8x32xf32> to vector<1x8x32xf32>
    %1185 = vector.shape_cast %1184 : vector<1x8x32xf32> to vector<8x32xf32>
    %1186 = arith.addf %1183, %1185 : vector<8x32xf32>
    %1187 = vector.extract_strided_slice %1172 {offsets = [5, 0, 0], sizes = [1, 8, 32], strides = [1, 1, 1]} : vector<8x8x32xf32> to vector<1x8x32xf32>
    %1188 = vector.shape_cast %1187 : vector<1x8x32xf32> to vector<8x32xf32>
    %1189 = arith.addf %1186, %1188 : vector<8x32xf32>
    %1190 = vector.extract_strided_slice %1172 {offsets = [6, 0, 0], sizes = [1, 8, 32], strides = [1, 1, 1]} : vector<8x8x32xf32> to vector<1x8x32xf32>
    %1191 = vector.shape_cast %1190 : vector<1x8x32xf32> to vector<8x32xf32>
    %1192 = arith.addf %1189, %1191 : vector<8x32xf32>
    %1193 = vector.extract_strided_slice %1172 {offsets = [7, 0, 0], sizes = [1, 8, 32], strides = [1, 1, 1]} : vector<8x8x32xf32> to vector<1x8x32xf32>
    %1194 = vector.shape_cast %1193 : vector<1x8x32xf32> to vector<8x32xf32>
    %1195 = arith.addf %1192, %1194 : vector<8x32xf32>
    %1196 = arith.truncf %1195 : vector<8x32xf32> to vector<8x32xbf16>
    %c10_399 = arith.constant 10 : index
    %c0_400 = arith.constant 0 : index
    %c0_401 = arith.constant 0 : index
    %1197 = vector.load %arg3[%c10_399, %c0_400, %c0_401] : memref<19x32x32xbf16, #tpu.memory_space<vmem>>, vector<1x32x32xbf16>
    %1198 = vector.shape_cast %1197 : vector<1x32x32xbf16> to vector<32x32xbf16>
    %cst_402 = arith.constant dense<0.000000e+00> : vector<8x32xf32>
    %1199 = tpu.matmul %1196, %1198, %cst_402 {dimension_numbers = #tpu.dot_dimension_numbers<[1], [0], [0], [1], [0, 0, 1, 1], [], []>} : vector<8x32xbf16>, vector<32x32xbf16>, vector<8x32xf32> -> vector<8x32xf32>
    %1200 = vector.broadcast %724 : vector<1x32xf32> to vector<8x32xf32>
    %1201 = arith.addf %1199, %1200 : vector<8x32xf32>
    %c11_403 = arith.constant 11 : index
    %c0_404 = arith.constant 0 : index
    %c0_405 = arith.constant 0 : index
    %1202 = vector.load %arg3[%c11_403, %c0_404, %c0_405] : memref<19x32x32xbf16, #tpu.memory_space<vmem>>, vector<1x32x32xbf16>
    %1203 = vector.shape_cast %1202 : vector<1x32x32xbf16> to vector<32x32xbf16>
    %cst_406 = arith.constant dense<0.000000e+00> : vector<8x32xf32>
    %1204 = tpu.matmul %1196, %1203, %cst_406 {dimension_numbers = #tpu.dot_dimension_numbers<[1], [0], [0], [1], [0, 0, 1, 1], [], []>} : vector<8x32xbf16>, vector<32x32xbf16>, vector<8x32xf32> -> vector<8x32xf32>
    %1205 = vector.broadcast %726 : vector<1x32xf32> to vector<8x32xf32>
    %1206 = arith.addf %1204, %1205 : vector<8x32xf32>
    %c12_407 = arith.constant 12 : index
    %c0_408 = arith.constant 0 : index
    %c0_409 = arith.constant 0 : index
    %1207 = vector.load %arg3[%c12_407, %c0_408, %c0_409] : memref<19x32x32xbf16, #tpu.memory_space<vmem>>, vector<1x32x32xbf16>
    %1208 = vector.shape_cast %1207 : vector<1x32x32xbf16> to vector<32x32xbf16>
    %cst_410 = arith.constant dense<0.000000e+00> : vector<8x32xf32>
    %1209 = tpu.matmul %1196, %1208, %cst_410 {dimension_numbers = #tpu.dot_dimension_numbers<[1], [0], [0], [1], [0, 0, 1, 1], [], []>} : vector<8x32xbf16>, vector<32x32xbf16>, vector<8x32xf32> -> vector<8x32xf32>
    %1210 = vector.broadcast %728 : vector<1x32xf32> to vector<8x32xf32>
    %1211 = arith.addf %1209, %1210 : vector<8x32xf32>
    %1212 = vector.extract_strided_slice %743 {offsets = [5, 0, 0], sizes = [1, 8, 32], strides = [1, 1, 1]} : vector<8x8x32xf32> to vector<1x8x32xf32>
    %1213 = vector.shape_cast %1212 : vector<1x8x32xf32> to vector<8x32xf32>
    %1214 = arith.addf %1213, %1201 : vector<8x32xf32>
    %1215 = arith.negf %1214 : vector<8x32xf32>
    %1216 = math.exp %1215 : vector<8x32xf32>
    %cst_411 = arith.constant 1.000000e+00 : f32
    %1217 = vector.broadcast %cst_411 : f32 to vector<8x32xf32>
    %1218 = arith.addf %1217, %1216 : vector<8x32xf32>
    %1219 = arith.divf %1217, %1218 : vector<8x32xf32>
    %1220 = vector.extract_strided_slice %752 {offsets = [5, 0, 0], sizes = [1, 8, 32], strides = [1, 1, 1]} : vector<8x8x32xf32> to vector<1x8x32xf32>
    %1221 = vector.shape_cast %1220 : vector<1x8x32xf32> to vector<8x32xf32>
    %1222 = arith.addf %1221, %1206 : vector<8x32xf32>
    %1223 = arith.negf %1222 : vector<8x32xf32>
    %1224 = math.exp %1223 : vector<8x32xf32>
    %cst_412 = arith.constant 1.000000e+00 : f32
    %1225 = vector.broadcast %cst_412 : f32 to vector<8x32xf32>
    %1226 = arith.addf %1225, %1224 : vector<8x32xf32>
    %1227 = arith.divf %1225, %1226 : vector<8x32xf32>
    %1228 = vector.extract_strided_slice %761 {offsets = [5, 0, 0], sizes = [1, 8, 32], strides = [1, 1, 1]} : vector<8x8x32xf32> to vector<1x8x32xf32>
    %1229 = vector.shape_cast %1228 : vector<1x8x32xf32> to vector<8x32xf32>
    %1230 = arith.mulf %1219, %1211 : vector<8x32xf32>
    %1231 = arith.addf %1229, %1230 : vector<8x32xf32>
    %1232 = math.tanh %1231 : vector<8x32xf32>
    %cst_413 = arith.constant 1.000000e+00 : f32
    %1233 = vector.broadcast %cst_413 : f32 to vector<8x32xf32>
    %1234 = arith.subf %1233, %1227 : vector<8x32xf32>
    %1235 = arith.mulf %1234, %1232 : vector<8x32xf32>
    %1236 = arith.mulf %1227, %1195 : vector<8x32xf32>
    %1237 = arith.addf %1235, %1236 : vector<8x32xf32>
    %c2_414 = arith.constant 2 : index
    %c5_415 = arith.constant 5 : index
    %c0_416 = arith.constant 0 : index
    %c0_417 = arith.constant 0 : index
    %1238 = vector.load %arg6[%c2_414, %c5_415, %c0_416, %c0_417] : memref<3x8x8x32xf32, #tpu.memory_space<vmem>>, vector<1x1x8x32xf32>
    %1239 = vector.shape_cast %1238 : vector<1x1x8x32xf32> to vector<8x32xf32>
    %1240 = vector.shape_cast %1237 : vector<8x32xf32> to vector<1x1x8x32xf32>
    tpu.vector_store %arg6[%c2_414, %c5_415, %c0_416, %c0_417], %1240 {strides = array<i32>} : memref<3x8x8x32xf32, #tpu.memory_space<vmem>>, vector<1x1x8x32xf32>,
    %c2_418 = arith.constant 2 : index
    %c0_419 = arith.constant 0 : index
    %c0_420 = arith.constant 0 : index
    %c0_421 = arith.constant 0 : index
    %1241 = vector.load %arg6[%c2_418, %c0_419, %c0_420, %c0_421] : memref<3x8x8x32xf32, #tpu.memory_space<vmem>>, vector<1x8x8x32xf32>
    %1242 = vector.shape_cast %1241 : vector<1x8x8x32xf32> to vector<8x8x32xf32>
    %1243 = vector.broadcast %731 : vector<1x1x32xf32> to vector<8x8x32xf32>
    %1244 = arith.mulf %1242, %1243 : vector<8x8x32xf32>
    %cst_422 = arith.constant dense<0.000000e+00> : vector<8x8xf32>
    %1245 = vector.multi_reduction <add>, %1244, %cst_422 [2] : vector<8x8x32xf32> to vector<8x8xf32>
    %1246 = vector.extract_strided_slice %722 {offsets = [6, 0, 0], sizes = [1, 8, 8], strides = [1, 1, 1]} : vector<8x8x8xf32> to vector<1x8x8xf32>
    %1247 = vector.shape_cast %1246 : vector<1x8x8xf32> to vector<8x8xf32>
    %1248 = arith.addf %1247, %1245 : vector<8x8xf32>
    %cst_423 = arith.constant dense<0xFF800000> : vector<8xf32>
    %1249 = vector.multi_reduction <maximumf>, %1248, %cst_423 [0] : vector<8x8xf32> to vector<8xf32>
    %1250 = vector.shape_cast %1249 : vector<8xf32> to vector<1x8xf32>
    %1251 = vector.broadcast %1250 : vector<1x8xf32> to vector<8x8xf32>
    %1252 = arith.subf %1248, %1251 : vector<8x8xf32>
    %1253 = math.exp %1252 : vector<8x8xf32>
    %cst_424 = arith.constant dense<0.000000e+00> : vector<8xf32>
    %1254 = vector.multi_reduction <add>, %1253, %cst_424 [0] : vector<8x8xf32> to vector<8xf32>
    %1255 = vector.shape_cast %1254 : vector<8xf32> to vector<1x8xf32>
    %1256 = tpu.reciprocal %1255 {approx = true} : vector<1x8xf32> -> vector<1x8xf32>
    %1257 = vector.broadcast %1256 : vector<1x8xf32> to vector<8x8xf32>
    %1258 = arith.mulf %1253, %1257 : vector<8x8xf32>
    %1259 = vector.shape_cast %1258 : vector<8x8xf32> to vector<8x8x1xf32>
    %1260 = vector.broadcast %1259 : vector<8x8x1xf32> to vector<8x8x32xf32>
    %1261 = arith.mulf %1260, %1242 : vector<8x8x32xf32>
    %1262 = vector.extract_strided_slice %1261 {offsets = [0, 0, 0], sizes = [1, 8, 32], strides = [1, 1, 1]} : vector<8x8x32xf32> to vector<1x8x32xf32>
    %1263 = vector.shape_cast %1262 : vector<1x8x32xf32> to vector<8x32xf32>
    %1264 = vector.extract_strided_slice %1261 {offsets = [1, 0, 0], sizes = [1, 8, 32], strides = [1, 1, 1]} : vector<8x8x32xf32> to vector<1x8x32xf32>
    %1265 = vector.shape_cast %1264 : vector<1x8x32xf32> to vector<8x32xf32>
    %1266 = arith.addf %1263, %1265 : vector<8x32xf32>
    %1267 = vector.extract_strided_slice %1261 {offsets = [2, 0, 0], sizes = [1, 8, 32], strides = [1, 1, 1]} : vector<8x8x32xf32> to vector<1x8x32xf32>
    %1268 = vector.shape_cast %1267 : vector<1x8x32xf32> to vector<8x32xf32>
    %1269 = arith.addf %1266, %1268 : vector<8x32xf32>
    %1270 = vector.extract_strided_slice %1261 {offsets = [3, 0, 0], sizes = [1, 8, 32], strides = [1, 1, 1]} : vector<8x8x32xf32> to vector<1x8x32xf32>
    %1271 = vector.shape_cast %1270 : vector<1x8x32xf32> to vector<8x32xf32>
    %1272 = arith.addf %1269, %1271 : vector<8x32xf32>
    %1273 = vector.extract_strided_slice %1261 {offsets = [4, 0, 0], sizes = [1, 8, 32], strides = [1, 1, 1]} : vector<8x8x32xf32> to vector<1x8x32xf32>
    %1274 = vector.shape_cast %1273 : vector<1x8x32xf32> to vector<8x32xf32>
    %1275 = arith.addf %1272, %1274 : vector<8x32xf32>
    %1276 = vector.extract_strided_slice %1261 {offsets = [5, 0, 0], sizes = [1, 8, 32], strides = [1, 1, 1]} : vector<8x8x32xf32> to vector<1x8x32xf32>
    %1277 = vector.shape_cast %1276 : vector<1x8x32xf32> to vector<8x32xf32>
    %1278 = arith.addf %1275, %1277 : vector<8x32xf32>
    %1279 = vector.extract_strided_slice %1261 {offsets = [6, 0, 0], sizes = [1, 8, 32], strides = [1, 1, 1]} : vector<8x8x32xf32> to vector<1x8x32xf32>
    %1280 = vector.shape_cast %1279 : vector<1x8x32xf32> to vector<8x32xf32>
    %1281 = arith.addf %1278, %1280 : vector<8x32xf32>
    %1282 = vector.extract_strided_slice %1261 {offsets = [7, 0, 0], sizes = [1, 8, 32], strides = [1, 1, 1]} : vector<8x8x32xf32> to vector<1x8x32xf32>
    %1283 = vector.shape_cast %1282 : vector<1x8x32xf32> to vector<8x32xf32>
    %1284 = arith.addf %1281, %1283 : vector<8x32xf32>
    %1285 = arith.truncf %1284 : vector<8x32xf32> to vector<8x32xbf16>
    %c10_425 = arith.constant 10 : index
    %c0_426 = arith.constant 0 : index
    %c0_427 = arith.constant 0 : index
    %1286 = vector.load %arg3[%c10_425, %c0_426, %c0_427] : memref<19x32x32xbf16, #tpu.memory_space<vmem>>, vector<1x32x32xbf16>
    %1287 = vector.shape_cast %1286 : vector<1x32x32xbf16> to vector<32x32xbf16>
    %cst_428 = arith.constant dense<0.000000e+00> : vector<8x32xf32>
    %1288 = tpu.matmul %1285, %1287, %cst_428 {dimension_numbers = #tpu.dot_dimension_numbers<[1], [0], [0], [1], [0, 0, 1, 1], [], []>} : vector<8x32xbf16>, vector<32x32xbf16>, vector<8x32xf32> -> vector<8x32xf32>
    %1289 = vector.broadcast %724 : vector<1x32xf32> to vector<8x32xf32>
    %1290 = arith.addf %1288, %1289 : vector<8x32xf32>
    %c11_429 = arith.constant 11 : index
    %c0_430 = arith.constant 0 : index
    %c0_431 = arith.constant 0 : index
    %1291 = vector.load %arg3[%c11_429, %c0_430, %c0_431] : memref<19x32x32xbf16, #tpu.memory_space<vmem>>, vector<1x32x32xbf16>
    %1292 = vector.shape_cast %1291 : vector<1x32x32xbf16> to vector<32x32xbf16>
    %cst_432 = arith.constant dense<0.000000e+00> : vector<8x32xf32>
    %1293 = tpu.matmul %1285, %1292, %cst_432 {dimension_numbers = #tpu.dot_dimension_numbers<[1], [0], [0], [1], [0, 0, 1, 1], [], []>} : vector<8x32xbf16>, vector<32x32xbf16>, vector<8x32xf32> -> vector<8x32xf32>
    %1294 = vector.broadcast %726 : vector<1x32xf32> to vector<8x32xf32>
    %1295 = arith.addf %1293, %1294 : vector<8x32xf32>
    %c12_433 = arith.constant 12 : index
    %c0_434 = arith.constant 0 : index
    %c0_435 = arith.constant 0 : index
    %1296 = vector.load %arg3[%c12_433, %c0_434, %c0_435] : memref<19x32x32xbf16, #tpu.memory_space<vmem>>, vector<1x32x32xbf16>
    %1297 = vector.shape_cast %1296 : vector<1x32x32xbf16> to vector<32x32xbf16>
    %cst_436 = arith.constant dense<0.000000e+00> : vector<8x32xf32>
    %1298 = tpu.matmul %1285, %1297, %cst_436 {dimension_numbers = #tpu.dot_dimension_numbers<[1], [0], [0], [1], [0, 0, 1, 1], [], []>} : vector<8x32xbf16>, vector<32x32xbf16>, vector<8x32xf32> -> vector<8x32xf32>
    %1299 = vector.broadcast %728 : vector<1x32xf32> to vector<8x32xf32>
    %1300 = arith.addf %1298, %1299 : vector<8x32xf32>
    %1301 = vector.extract_strided_slice %743 {offsets = [6, 0, 0], sizes = [1, 8, 32], strides = [1, 1, 1]} : vector<8x8x32xf32> to vector<1x8x32xf32>
    %1302 = vector.shape_cast %1301 : vector<1x8x32xf32> to vector<8x32xf32>
    %1303 = arith.addf %1302, %1290 : vector<8x32xf32>
    %1304 = arith.negf %1303 : vector<8x32xf32>
    %1305 = math.exp %1304 : vector<8x32xf32>
    %cst_437 = arith.constant 1.000000e+00 : f32
    %1306 = vector.broadcast %cst_437 : f32 to vector<8x32xf32>
    %1307 = arith.addf %1306, %1305 : vector<8x32xf32>
    %1308 = arith.divf %1306, %1307 : vector<8x32xf32>
    %1309 = vector.extract_strided_slice %752 {offsets = [6, 0, 0], sizes = [1, 8, 32], strides = [1, 1, 1]} : vector<8x8x32xf32> to vector<1x8x32xf32>
    %1310 = vector.shape_cast %1309 : vector<1x8x32xf32> to vector<8x32xf32>
    %1311 = arith.addf %1310, %1295 : vector<8x32xf32>
    %1312 = arith.negf %1311 : vector<8x32xf32>
    %1313 = math.exp %1312 : vector<8x32xf32>
    %cst_438 = arith.constant 1.000000e+00 : f32
    %1314 = vector.broadcast %cst_438 : f32 to vector<8x32xf32>
    %1315 = arith.addf %1314, %1313 : vector<8x32xf32>
    %1316 = arith.divf %1314, %1315 : vector<8x32xf32>
    %1317 = vector.extract_strided_slice %761 {offsets = [6, 0, 0], sizes = [1, 8, 32], strides = [1, 1, 1]} : vector<8x8x32xf32> to vector<1x8x32xf32>
    %1318 = vector.shape_cast %1317 : vector<1x8x32xf32> to vector<8x32xf32>
    %1319 = arith.mulf %1308, %1300 : vector<8x32xf32>
    %1320 = arith.addf %1318, %1319 : vector<8x32xf32>
    %1321 = math.tanh %1320 : vector<8x32xf32>
    %cst_439 = arith.constant 1.000000e+00 : f32
    %1322 = vector.broadcast %cst_439 : f32 to vector<8x32xf32>
    %1323 = arith.subf %1322, %1316 : vector<8x32xf32>
    %1324 = arith.mulf %1323, %1321 : vector<8x32xf32>
    %1325 = arith.mulf %1316, %1284 : vector<8x32xf32>
    %1326 = arith.addf %1324, %1325 : vector<8x32xf32>
    %c2_440 = arith.constant 2 : index
    %c6_441 = arith.constant 6 : index
    %c0_442 = arith.constant 0 : index
    %c0_443 = arith.constant 0 : index
    %1327 = vector.load %arg6[%c2_440, %c6_441, %c0_442, %c0_443] : memref<3x8x8x32xf32, #tpu.memory_space<vmem>>, vector<1x1x8x32xf32>
    %1328 = vector.shape_cast %1327 : vector<1x1x8x32xf32> to vector<8x32xf32>
    %1329 = vector.shape_cast %1326 : vector<8x32xf32> to vector<1x1x8x32xf32>
    tpu.vector_store %arg6[%c2_440, %c6_441, %c0_442, %c0_443], %1329 {strides = array<i32>} : memref<3x8x8x32xf32, #tpu.memory_space<vmem>>, vector<1x1x8x32xf32>,
    %c2_444 = arith.constant 2 : index
    %c0_445 = arith.constant 0 : index
    %c0_446 = arith.constant 0 : index
    %c0_447 = arith.constant 0 : index
    %1330 = vector.load %arg6[%c2_444, %c0_445, %c0_446, %c0_447] : memref<3x8x8x32xf32, #tpu.memory_space<vmem>>, vector<1x8x8x32xf32>
    %1331 = vector.shape_cast %1330 : vector<1x8x8x32xf32> to vector<8x8x32xf32>
    %1332 = vector.broadcast %731 : vector<1x1x32xf32> to vector<8x8x32xf32>
    %1333 = arith.mulf %1331, %1332 : vector<8x8x32xf32>
    %cst_448 = arith.constant dense<0.000000e+00> : vector<8x8xf32>
    %1334 = vector.multi_reduction <add>, %1333, %cst_448 [2] : vector<8x8x32xf32> to vector<8x8xf32>
    %1335 = vector.extract_strided_slice %722 {offsets = [7, 0, 0], sizes = [1, 8, 8], strides = [1, 1, 1]} : vector<8x8x8xf32> to vector<1x8x8xf32>
    %1336 = vector.shape_cast %1335 : vector<1x8x8xf32> to vector<8x8xf32>
    %1337 = arith.addf %1336, %1334 : vector<8x8xf32>
    %cst_449 = arith.constant dense<0xFF800000> : vector<8xf32>
    %1338 = vector.multi_reduction <maximumf>, %1337, %cst_449 [0] : vector<8x8xf32> to vector<8xf32>
    %1339 = vector.shape_cast %1338 : vector<8xf32> to vector<1x8xf32>
    %1340 = vector.broadcast %1339 : vector<1x8xf32> to vector<8x8xf32>
    %1341 = arith.subf %1337, %1340 : vector<8x8xf32>
    %1342 = math.exp %1341 : vector<8x8xf32>
    %cst_450 = arith.constant dense<0.000000e+00> : vector<8xf32>
    %1343 = vector.multi_reduction <add>, %1342, %cst_450 [0] : vector<8x8xf32> to vector<8xf32>
    %1344 = vector.shape_cast %1343 : vector<8xf32> to vector<1x8xf32>
    %1345 = tpu.reciprocal %1344 {approx = true} : vector<1x8xf32> -> vector<1x8xf32>
    %1346 = vector.broadcast %1345 : vector<1x8xf32> to vector<8x8xf32>
    %1347 = arith.mulf %1342, %1346 : vector<8x8xf32>
    %1348 = vector.shape_cast %1347 : vector<8x8xf32> to vector<8x8x1xf32>
    %1349 = vector.broadcast %1348 : vector<8x8x1xf32> to vector<8x8x32xf32>
    %1350 = arith.mulf %1349, %1331 : vector<8x8x32xf32>
    %1351 = vector.extract_strided_slice %1350 {offsets = [0, 0, 0], sizes = [1, 8, 32], strides = [1, 1, 1]} : vector<8x8x32xf32> to vector<1x8x32xf32>
    %1352 = vector.shape_cast %1351 : vector<1x8x32xf32> to vector<8x32xf32>
    %1353 = vector.extract_strided_slice %1350 {offsets = [1, 0, 0], sizes = [1, 8, 32], strides = [1, 1, 1]} : vector<8x8x32xf32> to vector<1x8x32xf32>
    %1354 = vector.shape_cast %1353 : vector<1x8x32xf32> to vector<8x32xf32>
    %1355 = arith.addf %1352, %1354 : vector<8x32xf32>
    %1356 = vector.extract_strided_slice %1350 {offsets = [2, 0, 0], sizes = [1, 8, 32], strides = [1, 1, 1]} : vector<8x8x32xf32> to vector<1x8x32xf32>
    %1357 = vector.shape_cast %1356 : vector<1x8x32xf32> to vector<8x32xf32>
    %1358 = arith.addf %1355, %1357 : vector<8x32xf32>
    %1359 = vector.extract_strided_slice %1350 {offsets = [3, 0, 0], sizes = [1, 8, 32], strides = [1, 1, 1]} : vector<8x8x32xf32> to vector<1x8x32xf32>
    %1360 = vector.shape_cast %1359 : vector<1x8x32xf32> to vector<8x32xf32>
    %1361 = arith.addf %1358, %1360 : vector<8x32xf32>
    %1362 = vector.extract_strided_slice %1350 {offsets = [4, 0, 0], sizes = [1, 8, 32], strides = [1, 1, 1]} : vector<8x8x32xf32> to vector<1x8x32xf32>
    %1363 = vector.shape_cast %1362 : vector<1x8x32xf32> to vector<8x32xf32>
    %1364 = arith.addf %1361, %1363 : vector<8x32xf32>
    %1365 = vector.extract_strided_slice %1350 {offsets = [5, 0, 0], sizes = [1, 8, 32], strides = [1, 1, 1]} : vector<8x8x32xf32> to vector<1x8x32xf32>
    %1366 = vector.shape_cast %1365 : vector<1x8x32xf32> to vector<8x32xf32>
    %1367 = arith.addf %1364, %1366 : vector<8x32xf32>
    %1368 = vector.extract_strided_slice %1350 {offsets = [6, 0, 0], sizes = [1, 8, 32], strides = [1, 1, 1]} : vector<8x8x32xf32> to vector<1x8x32xf32>
    %1369 = vector.shape_cast %1368 : vector<1x8x32xf32> to vector<8x32xf32>
    %1370 = arith.addf %1367, %1369 : vector<8x32xf32>
    %1371 = vector.extract_strided_slice %1350 {offsets = [7, 0, 0], sizes = [1, 8, 32], strides = [1, 1, 1]} : vector<8x8x32xf32> to vector<1x8x32xf32>
    %1372 = vector.shape_cast %1371 : vector<1x8x32xf32> to vector<8x32xf32>
    %1373 = arith.addf %1370, %1372 : vector<8x32xf32>
    %1374 = arith.truncf %1373 : vector<8x32xf32> to vector<8x32xbf16>
    %c10_451 = arith.constant 10 : index
    %c0_452 = arith.constant 0 : index
    %c0_453 = arith.constant 0 : index
    %1375 = vector.load %arg3[%c10_451, %c0_452, %c0_453] : memref<19x32x32xbf16, #tpu.memory_space<vmem>>, vector<1x32x32xbf16>
    %1376 = vector.shape_cast %1375 : vector<1x32x32xbf16> to vector<32x32xbf16>
    %cst_454 = arith.constant dense<0.000000e+00> : vector<8x32xf32>
    %1377 = tpu.matmul %1374, %1376, %cst_454 {dimension_numbers = #tpu.dot_dimension_numbers<[1], [0], [0], [1], [0, 0, 1, 1], [], []>} : vector<8x32xbf16>, vector<32x32xbf16>, vector<8x32xf32> -> vector<8x32xf32>
    %1378 = vector.broadcast %724 : vector<1x32xf32> to vector<8x32xf32>
    %1379 = arith.addf %1377, %1378 : vector<8x32xf32>
    %c11_455 = arith.constant 11 : index
    %c0_456 = arith.constant 0 : index
    %c0_457 = arith.constant 0 : index
    %1380 = vector.load %arg3[%c11_455, %c0_456, %c0_457] : memref<19x32x32xbf16, #tpu.memory_space<vmem>>, vector<1x32x32xbf16>
    %1381 = vector.shape_cast %1380 : vector<1x32x32xbf16> to vector<32x32xbf16>
    %cst_458 = arith.constant dense<0.000000e+00> : vector<8x32xf32>
    %1382 = tpu.matmul %1374, %1381, %cst_458 {dimension_numbers = #tpu.dot_dimension_numbers<[1], [0], [0], [1], [0, 0, 1, 1], [], []>} : vector<8x32xbf16>, vector<32x32xbf16>, vector<8x32xf32> -> vector<8x32xf32>
    %1383 = vector.broadcast %726 : vector<1x32xf32> to vector<8x32xf32>
    %1384 = arith.addf %1382, %1383 : vector<8x32xf32>
    %c12_459 = arith.constant 12 : index
    %c0_460 = arith.constant 0 : index
    %c0_461 = arith.constant 0 : index
    %1385 = vector.load %arg3[%c12_459, %c0_460, %c0_461] : memref<19x32x32xbf16, #tpu.memory_space<vmem>>, vector<1x32x32xbf16>
    %1386 = vector.shape_cast %1385 : vector<1x32x32xbf16> to vector<32x32xbf16>
    %cst_462 = arith.constant dense<0.000000e+00> : vector<8x32xf32>
    %1387 = tpu.matmul %1374, %1386, %cst_462 {dimension_numbers = #tpu.dot_dimension_numbers<[1], [0], [0], [1], [0, 0, 1, 1], [], []>} : vector<8x32xbf16>, vector<32x32xbf16>, vector<8x32xf32> -> vector<8x32xf32>
    %1388 = vector.broadcast %728 : vector<1x32xf32> to vector<8x32xf32>
    %1389 = arith.addf %1387, %1388 : vector<8x32xf32>
    %1390 = vector.extract_strided_slice %743 {offsets = [7, 0, 0], sizes = [1, 8, 32], strides = [1, 1, 1]} : vector<8x8x32xf32> to vector<1x8x32xf32>
    %1391 = vector.shape_cast %1390 : vector<1x8x32xf32> to vector<8x32xf32>
    %1392 = arith.addf %1391, %1379 : vector<8x32xf32>
    %1393 = arith.negf %1392 : vector<8x32xf32>
    %1394 = math.exp %1393 : vector<8x32xf32>
    %cst_463 = arith.constant 1.000000e+00 : f32
    %1395 = vector.broadcast %cst_463 : f32 to vector<8x32xf32>
    %1396 = arith.addf %1395, %1394 : vector<8x32xf32>
    %1397 = arith.divf %1395, %1396 : vector<8x32xf32>
    %1398 = vector.extract_strided_slice %752 {offsets = [7, 0, 0], sizes = [1, 8, 32], strides = [1, 1, 1]} : vector<8x8x32xf32> to vector<1x8x32xf32>
    %1399 = vector.shape_cast %1398 : vector<1x8x32xf32> to vector<8x32xf32>
    %1400 = arith.addf %1399, %1384 : vector<8x32xf32>
    %1401 = arith.negf %1400 : vector<8x32xf32>
    %1402 = math.exp %1401 : vector<8x32xf32>
    %cst_464 = arith.constant 1.000000e+00 : f32
    %1403 = vector.broadcast %cst_464 : f32 to vector<8x32xf32>
    %1404 = arith.addf %1403, %1402 : vector<8x32xf32>
    %1405 = arith.divf %1403, %1404 : vector<8x32xf32>
    %1406 = vector.extract_strided_slice %761 {offsets = [7, 0, 0], sizes = [1, 8, 32], strides = [1, 1, 1]} : vector<8x8x32xf32> to vector<1x8x32xf32>
    %1407 = vector.shape_cast %1406 : vector<1x8x32xf32> to vector<8x32xf32>
    %1408 = arith.mulf %1397, %1389 : vector<8x32xf32>
    %1409 = arith.addf %1407, %1408 : vector<8x32xf32>
    %1410 = math.tanh %1409 : vector<8x32xf32>
    %cst_465 = arith.constant 1.000000e+00 : f32
    %1411 = vector.broadcast %cst_465 : f32 to vector<8x32xf32>
    %1412 = arith.subf %1411, %1405 : vector<8x32xf32>
    %1413 = arith.mulf %1412, %1410 : vector<8x32xf32>
    %1414 = arith.mulf %1405, %1373 : vector<8x32xf32>
    %1415 = arith.addf %1413, %1414 : vector<8x32xf32>
    %c2_466 = arith.constant 2 : index
    %c7_467 = arith.constant 7 : index
    %c0_468 = arith.constant 0 : index
    %c0_469 = arith.constant 0 : index
    %1416 = vector.load %arg6[%c2_466, %c7_467, %c0_468, %c0_469] : memref<3x8x8x32xf32, #tpu.memory_space<vmem>>, vector<1x1x8x32xf32>
    %1417 = vector.shape_cast %1416 : vector<1x1x8x32xf32> to vector<8x32xf32>
    %1418 = vector.shape_cast %1415 : vector<8x32xf32> to vector<1x1x8x32xf32>
    tpu.vector_store %arg6[%c2_466, %c7_467, %c0_468, %c0_469], %1418 {strides = array<i32>} : memref<3x8x8x32xf32, #tpu.memory_space<vmem>>, vector<1x1x8x32xf32>,
    %1419 = arith.truncf %0 : vector<64x32xf32> to vector<64x32xbf16>
    %c16 = arith.constant 16 : index
    %c0_470 = arith.constant 0 : index
    %c0_471 = arith.constant 0 : index
    %1420 = vector.load %arg3[%c16, %c0_470, %c0_471] : memref<19x32x32xbf16, #tpu.memory_space<vmem>>, vector<1x32x32xbf16>
    %1421 = vector.shape_cast %1420 : vector<1x32x32xbf16> to vector<32x32xbf16>
    %cst_472 = arith.constant dense<0.000000e+00> : vector<64x32xf32>
    %1422 = tpu.matmul %1419, %1421, %cst_472 {dimension_numbers = #tpu.dot_dimension_numbers<[1], [0], [0], [1], [0, 0, 1, 1], [], []>} : vector<64x32xbf16>, vector<32x32xbf16>, vector<64x32xf32> -> vector<64x32xf32>
    %c0_473 = arith.constant 0 : index
    %c0_474 = arith.constant 0 : index
    %c0_475 = arith.constant 0 : index
    %c0_476 = arith.constant 0 : index
    %1423 = vector.load %arg6[%c0_473, %c0_474, %c0_475, %c0_476] : memref<3x8x8x32xf32, #tpu.memory_space<vmem>>, vector<1x8x8x32xf32>
    %1424 = vector.shape_cast %1423 : vector<1x8x8x32xf32> to vector<8x8x32xf32>
    %1425 = vector.shape_cast %1424 : vector<8x8x32xf32> to vector<64x32xf32>
    %1426 = arith.truncf %1425 : vector<64x32xf32> to vector<64x32xbf16>
    %c13_477 = arith.constant 13 : index
    %c0_478 = arith.constant 0 : index
    %c0_479 = arith.constant 0 : index
    %1427 = vector.load %arg3[%c13_477, %c0_478, %c0_479] : memref<19x32x32xbf16, #tpu.memory_space<vmem>>, vector<1x32x32xbf16>
    %1428 = vector.shape_cast %1427 : vector<1x32x32xbf16> to vector<32x32xbf16>
    %cst_480 = arith.constant dense<0.000000e+00> : vector<64x32xf32>
    %1429 = tpu.matmul %1426, %1428, %cst_480 {dimension_numbers = #tpu.dot_dimension_numbers<[1], [0], [0], [1], [0, 0, 1, 1], [], []>} : vector<64x32xbf16>, vector<32x32xbf16>, vector<64x32xf32> -> vector<64x32xf32>
    %1430 = arith.addf %1422, %1429 : vector<64x32xf32>
    %c1_481 = arith.constant 1 : index
    %c0_482 = arith.constant 0 : index
    %c0_483 = arith.constant 0 : index
    %c0_484 = arith.constant 0 : index
    %1431 = vector.load %arg6[%c1_481, %c0_482, %c0_483, %c0_484] : memref<3x8x8x32xf32, #tpu.memory_space<vmem>>, vector<1x8x8x32xf32>
    %1432 = vector.shape_cast %1431 : vector<1x8x8x32xf32> to vector<8x8x32xf32>
    %1433 = vector.shape_cast %1432 : vector<8x8x32xf32> to vector<64x32xf32>
    %1434 = arith.truncf %1433 : vector<64x32xf32> to vector<64x32xbf16>
    %c14_485 = arith.constant 14 : index
    %c0_486 = arith.constant 0 : index
    %c0_487 = arith.constant 0 : index
    %1435 = vector.load %arg3[%c14_485, %c0_486, %c0_487] : memref<19x32x32xbf16, #tpu.memory_space<vmem>>, vector<1x32x32xbf16>
    %1436 = vector.shape_cast %1435 : vector<1x32x32xbf16> to vector<32x32xbf16>
    %cst_488 = arith.constant dense<0.000000e+00> : vector<64x32xf32>
    %1437 = tpu.matmul %1434, %1436, %cst_488 {dimension_numbers = #tpu.dot_dimension_numbers<[1], [0], [0], [1], [0, 0, 1, 1], [], []>} : vector<64x32xbf16>, vector<32x32xbf16>, vector<64x32xf32> -> vector<64x32xf32>
    %1438 = arith.addf %1430, %1437 : vector<64x32xf32>
    %c2_489 = arith.constant 2 : index
    %c0_490 = arith.constant 0 : index
    %c0_491 = arith.constant 0 : index
    %c0_492 = arith.constant 0 : index
    %1439 = vector.load %arg6[%c2_489, %c0_490, %c0_491, %c0_492] : memref<3x8x8x32xf32, #tpu.memory_space<vmem>>, vector<1x8x8x32xf32>
    %1440 = vector.shape_cast %1439 : vector<1x8x8x32xf32> to vector<8x8x32xf32>
    %1441 = vector.shape_cast %1440 : vector<8x8x32xf32> to vector<64x32xf32>
    %1442 = arith.truncf %1441 : vector<64x32xf32> to vector<64x32xbf16>
    %c15 = arith.constant 15 : index
    %c0_493 = arith.constant 0 : index
    %c0_494 = arith.constant 0 : index
    %1443 = vector.load %arg3[%c15, %c0_493, %c0_494] : memref<19x32x32xbf16, #tpu.memory_space<vmem>>, vector<1x32x32xbf16>
    %1444 = vector.shape_cast %1443 : vector<1x32x32xbf16> to vector<32x32xbf16>
    %cst_495 = arith.constant dense<0.000000e+00> : vector<64x32xf32>
    %1445 = tpu.matmul %1442, %1444, %cst_495 {dimension_numbers = #tpu.dot_dimension_numbers<[1], [0], [0], [1], [0, 0, 1, 1], [], []>} : vector<64x32xbf16>, vector<32x32xbf16>, vector<64x32xf32> -> vector<64x32xf32>
    %1446 = arith.addf %1438, %1445 : vector<64x32xf32>
    %c15_496 = arith.constant 15 : index
    %c0_497 = arith.constant 0 : index
    %c0_498 = arith.constant 0 : index
    %1447 = vector.load %arg4[%c15_496, %c0_497, %c0_498] : memref<18x1x32xf32, #tpu.memory_space<vmem>>, vector<1x1x32xf32>
    %1448 = vector.shape_cast %1447 : vector<1x1x32xf32> to vector<1x32xf32>
    %1449 = vector.broadcast %1448 : vector<1x32xf32> to vector<64x32xf32>
    %1450 = arith.addf %1446, %1449 : vector<64x32xf32>
    %cst_499 = arith.constant 0.000000e+00 : f32
    %1451 = vector.broadcast %cst_499 : f32 to vector<64x32xf32>
    %1452 = arith.maximumf %1450, %1451 : vector<64x32xf32>
    %1453 = arith.truncf %1452 : vector<64x32xf32> to vector<64x32xbf16>
    %c17 = arith.constant 17 : index
    %c0_500 = arith.constant 0 : index
    %c0_501 = arith.constant 0 : index
    %1454 = vector.load %arg3[%c17, %c0_500, %c0_501] : memref<19x32x32xbf16, #tpu.memory_space<vmem>>, vector<1x32x32xbf16>
    %1455 = vector.shape_cast %1454 : vector<1x32x32xbf16> to vector<32x32xbf16>
    %cst_502 = arith.constant dense<0.000000e+00> : vector<64x32xf32>
    %1456 = tpu.matmul %1453, %1455, %cst_502 {dimension_numbers = #tpu.dot_dimension_numbers<[1], [0], [0], [1], [0, 0, 1, 1], [], []>} : vector<64x32xbf16>, vector<32x32xbf16>, vector<64x32xf32> -> vector<64x32xf32>
    %c16_503 = arith.constant 16 : index
    %c0_504 = arith.constant 0 : index
    %c0_505 = arith.constant 0 : index
    %1457 = vector.load %arg4[%c16_503, %c0_504, %c0_505] : memref<18x1x32xf32, #tpu.memory_space<vmem>>, vector<1x1x32xf32>
    %1458 = vector.shape_cast %1457 : vector<1x1x32xf32> to vector<1x32xf32>
    %1459 = vector.broadcast %1458 : vector<1x32xf32> to vector<64x32xf32>
    %1460 = arith.addf %1456, %1459 : vector<64x32xf32>
    %cst_506 = arith.constant 0.000000e+00 : f32
    %1461 = vector.broadcast %cst_506 : f32 to vector<64x32xf32>
    %1462 = arith.maximumf %1460, %1461 : vector<64x32xf32>
    %1463 = arith.truncf %1462 : vector<64x32xf32> to vector<64x32xbf16>
    %c18 = arith.constant 18 : index
    %c0_507 = arith.constant 0 : index
    %c0_508 = arith.constant 0 : index
    %1464 = vector.load %arg3[%c18, %c0_507, %c0_508] : memref<19x32x32xbf16, #tpu.memory_space<vmem>>, vector<1x32x32xbf16>
    %1465 = vector.shape_cast %1464 : vector<1x32x32xbf16> to vector<32x32xbf16>
    %cst_509 = arith.constant dense<0.000000e+00> : vector<64x32xf32>
    %1466 = tpu.matmul %1463, %1465, %cst_509 {dimension_numbers = #tpu.dot_dimension_numbers<[1], [0], [0], [1], [0, 0, 1, 1], [], []>} : vector<64x32xbf16>, vector<32x32xbf16>, vector<64x32xf32> -> vector<64x32xf32>
    %c17_510 = arith.constant 17 : index
    %c0_511 = arith.constant 0 : index
    %c0_512 = arith.constant 0 : index
    %1467 = vector.load %arg4[%c17_510, %c0_511, %c0_512] : memref<18x1x32xf32, #tpu.memory_space<vmem>>, vector<1x1x32xf32>
    %1468 = vector.shape_cast %1467 : vector<1x1x32xf32> to vector<1x32xf32>
    %1469 = vector.broadcast %1468 : vector<1x32xf32> to vector<64x32xf32>
    %1470 = arith.addf %1466, %1469 : vector<64x32xf32>
    %c0_513 = arith.constant 0 : index
    %c0_514 = arith.constant 0 : index
    %1471 = vector.load %arg5[%c0_513, %c0_514] : memref<64x32xf32, #tpu.memory_space<vmem>>, vector<64x32xf32>
    tpu.vector_store %arg5[%c0_513, %c0_514], %1470 {strides = array<i32>} : memref<64x32xf32, #tpu.memory_space<vmem>>, vector<64x32xf32>,
    return
  }
}

</mosaic_0001>

<bundles_post_ra>
// kernel: dagerc_forward.1
= control target key start
LH: loop header
LB: loop body
LE: loop exit
PB: predicated region body
PF: predicated region fallthrough
CT: control target
= control target key end

     0   :  { %10 = vsyncpa [#allocation4], 0  ;;  %s10553_s0 = inlined_call_operand.vmem [shape: f32[2], index: 0, kind: input, shape index: {}]   ;;  %s10554_s1 = inlined_call_operand.vmem [shape: f32[64,32], index: 1, kind: input, shape index: {}]   ;;  %s10555_s2 = inlined_call_operand.vmem [shape: f32[2,8,8,8], index: 2, kind: input, shape index: {}]   ;;  %s10556_s3 = inlined_call_operand.vmem [shape: bf16[19,32,32], index: 3, kind: input, shape index: {}]   ;;  %s10557_s4 = inlined_call_operand.vmem [shape: f32[18,1,32], index: 4, kind: input, shape index: {}]   ;;  %s10558_s5 = inlined_call_operand.vmem [shape: f32[64,32], index: 5, kind: output, shape index: {}]  }
   0x1   :  { %s17_s20 = sshll.u32 %s10553_s0, 4  ;;  %s18_s20 = int_to_ptr.vmem [resolvable:$true] %s17_s20 }
   0x2   :  { %s8434_s21 = scalar_lea.vmem %s18_s20, 16  ;;  %p8439_p1 = scmp.lt.s32.totalorder %s18_s20, %s18_s20 }
   0x3   :  { %p8435_p0 = scmp.ne.s32.totalorder %s18_s20, %s8434_s21  ;;  %p8440_p2 = scmp.lt.s32.totalorder %s8434_s21, %s8434_s21 }
   0x5   :  { %p8441_p3 = por %p8440_p2, %p8439_p1 }
   0x7   :  { %p8442_p4 = pnand %p8441_p3, %p8435_p0 }
   0x9   :  { %8445 = shalt.err (!%p8442_p4)
}
   0xa   :  { %s8448_s22 = smov [#allocation3]  }
   0xb   :  { %20 = dma.vmem_to_smem %s18_s20, 16, %s8448_s22, [#allocation4]  }
   0xc   :  { %8446 = dma.done.wait [#allocation4], 16  }
   0xd   :  { %8447 = vsyncadd [#allocation4], 4294967280 }
   0xe   :  { %32 = sfence }
   0xf   :  { %v8063_v0 = vld [vmem:[%s10556_s3] sm:$0xff]   ;;  %v8064_v1 = vld [vmem:[%s10556_s3 + $0x8] sm:$0xff]   ;;  %vm69_vm0 = vcmask 261120   ;;  %v36_v5 = vld [vmem:[%s10554_s1 + $0x10] sm:$0xff]  ;;  %v10559_v57 = vmov 0.0   ;;  %s178_s18 = sld [smem:[#allocation3]] }
  0x10   :  { %7544 = vmatprep.subr.bf16.mxu1 %v8063_v0  ;;  %v34_v2 = vld [vmem:[%s10554_s1] sm:$0xff]  ;;  %v35_v3 = vld [vmem:[%s10554_s1 + $0x8] sm:$0xff]  ;;  %v37_v6 = vld [vmem:[%s10554_s1 + $0x18] sm:$0xff]  ;;  %497 = vst.msk [vmem:[#allocation2 + $0x40] sm:$0xff] %vm69_vm0, %v10559_v57  ;;  %vm631_vm1 = vcmask 1041409   ;;  %vm633_vm2 = vcmask 1042434  }
  0x11   :  { %7545 = vmatpush3.bf16.msra.mxu1 %v8063_v0  ;;  %v8496_v4 = vpack.c.bf16 %v35_v3, %v34_v2  ;;  %v38_v7 = vld [vmem:[%s10554_s1 + $0x20] sm:$0xff]  ;;  %v39_v8 = vld [vmem:[%s10554_s1 + $0x28] sm:$0xff]  ;;  %v8512_v9 = vpack.c.bf16 %v37_v6, %v36_v5  ;;  %v40_v11 = vld [vmem:[%s10554_s1 + $0x30] sm:$0xff]  ;;  %498 = vst.msk [vmem:[#allocation2 + $0x48] sm:$0xff] %vm69_vm0, %v10559_v57  ;;  %vm635_vm3 = vcmask 1043459   ;;  %vm637_vm4 = vcmask 1044484  }
  0x12   :  { %7546 = vmatprep.subr.bf16.mxu1 %v8064_v1  ;;  %v8514_v10 = vpack.c.bf16 %v39_v8, %v38_v7  ;;  %v41_v12 = vld [vmem:[%s10554_s1 + $0x38] sm:$0xff]  ;;  %v8065_v14 = vld [vmem:[%s10556_s3 + $0x10] sm:$0xff]   ;;  %v8067_v15 = vld [vmem:[%s10556_s3 + $0x20] sm:$0xff]   ;;  %499 = vst.msk [vmem:[#allocation2 + $0x50] sm:$0xff] %vm69_vm0, %v10559_v57  ;;  %vm639_vm5 = vcmask 1045509   ;;  %vm641_vm6 = vcmask 1046534  }
  0x13   :  { %10565 = vst [vmem:[#allocation6_spill] sm:$0xff] %v8496_v4  ;;  %7548 = vmatprep.mubr.msk.bf16.mxu1 %vm69_vm0, %v8496_v4  ;;  %10566 = vst [vmem:[#allocation7_spill] sm:$0xff] %v8512_v9  ;;  %v8526_v13 = vpack.c.bf16 %v41_v12, %v40_v11  ;;  %7568 = vmatprep.subr.bf16.mxu0 %v8067_v15  ;;  %v8066_v16 = vld [vmem:[%s10556_s3 + $0x18] sm:$0xff]   ;;  %v8068_v17 = vld [vmem:[%s10556_s3 + $0x28] sm:$0xff]   ;;  %vm643_vm7 = vcmask 1047559   ;;  %vm647_vm8 = vcmask 64512  }
  0x14   :  { %10567 = vst [vmem:[#allocation8_spill] sm:$0xff] %v8514_v10  ;;  %7569 = vmatpush3.bf16.msra.mxu0 %v8067_v15  ;;  %v8069_v18 = vld [vmem:[%s10556_s3 + $0x30] sm:$0xff]   ;;  %v6845_v19 = vld [vmem:[%s10557_s4] ss:$0 sm:$0xff]  ;;  %v8070_v50 = vld [vmem:[%s10556_s3 + $0x38] sm:$0xff]   ;;  %vm8450_vm9 = vmmov 0  }
  0x15   :  { %7547 = vmatpush3.bf16.msra.mxu1 %v8064_v1  ;;  %10568 = vst [vmem:[#allocation9_spill] sm:$0xff] %v8526_v13  ;;  %7570 = vmatprep.subr.bf16.mxu0 %v8068_v17  ;;  %500 = vst.msk [vmem:[#allocation2 + $0x58] sm:$0xff] %vm69_vm0, %v10559_v57  ;;  %v8608_v58 = vld [vmem:[%s10557_s4 + $0x7] ss:$0 sm:$0xff]  ;;  %v6880_v15 = vld [vmem:[%s10557_s4 + $0x2] ss:$0 sm:$0xff] }
  0x16   :  { %7556 = vmatprep.subr.bf16.mxu1 %v8065_v14  ;;  %501 = vst.msk [vmem:[#allocation2 + $0x60] sm:$0xff] %vm69_vm0, %v10559_v57  ;;  %502 = vst.msk [vmem:[#allocation2 + $0x68] sm:$0xff] %vm69_vm0, %v10559_v57  ;;  %s7066_s11 = sld [smem:[#allocation3 + $0x1]] }
  0x17   :  { %503 = vst.msk [vmem:[#allocation2 + $0x70] sm:$0xff] %vm69_vm0, %v10559_v57  ;;  %504 = vst.msk [vmem:[#allocation2 + $0x78] sm:$0xff] %vm69_vm0, %v10559_v57 }
  0x18   :  { %7549 = vmatmul.mubr.msk.bf16.vlgmr.msra.gmra.mrb[0].mxu1 %vm69_vm0, %v8512_v9  ;;  %7571 = vmatpush3.bf16.msra.mxu0 %v8068_v17  ;;  %3499 = vst.msk [vmem:[#allocation2 + $0x80] sm:$0xff] %vm69_vm0, %v10559_v57  ;;  %3500 = vst.msk [vmem:[#allocation2 + $0x88] sm:$0xff] %vm69_vm0, %v10559_v57  ;;  %v8610_v59 = vld [vmem:[#allocation2 + $0x48] sm:$0xff] }
  0x19   :  { %7552 = vmatprep.mubr.msk.bf16.mxu1 %vm69_vm0, %v8514_v10  ;;  %7557 = vmatpush3.bf16.msra.mxu1 %v8065_v14  ;;  %3501 = vst.msk [vmem:[#allocation2 + $0x90] sm:$0xff] %vm69_vm0, %v10559_v57  ;;  %3502 = vst.msk [vmem:[#allocation2 + $0x98] sm:$0xff] %vm69_vm0, %v10559_v57  ;;  %v8612_v60 = vld [vmem:[#allocation2 + $0x50] sm:$0xff]  ;;  %v558_v61 = vmul.f32 %v8608_v58, %v8610_v59  ;;  %v6868_v14 = vld [vmem:[%s10557_s4 + $0x1] ss:$0 sm:$0xff] }
  0x1a   :  { %7558 = vmatprep.subr.bf16.mxu1 %v8066_v16  ;;  %3503 = vst.msk [vmem:[#allocation2 + $0xa0] sm:$0xff] %vm69_vm0, %v10559_v57  ;;  %3504 = vst.msk [vmem:[#allocation2 + $0xa8] sm:$0xff] %vm69_vm0, %v10559_v57  ;;  %7592 = vmatprep.subr.bf16.mxu0 %v10559_v57  ;;  %v559_v62 = vmul.f32 %v8608_v58, %v8612_v60 }
  0x1b   :  { %3505 = vst.msk [vmem:[#allocation2 + $0xb0] sm:$0xff] %vm69_vm0, %v10559_v57  ;;  %3506 = vst.msk [vmem:[#allocation2 + $0xb8] sm:$0xff] %vm69_vm0, %v10559_v57  ;;  %v568_v63 = vsel %vm69_vm0, %v558_v61, 0.0 }
  0x1c   :  { %v8620_v0 = vsel %vm69_vm0, %v559_v62, 0.0  ;;  %569 = vadd.xlane.f32.xlu0 %v568_v63  ;;  %v8623_v1 = vld [vmem:[#allocation2 + $0x58] sm:$0xff] }
  0x1d   :  { %7559 = vmatpush3.bf16.msra.mxu1 %v8066_v16  ;;  %572 = vadd.xlane.f32.xlu1 %v8620_v0  ;;  %v560_v2 = vmul.f32 %v8608_v58, %v8623_v1  ;;  %v8631_v5 = vld [vmem:[#allocation2 + $0x68] sm:$0xff] }
  0x1e   :  { %7580 = vmatprep.subr.bf16.mxu1 %v8069_v18  ;;  %v562_v6 = vmul.f32 %v8608_v58, %v8631_v5  ;;  %v8639_v8 = vld [vmem:[#allocation2 + $0x78] sm:$0xff] }
  0x1f   :  { %v8628_v3 = vsel %vm69_vm0, %v560_v2, 0.0  ;;  %v564_v11 = vmul.f32 %v8608_v58, %v8639_v8 }
  0x20   :  { %7553 = vmatmul.mubr.msk.bf16.gmra.mrb[4].mxu1 %vm69_vm0, %v8526_v13  ;;  %v8636_v7 = vsel %vm69_vm0, %v562_v6, 0.0 }
  0x21   :  { %575 = vadd.xlane.f32.xlu1 %v8628_v3  ;;  %v8644_v12 = vsel %vm69_vm0, %v564_v11, 0.0 }
  0x25   :  { %581 = vadd.xlane.f32.xlu1 %v8636_v7 }
  0x29   :  { %587 = vadd.xlane.f32.xlu1 %v8644_v12 }
  0xeb   :  { %v7550_v20 = vpop.f32.mrb[0].mxu1 }
  0xec   :  { %v125_v21 = vadd.f32 %v7550_v20, %v6845_v19  ;;  %v116_v22 = vpop.f32.mrb[1].mxu1  ;;  %v8660_v20 = vld [vmem:[%s10557_s4 + $0x4] ss:$0 sm:$0xff] }
  0xed   :  { %v117_v23 = vadd.f32 %v6845_v19, %v116_v22  ;;  %v7551_v24 = vpop.f32.mrb[2].mxu1 }
  0xee   :  { %v149_v25 = vmax.f32 %v125_v21, 0.0  ;;  %v128_v26 = vadd.f32 %v7551_v24, %v6845_v19  ;;  %v119_v27 = vpop.f32.mrb[3].mxu1 }
  0xef   :  { %v147_v28 = vmax.f32 %v117_v23, 0.0  ;;  %v120_v29 = vadd.f32 %v6845_v19, %v119_v27 }
  0xf0   :  { %157 = vst.msk [vmem:[#allocation2 + $0x10] sm:$0xff] %vm69_vm0, %v149_v25  ;;  %v150_v30 = vmax.f32 %v128_v26, 0.0 }
  0xf1   :  { %155 = vst.msk [vmem:[#allocation2] sm:$0xff] %vm69_vm0, %v147_v28  ;;  %v148_v31 = vmax.f32 %v120_v29, 0.0 }
  0xf2   :  { %158 = vst.msk [vmem:[#allocation2 + $0x18] sm:$0xff] %vm69_vm0, %v150_v30 }
  0xf3   :  { %156 = vst.msk [vmem:[#allocation2 + $0x8] sm:$0xff] %vm69_vm0, %v148_v31  ;;  %v7554_v32 = vpop.f32.mrb[4].mxu1 }
  0xf4   :  { %v141_v33 = vadd.f32 %v7554_v32, %v6845_v19  ;;  %v132_v34 = vpop.f32.mrb[5].mxu1  ;;  %v8670_v32 = vld [vmem:[%s10557_s4 + $0x5] ss:$0 sm:$0xff] }
  0xf5   :  { %v133_v35 = vadd.f32 %v6845_v19, %v132_v34  ;;  %v7555_v36 = vpop.f32.mrb[6].mxu1 }
  0xf6   :  { %v153_v37 = vmax.f32 %v141_v33, 0.0  ;;  %v144_v38 = vadd.f32 %v7555_v36, %v6845_v19  ;;  %v135_v39 = vpop.f32.mrb[7].mxu1 }
  0xf7   :  { %v151_v40 = vmax.f32 %v133_v35, 0.0  ;;  %v136_v41 = vadd.f32 %v6845_v19, %v135_v39  ;;  %v204_v48 = vld [vmem:[#allocation2 + $0x10] sm:$0xff] }
  0xf8   :  { %161 = vst.msk [vmem:[#allocation2 + $0x30] sm:$0xff] %vm69_vm0, %v153_v37  ;;  %v154_v42 = vmax.f32 %v144_v38, 0.0  ;;  %v202_v45 = vld [vmem:[#allocation2] sm:$0xff] }
  0xf9   :  { %159 = vst.msk [vmem:[#allocation2 + $0x20] sm:$0xff] %vm69_vm0, %v151_v40  ;;  %v152_v43 = vmax.f32 %v136_v41, 0.0  ;;  %v205_v44 = vld [vmem:[#allocation2 + $0x18] sm:$0xff] }
  0xfa   :  { %162 = vst.msk [vmem:[#allocation2 + $0x38] sm:$0xff] %vm69_vm0, %v154_v42  ;;  %v203_v46 = vld [vmem:[#allocation2 + $0x8] sm:$0xff]  ;;  %v211_v49 = vpack.c.bf16 %v205_v44, %v204_v48 }
  0xfb   :  { %160 = vst.msk [vmem:[#allocation2 + $0x28] sm:$0xff] %vm69_vm0, %v152_v43  ;;  %v210_v47 = vpack.c.bf16 %v203_v46, %v202_v45 }
  0xfd   :  { %7560 = vmatprep.mubr.msk.bf16.mxu1 %vm69_vm0, %v210_v47  ;;  %7572 = vmatprep.mubr.msk.bf16.mxu0 %vm69_vm0, %v210_v47 }
  0xfe   :  { %7561 = vmatmul.mubr.msk.bf16.vlgmr.msra.gmra.mrb[8].mxu1 %vm69_vm0, %v211_v49  ;;  %7573 = vmatmul.mubr.msk.bf16.vlgmr.msra.gmra.mrb[0].mxu0 %vm69_vm0, %v211_v49 }
  0xff   :  { %v208_v51 = vld [vmem:[#allocation2 + $0x30] sm:$0xff]  ;;  %7581 = vmatpush3.bf16.msra.mxu1 %v8069_v18 }
 0x100   :  { %v206_v52 = vld [vmem:[#allocation2 + $0x20] sm:$0xff]  ;;  %7582 = vmatprep.subr.bf16.mxu1 %v8070_v50 }
 0x101   :  { %v209_v53 = vld [vmem:[#allocation2 + $0x38] sm:$0xff] }
 0x102   :  { %v207_v54 = vld [vmem:[#allocation2 + $0x28] sm:$0xff]  ;;  %v213_v55 = vpack.c.bf16 %v209_v53, %v208_v51 }
 0x103   :  { %v212_v56 = vpack.c.bf16 %v207_v54, %v206_v52  ;;  %7583 = vmatpush3.bf16.msra.mxu1 %v8070_v50  ;;  %v6892_v54 = vld [vmem:[%s10557_s4 + $0x3] ss:$0 sm:$0xff] }
 0x104   :  { %7600 = vmatprep.subr.bf16.mxu1 %v10559_v57 }
 0x105   :  { %7564 = vmatprep.mubr.msk.bf16.mxu1 %vm69_vm0, %v212_v56  ;;  %7576 = vmatprep.mubr.msk.bf16.mxu0 %vm69_vm0, %v212_v56 }
 0x106   :  { %7565 = vmatmul.mubr.msk.bf16.gmra.mrb[12].mxu1 %vm69_vm0, %v213_v55  ;;  %7577 = vmatmul.mubr.msk.bf16.gmra.mrb[4].mxu0 %vm69_vm0, %v213_v55 }
 0x107   :  { %7584 = vmatprep.mubr.msk.bf16.mxu1 %vm69_vm0, %v210_v47 }
 0x10e   :  { %7585 = vmatmul.mubr.msk.bf16.vlgmr.msra.gmra.mrb[16].mxu1 %vm69_vm0, %v211_v49 }
 0x10f   :  { %7588 = vmatprep.mubr.msk.bf16.mxu1 %vm69_vm0, %v212_v56 }
 0x116   :  { %7589 = vmatmul.mubr.msk.bf16.gmra.mrb[20].mxu1 %vm69_vm0, %v213_v55 }
 0x1d1   :  { %v7562_v16 = vpop.f32.mrb[8].mxu1  ;;  %v7574_v17 = vpop.f32.mrb[0].mxu0 }
 0x1d2   :  { %v8653_v18 = vadd.f32 %v7562_v16, %v6868_v14  ;;  %v8655_v19 = vadd.f32 %v7574_v17, %v6880_v15  ;;  %v285_v21 = vpop.f32.mrb[9].mxu1  ;;  %v375_v22 = vpop.f32.mrb[1].mxu0 }
 0x1d3   :  { %v286_v23 = vadd.f32 %v6868_v14, %v285_v21  ;;  %v7563_v24 = vpop.f32.mrb[10].mxu1  ;;  %v7575_v25 = vpop.f32.mrb[2].mxu0  ;;  %v376_v26 = vadd.f32 %v6880_v15, %v375_v22 }
 0x1d4   :  { %v8662_v27 = vadd.f32 %v7563_v24, %v6868_v14  ;;  %v8664_v28 = vadd.f32 %v7575_v25, %v6880_v15  ;;  %v288_v29 = vpop.f32.mrb[11].mxu1  ;;  %v378_v30 = vpop.f32.mrb[3].mxu0 }
 0x1d5   :  { %v511_v31 = vadd.f32 %v8660_v20, %v286_v23  ;;  %v8672_v33 = vadd.f32 %v6868_v14, %v288_v29  ;;  %v8674_v34 = vadd.f32 %v6880_v15, %v378_v30  ;;  %v524_v36 = vadd.f32 %v8670_v32, %v376_v26  ;;  %v8713_v30 = vld [vmem:[%s10557_s4 + $0x6] ss:$0 sm:$0xff] }
 0x1d7   :  { %v6900_v35 = vmul.f32 -1.442695, %v511_v31  ;;  %v6902_v47 = vmul.f32 -1.442695, %v524_v36 }
 0x1d9   :  { %8173 = vpow2.f32 %v6900_v35  ;;  %v7566_v37 = vpop.f32.mrb[12].mxu1  ;;  %v7578_v38 = vpop.f32.mrb[4].mxu0 }
 0x1da   :  { %v8677_v39 = vadd.f32 %v7566_v37, %v6868_v14  ;;  %v301_v40 = vpop.f32.mrb[13].mxu1  ;;  %v8679_v41 = vadd.f32 %v7578_v38, %v6880_v15  ;;  %v391_v42 = vpop.f32.mrb[5].mxu0  ;;  %8175 = vpow2.f32 %v6902_v47 }
 0x1db   :  { %v8681_v43 = vadd.f32 %v6868_v14, %v301_v40  ;;  %v7567_v44 = vpop.f32.mrb[14].mxu1  ;;  %v8683_v45 = vadd.f32 %v6880_v15, %v391_v42  ;;  %v7579_v46 = vpop.f32.mrb[6].mxu0 }
 0x1dc   :  { %10569 = vst [vmem:[#allocation10_spill] sm:$0xff] %v8679_v41  ;;  %v8685_v48 = vadd.f32 %v7567_v44, %v6868_v14  ;;  %v304_v49 = vpop.f32.mrb[15].mxu1  ;;  %v8687_v50 = vadd.f32 %v7579_v46, %v6880_v15  ;;  %v394_v51 = vpop.f32.mrb[7].mxu0  ;;  %v8717_v46 = vld [vmem:[#allocation2 + $0x60] sm:$0xff] }
 0x1dd   :  { %v8689_v52 = vadd.f32 %v6868_v14, %v304_v49  ;;  %v8691_v53 = vadd.f32 %v6880_v15, %v394_v51  ;;  %v561_v51 = vmul.f32 %v8608_v58, %v8717_v46 }
 0x1de   :  { %10570 = vst [vmem:[#allocation11_spill] sm:$0xff] %v8685_v48  ;;  %10571 = vst [vmem:[#allocation12_spill] sm:$0xff] %v8687_v50 }
 0x1e1   :  { %v7586_v55 = vpop.f32.mrb[16].mxu1 }
 0x1e2   :  { %v8696_v56 = vadd.f32 %v7586_v55, %v6892_v54  ;;  %v465_v61 = vpop.f32.mrb[17].mxu1 }
 0x1e3   :  { %v8174_v62 = vpop.eup %8173  ;;  %v7587_v63 = vpop.f32.mrb[18].mxu1  ;;  %v466_v35 = vadd.f32 %v6892_v54, %v465_v61  ;;  %v8732_v61 = vsel %vm69_vm0, %v561_v51, 0.0 }
 0x1e4   :  { %v515_v2 = vadd.f32 1.0, %v8174_v62  ;;  %v8698_v6 = vadd.f32 %v7587_v63, %v6892_v54  ;;  %v468_v11 = vpop.f32.mrb[19].mxu1  ;;  %v8176_v15 = vpop.eup %8175 }
 0x1e5   :  { %v8700_v16 = vadd.f32 %v6892_v54, %v468_v11  ;;  %v528_v26 = vadd.f32 1.0, %v8176_v15  ;;  %v597_v11 = vlaneseq }
 0x1e6   :  { %8177 = vrcp.f32 %v515_v2  ;;  %v573_v2 = vpop.xlane.xlu1 %572 }
 0x1e7   :  { %8179 = vrcp.f32 %v528_v26  ;;  %v8741_v15 = vshrl.u32 %v597_v11, 7 }
 0x1e9   :  { %v7590_v14 = vpop.f32.mrb[20].mxu1 }
 0x1ea   :  { %v8702_v17 = vadd.f32 %v7590_v14, %v6892_v54  ;;  %v481_v21 = vpop.f32.mrb[21].mxu1  ;;  %v598_v14 = vand.u32 127, %v597_v11 }
 0x1eb   :  { %v8704_v22 = vadd.f32 %v6892_v54, %v481_v21  ;;  %v7591_v23 = vpop.f32.mrb[22].mxu1  ;;  %v576_v21 = vpop.xlane.xlu1 %575 }
 0x1ec   :  { %10572 = vst [vmem:[#allocation13_spill] sm:$0xff] %v8702_v17  ;;  %v8706_v24 = vadd.f32 %v7591_v23, %v6892_v54  ;;  %v484_v25 = vpop.f32.mrb[23].mxu1  ;;  %v570_v23 = vpop.xlane.xlu0 %569 }
 0x1ed   :  { %v8708_v29 = vadd.f32 %v6892_v54, %v484_v25  ;;  %v8725_v54 = vld [vmem:[#allocation2 + $0x70] sm:$0xff]  ;;  %v8744_v25 = vsub.s32 %v598_v14, %v8741_v15 }
 0x1ee   :  { %10573 = vst [vmem:[#allocation14_spill] sm:$0xff] %v8706_v24  ;;  %v563_v62 = vmul.f32 %v8608_v58, %v8725_v54 }
 0x1ef   :  { %v582_v26 = vpop.xlane.xlu1 %581 }
 0x1f0   :  { %v8178_v31 = vpop.eup %8177  ;;  %v8738_v63 = vsel %vm69_vm0, %v563_v62, 0.0 }
 0x1f1   :  { %v537_v36 = vmul.f32 %v8178_v31, %v8713_v30  ;;  %v8180_v38 = vpop.eup %8179 }
 0x1f2   :  { %v540_v40 = vsub.f32 1.0, %v8180_v38  ;;  %v610_v38 = vrot.slane %v573_v2, %v8744_v25 }
 0x1f3   :  { %v538_v37 = vadd.f32 %v537_v36, %v466_v35  ;;  %v606_v35 = vrot.slane %v570_v23, %v8744_v25  ;;  %v588_v2 = vpop.xlane.xlu1 %587  ;;  %v6852_v23 = vld [vmem:[%s10555_s2 + $0x48] sm:$0xff] }
 0x1f5   :  { %8181 = vtanh.f32 %v538_v37  ;;  %v614_v37 = vrot.slane %v576_v21, %v8744_v25  ;;  %v622_v21 = vrot.slane %v582_v26, %v8744_v25 }
 0x1ff   :  { %v8182_v42 = vpop.eup %8181 }
 0x200   :  { %v541_v44 = vmul.f32 %v8182_v42, %v540_v40  ;;  %v163_v40 = vld [vmem:[%s10555_s2 + $0x8] sm:$0xff]  ;;  %v8753_v42 = vstv %s178_s18 }
 0x201   :  { %v180_v14 = vmul.f32 %v8753_v42, %v163_v40 }
 0x202   :  { %542 = vst.msk [vmem:[#allocation2 + $0x40] sm:$0xff] %vm69_vm0, %v541_v44 }
 0x209   :  { %v8719_v47 = vld [vmem:[#allocation2 + $0x40] sm:$0xff] }
 0x20a   :  { %v557_v49 = vmul.f32 %v8608_v58, %v8719_v47 }
 0x20c   :  { %v8728_v55 = vsel %vm69_vm0, %v557_v49, 0.0 }
 0x20d   :  { %566 = vadd.xlane.f32.xlu0 %v8728_v55 }
 0x211   :  { %578 = vadd.xlane.f32.xlu0 %v8732_v61 }
 0x215   :  { %584 = vadd.xlane.f32.xlu0 %v8738_v63 }
 0x29a   :  { %v567_v31 = vpop.xlane.xlu0 %566 }
 0x29b   :  { %v602_v36 = vrot.slane %v567_v31, %v8744_v25 }
 0x29d   :  { %v632_v44 = vsel %vm631_vm1, %v606_v35, %v602_v36  ;;  %v630_v36 = vrot.slane %v588_v2, %v8744_v25 }
 0x29e   :  { %v634_v49 = vsel %vm633_vm2, %v610_v38, %v632_v44  ;;  %v579_v51 = vpop.xlane.xlu0 %578  ;;  %v187_v38 = vadd.f32 %v6852_v23, %v180_v14 }
 0x29f   :  { %v636_v62 = vsel %vm635_vm3, %v614_v37, %v634_v49  ;;  %v618_v11 = vrot.slane %v579_v51, %v8744_v25 }
 0x2a1   :  { %v638_v31 = vsel %vm637_vm4, %v618_v11, %v636_v62 }
 0x2a2   :  { %v585_v35 = vpop.xlane.xlu0 %584  ;;  %v640_v40 = vsel %vm639_vm5, %v622_v21, %v638_v31 }
 0x2a3   :  { %v626_v37 = vrot.slane %v585_v35, %v8744_v25 }
 0x2a5   :  { %v642_v44 = vsel %vm641_vm6, %v626_v37, %v640_v40 }
 0x2a6   :  { %v644_v26 = vsel %vm643_vm7, %v630_v36, %v642_v44  ;;  %v8071_v44 = vld [vmem:[%s10556_s3 + $0x40] sm:$0xff]  }
 0x2a7   :  { %v646_v49 = vadd.f32 %v644_v26, %v187_v38  ;;  %7593 = vmatpush3.bf16.msra.mxu0 %v8071_v44  ;;  %v10574_v26 = vmov 0.0  }
 0x2a8   :  { %7594 = vmatprep.subr.bf16.mxu0 %v10574_v26  ;;  %7596 = vmatprep.mubr.msk.bf16.mxu0 %vm8450_vm9, %v10574_v26 }
 0x2a9   :  { %v648_v51 = vsel %vm647_vm8, %v646_v49, -inf  ;;  %7604 = vmatprep.mubr.msk.bf16.mxu1 %vm8450_vm9, %v10574_v26 }
 0x2aa   :  { %v649_v62 = vrot.slane %v648_v51, 4 }
 0x2ac   :  { %v650_v11 = vmax.f32 %v648_v51, %v649_v62  ;;  %v8785_v62 = vsub.s32 2, %v8741_v15 }
 0x2ae   :  { %v651_v57 = vrot.slane %v650_v11, 2 }
 0x2b0   :  { %v652_v13 = vmax.f32 %v650_v11, %v651_v57  ;;  %v8776_v57 = vsub.s32 1, %v8741_v15  ;;  %v8788_v11 = vsub.s32 4, %v8741_v15 }
 0x2b2   :  { %v653_v10 = vrot.slane %v652_v13, 1 }
 0x2b4   :  { %v654_v2 = vmax.f32 %v652_v13, %v653_v10 }
 0x2b6   :  { %v655_v9 = vsub.f32 %v646_v49, %v654_v2  ;;  %v8072_v2 = vld [vmem:[%s10556_s3 + $0x48] sm:$0xff]  }
 0x2b7   :  { %7595 = vmatpush3.bf16.msra.mxu0 %v8072_v2 }
 0x2b8   :  { %v656_v35 = vmul.f32 1.442695, %v655_v9  ;;  %v8779_v9 = vsub.s32 0, %v8741_v15  ;;  %7608 = vmatprep.subr.bf16.mxu0 %v10574_v26 }
 0x2ba   :  { %8183 = vpow2.f32 %v656_v35  ;;  %v8073_v35 = vld [vmem:[%s10556_s3 + $0x50] sm:$0xff]  }
 0x2bb   :  { %7601 = vmatpush3.bf16.msra.mxu1 %v8073_v35 }
 0x2bc   :  { %7602 = vmatprep.subr.bf16.mxu1 %v10574_v26 }
 0x2c4   :  { %v8184_v14 = vpop.eup %8183 }
 0x2c5   :  { %v658_v21 = vsel %vm647_vm8, %v8184_v14, 0.0 }
 0x2c6   :  { %v659_v23 = vrot.slane %v658_v21, 4 }
 0x2c8   :  { %v660_v31 = vadd.f32 %v659_v23, %v658_v21  ;;  %v8799_v23 = vsub.s32 3, %v8741_v15 }
 0x2ca   :  { %v661_v37 = vrot.slane %v660_v31, 2 }
 0x2cc   :  { %v662_v40 = vadd.f32 %v661_v37, %v660_v31  ;;  %v8802_v31 = vsub.s32 6, %v8741_v15  ;;  %v8074_v37 = vld [vmem:[%s10556_s3 + $0x58] sm:$0xff]  }
 0x2cd   :  { %7603 = vmatpush3.bf16.msra.mxu1 %v8074_v37 }
 0x2ce   :  { %v663_v36 = vrot.slane %v662_v40, 1  ;;  %7616 = vmatprep.subr.bf16.mxu1 %v10574_v26 }
 0x2d0   :  { %v664_v38 = vadd.f32 %v663_v36, %v662_v40 }
 0x2d2   :  { %8185 = vrcp.f32 %v664_v38  ;;  %v8812_v38 = vsub.s32 5, %v8741_v15 }
 0x2dc   :  { %v8186_v10 = vpop.eup %8185 }
 0x2dd   :  { %v666_v13 = vmul.f32 %v8186_v10, %v8184_v14  ;;  %v8820_v10 = vsub.s32 7, %v8741_v15 }
 0x2df   :  { %v677_v49 = vrot.slane %v666_v13, %v8776_v57  ;;  %v670_v51 = vrot.slane %v666_v13, %v8779_v9  ;;  %v684_v14 = vrot.slane %v666_v13, %v8785_v62  ;;  %v698_v21 = vrot.slane %v666_v13, %v8788_v11 }
 0x2e0   :  { %v691_v40 = vrot.slane %v666_v13, %v8799_v23  ;;  %v712_v36 = vrot.slane %v666_v13, %v8802_v31  ;;  %v705_v44 = vrot.slane %v666_v13, %v8812_v38 }
 0x2e1   :  { %679 = vbcast.lane.b32.xlu1 %v677_v49, 256  ;;  %672 = vbcast.lane.b32.xlu0 %v670_v51, 256  ;;  %v719_v49 = vrot.slane %v666_v13, %v8820_v10 }
 0x2e5   :  { %686 = vbcast.lane.b32.xlu1 %v684_v14, 256  ;;  %700 = vbcast.lane.b32.xlu0 %v698_v21, 256 }
 0x2e9   :  { %693 = vbcast.lane.b32.xlu1 %v691_v40, 256  ;;  %714 = vbcast.lane.b32.xlu0 %v712_v36, 256 }
 0x2ed   :  { %707 = vbcast.lane.b32.xlu1 %v705_v44, 256 }
 0x2f1   :  { %721 = vbcast.lane.b32.xlu1 %v719_v49, 256 }
 0x308   :  { %953 = vadd.xlane.f32.xlu0 %v8728_v55 }
 0x30c   :  { %959 = vadd.xlane.f32.xlu0 %v8620_v0 }
 0x310   :  { %962 = vadd.xlane.f32.xlu0 %v8628_v3 }
 0x314   :  { %965 = vadd.xlane.f32.xlu0 %v8732_v61 }
 0x318   :  { %971 = vadd.xlane.f32.xlu0 %v8738_v63 }
 0x353   :  { %v680_v51 = vpop.permute.xlu1 %679  ;;  %v673_v2 = vpop.permute.xlu0 %672 }
 0x354   :  { %v724_v15 = vmul.f32 %v680_v51, %v8610_v59  ;;  %v723_v35 = vmul.f32 %v673_v2, %v8719_v47 }
 0x356   :  { %v731_v37 = vadd.f32 %v724_v15, %v723_v35  ;;  %v8075_v35 = vld [vmem:[%s10556_s3 + $0x60] sm:$0xff]  }
 0x357   :  { %v687_v14 = vpop.permute.xlu1 %686  ;;  %v701_v21 = vpop.permute.xlu0 %700 }
 0x358   :  { %v725_v13 = vmul.f32 %v687_v14, %v8612_v60  ;;  %v727_v44 = vmul.f32 %v701_v21, %v8717_v46 }
 0x35a   :  { %v732_v36 = vadd.f32 %v731_v37, %v725_v13 }
 0x35b   :  { %v694_v40 = vpop.permute.xlu1 %693  ;;  %v715_v4 = vpop.permute.xlu0 %714 }
 0x35c   :  { %v726_v0 = vmul.f32 %v694_v40, %v8623_v1  ;;  %v729_v59 = vmul.f32 %v715_v4, %v8725_v54  ;;  %v8076_v4 = vld [vmem:[%s10556_s3 + $0x68] sm:$0xff]  }
 0x35e   :  { %v733_v49 = vadd.f32 %v732_v36, %v726_v0 }
 0x35f   :  { %v708_v24 = vpop.permute.xlu1 %707 }
 0x360   :  { %v728_v50 = vmul.f32 %v708_v24, %v8631_v5  ;;  %v734_v48 = vadd.f32 %v733_v49, %v727_v44 }
 0x362   :  { %v735_v51 = vadd.f32 %v734_v48, %v728_v50 }
 0x363   :  { %v722_v2 = vpop.permute.xlu1 %721 }
 0x364   :  { %v730_v14 = vmul.f32 %v722_v2, %v8639_v8  ;;  %v736_v17 = vadd.f32 %v735_v51, %v729_v59 }
 0x366   :  { %v737_v15 = vadd.f32 %v736_v17, %v730_v14 }
 0x368   :  { %v738_v13 = vpack.c.bf16 %v737_v15, %v737_v15 }
 0x36a   :  { %7597 = vmatmul.mubr.msk.bf16.vlgmr.msra.gmra.mrb[8].mxu0 %vm69_vm0, %v738_v13  ;;  %7605 = vmatmul.mubr.msk.bf16.vlgmr.msra.gmra.mrb[24].mxu1 %vm69_vm0, %v738_v13 }
 0x36b   :  { %7609 = vmatpush3.bf16.msra.mxu0 %v8075_v35  ;;  %7612 = vmatprep.mubr.msk.bf16.mxu0 %vm8450_vm9, %v10574_v26 }
 0x36c   :  { %7610 = vmatprep.subr.bf16.mxu0 %v10574_v26  ;;  %7620 = vmatprep.mubr.msk.bf16.mxu1 %vm8450_vm9, %v10574_v26 }
 0x36f   :  { %7611 = vmatpush3.bf16.msra.mxu0 %v8076_v4 }
 0x370   :  { %7624 = vmatprep.subr.bf16.mxu0 %v10574_v26 }
 0x372   :  { %7613 = vmatmul.mubr.msk.bf16.vlgmr.msra.gmra.mrb[12].mxu0 %vm69_vm0, %v738_v13 }
 0x373   :  { %7628 = vmatprep.mubr.msk.bf16.mxu0 %vm8450_vm9, %v10574_v26 }
 0x43d   :  { %v793_v48 = vpop.f32.mrb[8].mxu0  ;;  %v850_v50 = vpop.f32.mrb[24].mxu1 }
 0x43e   :  { %v794_v17 = vadd.f32 %v8660_v20, %v793_v48  ;;  %v851_v24 = vadd.f32 %v8670_v32, %v850_v50  ;;  %v7598_v21 = vpop.f32.mrb[9].mxu0  ;;  %v7606_v37 = vpop.f32.mrb[25].mxu1 }
 0x43f   :  { %v796_v40 = vpop.f32.mrb[10].mxu0  ;;  %v853_v36 = vpop.f32.mrb[26].mxu1 }
 0x440   :  { %v913_v0 = vadd.f32 %v794_v17, %v8672_v33  ;;  %v920_v44 = vadd.f32 %v851_v24, %v8674_v34  ;;  %v7599_v49 = vpop.f32.mrb[11].mxu0  ;;  %v7607_v59 = vpop.f32.mrb[27].mxu1 }
 0x442   :  { %v6926_v51 = vmul.f32 -1.442695, %v913_v0  ;;  %v6927_v35 = vmul.f32 -1.442695, %v920_v44 }
 0x444   :  { %8187 = vpow2.f32 %v6926_v51 }
 0x445   :  { %v907_v2 = vpop.f32.mrb[12].mxu0  ;;  %8189 = vpow2.f32 %v6927_v35 }
 0x446   :  { %v7614_v14 = vpop.f32.mrb[13].mxu0  ;;  %v908_v40 = vadd.f32 %v8713_v30, %v907_v2 }
 0x447   :  { %v910_v13 = vpop.f32.mrb[14].mxu0 }
 0x448   :  { %v7615_v4 = vpop.f32.mrb[15].mxu0 }
 0x44e   :  { %v8188_v48 = vpop.eup %8187 }
 0x44f   :  { %v917_v50 = vadd.f32 1.0, %v8188_v48  ;;  %v8190_v21 = vpop.eup %8189 }
 0x450   :  { %v924_v37 = vadd.f32 1.0, %v8190_v21  ;;  %v164_v21 = vld [vmem:[%s10555_s2 + $0x10] sm:$0xff] }
 0x451   :  { %8191 = vrcp.f32 %v917_v50 }
 0x452   :  { %8193 = vrcp.f32 %v924_v37 }
 0x45b   :  { %v8192_v33 = vpop.eup %8191 }
 0x45c   :  { %v927_v34 = vmul.f32 %v8192_v33, %v908_v40  ;;  %v8194_v24 = vpop.eup %8193 }
 0x45d   :  { %v930_v36 = vsub.f32 1.0, %v8194_v24  ;;  %v932_v44 = vmul.f32 %v8194_v24, %v737_v15 }
 0x45e   :  { %v928_v17 = vadd.f32 %v927_v34, %v8700_v16  ;;  %v954_v16 = vpop.xlane.xlu0 %953 }
 0x45f   :  { %v987_v48 = vrot.slane %v954_v16, %v8744_v25 }
 0x460   :  { %8195 = vtanh.f32 %v928_v17 }
 0x462   :  { %v960_v15 = vpop.xlane.xlu0 %959 }
 0x463   :  { %v995_v37 = vrot.slane %v960_v15, %v8744_v25 }
 0x466   :  { %v963_v35 = vpop.xlane.xlu0 %962 }
 0x467   :  { %v999_v33 = vrot.slane %v963_v35, %v8744_v25 }
 0x46a   :  { %v8196_v0 = vpop.eup %8195  ;;  %v966_v13 = vpop.xlane.xlu0 %965 }
 0x46b   :  { %v931_v49 = vmul.f32 %v8196_v0, %v930_v36  ;;  %v1003_v40 = vrot.slane %v966_v13, %v8744_v25  ;;  %v181_v0 = vmul.f32 %v8753_v42, %v164_v21 }
 0x46d   :  { %v933_v59 = vadd.f32 %v932_v44, %v931_v49 }
 0x46e   :  { %v972_v17 = vpop.xlane.xlu0 %971 }
 0x46f   :  { %935 = vst.msk [vmem:[#allocation2 + $0x48] sm:$0xff] %vm69_vm0, %v933_v59  ;;  %v6853_v59 = vld [vmem:[%s10555_s2 + $0x50] sm:$0xff]  ;;  %v1011_v16 = vrot.slane %v972_v17, %v8744_v25 }
 0x470   :  { %v188_v35 = vadd.f32 %v6853_v59, %v181_v0 }
 0x476   :  { %v8861_v51 = vld [vmem:[#allocation2 + $0x48] sm:$0xff] }
 0x477   :  { %v945_v14 = vmul.f32 %v8608_v58, %v8861_v51 }
 0x479   :  { %v8866_v2 = vsel %vm69_vm0, %v945_v14, 0.0 }
 0x47a   :  { %956 = vadd.xlane.f32.xlu1 %v8866_v2 }
 0x47e   :  { %968 = vadd.xlane.f32.xlu1 %v8636_v7 }
 0x482   :  { %974 = vadd.xlane.f32.xlu1 %v8644_v12 }
 0x507   :  { %v957_v4 = vpop.xlane.xlu1 %956 }
 0x508   :  { %v991_v50 = vrot.slane %v957_v4, %v8744_v25 }
 0x50a   :  { %v1016_v34 = vsel %vm631_vm1, %v991_v50, %v987_v48 }
 0x50b   :  { %v1017_v24 = vsel %vm633_vm2, %v995_v37, %v1016_v34  ;;  %v969_v36 = vpop.xlane.xlu1 %968 }
 0x50c   :  { %v1018_v44 = vsel %vm635_vm3, %v999_v33, %v1017_v24  ;;  %v1007_v49 = vrot.slane %v969_v36, %v8744_v25 }
 0x50d   :  { %v1019_v14 = vsel %vm637_vm4, %v1003_v40, %v1018_v44 }
 0x50e   :  { %v1020_v15 = vsel %vm639_vm5, %v1007_v49, %v1019_v14 }
 0x50f   :  { %v975_v13 = vpop.xlane.xlu1 %974  ;;  %v1021_v48 = vsel %vm641_vm6, %v1011_v16, %v1020_v15 }
 0x510   :  { %v1015_v4 = vrot.slane %v975_v13, %v8744_v25 }
 0x512   :  { %v1022_v50 = vsel %vm643_vm7, %v1015_v4, %v1021_v48 }
 0x513   :  { %v1024_v21 = vadd.f32 %v1022_v50, %v188_v35 }
 0x515   :  { %v1025_v37 = vsel %vm647_vm8, %v1024_v21, -inf }
 0x516   :  { %v1026_v33 = vrot.slane %v1025_v37, 4 }
 0x518   :  { %v1027_v34 = vmax.f32 %v1025_v37, %v1026_v33 }
 0x51a   :  { %v1028_v24 = vrot.slane %v1027_v34, 2 }
 0x51c   :  { %v1029_v36 = vmax.f32 %v1027_v34, %v1028_v24  ;;  %v8079_v24 = vld [vmem:[%s10556_s3 + $0x48] sm:$0xff]  }
 0x51e   :  { %v1030_v40 = vrot.slane %v1029_v36, 1 }
 0x520   :  { %v1031_v44 = vmax.f32 %v1029_v36, %v1030_v40  ;;  %v8080_v36 = vld [vmem:[%s10556_s3 + $0x58] sm:$0xff]  }
 0x522   :  { %v1032_v17 = vsub.f32 %v1024_v21, %v1031_v44  ;;  %v8078_v21 = vld [vmem:[%s10556_s3 + $0x50] sm:$0xff]  }
 0x523   :  { %7625 = vmatpush3.bf16.msra.mxu0 %v8078_v21 }
 0x524   :  { %v1033_v41 = vmul.f32 1.442695, %v1032_v17  ;;  %7626 = vmatprep.subr.bf16.mxu0 %v10574_v26 }
 0x526   :  { %8197 = vpow2.f32 %v1033_v41  ;;  %v8077_v41 = vld [vmem:[%s10556_s3 + $0x40] sm:$0xff]  }
 0x527   :  { %7617 = vmatpush3.bf16.msra.mxu1 %v8077_v41  ;;  %7627 = vmatpush3.bf16.msra.mxu0 %v8080_v36 }
 0x528   :  { %7618 = vmatprep.subr.bf16.mxu1 %v10574_v26  ;;  %7640 = vmatprep.subr.bf16.mxu0 %v10574_v26 }
 0x52b   :  { %7619 = vmatpush3.bf16.msra.mxu1 %v8079_v24 }
 0x52c   :  { %7632 = vmatprep.subr.bf16.mxu1 %v10574_v26 }
 0x530   :  { %v8198_v0 = vpop.eup %8197 }
 0x531   :  { %v1035_v49 = vsel %vm647_vm8, %v8198_v0, 0.0 }
 0x532   :  { %v1036_v59 = vrot.slane %v1035_v49, 4 }
 0x534   :  { %v1037_v14 = vadd.f32 %v1036_v59, %v1035_v49 }
 0x536   :  { %v1038_v16 = vrot.slane %v1037_v14, 2 }
 0x538   :  { %v1039_v15 = vadd.f32 %v1038_v16, %v1037_v14 }
 0x53a   :  { %v1040_v13 = vrot.slane %v1039_v15, 1 }
 0x53c   :  { %v1041_v35 = vadd.f32 %v1040_v13, %v1039_v15 }
 0x53e   :  { %8199 = vrcp.f32 %v1041_v35 }
 0x548   :  { %v8200_v4 = vpop.eup %8199 }
 0x549   :  { %v1043_v48 = vmul.f32 %v8200_v4, %v8198_v0 }
 0x54b   :  { %v1054_v50 = vrot.slane %v1043_v48, %v8776_v57  ;;  %v1047_v37 = vrot.slane %v1043_v48, %v8779_v9  ;;  %v1061_v33 = vrot.slane %v1043_v48, %v8785_v62  ;;  %v1075_v34 = vrot.slane %v1043_v48, %v8788_v11 }
 0x54c   :  { %v1068_v40 = vrot.slane %v1043_v48, %v8799_v23  ;;  %v1089_v44 = vrot.slane %v1043_v48, %v8802_v31  ;;  %v1082_v17 = vrot.slane %v1043_v48, %v8812_v38  ;;  %v1096_v0 = vrot.slane %v1043_v48, %v8820_v10 }
 0x54d   :  { %1056 = vbcast.lane.b32.xlu1 %v1054_v50, 256  ;;  %1049 = vbcast.lane.b32.xlu0 %v1047_v37, 256 }
 0x551   :  { %1063 = vbcast.lane.b32.xlu1 %v1061_v33, 256  ;;  %1077 = vbcast.lane.b32.xlu0 %v1075_v34, 256 }
 0x555   :  { %1070 = vbcast.lane.b32.xlu1 %v1068_v40, 256  ;;  %1091 = vbcast.lane.b32.xlu0 %v1089_v44, 256 }
 0x559   :  { %1084 = vbcast.lane.b32.xlu1 %v1082_v17, 256 }
 0x55d   :  { %1098 = vbcast.lane.b32.xlu1 %v1096_v0, 256 }
 0x574   :  { %1327 = vadd.xlane.f32.xlu0 %v8728_v55 }
 0x578   :  { %1336 = vadd.xlane.f32.xlu0 %v8628_v3 }
 0x57c   :  { %1339 = vadd.xlane.f32.xlu0 %v8732_v61 }
 0x581   :  { %1330 = vadd.xlane.f32.xlu1 %v8866_v2 }
 0x585   :  { %1342 = vadd.xlane.f32.xlu1 %v8636_v7 }
 0x589   :  { %1348 = vadd.xlane.f32.xlu1 %v8644_v12 }
 0x5bf   :  { %v1057_v49 = vpop.permute.xlu1 %1056  ;;  %v1050_v59 = vpop.permute.xlu0 %1049 }
 0x5c0   :  { %v1101_v14 = vmul.f32 %v1057_v49, %v8861_v51  ;;  %v1100_v16 = vmul.f32 %v1050_v59, %v8719_v47 }
 0x5c2   :  { %v1108_v4 = vadd.f32 %v1101_v14, %v1100_v16 }
 0x5c3   :  { %v1064_v15 = vpop.permute.xlu1 %1063  ;;  %v1078_v35 = vpop.permute.xlu0 %1077 }
 0x5c4   :  { %v1102_v13 = vmul.f32 %v1064_v15, %v8612_v60  ;;  %v1104_v50 = vmul.f32 %v1078_v35, %v8717_v46 }
 0x5c6   :  { %v1109_v48 = vadd.f32 %v1108_v4, %v1102_v13 }
 0x5c7   :  { %v1071_v3 = vpop.permute.xlu1 %1070  ;;  %v1092_v37 = vpop.permute.xlu0 %1091 }
 0x5c8   :  { %v1103_v61 = vmul.f32 %v1071_v3, %v8623_v1  ;;  %v1106_v33 = vmul.f32 %v1092_v37, %v8725_v54  ;;  %v8081_v1 = vld [vmem:[%s10556_s3 + $0x60] sm:$0xff]  }
 0x5ca   :  { %v1110_v7 = vadd.f32 %v1109_v48, %v1103_v61 }
 0x5cb   :  { %v1085_v12 = vpop.permute.xlu1 %1084 }
 0x5cc   :  { %v1105_v41 = vmul.f32 %v1085_v12, %v8631_v5  ;;  %v1111_v21 = vadd.f32 %v1110_v7, %v1104_v50  ;;  %v8082_v5 = vld [vmem:[%s10556_s3 + $0x68] sm:$0xff]  }
 0x5ce   :  { %v1112_v34 = vadd.f32 %v1111_v21, %v1105_v41 }
 0x5cf   :  { %v1099_v24 = vpop.permute.xlu1 %1098 }
 0x5d0   :  { %v1107_v60 = vmul.f32 %v1099_v24, %v8639_v8  ;;  %v1113_v36 = vadd.f32 %v1112_v34, %v1106_v33 }
 0x5d2   :  { %v1114_v40 = vadd.f32 %v1113_v36, %v1107_v60 }
 0x5d4   :  { %v1115_v44 = vpack.c.bf16 %v1114_v40, %v1114_v40 }
 0x5d6   :  { %7621 = vmatmul.mubr.msk.bf16.vlgmr.msra.gmra.mrb[28].mxu1 %vm69_vm0, %v1115_v44  ;;  %7629 = vmatmul.mubr.msk.bf16.vlgmr.msra.gmra.mrb[16].mxu0 %vm69_vm0, %v1115_v44 }
 0x5d7   :  { %7633 = vmatpush3.bf16.msra.mxu1 %v8081_v1  ;;  %7636 = vmatprep.mubr.msk.bf16.mxu1 %vm8450_vm9, %v10574_v26 }
 0x5d8   :  { %7634 = vmatprep.subr.bf16.mxu1 %v10574_v26  ;;  %7644 = vmatprep.mubr.msk.bf16.mxu0 %vm8450_vm9, %v10574_v26 }
 0x5db   :  { %7635 = vmatpush3.bf16.msra.mxu1 %v8082_v5 }
 0x5dc   :  { %7648 = vmatprep.subr.bf16.mxu1 %v10574_v26 }
 0x5de   :  { %7637 = vmatmul.mubr.msk.bf16.vlgmr.msra.gmra.mrb[32].mxu1 %vm69_vm0, %v1115_v44 }
 0x5df   :  { %7652 = vmatprep.mubr.msk.bf16.mxu1 %vm8450_vm9, %v10574_v26 }
 0x6a9   :  { %v1169_v8 = vpop.f32.mrb[28].mxu1  ;;  %v1225_v17 = vpop.f32.mrb[16].mxu0 }
 0x6aa   :  { %v1170_v0 = vadd.f32 %v8660_v20, %v1169_v8  ;;  %v1226_v49 = vadd.f32 %v8670_v32, %v1225_v17  ;;  %v7622_v59 = vpop.f32.mrb[29].mxu1  ;;  %v7630_v14 = vpop.f32.mrb[17].mxu0 }
 0x6ab   :  { %v1172_v16 = vpop.f32.mrb[30].mxu1  ;;  %v1228_v15 = vpop.f32.mrb[18].mxu0 }
 0x6ac   :  { %v1287_v13 = vadd.f32 %v1170_v0, %v8653_v18  ;;  %v1294_v35 = vadd.f32 %v1226_v49, %v8655_v19  ;;  %v7623_v4 = vpop.f32.mrb[31].mxu1  ;;  %v7631_v3 = vpop.f32.mrb[19].mxu0  ;;  %v165_v16 = vld [vmem:[%s10555_s2 + $0x18] sm:$0xff] }
 0x6ad   :  { %v1331_v49 = vpop.xlane.xlu1 %1330 }
 0x6ae   :  { %v6949_v48 = vmul.f32 -1.442695, %v1287_v13  ;;  %v6950_v7 = vmul.f32 -1.442695, %v1294_v35  ;;  %v1365_v14 = vrot.slane %v1331_v49, %v8744_v25  ;;  %v182_v35 = vmul.f32 %v8753_v42, %v165_v16 }
 0x6b0   :  { %8201 = vpow2.f32 %v6949_v48  ;;  %v6854_v48 = vld [vmem:[%s10555_s2 + $0x58] sm:$0xff] }
 0x6b1   :  { %v1281_v61 = vpop.f32.mrb[32].mxu1  ;;  %8203 = vpow2.f32 %v6950_v7  ;;  %v1343_v59 = vpop.xlane.xlu1 %1342 }
 0x6b2   :  { %v7638_v50 = vpop.f32.mrb[33].mxu1  ;;  %v1282_v33 = vadd.f32 %v8713_v30, %v1281_v61 }
 0x6b3   :  { %v1284_v37 = vpop.f32.mrb[34].mxu1 }
 0x6b4   :  { %v7639_v12 = vpop.f32.mrb[35].mxu1  ;;  %v1381_v37 = vrot.slane %v1343_v59, %v8744_v25 }
 0x6b5   :  { %v1349_v4 = vpop.xlane.xlu1 %1348 }
 0x6ba   :  { %v8202_v20 = vpop.eup %8201 }
 0x6bb   :  { %v1291_v32 = vadd.f32 1.0, %v8202_v20  ;;  %v8204_v41 = vpop.eup %8203  ;;  %v1389_v20 = vrot.slane %v1349_v4, %v8744_v25 }
 0x6bc   :  { %v1298_v21 = vadd.f32 1.0, %v8204_v41 }
 0x6bd   :  { %8205 = vrcp.f32 %v1291_v32 }
 0x6be   :  { %8207 = vrcp.f32 %v1298_v21  ;;  %v189_v21 = vadd.f32 %v6854_v48, %v182_v35  ;;  %v8083_v48 = vld [vmem:[%s10556_s3 + $0x40] sm:$0xff]  }
 0x6bf   :  { %7641 = vmatpush3.bf16.msra.mxu0 %v8083_v48  ;;  %v9043_v48 = vld [vmem:[#allocation2 + $0x60] sm:$0xff] }
 0x6c0   :  { %7642 = vmatprep.subr.bf16.mxu0 %v10574_v26 }
 0x6c7   :  { %v8206_v18 = vpop.eup %8205 }
 0x6c8   :  { %v1301_v19 = vmul.f32 %v8206_v18, %v1282_v33  ;;  %v8208_v24 = vpop.eup %8207 }
 0x6c9   :  { %v1304_v60 = vsub.f32 1.0, %v8208_v24  ;;  %v1306_v1 = vmul.f32 %v8208_v24, %v1114_v40 }
 0x6ca   :  { %v1302_v34 = vadd.f32 %v1301_v19, %v8696_v56  ;;  %v1328_v56 = vpop.xlane.xlu0 %1327 }
 0x6cc   :  { %8209 = vtanh.f32 %v1302_v34 }
 0x6ce   :  { %v1337_v0 = vpop.xlane.xlu0 %1336 }
 0x6cf   :  { %v1373_v3 = vrot.slane %v1337_v0, %v8744_v25 }
 0x6d2   :  { %v1340_v40 = vpop.xlane.xlu0 %1339 }
 0x6d3   :  { %v1377_v61 = vrot.slane %v1340_v40, %v8744_v25 }
 0x6d6   :  { %v8210_v36 = vpop.eup %8209 }
 0x6d7   :  { %v1305_v44 = vmul.f32 %v8210_v36, %v1304_v60 }
 0x6d9   :  { %v1307_v5 = vadd.f32 %v1306_v1, %v1305_v44 }
 0x6db   :  { %1309 = vst.msk [vmem:[#allocation2 + $0x50] sm:$0xff] %vm69_vm0, %v1307_v5 }
 0x6e2   :  { %v8957_v8 = vld [vmem:[#allocation2 + $0x50] sm:$0xff] }
 0x6e3   :  { %v1320_v17 = vmul.f32 %v8608_v58, %v8957_v8  ;;  %v1361_v58 = vrot.slane %v1328_v56, %v8744_v25 }
 0x6e5   :  { %v8962_v30 = vsel %vm69_vm0, %v1320_v17, 0.0 }
 0x6e6   :  { %1333 = vadd.xlane.f32.xlu0 %v8962_v30 }
 0x6ea   :  { %1345 = vadd.xlane.f32.xlu0 %v8738_v63  ;;  %v1390_v63 = vsel %vm631_vm1, %v1365_v14, %v1361_v58 }
 0x773   :  { %v1334_v15 = vpop.xlane.xlu0 %1333 }
 0x774   :  { %v1369_v13 = vrot.slane %v1334_v15, %v8744_v25 }
 0x776   :  { %v1391_v50 = vsel %vm633_vm2, %v1369_v13, %v1390_v63 }
 0x777   :  { %v1392_v7 = vsel %vm635_vm3, %v1373_v3, %v1391_v50  ;;  %v1346_v12 = vpop.xlane.xlu0 %1345 }
 0x778   :  { %v1393_v32 = vsel %vm637_vm4, %v1377_v61, %v1392_v7  ;;  %v1385_v41 = vrot.slane %v1346_v12, %v8744_v25  ;;  %v8084_v61 = vld [vmem:[%s10556_s3 + $0x50] sm:$0xff]   ;;  %v8086_v12 = vld [vmem:[%s10556_s3 + $0x58] sm:$0xff]  }
 0x779   :  { %v1394_v33 = vsel %vm639_vm5, %v1381_v37, %v1393_v32  ;;  %7649 = vmatpush3.bf16.msra.mxu1 %v8084_v61  ;;  %v8085_v37 = vld [vmem:[%s10556_s3 + $0x48] sm:$0xff]   ;;  %v9048_v61 = vld [vmem:[%s10557_s4 + $0x7] ss:$0 sm:$0xff] }
 0x77a   :  { %v1395_v18 = vsel %vm641_vm6, %v1385_v41, %v1394_v33  ;;  %7650 = vmatprep.subr.bf16.mxu1 %v10574_v26  ;;  %7643 = vmatpush3.bf16.msra.mxu0 %v8085_v37  ;;  %v9053_v37 = vld [vmem:[#allocation2 + $0x68] sm:$0xff] }
 0x77b   :  { %v1396_v19 = vsel %vm643_vm7, %v1389_v20, %v1395_v18  ;;  %7656 = vmatprep.subr.bf16.mxu0 %v10574_v26 }
 0x77c   :  { %v1398_v34 = vadd.f32 %v1396_v19, %v189_v21 }
 0x77d   :  { %7651 = vmatpush3.bf16.msra.mxu1 %v8086_v12  ;;  %v1697_v12 = vmul.f32 %v9048_v61, %v9053_v37 }
 0x77e   :  { %v1399_v24 = vsel %vm647_vm8, %v1398_v34, -inf  ;;  %7664 = vmatprep.subr.bf16.mxu1 %v10574_v26 }
 0x77f   :  { %v1400_v60 = vrot.slane %v1399_v24, 4 }
 0x781   :  { %v1401_v36 = vmax.f32 %v1399_v24, %v1400_v60 }
 0x783   :  { %v1402_v1 = vrot.slane %v1401_v36, 2 }
 0x785   :  { %v1403_v44 = vmax.f32 %v1401_v36, %v1402_v1 }
 0x787   :  { %v1404_v5 = vrot.slane %v1403_v44, 1 }
 0x789   :  { %v1405_v17 = vmax.f32 %v1403_v44, %v1404_v5 }
 0x78b   :  { %v1406_v56 = vsub.f32 %v1398_v34, %v1405_v17  ;;  %v8389_v17 = vld [vmem:[#allocation2 + $0x58] sm:$0xff] }
 0x78d   :  { %v1407_v0 = vmul.f32 1.442695, %v1406_v56 }
 0x78f   :  { %8211 = vpow2.f32 %v1407_v0 }
 0x799   :  { %v8212_v49 = vpop.eup %8211 }
 0x79a   :  { %v1409_v40 = vsel %vm647_vm8, %v8212_v49, 0.0 }
 0x79b   :  { %v1410_v59 = vrot.slane %v1409_v40, 4 }
 0x79d   :  { %v1411_v14 = vadd.f32 %v1410_v59, %v1409_v40  ;;  %v8390_v59 = vld [vmem:[#allocation2 + $0x68] sm:$0xff] }
 0x79f   :  { %v1412_v16 = vrot.slane %v1411_v14, 2 }
 0x7a1   :  { %v1413_v58 = vadd.f32 %v1412_v16, %v1411_v14 }
 0x7a3   :  { %v1414_v15 = vrot.slane %v1413_v58, 1 }
 0x7a5   :  { %v1415_v13 = vadd.f32 %v1414_v15, %v1413_v58 }
 0x7a7   :  { %8213 = vrcp.f32 %v1415_v13  ;;  %v8391_v13 = vld [vmem:[#allocation2 + $0x78] sm:$0xff] }
 0x7b1   :  { %v8214_v35 = vpop.eup %8213 }
 0x7b2   :  { %v1417_v4 = vmul.f32 %v8214_v35, %v8212_v49 }
 0x7b4   :  { %v1428_v63 = vrot.slane %v1417_v4, %v8776_v57  ;;  %v1421_v3 = vrot.slane %v1417_v4, %v8779_v9  ;;  %v1435_v50 = vrot.slane %v1417_v4, %v8785_v62  ;;  %v1449_v7 = vrot.slane %v1417_v4, %v8788_v11 }
 0x7b5   :  { %v1442_v20 = vrot.slane %v1417_v4, %v8799_v23  ;;  %v1463_v32 = vrot.slane %v1417_v4, %v8802_v31  ;;  %v1456_v41 = vrot.slane %v1417_v4, %v8812_v38  ;;  %v1470_v21 = vrot.slane %v1417_v4, %v8820_v10 }
 0x7b6   :  { %1430 = vbcast.lane.b32.xlu1 %v1428_v63, 256  ;;  %1423 = vbcast.lane.b32.xlu0 %v1421_v3, 256  ;;  %v8087_v3 = vld [vmem:[%s10556_s3 + $0x60] sm:$0xff]  }
 0x7ba   :  { %1437 = vbcast.lane.b32.xlu1 %v1435_v50, 256  ;;  %1451 = vbcast.lane.b32.xlu0 %v1449_v7, 256  ;;  %v1696_v50 = vmul.f32 %v9048_v61, %v9043_v48 }
 0x7bc   :  { %v1712_v7 = vsel %vm69_vm0, %v1696_v50, 0.0 }
 0x7be   :  { %1444 = vbcast.lane.b32.xlu1 %v1442_v20, 256  ;;  %1465 = vbcast.lane.b32.xlu0 %v1463_v32, 256  ;;  %v9058_v20 = vsel %vm69_vm0, %v1697_v12, 0.0  ;;  %v9061_v32 = vld [vmem:[#allocation2 + $0x78] sm:$0xff] }
 0x7c2   :  { %1458 = vbcast.lane.b32.xlu1 %v1456_v41, 256  ;;  %v1699_v41 = vmul.f32 %v9048_v61, %v9061_v32 }
 0x7c6   :  { %1472 = vbcast.lane.b32.xlu1 %v1470_v21, 256  ;;  %v9066_v21 = vsel %vm69_vm0, %v1699_v41, 0.0 }
 0x7dd   :  { %1701 = vadd.xlane.f32.xlu0 %v8728_v55 }
 0x7e1   :  { %1707 = vadd.xlane.f32.xlu0 %v8962_v30 }
 0x7e5   :  { %1713 = vadd.xlane.f32.xlu0 %v1712_v7 }
 0x7ea   :  { %1704 = vadd.xlane.f32.xlu1 %v8866_v2 }
 0x7ee   :  { %1716 = vadd.xlane.f32.xlu1 %v9058_v20 }
 0x7f2   :  { %1722 = vadd.xlane.f32.xlu1 %v9066_v21 }
 0x828   :  { %v1431_v33 = vpop.permute.xlu1 %1430  ;;  %v1424_v18 = vpop.permute.xlu0 %1423 }
 0x829   :  { %v1475_v19 = vmul.f32 %v1431_v33, %v8861_v51  ;;  %v1474_v34 = vmul.f32 %v1424_v18, %v8719_v47 }
 0x82b   :  { %v1482_v1 = vadd.f32 %v1475_v19, %v1474_v34  ;;  %v9072_v19 = vld [vmem:[%s10557_s4 + $0x4] ss:$0 sm:$0xff] }
 0x82c   :  { %v1438_v24 = vpop.permute.xlu1 %1437  ;;  %v1452_v36 = vpop.permute.xlu0 %1451 }
 0x82d   :  { %v1476_v60 = vmul.f32 %v1438_v24, %v8957_v8  ;;  %v1478_v55 = vmul.f32 %v1452_v36, %v8717_v46  ;;  %v9078_v24 = vld [vmem:[%s10557_s4 + $0x5] ss:$0 sm:$0xff] }
 0x82f   :  { %v1483_v5 = vadd.f32 %v1482_v1, %v1476_v60 }
 0x830   :  { %v1445_v44 = vpop.permute.xlu1 %1444  ;;  %v1466_v49 = vpop.permute.xlu0 %1465 }
 0x831   :  { %v1477_v56 = vmul.f32 %v8389_v17, %v1445_v44  ;;  %v1480_v58 = vmul.f32 %v1466_v49, %v8725_v54  ;;  %v8088_v54 = vld [vmem:[%s10556_s3 + $0x68] sm:$0xff]  }
 0x833   :  { %v1484_v0 = vadd.f32 %v1483_v5, %v1477_v56 }
 0x834   :  { %v1459_v40 = vpop.permute.xlu1 %1458 }
 0x835   :  { %v1479_v14 = vmul.f32 %v8390_v59, %v1459_v40  ;;  %v1485_v16 = vadd.f32 %v1484_v0, %v1478_v55 }
 0x837   :  { %v1486_v47 = vadd.f32 %v1485_v16, %v1479_v14 }
 0x838   :  { %v1473_v15 = vpop.permute.xlu1 %1472 }
 0x839   :  { %v1481_v35 = vmul.f32 %v8391_v13, %v1473_v15  ;;  %v1487_v4 = vadd.f32 %v1486_v47, %v1480_v58 }
 0x83b   :  { %v9022_v63 = vadd.f32 %v1487_v4, %v1481_v35 }
 0x83d   :  { %v1489_v46 = vpack.c.bf16 %v9022_v63, %v9022_v63 }
 0x83f   :  { %7645 = vmatmul.mubr.msk.bf16.vlgmr.msra.gmra.mrb[20].mxu0 %vm69_vm0, %v1489_v46  ;;  %7653 = vmatmul.mubr.msk.bf16.vlgmr.msra.gmra.mrb[36].mxu1 %vm69_vm0, %v1489_v46 }
 0x840   :  { %7657 = vmatpush3.bf16.msra.mxu0 %v8087_v3  ;;  %7660 = vmatprep.mubr.msk.bf16.mxu0 %vm8450_vm9, %v10574_v26 }
 0x841   :  { %7658 = vmatprep.subr.bf16.mxu0 %v10574_v26  ;;  %7668 = vmatprep.mubr.msk.bf16.mxu1 %vm8450_vm9, %v10574_v26 }
 0x844   :  { %7659 = vmatpush3.bf16.msra.mxu0 %v8088_v54 }
 0x845   :  { %7672 = vmatprep.subr.bf16.mxu0 %v10574_v26 }
 0x847   :  { %7661 = vmatmul.mubr.msk.bf16.vlgmr.msra.gmra.mrb[24].mxu0 %vm69_vm0, %v1489_v46 }
 0x848   :  { %7676 = vmatprep.mubr.msk.bf16.mxu0 %vm8450_vm9, %v10574_v26 }
 0x912   :  { %v1543_v33 = vpop.f32.mrb[20].mxu0  ;;  %v1599_v18 = vpop.f32.mrb[36].mxu1 }
 0x913   :  { %v1544_v34 = vadd.f32 %v9072_v19, %v1543_v33  ;;  %v1600_v60 = vadd.f32 %v9078_v24, %v1599_v18  ;;  %v7646_v36 = vpop.f32.mrb[21].mxu0  ;;  %v7654_v1 = vpop.f32.mrb[37].mxu1  ;;  %v9092_v18 = vld [vmem:[#allocation2 + $0x70] sm:$0xff] }
 0x914   :  { %v1546_v44 = vpop.f32.mrb[22].mxu0  ;;  %v1602_v5 = vpop.f32.mrb[38].mxu1 }
 0x915   :  { %v1661_v17 = vadd.f32 %v1544_v34, %v8662_v27  ;;  %v1668_v56 = vadd.f32 %v1600_v60, %v8664_v28  ;;  %v7647_v55 = vpop.f32.mrb[23].mxu0  ;;  %v7655_v0 = vpop.f32.mrb[39].mxu1  ;;  %v9086_v27 = vld [vmem:[%s10557_s4 + $0x6] ss:$0 sm:$0xff] }
 0x916   :  { %v1702_v1 = vpop.xlane.xlu0 %1701  ;;  %v1705_v5 = vpop.xlane.xlu1 %1704 }
 0x917   :  { %v6972_v49 = vmul.f32 -1.442695, %v1661_v17  ;;  %v6973_v14 = vmul.f32 -1.442695, %v1668_v56  ;;  %v1739_v56 = vrot.slane %v1705_v5, %v8744_v25  ;;  %v1735_v0 = vrot.slane %v1702_v1, %v8744_v25 }
 0x919   :  { %8215 = vpow2.f32 %v6972_v49  ;;  %v166_v49 = vld [vmem:[%s10555_s2 + $0x20] sm:$0xff] }
 0x91a   :  { %v1655_v40 = vpop.f32.mrb[24].mxu0  ;;  %8217 = vpow2.f32 %v6973_v14  ;;  %v1708_v44 = vpop.xlane.xlu0 %1707 }
 0x91b   :  { %v7662_v59 = vpop.f32.mrb[25].mxu0  ;;  %v1656_v28 = vadd.f32 %v9086_v27, %v1655_v40  ;;  %v1717_v55 = vpop.xlane.xlu1 %1716  ;;  %v1764_v40 = vsel %vm631_vm1, %v1739_v56, %v1735_v0 }
 0x91c   :  { %v1658_v16 = vpop.f32.mrb[26].mxu0  ;;  %v1743_v59 = vrot.slane %v1708_v44, %v8744_v25 }
 0x91d   :  { %v7663_v58 = vpop.f32.mrb[27].mxu0 }
 0x91e   :  { %v1714_v17 = vpop.xlane.xlu0 %1713  ;;  %v1755_v58 = vrot.slane %v1717_v55, %v8744_v25 }
 0x923   :  { %v8216_v47 = vpop.eup %8215 }
 0x924   :  { %v1665_v15 = vadd.f32 1.0, %v8216_v47  ;;  %v8218_v13 = vpop.eup %8217  ;;  %v183_v47 = vmul.f32 %v8753_v42, %v166_v49 }
 0x925   :  { %v1672_v35 = vadd.f32 1.0, %v8218_v13  ;;  %v1751_v13 = vrot.slane %v1714_v17, %v8744_v25 }
 0x926   :  { %8219 = vrcp.f32 %v1665_v15  ;;  %v1723_v15 = vpop.xlane.xlu1 %1722 }
 0x927   :  { %8221 = vrcp.f32 %v1672_v35  ;;  %v1765_v35 = vsel %vm633_vm2, %v1743_v59, %v1764_v40 }
 0x930   :  { %v8220_v4 = vpop.eup %8219 }
 0x931   :  { %v1675_v3 = vmul.f32 %v8220_v4, %v1656_v28  ;;  %v8222_v54 = vpop.eup %8221  ;;  %v6855_v28 = vld [vmem:[%s10555_s2 + $0x60] sm:$0xff] }
 0x932   :  { %v1678_v50 = vsub.f32 1.0, %v8222_v54  ;;  %v1680_v12 = vmul.f32 %v8222_v54, %v9022_v63  ;;  %v1763_v54 = vrot.slane %v1723_v15, %v8744_v25 }
 0x933   :  { %v1676_v46 = vadd.f32 %v1675_v3, %v8698_v6  ;;  %v1698_v6 = vmul.f32 %v9048_v61, %v9092_v18 }
 0x935   :  { %8223 = vtanh.f32 %v1676_v46  ;;  %v9105_v63 = vsel %vm69_vm0, %v1698_v6, 0.0 }
 0x93f   :  { %v8224_v7 = vpop.eup %8223 }
 0x940   :  { %v1679_v41 = vmul.f32 %v8224_v7, %v1678_v50 }
 0x942   :  { %v1681_v33 = vadd.f32 %v1680_v12, %v1679_v41  ;;  %v190_v12 = vadd.f32 %v6855_v28, %v183_v47 }
 0x944   :  { %1683 = vst.msk [vmem:[#allocation2 + $0x58] sm:$0xff] %vm69_vm0, %v1681_v33 }
 0x94b   :  { %v9094_v34 = vld [vmem:[#allocation2 + $0x58] sm:$0xff] }
 0x94c   :  { %v1695_v60 = vmul.f32 %v9048_v61, %v9094_v34 }
 0x94e   :  { %v9101_v36 = vsel %vm69_vm0, %v1695_v60, 0.0 }
 0x94f   :  { %1710 = vadd.xlane.f32.xlu0 %v9101_v36 }
 0x953   :  { %1719 = vadd.xlane.f32.xlu0 %v9105_v63 }
 0x9dc   :  { %v1711_v14 = vpop.xlane.xlu0 %1710 }
 0x9dd   :  { %v1747_v16 = vrot.slane %v1711_v14, %v8744_v25 }
 0x9df   :  { %v1766_v4 = vsel %vm635_vm3, %v1747_v16, %v1765_v35 }
 0x9e0   :  { %v1767_v3 = vsel %vm637_vm4, %v1751_v13, %v1766_v4  ;;  %v1720_v46 = vpop.xlane.xlu0 %1719 }
 0x9e1   :  { %v1768_v50 = vsel %vm639_vm5, %v1755_v58, %v1767_v3  ;;  %v1759_v7 = vrot.slane %v1720_v46, %v8744_v25  ;;  %v8089_v46 = vld [vmem:[%s10556_s3 + $0x40] sm:$0xff]  }
 0x9e2   :  { %7665 = vmatpush3.bf16.msra.mxu1 %v8089_v46 }
 0x9e3   :  { %v1769_v41 = vsel %vm641_vm6, %v1759_v7, %v1768_v50  ;;  %7666 = vmatprep.subr.bf16.mxu1 %v10574_v26 }
 0x9e4   :  { %v1770_v33 = vsel %vm643_vm7, %v1763_v54, %v1769_v41  ;;  %v8090_v54 = vld [vmem:[%s10556_s3 + $0x50] sm:$0xff]   ;;  %v8092_v41 = vld [vmem:[%s10556_s3 + $0x58] sm:$0xff]  }
 0x9e5   :  { %v1772_v60 = vadd.f32 %v1770_v33, %v190_v12  ;;  %7673 = vmatpush3.bf16.msra.mxu0 %v8090_v54  ;;  %v8091_v12 = vld [vmem:[%s10556_s3 + $0x48] sm:$0xff]  }
 0x9e6   :  { %7674 = vmatprep.subr.bf16.mxu0 %v10574_v26  ;;  %7667 = vmatpush3.bf16.msra.mxu1 %v8091_v12 }
 0x9e7   :  { %v1773_v6 = vsel %vm647_vm8, %v1772_v60, -inf  ;;  %7680 = vmatprep.subr.bf16.mxu1 %v10574_v26 }
 0x9e8   :  { %v1774_v1 = vrot.slane %v1773_v6, 4 }
 0x9e9   :  { %7675 = vmatpush3.bf16.msra.mxu0 %v8092_v41  ;;  %v8093_v41 = vld [vmem:[%s10556_s3 + $0x60] sm:$0xff]  }
 0x9ea   :  { %v1775_v44 = vmax.f32 %v1773_v6, %v1774_v1  ;;  %7688 = vmatprep.subr.bf16.mxu0 %v10574_v26 }
 0x9ec   :  { %v1776_v5 = vrot.slane %v1775_v44, 2 }
 0x9ee   :  { %v1777_v17 = vmax.f32 %v1775_v44, %v1776_v5  ;;  %v9156_v44 = vld [vmem:[#allocation2 + $0x40] sm:$0xff] }
 0x9ef   :  { %v2066_v5 = vmul.f32 %v9048_v61, %v9156_v44 }
 0x9f0   :  { %v1778_v56 = vrot.slane %v1777_v17, 1 }
 0x9f2   :  { %v1779_v55 = vmax.f32 %v1777_v17, %v1778_v56  ;;  %v9161_v17 = vsel %vm69_vm0, %v2066_v5, 0.0 }
 0x9f4   :  { %v1780_v0 = vsub.f32 %v1772_v60, %v1779_v55 }
 0x9f6   :  { %v1781_v49 = vmul.f32 1.442695, %v1780_v0 }
 0x9f8   :  { %8225 = vpow2.f32 %v1781_v49  ;;  %v8396_v49 = vld [vmem:[#allocation2 + $0x40] sm:$0xff] }
 0xa02   :  { %v8226_v40 = vpop.eup %8225 }
 0xa03   :  { %v1783_v59 = vsel %vm647_vm8, %v8226_v40, 0.0 }
 0xa04   :  { %v1784_v14 = vrot.slane %v1783_v59, 4 }
 0xa06   :  { %v1785_v16 = vadd.f32 %v1784_v14, %v1783_v59 }
 0xa08   :  { %v1786_v58 = vrot.slane %v1785_v16, 2 }
 0xa0a   :  { %v1787_v47 = vadd.f32 %v1786_v58, %v1785_v16 }
 0xa0c   :  { %v1788_v15 = vrot.slane %v1787_v47, 1 }
 0xa0e   :  { %v1789_v13 = vadd.f32 %v1788_v15, %v1787_v47 }
 0xa10   :  { %8227 = vrcp.f32 %v1789_v13 }
 0xa1a   :  { %v8228_v35 = vpop.eup %8227 }
 0xa1b   :  { %v1791_v28 = vmul.f32 %v8228_v35, %v8226_v40 }
 0xa1d   :  { %v1802_v4 = vrot.slane %v1791_v28, %v8776_v57  ;;  %v1795_v3 = vrot.slane %v1791_v28, %v8779_v9  ;;  %v1809_v50 = vrot.slane %v1791_v28, %v8785_v62  ;;  %v1823_v7 = vrot.slane %v1791_v28, %v8788_v11 }
 0xa1e   :  { %v1816_v33 = vrot.slane %v1791_v28, %v8799_v23  ;;  %v1837_v60 = vrot.slane %v1791_v28, %v8802_v31  ;;  %v1830_v6 = vrot.slane %v1791_v28, %v8812_v38  ;;  %v1844_v1 = vrot.slane %v1791_v28, %v8820_v10 }
 0xa1f   :  { %1804 = vbcast.lane.b32.xlu1 %v1802_v4, 256  ;;  %1797 = vbcast.lane.b32.xlu0 %v1795_v3, 256 }
 0xa23   :  { %1811 = vbcast.lane.b32.xlu1 %v1809_v50, 256  ;;  %1825 = vbcast.lane.b32.xlu0 %v1823_v7, 256 }
 0xa27   :  { %1818 = vbcast.lane.b32.xlu1 %v1816_v33, 256  ;;  %1839 = vbcast.lane.b32.xlu0 %v1837_v60, 256 }
 0xa2b   :  { %1832 = vbcast.lane.b32.xlu1 %v1830_v6, 256 }
 0xa2f   :  { %1846 = vbcast.lane.b32.xlu1 %v1844_v1, 256 }
 0xa46   :  { %2075 = vadd.xlane.f32.xlu0 %v9161_v17 }
 0xa4a   :  { %2081 = vadd.xlane.f32.xlu0 %v8962_v30 }
 0xa4e   :  { %2084 = vadd.xlane.f32.xlu0 %v9101_v36 }
 0xa53   :  { %2078 = vadd.xlane.f32.xlu1 %v8866_v2 }
 0xa57   :  { %2090 = vadd.xlane.f32.xlu1 %v9058_v20 }
 0xa5b   :  { %2096 = vadd.xlane.f32.xlu1 %v9066_v21 }
 0xa91   :  { %v1805_v56 = vpop.permute.xlu1 %1804  ;;  %v1798_v55 = vpop.permute.xlu0 %1797 }
 0xa92   :  { %v1849_v0 = vmul.f32 %v1805_v56, %v8861_v51  ;;  %v1848_v40 = vmul.f32 %v8396_v49, %v1798_v55 }
 0xa94   :  { %v1856_v58 = vadd.f32 %v1849_v0, %v1848_v40 }
 0xa95   :  { %v1812_v59 = vpop.permute.xlu1 %1811  ;;  %v1826_v16 = vpop.permute.xlu0 %1825 }
 0xa96   :  { %v1850_v14 = vmul.f32 %v1812_v59, %v8957_v8  ;;  %v1852_v2 = vmul.f32 %v1826_v16, %v9043_v48  ;;  %v8094_v48 = vld [vmem:[%s10556_s3 + $0x68] sm:$0xff]  }
 0xa98   :  { %v1857_v15 = vadd.f32 %v1856_v58, %v1850_v14 }
 0xa99   :  { %v1819_v47 = vpop.permute.xlu1 %1818  ;;  %v1840_v35 = vpop.permute.xlu0 %1839 }
 0xa9a   :  { %v1851_v13 = vmul.f32 %v1819_v47, %v9094_v34  ;;  %v1854_v51 = vmul.f32 %v1840_v35, %v9092_v18 }
 0xa9c   :  { %v1858_v20 = vadd.f32 %v1857_v15, %v1851_v13 }
 0xa9d   :  { %v1833_v28 = vpop.permute.xlu1 %1832 }
 0xa9e   :  { %v1853_v4 = vmul.f32 %v1833_v28, %v9053_v37  ;;  %v1859_v3 = vadd.f32 %v1858_v20, %v1852_v2 }
 0xaa0   :  { %v1860_v46 = vadd.f32 %v1859_v3, %v1853_v4 }
 0xaa1   :  { %v1847_v54 = vpop.permute.xlu1 %1846 }
 0xaa2   :  { %v1855_v50 = vmul.f32 %v1847_v54, %v9061_v32  ;;  %v1861_v7 = vadd.f32 %v1860_v46, %v1854_v51 }
 0xaa4   :  { %v1862_v12 = vadd.f32 %v1861_v7, %v1855_v50 }
 0xaa6   :  { %v1863_v33 = vpack.c.bf16 %v1862_v12, %v1862_v12 }
 0xaa8   :  { %7669 = vmatmul.mubr.msk.bf16.vlgmr.msra.gmra.mrb[40].mxu1 %vm69_vm0, %v1863_v33  ;;  %7677 = vmatmul.mubr.msk.bf16.vlgmr.msra.gmra.mrb[28].mxu0 %vm69_vm0, %v1863_v33 }
 0xaa9   :  { %7681 = vmatpush3.bf16.msra.mxu1 %v8093_v41  ;;  %7684 = vmatprep.mubr.msk.bf16.mxu1 %vm8450_vm9, %v10574_v26 }
 0xaaa   :  { %7682 = vmatprep.subr.bf16.mxu1 %v10574_v26  ;;  %7692 = vmatprep.mubr.msk.bf16.mxu0 %vm8450_vm9, %v10574_v26 }
 0xaad   :  { %7683 = vmatpush3.bf16.msra.mxu1 %v8094_v48 }
 0xaae   :  { %7696 = vmatprep.subr.bf16.mxu1 %v10574_v26 }
 0xab0   :  { %7685 = vmatmul.mubr.msk.bf16.vlgmr.msra.gmra.mrb[44].mxu1 %vm69_vm0, %v1863_v33 }
 0xab1   :  { %7700 = vmatprep.mubr.msk.bf16.mxu1 %vm8450_vm9, %v10574_v26 }
 0xb7b   :  { %v1917_v60 = vpop.f32.mrb[40].mxu1  ;;  %v1973_v6 = vpop.f32.mrb[28].mxu0 }
 0xb7c   :  { %v1918_v1 = vadd.f32 %v9072_v19, %v1917_v60  ;;  %v1974_v5 = vadd.f32 %v9078_v24, %v1973_v6  ;;  %v7670_v56 = vpop.f32.mrb[41].mxu1  ;;  %v7678_v55 = vpop.f32.mrb[29].mxu0 }
 0xb7d   :  { %v1920_v0 = vpop.f32.mrb[42].mxu1  ;;  %v1976_v49 = vpop.f32.mrb[30].mxu0 }
 0xb7e   :  { %v2035_v40 = vadd.f32 %v1918_v1, %v8681_v43  ;;  %v2042_v59 = vadd.f32 %v1974_v5, %v8683_v45  ;;  %v7671_v14 = vpop.f32.mrb[43].mxu1  ;;  %v7679_v16 = vpop.f32.mrb[31].mxu0 }
 0xb7f   :  { %v2079_v5 = vpop.xlane.xlu1 %2078  ;;  %v167_v14 = vld [vmem:[%s10555_s2 + $0x28] sm:$0xff] }
 0xb80   :  { %v6995_v58 = vmul.f32 -1.442695, %v2035_v40  ;;  %v6996_v13 = vmul.f32 -1.442695, %v2042_v59 }
 0xb82   :  { %8229 = vpow2.f32 %v6995_v58 }
 0xb83   :  { %v2029_v47 = vpop.f32.mrb[44].mxu1  ;;  %8231 = vpow2.f32 %v6996_v13  ;;  %v2091_v0 = vpop.xlane.xlu1 %2090  ;;  %v184_v13 = vmul.f32 %v8753_v42, %v167_v14 }
 0xb84   :  { %v7686_v15 = vpop.f32.mrb[45].mxu1  ;;  %v2030_v51 = vadd.f32 %v9086_v27, %v2029_v47 }
 0xb85   :  { %v2032_v2 = vpop.f32.mrb[46].mxu1 }
 0xb86   :  { %v7687_v20 = vpop.f32.mrb[47].mxu1 }
 0xb87   :  { %v2097_v2 = vpop.xlane.xlu1 %2096 }
 0xb8c   :  { %v8230_v35 = vpop.eup %8229 }
 0xb8d   :  { %v2039_v28 = vadd.f32 1.0, %v8230_v35  ;;  %v8232_v4 = vpop.eup %8231  ;;  %v2129_v35 = vrot.slane %v2091_v0, %v8744_v25 }
 0xb8e   :  { %v2046_v3 = vadd.f32 1.0, %v8232_v4 }
 0xb8f   :  { %8233 = vrcp.f32 %v2039_v28  ;;  %v6856_v28 = vld [vmem:[%s10555_s2 + $0x68] sm:$0xff] }
 0xb90   :  { %8235 = vrcp.f32 %v2046_v3 }
 0xb99   :  { %v8234_v43 = vpop.eup %8233 }
 0xb9a   :  { %v2049_v45 = vmul.f32 %v8234_v43, %v2030_v51  ;;  %v8236_v54 = vpop.eup %8235  ;;  %v2137_v51 = vrot.slane %v2097_v2, %v8744_v25 }
 0xb9b   :  { %v2052_v50 = vsub.f32 1.0, %v8236_v54  ;;  %v2054_v41 = vmul.f32 %v8236_v54, %v1862_v12  ;;  %v2113_v12 = vrot.slane %v2079_v5, %v8744_v25 }
 0xb9c   :  { %v2050_v46 = vadd.f32 %v2049_v45, %v8704_v22  ;;  %v2076_v22 = vpop.xlane.xlu0 %2075  ;;  %v191_v45 = vadd.f32 %v6856_v28, %v184_v13  ;;  %v8096_v28 = vld [vmem:[%s10556_s3 + $0x50] sm:$0xff]  }
 0xb9d   :  { %v2109_v55 = vrot.slane %v2076_v22, %v8744_v25  ;;  %7697 = vmatpush3.bf16.msra.mxu1 %v8096_v28 }
 0xb9e   :  { %8237 = vtanh.f32 %v2050_v46  ;;  %7698 = vmatprep.subr.bf16.mxu1 %v10574_v26 }
 0xb9f   :  { %v2138_v40 = vsel %vm631_vm1, %v2113_v12, %v2109_v55 }
 0xba0   :  { %v2082_v56 = vpop.xlane.xlu0 %2081 }
 0xba1   :  { %v2117_v59 = vrot.slane %v2082_v56, %v8744_v25 }
 0xba3   :  { %v2139_v16 = vsel %vm633_vm2, %v2117_v59, %v2138_v40 }
 0xba4   :  { %v2085_v49 = vpop.xlane.xlu0 %2084 }
 0xba5   :  { %v2121_v58 = vrot.slane %v2085_v49, %v8744_v25 }
 0xba7   :  { %v2140_v20 = vsel %vm635_vm3, %v2121_v58, %v2139_v16 }
 0xba8   :  { %v8238_v7 = vpop.eup %8237 }
 0xba9   :  { %v2053_v33 = vmul.f32 %v8238_v7, %v2052_v50 }
 0xbab   :  { %v2055_v48 = vadd.f32 %v2054_v41, %v2053_v33 }
 0xbad   :  { %2057 = vst.msk [vmem:[#allocation2 + $0x60] sm:$0xff] %vm69_vm0, %v2055_v48 }
 0xbb4   :  { %v9200_v60 = vld [vmem:[#allocation2 + $0x60] sm:$0xff] }
 0xbb5   :  { %v2070_v6 = vmul.f32 %v9048_v61, %v9200_v60 }
 0xbb7   :  { %v9205_v1 = vsel %vm69_vm0, %v2070_v6, 0.0 }
 0xbb8   :  { %2087 = vadd.xlane.f32.xlu0 %v9205_v1 }
 0xbbc   :  { %2093 = vadd.xlane.f32.xlu0 %v9105_v63 }
 0xc45   :  { %v2088_v47 = vpop.xlane.xlu0 %2087 }
 0xc46   :  { %v2125_v15 = vrot.slane %v2088_v47, %v8744_v25 }
 0xc48   :  { %v2141_v4 = vsel %vm637_vm4, %v2125_v15, %v2140_v20 }
 0xc49   :  { %v2094_v3 = vpop.xlane.xlu0 %2093  ;;  %v2142_v46 = vsel %vm639_vm5, %v2129_v35, %v2141_v4  ;;  %v8095_v35 = vld [vmem:[%s10556_s3 + $0x40] sm:$0xff]  }
 0xc4a   :  { %v2133_v43 = vrot.slane %v2094_v3, %v8744_v25  ;;  %7689 = vmatpush3.bf16.msra.mxu0 %v8095_v35 }
 0xc4b   :  { %7690 = vmatprep.subr.bf16.mxu0 %v10574_v26 }
 0xc4c   :  { %v2143_v54 = vsel %vm641_vm6, %v2133_v43, %v2142_v46  ;;  %v8098_v43 = vld [vmem:[%s10556_s3 + $0x58] sm:$0xff]  }
 0xc4d   :  { %v2144_v50 = vsel %vm643_vm7, %v2137_v51, %v2143_v54  ;;  %v8097_v51 = vld [vmem:[%s10556_s3 + $0x48] sm:$0xff]   ;;  %7699 = vmatpush3.bf16.msra.mxu1 %v8098_v43 }
 0xc4e   :  { %v2146_v7 = vadd.f32 %v2144_v50, %v191_v45  ;;  %7691 = vmatpush3.bf16.msra.mxu0 %v8097_v51  ;;  %7712 = vmatprep.subr.bf16.mxu1 %v10574_v26 }
 0xc4f   :  { %7704 = vmatprep.subr.bf16.mxu0 %v10574_v26 }
 0xc50   :  { %v2147_v41 = vsel %vm647_vm8, %v2146_v7, -inf }
 0xc51   :  { %v2148_v33 = vrot.slane %v2147_v41, 4 }
 0xc53   :  { %v2149_v48 = vmax.f32 %v2147_v41, %v2148_v33 }
 0xc55   :  { %v2150_v6 = vrot.slane %v2149_v48, 2 }
 0xc57   :  { %v2151_v22 = vmax.f32 %v2149_v48, %v2150_v6 }
 0xc59   :  { %v2152_v5 = vrot.slane %v2151_v22, 1 }
 0xc5b   :  { %v2153_v56 = vmax.f32 %v2151_v22, %v2152_v5  ;;  %v8397_v22 = vld [vmem:[#allocation2 + $0x48] sm:$0xff] }
 0xc5d   :  { %v2154_v12 = vsub.f32 %v2146_v7, %v2153_v56  ;;  %v9259_v7 = vld [vmem:[#allocation2 + $0x48] sm:$0xff] }
 0xc5e   :  { %v2441_v41 = vmul.f32 %v9048_v61, %v9259_v7 }
 0xc5f   :  { %v2155_v55 = vmul.f32 1.442695, %v2154_v12 }
 0xc60   :  { %v9266_v33 = vsel %vm69_vm0, %v2441_v41, 0.0 }
 0xc61   :  { %8239 = vpow2.f32 %v2155_v55 }
 0xc6b   :  { %v8240_v0 = vpop.eup %8239 }
 0xc6c   :  { %v2157_v49 = vsel %vm647_vm8, %v8240_v0, 0.0 }
 0xc6d   :  { %v2158_v40 = vrot.slane %v2157_v49, 4 }
 0xc6f   :  { %v2159_v59 = vadd.f32 %v2158_v40, %v2157_v49 }
 0xc71   :  { %v2160_v14 = vrot.slane %v2159_v59, 2 }
 0xc73   :  { %v2161_v16 = vadd.f32 %v2160_v14, %v2159_v59 }
 0xc75   :  { %v2162_v58 = vrot.slane %v2161_v16, 1 }
 0xc77   :  { %v2163_v47 = vadd.f32 %v2162_v58, %v2161_v16 }
 0xc79   :  { %8241 = vrcp.f32 %v2163_v47 }
 0xc83   :  { %v8242_v15 = vpop.eup %8241 }
 0xc84   :  { %v2165_v13 = vmul.f32 %v8242_v15, %v8240_v0 }
 0xc86   :  { %v2176_v2 = vrot.slane %v2165_v13, %v8776_v57  ;;  %v2169_v20 = vrot.slane %v2165_v13, %v8779_v9  ;;  %v2183_v4 = vrot.slane %v2165_v13, %v8785_v62  ;;  %v2197_v3 = vrot.slane %v2165_v13, %v8788_v11 }
 0xc87   :  { %v2190_v45 = vrot.slane %v2165_v13, %v8799_v23  ;;  %v2211_v46 = vrot.slane %v2165_v13, %v8802_v31  ;;  %v2204_v54 = vrot.slane %v2165_v13, %v8812_v38  ;;  %v2218_v50 = vrot.slane %v2165_v13, %v8820_v10 }
 0xc88   :  { %2178 = vbcast.lane.b32.xlu1 %v2176_v2, 256  ;;  %2171 = vbcast.lane.b32.xlu0 %v2169_v20, 256 }
 0xc8c   :  { %2185 = vbcast.lane.b32.xlu1 %v2183_v4, 256  ;;  %2199 = vbcast.lane.b32.xlu0 %v2197_v3, 256  ;;  %v8099_v4 = vld [vmem:[%s10556_s3 + $0x60] sm:$0xff]  }
 0xc90   :  { %2192 = vbcast.lane.b32.xlu1 %v2190_v45, 256  ;;  %2213 = vbcast.lane.b32.xlu0 %v2211_v46, 256 }
 0xc94   :  { %2206 = vbcast.lane.b32.xlu1 %v2204_v54, 256 }
 0xc98   :  { %2220 = vbcast.lane.b32.xlu1 %v2218_v50, 256 }
 0xcaf   :  { %2449 = vadd.xlane.f32.xlu0 %v9161_v17 }
 0xcb3   :  { %2455 = vadd.xlane.f32.xlu0 %v8962_v30 }
 0xcb7   :  { %2458 = vadd.xlane.f32.xlu0 %v9101_v36 }
 0xcbb   :  { %2461 = vadd.xlane.f32.xlu0 %v9205_v1 }
 0xcbc   :  { %2452 = vadd.xlane.f32.xlu1 %v9266_v33 }
 0xcbf   :  { %2467 = vadd.xlane.f32.xlu0 %v9105_v63 }
 0xcfa   :  { %v2179_v48 = vpop.permute.xlu1 %2178  ;;  %v2172_v6 = vpop.permute.xlu0 %2171 }
 0xcfb   :  { %v2223_v30 = vmul.f32 %v8397_v22, %v2179_v48  ;;  %v2222_v5 = vmul.f32 %v2172_v6, %v9156_v44 }
 0xcfd   :  { %v2230_v0 = vadd.f32 %v2223_v30, %v2222_v5 }
 0xcfe   :  { %v2186_v56 = vpop.permute.xlu1 %2185  ;;  %v2200_v55 = vpop.permute.xlu0 %2199 }
 0xcff   :  { %v2224_v12 = vmul.f32 %v2186_v56, %v8957_v8  ;;  %v2226_v14 = vmul.f32 %v2200_v55, %v9200_v60 }
 0xd01   :  { %v2231_v40 = vadd.f32 %v2230_v0, %v2224_v12 }
 0xd02   :  { %v2193_v49 = vpop.permute.xlu1 %2192  ;;  %v2214_v58 = vpop.permute.xlu0 %2213 }
 0xd03   :  { %v2225_v59 = vmul.f32 %v2193_v49, %v9094_v34  ;;  %v2228_v13 = vmul.f32 %v2214_v58, %v9092_v18 }
 0xd05   :  { %v2232_v16 = vadd.f32 %v2231_v40, %v2225_v59 }
 0xd06   :  { %v2207_v63 = vpop.permute.xlu1 %2206 }
 0xd07   :  { %v2227_v47 = vmul.f32 %v2207_v63, %v9053_v37  ;;  %v2233_v15 = vadd.f32 %v2232_v16, %v2226_v14  ;;  %v8100_v37 = vld [vmem:[%s10556_s3 + $0x68] sm:$0xff]  }
 0xd09   :  { %v2234_v2 = vadd.f32 %v2233_v15, %v2227_v47 }
 0xd0a   :  { %v2221_v20 = vpop.permute.xlu1 %2220 }
 0xd0b   :  { %v2229_v8 = vmul.f32 %v2221_v20, %v9061_v32  ;;  %v2235_v35 = vadd.f32 %v2234_v2, %v2228_v13 }
 0xd0d   :  { %v2236_v28 = vadd.f32 %v2235_v35, %v2229_v8 }
 0xd0f   :  { %v2237_v3 = vpack.c.bf16 %v2236_v28, %v2236_v28 }
 0xd11   :  { %7693 = vmatmul.mubr.msk.bf16.vlgmr.msra.gmra.mrb[32].mxu0 %vm69_vm0, %v2237_v3  ;;  %7701 = vmatmul.mubr.msk.bf16.vlgmr.msra.gmra.mrb[48].mxu1 %vm69_vm0, %v2237_v3 }
 0xd12   :  { %7705 = vmatpush3.bf16.msra.mxu0 %v8099_v4  ;;  %7708 = vmatprep.mubr.msk.bf16.mxu0 %vm8450_vm9, %v10574_v26 }
 0xd13   :  { %7706 = vmatprep.subr.bf16.mxu0 %v10574_v26  ;;  %7716 = vmatprep.mubr.msk.bf16.mxu1 %vm8450_vm9, %v10574_v26 }
 0xd16   :  { %7707 = vmatpush3.bf16.msra.mxu0 %v8100_v37 }
 0xd17   :  { %7720 = vmatprep.subr.bf16.mxu0 %v10574_v26 }
 0xd19   :  { %7709 = vmatmul.mubr.msk.bf16.vlgmr.msra.gmra.mrb[36].mxu0 %vm69_vm0, %v2237_v3 }
 0xd1a   :  { %7724 = vmatprep.mubr.msk.bf16.mxu0 %vm8450_vm9, %v10574_v26 }
 0xde4   :  { %v2291_v51 = vpop.f32.mrb[32].mxu0  ;;  %v2347_v43 = vpop.f32.mrb[48].mxu1 }
 0xde5   :  { %v2292_v45 = vadd.f32 %v9072_v19, %v2291_v51  ;;  %v2348_v46 = vadd.f32 %v9078_v24, %v2347_v43  ;;  %v7694_v54 = vpop.f32.mrb[33].mxu0  ;;  %v7702_v50 = vpop.f32.mrb[49].mxu1 }
 0xde6   :  { %v2294_v41 = vpop.f32.mrb[34].mxu0  ;;  %v2350_v48 = vpop.f32.mrb[50].mxu1 }
 0xde7   :  { %v2409_v6 = vadd.f32 %v2292_v45, %v8689_v52  ;;  %v2416_v22 = vadd.f32 %v2348_v46, %v8691_v53  ;;  %v7695_v30 = vpop.f32.mrb[35].mxu0  ;;  %v7703_v5 = vpop.f32.mrb[51].mxu1 }
 0xde8   :  { %v2453_v43 = vpop.xlane.xlu1 %2452 }
 0xde9   :  { %v7018_v56 = vmul.f32 -1.442695, %v2409_v6  ;;  %v7019_v0 = vmul.f32 -1.442695, %v2416_v22  ;;  %v2487_v45 = vrot.slane %v2453_v43, %v8744_v25 }
 0xdeb   :  { %8243 = vpow2.f32 %v7018_v56 }
 0xdec   :  { %v2403_v12 = vpop.f32.mrb[36].mxu0  ;;  %8245 = vpow2.f32 %v7019_v0  ;;  %v6857_v0 = vld [vmem:[%s10555_s2 + $0x70] sm:$0xff] }
 0xded   :  { %v7710_v55 = vpop.f32.mrb[37].mxu0  ;;  %v2404_v63 = vadd.f32 %v9086_v27, %v2403_v12 }
 0xdee   :  { %v2406_v49 = vpop.f32.mrb[38].mxu0 }
 0xdef   :  { %v7711_v40 = vpop.f32.mrb[39].mxu0 }
 0xdf5   :  { %v8244_v59 = vpop.eup %8243 }
 0xdf6   :  { %v2413_v14 = vadd.f32 1.0, %v8244_v59  ;;  %v8246_v16 = vpop.eup %8245 }
 0xdf7   :  { %v2420_v58 = vadd.f32 1.0, %v8246_v16 }
 0xdf8   :  { %8247 = vrcp.f32 %v2413_v14 }
 0xdf9   :  { %8249 = vrcp.f32 %v2420_v58 }
 0xe02   :  { %v8248_v52 = vpop.eup %8247 }
 0xe03   :  { %v2423_v53 = vmul.f32 %v8248_v52, %v2404_v63  ;;  %v8250_v15 = vpop.eup %8249 }
 0xe04   :  { %v2426_v13 = vsub.f32 1.0, %v8250_v15  ;;  %v2428_v20 = vmul.f32 %v8250_v15, %v2236_v28 }
 0xe05   :  { %v2424_v47 = vadd.f32 %v2423_v53, %v8708_v29  ;;  %v2450_v29 = vpop.xlane.xlu0 %2449 }
 0xe06   :  { %v2483_v46 = vrot.slane %v2450_v29, %v8744_v25 }
 0xe07   :  { %8251 = vtanh.f32 %v2424_v47 }
 0xe08   :  { %v2512_v54 = vsel %vm631_vm1, %v2487_v45, %v2483_v46 }
 0xe09   :  { %v2456_v51 = vpop.xlane.xlu0 %2455 }
 0xe0a   :  { %v2491_v50 = vrot.slane %v2456_v51, %v8744_v25 }
 0xe0c   :  { %v2513_v48 = vsel %vm633_vm2, %v2491_v50, %v2512_v54 }
 0xe0d   :  { %v2459_v28 = vpop.xlane.xlu0 %2458 }
 0xe0e   :  { %v2495_v6 = vrot.slane %v2459_v28, %v8744_v25 }
 0xe10   :  { %v2514_v22 = vsel %vm635_vm3, %v2495_v6, %v2513_v48 }
 0xe11   :  { %v8252_v2 = vpop.eup %8251  ;;  %v2462_v41 = vpop.xlane.xlu0 %2461 }
 0xe12   :  { %v2427_v8 = vmul.f32 %v8252_v2, %v2426_v13  ;;  %v2499_v5 = vrot.slane %v2462_v41, %v8744_v25 }
 0xe14   :  { %v2429_v35 = vadd.f32 %v2428_v20, %v2427_v8  ;;  %v2515_v49 = vsel %vm637_vm4, %v2499_v5, %v2514_v22  ;;  %v8102_v5 = vld [vmem:[%s10556_s3 + $0x50] sm:$0xff]  }
 0xe15   :  { %v2468_v30 = vpop.xlane.xlu0 %2467  ;;  %7721 = vmatpush3.bf16.msra.mxu0 %v8102_v5 }
 0xe16   :  { %2431 = vst.msk [vmem:[#allocation2 + $0x68] sm:$0xff] %vm69_vm0, %v2429_v35  ;;  %v2507_v40 = vrot.slane %v2468_v30, %v8744_v25  ;;  %v8101_v30 = vld [vmem:[%s10556_s3 + $0x40] sm:$0xff]   ;;  %7722 = vmatprep.subr.bf16.mxu0 %v10574_v26 }
 0xe17   :  { %7713 = vmatpush3.bf16.msra.mxu1 %v8101_v30 }
 0xe18   :  { %7714 = vmatprep.subr.bf16.mxu1 %v10574_v26 }
 0xe1d   :  { %v9301_v4 = vld [vmem:[#allocation2 + $0x68] sm:$0xff] }
 0xe1e   :  { %v2445_v3 = vmul.f32 %v9048_v61, %v9301_v4 }
 0xe20   :  { %v9306_v37 = vsel %vm69_vm0, %v2445_v3, 0.0 }
 0xe21   :  { %2464 = vadd.xlane.f32.xlu1 %v9306_v37 }
 0xe25   :  { %2470 = vadd.xlane.f32.xlu1 %v9066_v21  ;;  %v168_v21 = vld [vmem:[%s10555_s2 + $0x30] sm:$0xff] }
 0xe26   :  { %v185_v12 = vmul.f32 %v8753_v42, %v168_v21 }
 0xe28   :  { %v192_v14 = vadd.f32 %v6857_v0, %v185_v12  ;;  %v8104_v0 = vld [vmem:[%s10556_s3 + $0x58] sm:$0xff]  }
 0xe29   :  { %7723 = vmatpush3.bf16.msra.mxu0 %v8104_v0 }
 0xe2a   :  { %7736 = vmatprep.subr.bf16.mxu0 %v10574_v26 }
 0xeae   :  { %v2465_v56 = vpop.xlane.xlu1 %2464 }
 0xeaf   :  { %v2503_v55 = vrot.slane %v2465_v56, %v8744_v25 }
 0xeb1   :  { %v2516_v59 = vsel %vm639_vm5, %v2503_v55, %v2515_v49  ;;  %v8103_v55 = vld [vmem:[%s10556_s3 + $0x48] sm:$0xff]  }
 0xeb2   :  { %v2471_v16 = vpop.xlane.xlu1 %2470  ;;  %v2517_v63 = vsel %vm641_vm6, %v2507_v40, %v2516_v59  ;;  %7715 = vmatpush3.bf16.msra.mxu1 %v8103_v55 }
 0xeb3   :  { %v2511_v58 = vrot.slane %v2471_v16, %v8744_v25  ;;  %7728 = vmatprep.subr.bf16.mxu1 %v10574_v26  ;;  %v9358_v16 = vld [vmem:[#allocation2 + $0x50] sm:$0xff] }
 0xeb5   :  { %v2518_v52 = vsel %vm643_vm7, %v2511_v58, %v2517_v63  ;;  %v2816_v58 = vmul.f32 %v9048_v61, %v9358_v16 }
 0xeb6   :  { %v2520_v53 = vadd.f32 %v2518_v52, %v192_v14 }
 0xeb7   :  { %v2828_v63 = vsel %vm69_vm0, %v2816_v58, 0.0 }
 0xeb8   :  { %v2521_v47 = vsel %vm647_vm8, %v2520_v53, -inf }
 0xeb9   :  { %v2522_v15 = vrot.slane %v2521_v47, 4 }
 0xebb   :  { %v2523_v13 = vmax.f32 %v2521_v47, %v2522_v15 }
 0xebd   :  { %v2524_v2 = vrot.slane %v2523_v13, 2 }
 0xebf   :  { %v2525_v20 = vmax.f32 %v2523_v13, %v2524_v2  ;;  %v8398_v2 = vld [vmem:[#allocation2 + $0x50] sm:$0xff] }
 0xec1   :  { %v2526_v8 = vrot.slane %v2525_v20, 1 }
 0xec3   :  { %v2527_v35 = vmax.f32 %v2525_v20, %v2526_v8 }
 0xec5   :  { %v2528_v3 = vsub.f32 %v2520_v53, %v2527_v35 }
 0xec7   :  { %v2529_v29 = vmul.f32 1.442695, %v2528_v3 }
 0xec9   :  { %8253 = vpow2.f32 %v2529_v29 }
 0xed3   :  { %v8254_v51 = vpop.eup %8253 }
 0xed4   :  { %v2531_v43 = vsel %vm647_vm8, %v8254_v51, 0.0 }
 0xed5   :  { %v2532_v28 = vrot.slane %v2531_v43, 4 }
 0xed7   :  { %v2533_v45 = vadd.f32 %v2532_v28, %v2531_v43 }
 0xed9   :  { %v2534_v46 = vrot.slane %v2533_v45, 2 }
 0xedb   :  { %v2535_v54 = vadd.f32 %v2534_v46, %v2533_v45 }
 0xedd   :  { %v2536_v50 = vrot.slane %v2535_v54, 1 }
 0xedf   :  { %v2537_v41 = vadd.f32 %v2536_v50, %v2535_v54 }
 0xee1   :  { %8255 = vrcp.f32 %v2537_v41 }
 0xeeb   :  { %v8256_v48 = vpop.eup %8255 }
 0xeec   :  { %v2539_v6 = vmul.f32 %v8256_v48, %v8254_v51 }
 0xeee   :  { %v2550_v21 = vrot.slane %v2539_v6, %v8776_v57  ;;  %v2543_v22 = vrot.slane %v2539_v6, %v8779_v9  ;;  %v2557_v56 = vrot.slane %v2539_v6, %v8785_v62  ;;  %v2571_v12 = vrot.slane %v2539_v6, %v8788_v11 }
 0xeef   :  { %v2564_v49 = vrot.slane %v2539_v6, %v8799_v23  ;;  %v2585_v40 = vrot.slane %v2539_v6, %v8802_v31  ;;  %v2578_v59 = vrot.slane %v2539_v6, %v8812_v38  ;;  %v2592_v14 = vrot.slane %v2539_v6, %v8820_v10 }
 0xef0   :  { %2552 = vbcast.lane.b32.xlu1 %v2550_v21, 256  ;;  %2545 = vbcast.lane.b32.xlu0 %v2543_v22, 256 }
 0xef4   :  { %2559 = vbcast.lane.b32.xlu1 %v2557_v56, 256  ;;  %2573 = vbcast.lane.b32.xlu0 %v2571_v12, 256 }
 0xef8   :  { %2566 = vbcast.lane.b32.xlu1 %v2564_v49, 256  ;;  %2587 = vbcast.lane.b32.xlu0 %v2585_v40, 256 }
 0xefc   :  { %2580 = vbcast.lane.b32.xlu1 %v2578_v59, 256  ;;  %v10575_v59 = vld [vmem:[#allocation10_spill] sm:$0xff] }
 0xf00   :  { %2594 = vbcast.lane.b32.xlu1 %v2592_v14, 256 }
 0xf17   :  { %2823 = vadd.xlane.f32.xlu0 %v9161_v17 }
 0xf1b   :  { %2829 = vadd.xlane.f32.xlu0 %v2828_v63 }
 0xf1f   :  { %2832 = vadd.xlane.f32.xlu0 %v9101_v36 }
 0xf23   :  { %2835 = vadd.xlane.f32.xlu0 %v9205_v1 }
 0xf24   :  { %2826 = vadd.xlane.f32.xlu1 %v9266_v33 }
 0xf28   :  { %2838 = vadd.xlane.f32.xlu1 %v9306_v37 }
 0xf62   :  { %v2553_v52 = vpop.permute.xlu1 %2552  ;;  %v2546_v53 = vpop.permute.xlu0 %2545 }
 0xf63   :  { %v2597_v47 = vmul.f32 %v2553_v52, %v9259_v7  ;;  %v2596_v15 = vmul.f32 %v2546_v53, %v9156_v44 }
 0xf65   :  { %v2604_v8 = vadd.f32 %v2597_v47, %v2596_v15 }
 0xf66   :  { %v2560_v13 = vpop.permute.xlu1 %2559  ;;  %v2574_v20 = vpop.permute.xlu0 %2573 }
 0xf67   :  { %v2598_v17 = vmul.f32 %v8398_v2, %v2560_v13  ;;  %v2600_v1 = vmul.f32 %v2574_v20, %v9200_v60 }
 0xf69   :  { %v2605_v3 = vadd.f32 %v2604_v8, %v2598_v17 }
 0xf6a   :  { %v2567_v35 = vpop.permute.xlu1 %2566  ;;  %v2588_v29 = vpop.permute.xlu0 %2587 }
 0xf6b   :  { %v2599_v36 = vmul.f32 %v2567_v35, %v9094_v34  ;;  %v2602_v28 = vmul.f32 %v2588_v29, %v9092_v18  ;;  %v8105_v34 = vld [vmem:[%s10556_s3 + $0x60] sm:$0xff]   ;;  %v8106_v18 = vld [vmem:[%s10556_s3 + $0x68] sm:$0xff]   ;;  %v10576_v35 = vld [vmem:[#allocation13_spill] sm:$0xff] }
 0xf6d   :  { %v2606_v33 = vadd.f32 %v2605_v3, %v2599_v36 }
 0xf6e   :  { %v2581_v37 = vpop.permute.xlu1 %2580 }
 0xf6f   :  { %v2601_v51 = vmul.f32 %v2581_v37, %v9301_v4  ;;  %v2607_v43 = vadd.f32 %v2606_v33, %v2600_v1 }
 0xf71   :  { %v2608_v45 = vadd.f32 %v2607_v43, %v2601_v51 }
 0xf72   :  { %v2595_v46 = vpop.permute.xlu1 %2594 }
 0xf73   :  { %v2603_v54 = vmul.f32 %v2595_v46, %v9061_v32  ;;  %v2609_v50 = vadd.f32 %v2608_v45, %v2602_v28  ;;  %v9392_v32 = vld [vmem:[#allocation2 + $0x78] sm:$0xff] }
 0xf74   :  { %v2821_v6 = vmul.f32 %v9048_v61, %v9392_v32 }
 0xf75   :  { %v2610_v41 = vadd.f32 %v2609_v50, %v2603_v54 }
 0xf76   :  { %v2843_v21 = vsel %vm69_vm0, %v2821_v6, 0.0 }
 0xf77   :  { %v2611_v48 = vpack.c.bf16 %v2610_v41, %v2610_v41  ;;  %2844 = vadd.xlane.f32.xlu1 %v2843_v21 }
 0xf79   :  { %7717 = vmatmul.mubr.msk.bf16.vlgmr.msra.gmra.mrb[52].mxu1 %vm69_vm0, %v2611_v48  ;;  %7725 = vmatmul.mubr.msk.bf16.vlgmr.msra.gmra.mrb[40].mxu0 %vm69_vm0, %v2611_v48 }
 0xf7a   :  { %7729 = vmatpush3.bf16.msra.mxu1 %v8105_v34  ;;  %7732 = vmatprep.mubr.msk.bf16.mxu1 %vm8450_vm9, %v10574_v26 }
 0xf7b   :  { %7730 = vmatprep.subr.bf16.mxu1 %v10574_v26  ;;  %7740 = vmatprep.mubr.msk.bf16.mxu0 %vm8450_vm9, %v10574_v26 }
 0xf7e   :  { %7731 = vmatpush3.bf16.msra.mxu1 %v8106_v18 }
 0xf7f   :  { %7744 = vmatprep.subr.bf16.mxu1 %v10574_v26 }
 0xf81   :  { %7733 = vmatmul.mubr.msk.bf16.vlgmr.msra.gmra.mrb[56].mxu1 %vm69_vm0, %v2611_v48 }
 0xf82   :  { %7748 = vmatprep.mubr.msk.bf16.mxu1 %vm8450_vm9, %v10574_v26 }
 0xfa4   :  { %v2824_v46 = vpop.xlane.xlu0 %2823 }
 0xfa5   :  { %v2857_v34 = vrot.slane %v2824_v46, %v8744_v25 }
 0xfa8   :  { %v2830_v54 = vpop.xlane.xlu0 %2829 }
 0xfa9   :  { %v2865_v6 = vrot.slane %v2830_v54, %v8744_v25 }
 0xfac   :  { %v2833_v48 = vpop.xlane.xlu0 %2832 }
 0xfb1   :  { %v2827_v50 = vpop.xlane.xlu1 %2826 }
0x104c   :  { %v2665_v22 = vpop.f32.mrb[52].mxu1  ;;  %v2721_v30 = vpop.f32.mrb[40].mxu0 }
0x104d   :  { %v2666_v5 = vadd.f32 %v9072_v19, %v2665_v22  ;;  %v2722_v56 = vadd.f32 %v9078_v24, %v2721_v30  ;;  %v7718_v12 = vpop.f32.mrb[53].mxu1  ;;  %v7726_v55 = vpop.f32.mrb[41].mxu0  ;;  %v2869_v30 = vrot.slane %v2833_v48, %v8744_v25 }
0x104e   :  { %v2668_v0 = vpop.f32.mrb[54].mxu1  ;;  %v2724_v49 = vpop.f32.mrb[42].mxu0 }
0x104f   :  { %v2783_v40 = vadd.f32 %v2666_v5, %v8677_v39  ;;  %v2790_v14 = vadd.f32 %v2722_v56, %v10575_v59  ;;  %v7719_v58 = vpop.f32.mrb[55].mxu1  ;;  %v7727_v63 = vpop.f32.mrb[43].mxu0  ;;  %v169_v56 = vld [vmem:[%s10555_s2 + $0x38] sm:$0xff] }
0x1050   :  { %v2839_v22 = vpop.xlane.xlu1 %2838  ;;  %v2836_v5 = vpop.xlane.xlu0 %2835  ;;  %v186_v0 = vmul.f32 %v8753_v42, %v169_v56  ;;  %v6858_v59 = vld [vmem:[%s10555_s2 + $0x78] sm:$0xff] }
0x1051   :  { %v7041_v61 = vmul.f32 -1.442695, %v2783_v40  ;;  %v7042_v47 = vmul.f32 -1.442695, %v2790_v14  ;;  %v2873_v55 = vrot.slane %v2836_v5, %v8744_v25  ;;  %v2877_v40 = vrot.slane %v2839_v22, %v8744_v25 }
0x1053   :  { %8257 = vpow2.f32 %v7041_v61 }
0x1054   :  { %v2777_v52 = vpop.f32.mrb[56].mxu1  ;;  %8259 = vpow2.f32 %v7042_v47  ;;  %v2845_v49 = vpop.xlane.xlu1 %2844 }
0x1055   :  { %v7734_v53 = vpop.f32.mrb[57].mxu1  ;;  %v2778_v20 = vadd.f32 %v9086_v27, %v2777_v52  ;;  %v8399_v27 = vld [vmem:[%s10557_s4 + $0x7] ss:$0 sm:$0xff]  ;;  %v2885_v63 = vrot.slane %v2845_v49, %v8744_v25  ;;  %v193_v52 = vadd.f32 %v6858_v59, %v186_v0 }
0x1056   :  { %v2780_v15 = vpop.f32.mrb[58].mxu1 }
0x1057   :  { %v7735_v13 = vpop.f32.mrb[59].mxu1 }
0x105d   :  { %v8258_v19 = vpop.eup %8257 }
0x105e   :  { %v2787_v24 = vadd.f32 1.0, %v8258_v19  ;;  %v8260_v2 = vpop.eup %8259 }
0x105f   :  { %v2794_v17 = vadd.f32 1.0, %v8260_v2 }
0x1060   :  { %8261 = vrcp.f32 %v2787_v24 }
0x1061   :  { %8263 = vrcp.f32 %v2794_v17 }
0x106a   :  { %v8262_v39 = vpop.eup %8261 }
0x106b   :  { %v2797_v8 = vmul.f32 %v8262_v39, %v2778_v20  ;;  %v8264_v36 = vpop.eup %8263 }
0x106c   :  { %v2800_v1 = vsub.f32 1.0, %v8264_v36  ;;  %v2802_v29 = vmul.f32 %v8264_v36, %v2610_v41  ;;  %v2861_v41 = vrot.slane %v2827_v50, %v8744_v25  ;;  %v8107_v50 = vld [vmem:[%s10556_s3 + $0x40] sm:$0xff]  }
0x106d   :  { %v2798_v3 = vadd.f32 %v2797_v8, %v10576_v35  ;;  %7737 = vmatpush3.bf16.msra.mxu0 %v8107_v50  ;;  %v8402_v50 = vld [vmem:[%s10557_s4 + $0x5] ss:$0 sm:$0xff] }
0x106e   :  { %v2886_v18 = vsel %vm631_vm1, %v2861_v41, %v2857_v34  ;;  %v8108_v41 = vld [vmem:[%s10556_s3 + $0x50] sm:$0xff]   ;;  %7738 = vmatprep.subr.bf16.mxu0 %v10574_v26 }
0x106f   :  { %8265 = vtanh.f32 %v2798_v3  ;;  %v2887_v21 = vsel %vm633_vm2, %v2865_v6, %v2886_v18  ;;  %7745 = vmatpush3.bf16.msra.mxu1 %v8108_v41  ;;  %v8109_v18 = vld [vmem:[%s10556_s3 + $0x48] sm:$0xff]   ;;  %v8110_v6 = vld [vmem:[%s10556_s3 + $0x58] sm:$0xff]  }
0x1070   :  { %v2888_v12 = vsel %vm635_vm3, %v2869_v30, %v2887_v21  ;;  %7746 = vmatprep.subr.bf16.mxu1 %v10574_v26  ;;  %v8111_v30 = vld [vmem:[%s10556_s3 + $0x70] sm:$0xff]  }
0x1071   :  { %v2889_v14 = vsel %vm637_vm4, %v2873_v55, %v2888_v12  ;;  %7739 = vmatpush3.bf16.msra.mxu0 %v8109_v18 }
0x1072   :  { %v2890_v53 = vsel %vm639_vm5, %v2877_v40, %v2889_v14  ;;  %7752 = vmatprep.subr.bf16.mxu0 %v10574_v26 }
0x1073   :  { %7747 = vmatpush3.bf16.msra.mxu1 %v8110_v6 }
0x1074   :  { %7760 = vmatprep.subr.bf16.mxu1 %v8111_v30 }
0x1079   :  { %v8266_v33 = vpop.eup %8265 }
0x107a   :  { %v2801_v37 = vmul.f32 %v8266_v33, %v2800_v1 }
0x107c   :  { %v2803_v51 = vadd.f32 %v2802_v29, %v2801_v37 }
0x107e   :  { %2805 = vst.msk [vmem:[#allocation2 + $0x70] sm:$0xff] %vm69_vm0, %v2803_v51 }
0x1085   :  { %v9404_v43 = vld [vmem:[#allocation2 + $0x70] sm:$0xff] }
0x1086   :  { %v2820_v28 = vmul.f32 %v8399_v27, %v9404_v43 }
0x1088   :  { %v2840_v45 = vsel %vm69_vm0, %v2820_v28, 0.0 }
0x1089   :  { %2841 = vadd.xlane.f32.xlu0 %v2840_v45 }
0x1116   :  { %v2842_v58 = vpop.xlane.xlu0 %2841 }
0x1117   :  { %v2881_v61 = vrot.slane %v2842_v58, %v8744_v25 }
0x1119   :  { %v2891_v47 = vsel %vm641_vm6, %v2881_v61, %v2890_v53 }
0x111a   :  { %v2892_v42 = vsel %vm643_vm7, %v2885_v63, %v2891_v47 }
0x111b   :  { %v2894_v15 = vadd.f32 %v2892_v42, %v193_v52  ;;  %v8400_v52 = vld [vmem:[#allocation2 + $0x58] sm:$0xff] }
0x111d   :  { %v2895_v13 = vsel %vm647_vm8, %v2894_v15, -inf }
0x111e   :  { %v2896_v19 = vrot.slane %v2895_v13, 4 }
0x1120   :  { %v2897_v24 = vmax.f32 %v2895_v13, %v2896_v19 }
0x1122   :  { %v2898_v2 = vrot.slane %v2897_v24, 2 }
0x1124   :  { %v2899_v17 = vmax.f32 %v2897_v24, %v2898_v2 }
0x1126   :  { %v2900_v20 = vrot.slane %v2899_v17, 1 }
0x1128   :  { %v2901_v39 = vmax.f32 %v2899_v17, %v2900_v20 }
0x112a   :  { %v2902_v8 = vsub.f32 %v2894_v15, %v2901_v39 }
0x112c   :  { %v2903_v35 = vmul.f32 1.442695, %v2902_v8 }
0x112e   :  { %8267 = vpow2.f32 %v2903_v35  ;;  %v8112_v35 = vld [vmem:[%s10556_s3 + $0x60] sm:$0xff]  }
0x1138   :  { %v8268_v3 = vpop.eup %8267 }
0x1139   :  { %v2905_v36 = vsel %vm647_vm8, %v8268_v3, 0.0 }
0x113a   :  { %v2906_v1 = vrot.slane %v2905_v36, 4 }
0x113c   :  { %v2907_v33 = vadd.f32 %v2906_v1, %v2905_v36  ;;  %v8113_v36 = vld [vmem:[%s10556_s3 + $0x78] sm:$0xff]   ;;  %v8114_v1 = vld [vmem:[%s10556_s3 + $0x68] sm:$0xff]  }
0x113e   :  { %v2908_v29 = vrot.slane %v2907_v33, 2 }
0x1140   :  { %v2909_v37 = vadd.f32 %v2908_v29, %v2907_v33  ;;  %v8115_v33 = vld [vmem:[%s10556_s3 + $0x80] sm:$0xff]  }
0x1142   :  { %v2910_v51 = vrot.slane %v2909_v37, 1 }
0x1144   :  { %v2911_v27 = vadd.f32 %v2910_v51, %v2909_v37  ;;  %v3208_v37 = vld [vmem:[#allocation2 + $0x60] sm:$0xff]  ;;  %v8116_v51 = vld [vmem:[%s10556_s3 + $0x88] sm:$0xff]  }
0x1146   :  { %8269 = vrcp.f32 %v2911_v27  ;;  %v9501_v27 = vpack.c.bf16 %v9301_v4, %v3208_v37 }
0x1150   :  { %v8270_v28 = vpop.eup %8269 }
0x1151   :  { %v2913_v45 = vmul.f32 %v8270_v28, %v8268_v3  ;;  %v3204_v3 = vld [vmem:[#allocation2 + $0x40] sm:$0xff] }
0x1153   :  { %v2924_v46 = vrot.slane %v2913_v45, %v8776_v57  ;;  %v2917_v54 = vrot.slane %v2913_v45, %v8779_v9  ;;  %v2931_v34 = vrot.slane %v2913_v45, %v8785_v62  ;;  %v2945_v48 = vrot.slane %v2913_v45, %v8788_v11 }
0x1154   :  { %v2938_v21 = vrot.slane %v2913_v45, %v8799_v23  ;;  %v2959_v22 = vrot.slane %v2913_v45, %v8802_v31  ;;  %v2952_v5 = vrot.slane %v2913_v45, %v8812_v38  ;;  %v2966_v56 = vrot.slane %v2913_v45, %v8820_v10 }
0x1155   :  { %2926 = vbcast.lane.b32.xlu1 %v2924_v46, 256  ;;  %2919 = vbcast.lane.b32.xlu0 %v2917_v54, 256  ;;  %v8401_v46 = vld [vmem:[%s10557_s4 + $0x4] ss:$0 sm:$0xff] }
0x1159   :  { %2933 = vbcast.lane.b32.xlu1 %v2931_v34, 256  ;;  %2947 = vbcast.lane.b32.xlu0 %v2945_v48, 256 }
0x115d   :  { %2940 = vbcast.lane.b32.xlu1 %v2938_v21, 256  ;;  %2961 = vbcast.lane.b32.xlu0 %v2959_v22, 256  ;;  %v10577_v21 = vld [vmem:[#allocation11_spill] sm:$0xff] }
0x1161   :  { %2954 = vbcast.lane.b32.xlu1 %v2952_v5, 256 }
0x1165   :  { %2968 = vbcast.lane.b32.xlu1 %v2966_v56, 256 }
0x11c7   :  { %v2927_v12 = vpop.permute.xlu1 %2926  ;;  %v2920_v55 = vpop.permute.xlu0 %2919 }
0x11c8   :  { %v2971_v0 = vmul.f32 %v2927_v12, %v9259_v7  ;;  %v2970_v49 = vmul.f32 %v2920_v55, %v9156_v44 }
0x11ca   :  { %v2978_v58 = vadd.f32 %v2971_v0, %v2970_v49 }
0x11cb   :  { %v2934_v40 = vpop.permute.xlu1 %2933  ;;  %v2948_v14 = vpop.permute.xlu0 %2947 }
0x11cc   :  { %v2972_v59 = vmul.f32 %v2934_v40, %v9358_v16  ;;  %v2974_v47 = vmul.f32 %v2948_v14, %v9200_v60 }
0x11ce   :  { %v2979_v61 = vadd.f32 %v2978_v58, %v2972_v59 }
0x11cf   :  { %v2941_v63 = vpop.permute.xlu1 %2940  ;;  %v2962_v15 = vpop.permute.xlu0 %2961 }
0x11d0   :  { %v2973_v53 = vmul.f32 %v8400_v52, %v2941_v63  ;;  %v2976_v2 = vmul.f32 %v2962_v15, %v9404_v43 }
0x11d2   :  { %v2980_v42 = vadd.f32 %v2979_v61, %v2973_v53 }
0x11d3   :  { %v2955_v13 = vpop.permute.xlu1 %2954 }
0x11d4   :  { %v2975_v19 = vmul.f32 %v2955_v13, %v9301_v4  ;;  %v2981_v24 = vadd.f32 %v2980_v42, %v2974_v47  ;;  %v8117_v4 = vld [vmem:[%s10556_s3 + $0x90] sm:$0xff]  }
0x11d6   :  { %v2982_v44 = vadd.f32 %v2981_v24, %v2975_v19 }
0x11d7   :  { %v2969_v17 = vpop.permute.xlu1 %2968 }
0x11d8   :  { %v2977_v20 = vmul.f32 %v2969_v17, %v9392_v32  ;;  %v2983_v39 = vadd.f32 %v2982_v44, %v2976_v2  ;;  %v9481_v32 = vpack.c.bf16 %v9259_v7, %v3204_v3  ;;  %v3207_v7 = vld [vmem:[#allocation2 + $0x58] sm:$0xff]  ;;  %v8403_v44 = vld [vmem:[%s10557_s4 + $0x6] ss:$0 sm:$0xff] }
0x11d9   :  { %v9495_v29 = vpack.c.bf16 %v3207_v7, %v9358_v16  ;;  %v8118_v16 = vld [vmem:[%s10556_s3 + $0x98] sm:$0xff]  }
0x11da   :  { %v9468_v8 = vadd.f32 %v2983_v39, %v2977_v20 }
0x11dc   :  { %v2985_v60 = vpack.c.bf16 %v9468_v8, %v9468_v8 }
0x11de   :  { %7741 = vmatmul.mubr.msk.bf16.vlgmr.msra.gmra.mrb[44].mxu0 %vm69_vm0, %v2985_v60  ;;  %7749 = vmatmul.mubr.msk.bf16.vlgmr.msra.gmra.mrb[60].mxu1 %vm69_vm0, %v2985_v60 }
0x11df   :  { %7753 = vmatpush3.bf16.msra.mxu0 %v8112_v35  ;;  %7761 = vmatpush3.bf16.msra.mxu1 %v8111_v30  ;;  %v10578_v30 = vld [vmem:[#allocation12_spill] sm:$0xff]  ;;  %v10579_v35 = vld [vmem:[#allocation14_spill] sm:$0xff] }
0x11e0   :  { %7764 = vmatprep.mubr.msk.bf16.mxu1 %vm69_vm0, %v9481_v32  ;;  %7754 = vmatprep.subr.bf16.mxu0 %v10574_v26 }
0x11e1   :  { %7762 = vmatprep.subr.bf16.mxu1 %v8113_v36  ;;  %7756 = vmatprep.mubr.msk.bf16.mxu0 %vm8450_vm9, %v10574_v26 }
0x11e3   :  { %7755 = vmatpush3.bf16.msra.mxu0 %v8114_v1  ;;  %7763 = vmatpush3.bf16.msra.mxu1 %v8113_v36 }
0x11e4   :  { %7772 = vmatprep.subr.bf16.mxu0 %v8115_v33  ;;  %7784 = vmatprep.subr.bf16.mxu1 %v8117_v4 }
0x11e6   :  { %7757 = vmatmul.mubr.msk.bf16.vlgmr.msra.gmra.mrb[48].mxu0 %vm69_vm0, %v2985_v60  ;;  %7765 = vmatmul.mubr.msk.bf16.vlgmr.msra.gmra.mrb[64].mxu1 %vm69_vm0, %v9495_v29 }
0x11e7   :  { %7768 = vmatprep.mubr.msk.bf16.mxu1 %vm69_vm0, %v9501_v27  ;;  %7773 = vmatpush3.bf16.msra.mxu0 %v8115_v33 }
0x11e8   :  { %7776 = vmatprep.mubr.msk.bf16.mxu0 %vm69_vm0, %v9481_v32  ;;  %7774 = vmatprep.subr.bf16.mxu0 %v8116_v51 }
0x11e9   :  { %7785 = vmatpush3.bf16.msra.mxu1 %v8117_v4 }
0x11ea   :  { %7786 = vmatprep.subr.bf16.mxu1 %v8118_v16 }
0x11eb   :  { %7775 = vmatpush3.bf16.msra.mxu0 %v8116_v51 }
0x11ec   :  { %7796 = vmatprep.subr.bf16.mxu0 %v10574_v26 }
0x11ed   :  { %7787 = vmatpush3.bf16.msra.mxu1 %v8118_v16  ;;  %v9575_v16 = vld [vmem:[#allocation2 + $0x88] sm:$0xff] }
0x11ee   :  { %7777 = vmatmul.mubr.msk.bf16.vlgmr.msra.gmra.mrb[52].mxu0 %vm69_vm0, %v9495_v29  ;;  %7812 = vmatprep.subr.bf16.mxu1 %v10574_v26 }
0x11ef   :  { %7780 = vmatprep.mubr.msk.bf16.mxu0 %vm69_vm0, %v9501_v27 }
0x12b1   :  { %v3039_v28 = vpop.f32.mrb[44].mxu0  ;;  %v3095_v45 = vpop.f32.mrb[60].mxu1 }
0x12b2   :  { %v3040_v54 = vadd.f32 %v8401_v46, %v3039_v28  ;;  %v3096_v41 = vadd.f32 %v8402_v50, %v3095_v45  ;;  %v7742_v34 = vpop.f32.mrb[45].mxu0  ;;  %v7750_v48 = vpop.f32.mrb[61].mxu1  ;;  %v9588_v50 = vld [vmem:[#allocation2 + $0xa8] sm:$0xff] }
0x12b3   :  { %v3042_v18 = vpop.f32.mrb[46].mxu0  ;;  %v3098_v6 = vpop.f32.mrb[62].mxu1  ;;  %v9596_v48 = vld [vmem:[#allocation2 + $0xb8] sm:$0xff] }
0x12b4   :  { %v3157_v22 = vadd.f32 %v3040_v54, %v10577_v21  ;;  %v3164_v5 = vadd.f32 %v3096_v41, %v10578_v30  ;;  %v7743_v56 = vpop.f32.mrb[47].mxu0  ;;  %v7751_v12 = vpop.f32.mrb[63].mxu1  ;;  %v9607_v21 = vld [vmem:[%s10557_s4 + $0x8] ss:$0 sm:$0xff]  ;;  %v9613_v30 = vld [vmem:[%s10557_s4 + $0xb] ss:$0 sm:$0xff] }
0x12b5   :  { %v9619_v12 = vld [vmem:[%s10557_s4 + $0x9] ss:$0 sm:$0xff] }
0x12b6   :  { %v7064_v55 = vmul.f32 -1.442695, %v3157_v22  ;;  %v7065_v14 = vmul.f32 -1.442695, %v3164_v5 }
0x12b8   :  { %8271 = vpow2.f32 %v7064_v55 }
0x12b9   :  { %v3151_v0 = vpop.f32.mrb[48].mxu0  ;;  %v9530_v49 = vpop.f32.mrb[64].mxu1  ;;  %8273 = vpow2.f32 %v7065_v14 }
0x12ba   :  { %v7758_v40 = vpop.f32.mrb[49].mxu0  ;;  %v3287_v59 = vpop.f32.mrb[65].mxu1  ;;  %v3152_v17 = vadd.f32 %v8403_v44, %v3151_v0  ;;  %v9625_v0 = vld [vmem:[%s10557_s4 + $0xc] ss:$0 sm:$0xff] }
0x12bb   :  { %v3154_v58 = vpop.f32.mrb[50].mxu0  ;;  %v9532_v63 = vpop.f32.mrb[66].mxu1  ;;  %v3288_v22 = vadd.f32 %v9607_v21, %v3287_v59 }
0x12bc   :  { %v7759_v61 = vpop.f32.mrb[51].mxu0  ;;  %v9534_v52 = vpop.f32.mrb[67].mxu1 }
0x12bd   :  { %v3513_v5 = vadd.f32 %v9613_v30, %v3288_v22 }
0x12bf   :  { %v7108_v56 = vmul.f32 -1.442695, %v3513_v5 }
0x12c1   :  { %v9536_v53 = vpop.f32.mrb[52].mxu0 }
0x12c2   :  { %v8272_v47 = vpop.eup %8271  ;;  %v3377_v42 = vpop.f32.mrb[53].mxu0 }
0x12c3   :  { %v3161_v15 = vadd.f32 1.0, %v8272_v47  ;;  %v9538_v13 = vpop.f32.mrb[54].mxu0  ;;  %v8274_v24 = vpop.eup %8273  ;;  %v3378_v55 = vadd.f32 %v9619_v12, %v3377_v42 }
0x12c4   :  { %v9540_v19 = vpop.f32.mrb[55].mxu0  ;;  %v3168_v2 = vadd.f32 1.0, %v8274_v24 }
0x12c5   :  { %8275 = vrcp.f32 %v3161_v15  ;;  %v3526_v40 = vadd.f32 %v9625_v0, %v3378_v55 }
0x12c6   :  { %8277 = vrcp.f32 %v3168_v2 }
0x12c7   :  { %v7110_v59 = vmul.f32 -1.442695, %v3526_v40 }
0x12cf   :  { %v8276_v20 = vpop.eup %8275 }
0x12d0   :  { %v3171_v39 = vmul.f32 %v8276_v20, %v3152_v17  ;;  %v8278_v3 = vpop.eup %8277 }
0x12d1   :  { %v3174_v36 = vsub.f32 1.0, %v8278_v3  ;;  %v3176_v33 = vmul.f32 %v8278_v3, %v9468_v8  ;;  %v9567_v8 = vld [vmem:[#allocation2 + $0x90] sm:$0xff]  ;;  %v9650_v3 = vld [vmem:[%s10557_s4 + $0xd] ss:$0 sm:$0xff] }
0x12d2   :  { %v3172_v60 = vadd.f32 %v3171_v39, %v10579_v35  ;;  %v7100_v35 = vld [vmem:[%s10557_s4 + $0xa] ss:$0 sm:$0xff] }
0x12d4   :  { %8279 = vtanh.f32 %v3172_v60 }
0x12d5   :  { %8281 = vpow2.f32 %v7108_v56 }
0x12d6   :  { %8283 = vpow2.f32 %v7110_v59 }
0x12de   :  { %v8280_v1 = vpop.eup %8279 }
0x12df   :  { %v3175_v7 = vmul.f32 %v8280_v1, %v3174_v36  ;;  %v8282_v14 = vpop.eup %8281 }
0x12e0   :  { %v3517_v58 = vadd.f32 1.0, %v8282_v14  ;;  %v8284_v44 = vpop.eup %8283 }
0x12e1   :  { %v3177_v37 = vadd.f32 %v3176_v33, %v3175_v7  ;;  %v3530_v39 = vadd.f32 1.0, %v8284_v44 }
0x12e2   :  { %8285 = vrcp.f32 %v3517_v58 }
0x12e3   :  { %3179 = vst.msk [vmem:[#allocation2 + $0x78] sm:$0xff] %vm69_vm0, %v3177_v37  ;;  %8287 = vrcp.f32 %v3530_v39  ;;  %v9668_v39 = vld [vmem:[#allocation2 + $0xa0] sm:$0xff] }
0x12ea   :  { %v3211_v51 = vld [vmem:[#allocation2 + $0x78] sm:$0xff] }
0x12eb   :  { %v3215_v4 = vpack.c.bf16 %v3211_v51, %v9404_v43  ;;  %v9565_v43 = vld [vmem:[%s10557_s4 + $0xe] ss:$0 sm:$0xff] }
0x12ec   :  { %v3560_v28 = vmul.f32 %v9565_v43, %v9575_v16  ;;  %v3564_v41 = vmul.f32 %v9565_v43, %v9588_v50  ;;  %v3566_v18 = vmul.f32 %v9565_v43, %v9596_v48  ;;  %v8286_v60 = vpop.eup %8285 }
0x12ed   :  { %7769 = vmatmul.mubr.msk.bf16.gmra.mrb[68].mxu1 %vm69_vm0, %v3215_v4  ;;  %7781 = vmatmul.mubr.msk.bf16.gmra.mrb[56].mxu0 %vm69_vm0, %v3215_v4  ;;  %v3539_v37 = vmul.f32 %v8286_v60, %v9650_v3  ;;  %v8288_v40 = vpop.eup %8287 }
0x12ee   :  { %7788 = vmatprep.mubr.msk.bf16.mxu1 %vm69_vm0, %v9481_v32  ;;  %7800 = vmatprep.mubr.msk.bf16.mxu0 %vm8450_vm9, %v10574_v26  ;;  %v9569_v32 = vld [vmem:[#allocation2 + $0x98] sm:$0xff]  ;;  %v3570_v46 = vsel %vm69_vm0, %v3560_v28, 0.0  ;;  %v9593_v34 = vsel %vm69_vm0, %v3564_v41, 0.0  ;;  %v9601_v6 = vsel %vm69_vm0, %v3566_v18, 0.0  ;;  %v3542_v14 = vsub.f32 1.0, %v8288_v40 }
0x12ef   :  { %3571 = vadd.xlane.f32.xlu1 %v3570_v46 }
0x12f3   :  { %3583 = vadd.xlane.f32.xlu1 %v9593_v34 }
0x12f5   :  { %7789 = vmatmul.mubr.msk.bf16.vlgmr.msra.gmra.mrb[72].mxu1 %vm69_vm0, %v9495_v29  ;;  %v3561_v29 = vmul.f32 %v9565_v43, %v9567_v8 }
0x12f6   :  { %7792 = vmatprep.mubr.msk.bf16.mxu1 %vm69_vm0, %v9501_v27  ;;  %v3562_v27 = vmul.f32 %v9565_v43, %v9569_v32 }
0x12f7   :  { %v9580_v45 = vsel %vm69_vm0, %v3561_v29, 0.0  ;;  %3589 = vadd.xlane.f32.xlu1 %v9601_v6 }
0x12f8   :  { %3574 = vadd.xlane.f32.xlu0 %v9580_v45  ;;  %v9585_v54 = vsel %vm69_vm0, %v3562_v27, 0.0 }
0x12fc   :  { %3577 = vadd.xlane.f32.xlu0 %v9585_v54 }
0x12fd   :  { %7793 = vmatmul.mubr.msk.bf16.gmra.mrb[76].mxu1 %vm69_vm0, %v3215_v4 }
0x12fe   :  { %7816 = vmatprep.mubr.msk.bf16.mxu1 %vm8450_vm9, %v10574_v26 }
0x13c0   :  { %v9628_v61 = vpop.f32.mrb[68].mxu1  ;;  %v9630_v47 = vpop.f32.mrb[56].mxu0 }
0x13c1   :  { %10580 = vst [vmem:[#allocation10_spill] sm:$0xff] %v9628_v61  ;;  %10581 = vst [vmem:[#allocation13_spill] sm:$0xff] %v9630_v47  ;;  %v9632_v15 = vpop.f32.mrb[69].mxu1  ;;  %v9634_v24 = vpop.f32.mrb[57].mxu0 }
0x13c2   :  { %v9636_v42 = vpop.f32.mrb[70].mxu1  ;;  %v9638_v2 = vpop.f32.mrb[58].mxu0 }
0x13c3   :  { %10582 = vst [vmem:[#allocation11_spill] sm:$0xff] %v9636_v42  ;;  %10583 = vst [vmem:[#allocation12_spill] sm:$0xff] %v9638_v2  ;;  %v9640_v17 = vpop.f32.mrb[71].mxu1  ;;  %v9642_v20 = vpop.f32.mrb[59].mxu0 }
0x13c4   :  { %10584 = vst [vmem:[#allocation14_spill] sm:$0xff] %v9640_v17  ;;  %10585 = vst [vmem:[#allocation15_spill] sm:$0xff] %v9642_v20 }
0x13c8   :  { %v7790_v36 = vpop.f32.mrb[72].mxu1 }
0x13c9   :  { %v9652_v1 = vadd.f32 %v7790_v36, %v7100_v35  ;;  %v3467_v33 = vpop.f32.mrb[73].mxu1 }
0x13ca   :  { %v3468_v7 = vadd.f32 %v7100_v35, %v3467_v33  ;;  %v7791_v51 = vpop.f32.mrb[74].mxu1  ;;  %v3563_v33 = vmul.f32 %v9565_v43, %v9668_v39 }
0x13cb   :  { %v9655_v4 = vadd.f32 %v7791_v51, %v7100_v35  ;;  %v3470_v29 = vpop.f32.mrb[75].mxu1 }
0x13cc   :  { %v3540_v27 = vadd.f32 %v3539_v37, %v3468_v7  ;;  %v9657_v28 = vadd.f32 %v7100_v35, %v3470_v29  ;;  %v9676_v7 = vld [vmem:[#allocation2 + $0xb0] sm:$0xff]  ;;  %v9683_v37 = vsel %vm69_vm0, %v3563_v33, 0.0 }
0x13cd   :  { %v3565_v51 = vmul.f32 %v9565_v43, %v9676_v7 }
0x13ce   :  { %8289 = vtanh.f32 %v3540_v27  ;;  %v3575_v27 = vpop.xlane.xlu0 %3574 }
0x13cf   :  { %v9689_v29 = vsel %vm69_vm0, %v3565_v51, 0.0 }
0x13d0   :  { %v7794_v46 = vpop.f32.mrb[76].mxu1 }
0x13d1   :  { %v9659_v41 = vadd.f32 %v7794_v46, %v7100_v35  ;;  %v3483_v18 = vpop.f32.mrb[77].mxu1  ;;  %v3572_v46 = vpop.xlane.xlu1 %3571 }
0x13d2   :  { %v9661_v22 = vadd.f32 %v7100_v35, %v3483_v18  ;;  %v7795_v5 = vpop.f32.mrb[78].mxu1  ;;  %v3578_v18 = vpop.xlane.xlu0 %3577 }
0x13d3   :  { %10586 = vst [vmem:[#allocation16_spill] sm:$0xff] %v9659_v41  ;;  %v9663_v56 = vadd.f32 %v7795_v5, %v7100_v35  ;;  %v3486_v55 = vpop.f32.mrb[79].mxu1  ;;  %v3606_v5 = vrot.slane %v3572_v46, %v8744_v25  ;;  %v8404_v46 = vld [vmem:[%s10555_s2 + $0x8] sm:$0xff] }
0x13d4   :  { %10587 = vst [vmem:[#allocation17_spill] sm:$0xff] %v9661_v22  ;;  %v9665_v59 = vadd.f32 %v7100_v35, %v3486_v55 }
0x13d5   :  { %10588 = vst [vmem:[#allocation18_spill] sm:$0xff] %v9663_v56  ;;  %v3584_v55 = vpop.xlane.xlu1 %3583 }
0x13d6   :  { %10589 = vst [vmem:[#allocation19_spill] sm:$0xff] %v9665_v59  ;;  %v3622_v41 = vrot.slane %v3584_v55, %v8744_v25 }
0x13d8   :  { %v8290_v58 = vpop.eup %8289 }
0x13d9   :  { %v3543_v44 = vmul.f32 %v8290_v58, %v3542_v14  ;;  %v3610_v58 = vrot.slane %v3575_v27, %v8744_v25  ;;  %v3590_v27 = vpop.xlane.xlu1 %3589 }
0x13db   :  { %3544 = vst.msk [vmem:[#allocation2 + $0x80] sm:$0xff] %vm69_vm0, %v3543_v44  ;;  %v9695_v44 = vstv %s7066_s11 }
0x13e2   :  { %v9670_v60 = vld [vmem:[#allocation2 + $0x80] sm:$0xff] }
0x13e3   :  { %v3559_v36 = vmul.f32 %v9565_v43, %v9670_v60 }
0x13e5   :  { %v9679_v35 = vsel %vm69_vm0, %v3559_v36, 0.0  ;;  %v3614_v36 = vrot.slane %v3578_v18, %v8744_v25 }
0x13e6   :  { %3568 = vadd.xlane.f32.xlu0 %v9679_v35 }
0x13ea   :  { %3580 = vadd.xlane.f32.xlu0 %v9683_v37 }
0x13ee   :  { %3586 = vadd.xlane.f32.xlu0 %v9689_v29 }
0x1473   :  { %v3569_v40 = vpop.xlane.xlu0 %3568 }
0x1474   :  { %v3602_v14 = vrot.slane %v3569_v40, %v8744_v25  ;;  %v3182_v40 = vmul.f32 %v8404_v46, %v9695_v44 }
0x1476   :  { %v3631_v33 = vsel %vm631_vm1, %v3606_v5, %v3602_v14  ;;  %v3630_v5 = vrot.slane %v3590_v27, %v8744_v25 }
0x1477   :  { %v3632_v51 = vsel %vm633_vm2, %v3610_v58, %v3631_v33  ;;  %v3581_v56 = vpop.xlane.xlu0 %3580 }
0x1478   :  { %v3633_v2 = vsel %vm635_vm3, %v3614_v36, %v3632_v51  ;;  %v3618_v42 = vrot.slane %v3581_v56, %v8744_v25  ;;  %v8405_v56 = vld [vmem:[%s10555_s2 + $0x48] sm:$0xff] }
0x1479   :  { %v3189_v58 = vadd.f32 %v8405_v56, %v3182_v40 }
0x147a   :  { %v3634_v18 = vsel %vm637_vm4, %v3618_v42, %v3633_v2 }
0x147b   :  { %v3587_v47 = vpop.xlane.xlu0 %3586  ;;  %v3635_v36 = vsel %vm639_vm5, %v3622_v41, %v3634_v18 }
0x147c   :  { %v3626_v14 = vrot.slane %v3587_v47, %v8744_v25 }
0x147e   :  { %v3636_v33 = vsel %vm641_vm6, %v3626_v14, %v3635_v36  ;;  %v8119_v36 = vld [vmem:[%s10556_s3 + $0xa0] sm:$0xff]  }
0x147f   :  { %v3637_v51 = vsel %vm643_vm7, %v3630_v5, %v3636_v33  ;;  %7797 = vmatpush3.bf16.msra.mxu0 %v8119_v36  ;;  %v8120_v33 = vld [vmem:[%s10556_s3 + $0xa8] sm:$0xff]  }
0x1480   :  { %v3639_v46 = vadd.f32 %v3637_v51, %v3189_v58  ;;  %7798 = vmatprep.subr.bf16.mxu0 %v10574_v26  ;;  %v8121_v51 = vld [vmem:[%s10556_s3 + $0xc0] sm:$0xff]  }
0x1481   :  { %7813 = vmatpush3.bf16.msra.mxu1 %v8121_v51 }
0x1482   :  { %v3640_v55 = vsel %vm647_vm8, %v3639_v46, -inf  ;;  %7814 = vmatprep.subr.bf16.mxu1 %v10574_v26 }
0x1483   :  { %v3641_v42 = vrot.slane %v3640_v55, 4  ;;  %7799 = vmatpush3.bf16.msra.mxu0 %v8120_v33 }
0x1484   :  { %7804 = vmatprep.subr.bf16.mxu0 %v10574_v26 }
0x1485   :  { %v3642_v2 = vmax.f32 %v3640_v55, %v3641_v42  ;;  %v8122_v55 = vld [vmem:[%s10556_s3 + $0xc8] sm:$0xff]  }
0x1486   :  { %7815 = vmatpush3.bf16.msra.mxu1 %v8122_v55 }
0x1487   :  { %v3643_v61 = vrot.slane %v3642_v2, 2  ;;  %7828 = vmatprep.subr.bf16.mxu1 %v10574_v26 }
0x1489   :  { %v3644_v27 = vmax.f32 %v3642_v2, %v3643_v61 }
0x148b   :  { %v3645_v59 = vrot.slane %v3644_v27, 1 }
0x148d   :  { %v3646_v47 = vmax.f32 %v3644_v27, %v3645_v59 }
0x148f   :  { %v3647_v20 = vsub.f32 %v3639_v46, %v3646_v47 }
0x1491   :  { %v3648_v17 = vmul.f32 1.442695, %v3647_v20 }
0x1493   :  { %8291 = vpow2.f32 %v3648_v17 }
0x149d   :  { %v8292_v22 = vpop.eup %8291 }
0x149e   :  { %v3650_v40 = vsel %vm647_vm8, %v8292_v22, 0.0 }
0x149f   :  { %v3651_v41 = vrot.slane %v3650_v40, 4 }
0x14a1   :  { %v3652_v18 = vadd.f32 %v3651_v41, %v3650_v40 }
0x14a3   :  { %v3653_v14 = vrot.slane %v3652_v18, 2 }
0x14a5   :  { %v3654_v56 = vadd.f32 %v3653_v14, %v3652_v18 }
0x14a7   :  { %v3655_v5 = vrot.slane %v3654_v56, 1 }
0x14a9   :  { %v3656_v58 = vadd.f32 %v3655_v5, %v3654_v56 }
0x14ab   :  { %8293 = vrcp.f32 %v3656_v58 }
0x14b5   :  { %v8294_v61 = vpop.eup %8293 }
0x14b6   :  { %v3658_v59 = vmul.f32 %v8294_v61, %v8292_v22 }
0x14b8   :  { %v3669_v17 = vrot.slane %v3658_v59, %v8776_v57  ;;  %v3662_v20 = vrot.slane %v3658_v59, %v8779_v9  ;;  %v3676_v46 = vrot.slane %v3658_v59, %v8785_v62  ;;  %v3690_v22 = vrot.slane %v3658_v59, %v8788_v11 }
0x14b9   :  { %v3683_v42 = vrot.slane %v3658_v59, %v8799_v23  ;;  %v3704_v2 = vrot.slane %v3658_v59, %v8802_v31  ;;  %v3697_v27 = vrot.slane %v3658_v59, %v8812_v38  ;;  %v3711_v47 = vrot.slane %v3658_v59, %v8820_v10 }
0x14ba   :  { %3671 = vbcast.lane.b32.xlu1 %v3669_v17, 256  ;;  %3664 = vbcast.lane.b32.xlu0 %v3662_v20, 256 }
0x14be   :  { %3678 = vbcast.lane.b32.xlu1 %v3676_v46, 256  ;;  %3692 = vbcast.lane.b32.xlu0 %v3690_v22, 256 }
0x14c2   :  { %3685 = vbcast.lane.b32.xlu1 %v3683_v42, 256  ;;  %3706 = vbcast.lane.b32.xlu0 %v3704_v2, 256 }
0x14c6   :  { %3699 = vbcast.lane.b32.xlu1 %v3697_v27, 256 }
0x14ca   :  { %3713 = vbcast.lane.b32.xlu1 %v3711_v47, 256 }
0x14e1   :  { %3945 = vadd.xlane.f32.xlu0 %v9679_v35 }
0x14e5   :  { %3951 = vadd.xlane.f32.xlu0 %v9580_v45 }
0x14e9   :  { %3954 = vadd.xlane.f32.xlu0 %v9585_v54 }
0x14ed   :  { %3957 = vadd.xlane.f32.xlu0 %v9683_v37 }
0x14f1   :  { %3963 = vadd.xlane.f32.xlu0 %v9689_v29 }
0x152c   :  { %v3672_v40 = vpop.permute.xlu1 %3671  ;;  %v3665_v41 = vpop.permute.xlu0 %3664 }
0x152d   :  { %v3716_v18 = vmul.f32 %v3672_v40, %v9575_v16  ;;  %v3715_v14 = vmul.f32 %v3665_v41, %v9670_v60  ;;  %v8123_v40 = vld [vmem:[%s10556_s3 + $0xb0] sm:$0xff]  }
0x152f   :  { %v3723_v36 = vadd.f32 %v3716_v18, %v3715_v14  ;;  %v8124_v18 = vld [vmem:[%s10556_s3 + $0xb8] sm:$0xff]  }
0x1530   :  { %v3679_v56 = vpop.permute.xlu1 %3678  ;;  %v3693_v58 = vpop.permute.xlu0 %3692 }
0x1531   :  { %v3717_v5 = vmul.f32 %v3679_v56, %v9567_v8  ;;  %v3719_v17 = vmul.f32 %v3693_v58, %v9668_v39 }
0x1533   :  { %v3724_v59 = vadd.f32 %v3723_v36, %v3717_v5  ;;  %v3291_v5 = vadd.f32 %v9607_v21, %v9534_v52 }
0x1534   :  { %v3686_v61 = vpop.permute.xlu1 %3685  ;;  %v3707_v33 = vpop.permute.xlu0 %3706 }
0x1535   :  { %v3718_v45 = vmul.f32 %v3686_v61, %v9569_v32  ;;  %v3721_v16 = vmul.f32 %v3707_v33, %v9676_v7 }
0x1537   :  { %v3725_v20 = vadd.f32 %v3724_v59, %v3718_v45 }
0x1538   :  { %v3700_v51 = vpop.permute.xlu1 %3699 }
0x1539   :  { %v3720_v46 = vmul.f32 %v3700_v51, %v9588_v50  ;;  %v3726_v22 = vadd.f32 %v3725_v20, %v3719_v17 }
0x153b   :  { %v3727_v55 = vadd.f32 %v3726_v22, %v3720_v46  ;;  %v3381_v22 = vadd.f32 %v9619_v12, %v9540_v19 }
0x153c   :  { %v3714_v42 = vpop.permute.xlu1 %3713 }
0x153d   :  { %v3722_v2 = vmul.f32 %v3714_v42, %v9596_v48  ;;  %v3728_v27 = vadd.f32 %v3727_v55, %v3721_v16 }
0x153f   :  { %v3729_v47 = vadd.f32 %v3728_v27, %v3722_v2 }
0x1541   :  { %v3730_v41 = vpack.c.bf16 %v3729_v47, %v3729_v47 }
0x1543   :  { %7801 = vmatmul.mubr.msk.bf16.vlgmr.msra.gmra.mrb[60].mxu0 %vm69_vm0, %v3730_v41  ;;  %7817 = vmatmul.mubr.msk.bf16.vlgmr.msra.gmra.mrb[80].mxu1 %vm69_vm0, %v3730_v41 }
0x1544   :  { %7805 = vmatpush3.bf16.msra.mxu0 %v8123_v40  ;;  %7808 = vmatprep.mubr.msk.bf16.mxu0 %vm8450_vm9, %v10574_v26 }
0x1545   :  { %7806 = vmatprep.subr.bf16.mxu0 %v10574_v26  ;;  %7832 = vmatprep.mubr.msk.bf16.mxu1 %vm8450_vm9, %v10574_v26 }
0x1548   :  { %7807 = vmatpush3.bf16.msra.mxu0 %v8124_v18 }
0x1549   :  { %7820 = vmatprep.subr.bf16.mxu0 %v10574_v26 }
0x154b   :  { %7809 = vmatmul.mubr.msk.bf16.vlgmr.msra.gmra.mrb[64].mxu0 %vm69_vm0, %v3730_v41 }
0x154c   :  { %7824 = vmatprep.mubr.msk.bf16.mxu0 %vm8450_vm9, %v10574_v26 }
0x1616   :  { %v3785_v14 = vpop.f32.mrb[60].mxu0  ;;  %v3899_v56 = vpop.f32.mrb[80].mxu1 }
0x1617   :  { %v3786_v58 = vadd.f32 %v9613_v30, %v3785_v14  ;;  %v7802_v36 = vpop.f32.mrb[61].mxu0  ;;  %v7818_v61 = vpop.f32.mrb[81].mxu1 }
0x1618   :  { %v3788_v59 = vpop.f32.mrb[62].mxu0  ;;  %v3902_v45 = vpop.f32.mrb[82].mxu1 }
0x1619   :  { %v3905_v17 = vadd.f32 %v3786_v58, %v3291_v5  ;;  %v7803_v20 = vpop.f32.mrb[63].mxu0  ;;  %v7819_v33 = vpop.f32.mrb[83].mxu1  ;;  %v3900_v5 = vadd.f32 %v9650_v3, %v3899_v56 }
0x161b   :  { %v7134_v51 = vmul.f32 -1.442695, %v3905_v17 }
0x161d   :  { %8295 = vpow2.f32 %v7134_v51 }
0x161e   :  { %v3842_v46 = vpop.f32.mrb[64].mxu0 }
0x161f   :  { %v3843_v16 = vadd.f32 %v9625_v0, %v3842_v46  ;;  %v7810_v55 = vpop.f32.mrb[65].mxu0 }
0x1620   :  { %v3845_v42 = vpop.f32.mrb[66].mxu0 }
0x1621   :  { %v3912_v52 = vadd.f32 %v3843_v16, %v3381_v22  ;;  %v7811_v2 = vpop.f32.mrb[67].mxu0 }
0x1623   :  { %v7135_v27 = vmul.f32 -1.442695, %v3912_v52 }
0x1625   :  { %8297 = vpow2.f32 %v7135_v27 }
0x1627   :  { %v8296_v40 = vpop.eup %8295 }
0x1628   :  { %v3909_v41 = vadd.f32 1.0, %v8296_v40 }
0x162a   :  { %8299 = vrcp.f32 %v3909_v41 }
0x162f   :  { %v8298_v18 = vpop.eup %8297 }
0x1630   :  { %v3916_v14 = vadd.f32 1.0, %v8298_v18 }
0x1632   :  { %8301 = vrcp.f32 %v3916_v14 }
0x1634   :  { %v8300_v58 = vpop.eup %8299 }
0x1635   :  { %v3919_v36 = vmul.f32 %v8300_v58, %v3900_v5  ;;  %v8406_v58 = vld [vmem:[%s10555_s2 + $0x10] sm:$0xff] }
0x1637   :  { %v3920_v19 = vadd.f32 %v3919_v36, %v9657_v28  ;;  %v3946_v28 = vpop.xlane.xlu0 %3945  ;;  %v3183_v36 = vmul.f32 %v8406_v58, %v9695_v44 }
0x1638   :  { %v3979_v42 = vrot.slane %v3946_v28, %v8744_v25 }
0x1639   :  { %8303 = vtanh.f32 %v3920_v19 }
0x163b   :  { %v3952_v22 = vpop.xlane.xlu0 %3951 }
0x163c   :  { %v8302_v61 = vpop.eup %8301  ;;  %v3987_v2 = vrot.slane %v3952_v22, %v8744_v25 }
0x163d   :  { %v3922_v59 = vsub.f32 1.0, %v8302_v61  ;;  %v3924_v20 = vmul.f32 %v8302_v61, %v3729_v47 }
0x163f   :  { %v3955_v47 = vpop.xlane.xlu0 %3954 }
0x1640   :  { %v3991_v40 = vrot.slane %v3955_v47, %v8744_v25 }
0x1643   :  { %v8304_v45 = vpop.eup %8303  ;;  %v3958_v16 = vpop.xlane.xlu0 %3957 }
0x1644   :  { %v3923_v17 = vmul.f32 %v8304_v45, %v3922_v59  ;;  %v3995_v27 = vrot.slane %v3958_v16, %v8744_v25 }
0x1646   :  { %v3925_v33 = vadd.f32 %v3924_v20, %v3923_v17  ;;  %v8407_v20 = vld [vmem:[%s10555_s2 + $0x50] sm:$0xff] }
0x1647   :  { %v3964_v18 = vpop.xlane.xlu0 %3963 }
0x1648   :  { %3927 = vst.msk [vmem:[#allocation2 + $0x88] sm:$0xff] %vm69_vm0, %v3925_v33  ;;  %v4003_v45 = vrot.slane %v3964_v18, %v8744_v25  ;;  %v3190_v33 = vadd.f32 %v8407_v20, %v3183_v36 }
0x164f   :  { %v9781_v51 = vld [vmem:[#allocation2 + $0x88] sm:$0xff] }
0x1650   :  { %v3937_v46 = vmul.f32 %v9565_v43, %v9781_v51 }
0x1652   :  { %v9786_v56 = vsel %vm69_vm0, %v3937_v46, 0.0 }
0x1653   :  { %3948 = vadd.xlane.f32.xlu1 %v9786_v56 }
0x1657   :  { %3960 = vadd.xlane.f32.xlu1 %v9593_v34 }
0x165b   :  { %3966 = vadd.xlane.f32.xlu1 %v9601_v6 }
0x16e0   :  { %v3949_v55 = vpop.xlane.xlu1 %3948 }
0x16e1   :  { %v3983_v52 = vrot.slane %v3949_v55, %v8744_v25 }
0x16e3   :  { %v4008_v41 = vsel %vm631_vm1, %v3983_v52, %v3979_v42 }
0x16e4   :  { %v4009_v14 = vsel %vm633_vm2, %v3987_v2, %v4008_v41  ;;  %v3961_v5 = vpop.xlane.xlu1 %3960 }
0x16e5   :  { %v4010_v19 = vsel %vm635_vm3, %v3991_v40, %v4009_v14  ;;  %v3999_v61 = vrot.slane %v3961_v5, %v8744_v25 }
0x16e6   :  { %v4011_v59 = vsel %vm637_vm4, %v3995_v27, %v4010_v19 }
0x16e7   :  { %v4012_v17 = vsel %vm639_vm5, %v3999_v61, %v4011_v59 }
0x16e8   :  { %v3967_v46 = vpop.xlane.xlu1 %3966  ;;  %v4013_v22 = vsel %vm641_vm6, %v4003_v45, %v4012_v17 }
0x16e9   :  { %v4007_v28 = vrot.slane %v3967_v46, %v8744_v25 }
0x16eb   :  { %v4014_v47 = vsel %vm643_vm7, %v4007_v28, %v4013_v22  ;;  %v8125_v22 = vld [vmem:[%s10556_s3 + $0xa0] sm:$0xff]  }
0x16ec   :  { %v4016_v16 = vadd.f32 %v4014_v47, %v3190_v33  ;;  %v8126_v47 = vld [vmem:[%s10556_s3 + $0xb0] sm:$0xff]   ;;  %7821 = vmatpush3.bf16.msra.mxu0 %v8125_v22 }
0x16ed   :  { %7829 = vmatpush3.bf16.msra.mxu1 %v8126_v47  ;;  %7822 = vmatprep.subr.bf16.mxu0 %v10574_v26 }
0x16ee   :  { %v4017_v55 = vsel %vm647_vm8, %v4016_v16, -inf  ;;  %7830 = vmatprep.subr.bf16.mxu1 %v10574_v26 }
0x16ef   :  { %v4018_v42 = vrot.slane %v4017_v55, 4 }
0x16f1   :  { %v4019_v52 = vmax.f32 %v4017_v55, %v4018_v42  ;;  %v8127_v42 = vld [vmem:[%s10556_s3 + $0xa8] sm:$0xff]  }
0x16f2   :  { %7823 = vmatpush3.bf16.msra.mxu0 %v8127_v42  ;;  %v8129_v42 = vld [vmem:[%s10556_s3 + $0xc0] sm:$0xff]  }
0x16f3   :  { %v4020_v2 = vrot.slane %v4019_v52, 2  ;;  %7836 = vmatprep.subr.bf16.mxu0 %v10574_v26 }
0x16f5   :  { %v4021_v27 = vmax.f32 %v4019_v52, %v4020_v2  ;;  %v8128_v52 = vld [vmem:[%s10556_s3 + $0xb8] sm:$0xff]  }
0x16f6   :  { %7831 = vmatpush3.bf16.msra.mxu1 %v8128_v52 }
0x16f7   :  { %v4022_v40 = vrot.slane %v4021_v27, 1  ;;  %7844 = vmatprep.subr.bf16.mxu1 %v10574_v26 }
0x16f9   :  { %v4023_v41 = vmax.f32 %v4021_v27, %v4022_v40 }
0x16fb   :  { %v4024_v18 = vsub.f32 %v4016_v16, %v4023_v41 }
0x16fd   :  { %v4025_v14 = vmul.f32 1.442695, %v4024_v18 }
0x16ff   :  { %8305 = vpow2.f32 %v4025_v14 }
0x1709   :  { %v8306_v5 = vpop.eup %8305 }
0x170a   :  { %v4027_v58 = vsel %vm647_vm8, %v8306_v5, 0.0 }
0x170b   :  { %v4028_v36 = vrot.slane %v4027_v58, 4 }
0x170d   :  { %v4029_v19 = vadd.f32 %v4028_v36, %v4027_v58 }
0x170f   :  { %v4030_v61 = vrot.slane %v4029_v19, 2 }
0x1711   :  { %v4031_v59 = vadd.f32 %v4030_v61, %v4029_v19 }
0x1713   :  { %v4032_v45 = vrot.slane %v4031_v59, 1 }
0x1715   :  { %v4033_v17 = vadd.f32 %v4032_v45, %v4031_v59 }
0x1717   :  { %8307 = vrcp.f32 %v4033_v17 }
0x1721   :  { %v8308_v20 = vpop.eup %8307 }
0x1722   :  { %v4035_v33 = vmul.f32 %v8308_v20, %v8306_v5 }
0x1724   :  { %v4046_v46 = vrot.slane %v4035_v33, %v8776_v57  ;;  %v4039_v28 = vrot.slane %v4035_v33, %v8779_v9  ;;  %v4053_v16 = vrot.slane %v4035_v33, %v8785_v62  ;;  %v4067_v55 = vrot.slane %v4035_v33, %v8788_v11 }
0x1725   :  { %v4060_v2 = vrot.slane %v4035_v33, %v8799_v23  ;;  %v4081_v27 = vrot.slane %v4035_v33, %v8802_v31  ;;  %v4074_v40 = vrot.slane %v4035_v33, %v8812_v38  ;;  %v4088_v41 = vrot.slane %v4035_v33, %v8820_v10 }
0x1726   :  { %4048 = vbcast.lane.b32.xlu1 %v4046_v46, 256  ;;  %4041 = vbcast.lane.b32.xlu0 %v4039_v28, 256 }
0x172a   :  { %4055 = vbcast.lane.b32.xlu1 %v4053_v16, 256  ;;  %4069 = vbcast.lane.b32.xlu0 %v4067_v55, 256 }
0x172e   :  { %4062 = vbcast.lane.b32.xlu1 %v4060_v2, 256  ;;  %4083 = vbcast.lane.b32.xlu0 %v4081_v27, 256  ;;  %v8130_v2 = vld [vmem:[%s10556_s3 + $0xc8] sm:$0xff]  }
0x1732   :  { %4076 = vbcast.lane.b32.xlu1 %v4074_v40, 256 }
0x1736   :  { %4090 = vbcast.lane.b32.xlu1 %v4088_v41, 256  ;;  %v3296_v41 = vadd.f32 %v9530_v49, %v9607_v21 }
0x174d   :  { %4319 = vadd.xlane.f32.xlu0 %v9679_v35 }
0x1751   :  { %4328 = vadd.xlane.f32.xlu0 %v9585_v54 }
0x1755   :  { %4331 = vadd.xlane.f32.xlu0 %v9683_v37 }
0x175a   :  { %4322 = vadd.xlane.f32.xlu1 %v9786_v56 }
0x175e   :  { %4334 = vadd.xlane.f32.xlu1 %v9593_v34 }
0x1762   :  { %4340 = vadd.xlane.f32.xlu1 %v9601_v6 }
0x1798   :  { %v4049_v18 = vpop.permute.xlu1 %4048  ;;  %v4042_v14 = vpop.permute.xlu0 %4041 }
0x1799   :  { %v4093_v5 = vmul.f32 %v4049_v18, %v9781_v51  ;;  %v4092_v58 = vmul.f32 %v4042_v14, %v9670_v60  ;;  %v3386_v18 = vadd.f32 %v9536_v53, %v9619_v12 }
0x179b   :  { %v4100_v59 = vadd.f32 %v4093_v5, %v4092_v58 }
0x179c   :  { %v4056_v36 = vpop.permute.xlu1 %4055  ;;  %v4070_v61 = vpop.permute.xlu0 %4069 }
0x179d   :  { %v4094_v19 = vmul.f32 %v4056_v36, %v9567_v8  ;;  %v4096_v17 = vmul.f32 %v4070_v61, %v9668_v39 }
0x179f   :  { %v4101_v45 = vadd.f32 %v4100_v59, %v4094_v19 }
0x17a0   :  { %v4063_v54 = vpop.permute.xlu1 %4062  ;;  %v4084_v20 = vpop.permute.xlu0 %4083 }
0x17a1   :  { %v4095_v37 = vmul.f32 %v4063_v54, %v9569_v32  ;;  %v4098_v28 = vmul.f32 %v4084_v20, %v9676_v7 }
0x17a3   :  { %v4102_v34 = vadd.f32 %v4101_v45, %v4095_v37 }
0x17a4   :  { %v4077_v6 = vpop.permute.xlu1 %4076 }
0x17a5   :  { %v4097_v33 = vmul.f32 %v4077_v6, %v9588_v50  ;;  %v4103_v46 = vadd.f32 %v4102_v34, %v4096_v17 }
0x17a7   :  { %v4104_v22 = vadd.f32 %v4103_v46, %v4097_v33 }
0x17a8   :  { %v4091_v47 = vpop.permute.xlu1 %4090 }
0x17a9   :  { %v4099_v8 = vmul.f32 %v4091_v47, %v9596_v48  ;;  %v4105_v16 = vadd.f32 %v4104_v22, %v4098_v28 }
0x17ab   :  { %v4106_v55 = vadd.f32 %v4105_v16, %v4099_v8 }
0x17ad   :  { %v4107_v52 = vpack.c.bf16 %v4106_v55, %v4106_v55 }
0x17af   :  { %7825 = vmatmul.mubr.msk.bf16.vlgmr.msra.gmra.mrb[68].mxu0 %vm69_vm0, %v4107_v52  ;;  %7833 = vmatmul.mubr.msk.bf16.vlgmr.msra.gmra.mrb[84].mxu1 %vm69_vm0, %v4107_v52 }
0x17b0   :  { %7837 = vmatpush3.bf16.msra.mxu0 %v8129_v42  ;;  %7840 = vmatprep.mubr.msk.bf16.mxu0 %vm8450_vm9, %v10574_v26 }
0x17b1   :  { %7838 = vmatprep.subr.bf16.mxu0 %v10574_v26  ;;  %7848 = vmatprep.mubr.msk.bf16.mxu1 %vm8450_vm9, %v10574_v26 }
0x17b4   :  { %7839 = vmatpush3.bf16.msra.mxu0 %v8130_v2 }
0x17b5   :  { %7852 = vmatprep.subr.bf16.mxu0 %v10574_v26 }
0x17b7   :  { %7841 = vmatmul.mubr.msk.bf16.vlgmr.msra.gmra.mrb[72].mxu0 %vm69_vm0, %v4107_v52 }
0x17b8   :  { %7856 = vmatprep.mubr.msk.bf16.mxu0 %vm8450_vm9, %v10574_v26 }
0x1882   :  { %v4161_v27 = vpop.f32.mrb[68].mxu0  ;;  %v4217_v40 = vpop.f32.mrb[84].mxu1 }
0x1883   :  { %v4162_v14 = vadd.f32 %v9613_v30, %v4161_v27  ;;  %v4218_v5 = vadd.f32 %v9625_v0, %v4217_v40  ;;  %v7826_v58 = vpop.f32.mrb[69].mxu0  ;;  %v7834_v36 = vpop.f32.mrb[85].mxu1 }
0x1884   :  { %v4164_v19 = vpop.f32.mrb[70].mxu0  ;;  %v4220_v61 = vpop.f32.mrb[86].mxu1 }
0x1885   :  { %v4279_v59 = vadd.f32 %v4162_v14, %v3296_v41  ;;  %v4286_v54 = vadd.f32 %v4218_v5, %v3386_v18  ;;  %v7827_v45 = vpop.f32.mrb[71].mxu0  ;;  %v7835_v37 = vpop.f32.mrb[87].mxu1 }
0x1886   :  { %v4323_v18 = vpop.xlane.xlu1 %4322 }
0x1887   :  { %v7157_v17 = vmul.f32 -1.442695, %v4279_v59  ;;  %v7158_v49 = vmul.f32 -1.442695, %v4286_v54  ;;  %v4357_v5 = vrot.slane %v4323_v18, %v8744_v25 }
0x1889   :  { %8309 = vpow2.f32 %v7157_v17 }
0x188a   :  { %v4273_v34 = vpop.f32.mrb[72].mxu0  ;;  %8311 = vpow2.f32 %v7158_v49  ;;  %v4335_v14 = vpop.xlane.xlu1 %4334 }
0x188b   :  { %v7842_v20 = vpop.f32.mrb[73].mxu0  ;;  %v4274_v33 = vadd.f32 %v9650_v3, %v4273_v34  ;;  %v4373_v34 = vrot.slane %v4335_v14, %v8744_v25 }
0x188c   :  { %v4276_v21 = vpop.f32.mrb[74].mxu0 }
0x188d   :  { %v7843_v6 = vpop.f32.mrb[75].mxu0 }
0x188e   :  { %v4341_v59 = vpop.xlane.xlu1 %4340 }
0x188f   :  { %v4381_v49 = vrot.slane %v4341_v59, %v8744_v25 }
0x1893   :  { %v8310_v53 = vpop.eup %8309 }
0x1894   :  { %v4283_v30 = vadd.f32 1.0, %v8310_v53  ;;  %v8312_v12 = vpop.eup %8311  ;;  %v8409_v53 = vld [vmem:[%s10555_s2 + $0x58] sm:$0xff] }
0x1895   :  { %v4290_v0 = vadd.f32 1.0, %v8312_v12 }
0x1896   :  { %8313 = vrcp.f32 %v4283_v30 }
0x1897   :  { %8315 = vrcp.f32 %v4290_v0 }
0x18a0   :  { %v8314_v46 = vpop.eup %8313 }
0x18a1   :  { %v4293_v28 = vmul.f32 %v8314_v46, %v4274_v33  ;;  %v8316_v47 = vpop.eup %8315 }
0x18a2   :  { %v4296_v8 = vsub.f32 1.0, %v8316_v47  ;;  %v4298_v42 = vmul.f32 %v8316_v47, %v4106_v55 }
0x18a3   :  { %v4294_v22 = vadd.f32 %v4293_v28, %v9652_v1  ;;  %v4320_v1 = vpop.xlane.xlu0 %4319 }
0x18a4   :  { %v4353_v58 = vrot.slane %v4320_v1, %v8744_v25 }
0x18a5   :  { %8317 = vtanh.f32 %v4294_v22 }
0x18a7   :  { %v4329_v41 = vpop.xlane.xlu0 %4328 }
0x18a8   :  { %v4365_v54 = vrot.slane %v4329_v41, %v8744_v25 }
0x18ab   :  { %v4332_v55 = vpop.xlane.xlu0 %4331 }
0x18ac   :  { %v4369_v45 = vrot.slane %v4332_v55, %v8744_v25 }
0x18af   :  { %v8318_v16 = vpop.eup %8317 }
0x18b0   :  { %v4297_v52 = vmul.f32 %v8318_v16, %v4296_v8 }
0x18b2   :  { %v4299_v2 = vadd.f32 %v4298_v42, %v4297_v52 }
0x18b4   :  { %4301 = vst.msk [vmem:[#allocation2 + $0x90] sm:$0xff] %vm69_vm0, %v4299_v2 }
0x18bb   :  { %v9879_v27 = vld [vmem:[#allocation2 + $0x90] sm:$0xff] }
0x18bc   :  { %v4312_v40 = vmul.f32 %v9565_v43, %v9879_v27  ;;  %v8408_v43 = vld [vmem:[%s10555_s2 + $0x18] sm:$0xff] }
0x18bd   :  { %v3184_v61 = vmul.f32 %v8408_v43, %v9695_v44 }
0x18be   :  { %v9884_v3 = vsel %vm69_vm0, %v4312_v40, 0.0 }
0x18bf   :  { %4325 = vadd.xlane.f32.xlu0 %v9884_v3  ;;  %v3191_v30 = vadd.f32 %v8409_v53, %v3184_v61 }
0x18c3   :  { %4337 = vadd.xlane.f32.xlu0 %v9689_v29  ;;  %v4382_v29 = vsel %vm631_vm1, %v4357_v5, %v4353_v58 }
0x194c   :  { %v4326_v36 = vpop.xlane.xlu0 %4325 }
0x194d   :  { %v4361_v19 = vrot.slane %v4326_v36, %v8744_v25 }
0x194f   :  { %v4383_v37 = vsel %vm633_vm2, %v4361_v19, %v4382_v29  ;;  %v8131_v29 = vld [vmem:[%s10556_s3 + $0xa0] sm:$0xff]  }
0x1950   :  { %v4384_v17 = vsel %vm635_vm3, %v4365_v54, %v4383_v37  ;;  %v4338_v20 = vpop.xlane.xlu0 %4337  ;;  %v8132_v54 = vld [vmem:[%s10556_s3 + $0xb0] sm:$0xff]   ;;  %7845 = vmatpush3.bf16.msra.mxu1 %v8131_v29 }
0x1951   :  { %v4385_v21 = vsel %vm637_vm4, %v4369_v45, %v4384_v17  ;;  %v4377_v6 = vrot.slane %v4338_v20, %v8744_v25  ;;  %7853 = vmatpush3.bf16.msra.mxu0 %v8132_v54  ;;  %7846 = vmatprep.subr.bf16.mxu1 %v10574_v26  ;;  %v8133_v17 = vld [vmem:[%s10556_s3 + $0xa8] sm:$0xff]  }
0x1952   :  { %v4386_v12 = vsel %vm639_vm5, %v4373_v34, %v4385_v21  ;;  %7854 = vmatprep.subr.bf16.mxu0 %v10574_v26  ;;  %v8134_v34 = vld [vmem:[%s10556_s3 + $0xb8] sm:$0xff]  }
0x1953   :  { %v4387_v0 = vsel %vm641_vm6, %v4377_v6, %v4386_v12 }
0x1954   :  { %v4388_v33 = vsel %vm643_vm7, %v4381_v49, %v4387_v0  ;;  %7847 = vmatpush3.bf16.msra.mxu1 %v8133_v17  ;;  %v9997_v17 = vld [vmem:[%s10557_s4 + $0x8] ss:$0 sm:$0xff] }
0x1955   :  { %v4390_v46 = vadd.f32 %v4388_v33, %v3191_v30  ;;  %7855 = vmatpush3.bf16.msra.mxu0 %v8134_v34  ;;  %7860 = vmatprep.subr.bf16.mxu1 %v10574_v26  ;;  %v3299_v34 = vadd.f32 %v9997_v17, %v9532_v63 }
0x1956   :  { %7868 = vmatprep.subr.bf16.mxu0 %v10574_v26 }
0x1957   :  { %v4391_v28 = vsel %vm647_vm8, %v4390_v46, -inf }
0x1958   :  { %v4392_v22 = vrot.slane %v4391_v28, 4 }
0x195a   :  { %v4393_v47 = vmax.f32 %v4391_v28, %v4392_v22 }
0x195c   :  { %v4394_v8 = vrot.slane %v4393_v47, 2 }
0x195e   :  { %v4395_v16 = vmax.f32 %v4393_v47, %v4394_v8 }
0x1960   :  { %v4396_v42 = vrot.slane %v4395_v16, 1 }
0x1962   :  { %v4397_v52 = vmax.f32 %v4395_v16, %v4396_v42 }
0x1964   :  { %v4398_v2 = vsub.f32 %v4390_v46, %v4397_v52 }
0x1966   :  { %v4399_v40 = vmul.f32 1.442695, %v4398_v2 }
0x1968   :  { %8319 = vpow2.f32 %v4399_v40 }
0x1972   :  { %v8320_v1 = vpop.eup %8319 }
0x1973   :  { %v4401_v41 = vsel %vm647_vm8, %v8320_v1, 0.0 }
0x1974   :  { %v4402_v18 = vrot.slane %v4401_v41, 4 }
0x1976   :  { %v4403_v55 = vadd.f32 %v4402_v18, %v4401_v41 }
0x1978   :  { %v4404_v14 = vrot.slane %v4403_v55, 2 }
0x197a   :  { %v4405_v5 = vadd.f32 %v4404_v14, %v4403_v55 }
0x197c   :  { %v4406_v58 = vrot.slane %v4405_v5, 1 }
0x197e   :  { %v4407_v36 = vadd.f32 %v4406_v58, %v4405_v5 }
0x1980   :  { %8321 = vrcp.f32 %v4407_v36 }
0x198a   :  { %v8322_v19 = vpop.eup %8321 }
0x198b   :  { %v4409_v43 = vmul.f32 %v8322_v19, %v8320_v1  ;;  %v9978_v19 = vld [vmem:[#allocation2 + $0xa8] sm:$0xff] }
0x198d   :  { %v4420_v61 = vrot.slane %v4409_v43, %v8776_v57  ;;  %v4413_v59 = vrot.slane %v4409_v43, %v8779_v9  ;;  %v4427_v45 = vrot.slane %v4409_v43, %v8785_v62  ;;  %v4441_v37 = vrot.slane %v4409_v43, %v8788_v11 }
0x198e   :  { %v4434_v20 = vrot.slane %v4409_v43, %v8799_v23  ;;  %v4455_v49 = vrot.slane %v4409_v43, %v8802_v31  ;;  %v4448_v21 = vrot.slane %v4409_v43, %v8812_v38  ;;  %v4462_v6 = vrot.slane %v4409_v43, %v8820_v10 }
0x198f   :  { %4422 = vbcast.lane.b32.xlu1 %v4420_v61, 256  ;;  %4415 = vbcast.lane.b32.xlu0 %v4413_v59, 256  ;;  %v9986_v59 = vld [vmem:[#allocation2 + $0xb8] sm:$0xff] }
0x1993   :  { %4429 = vbcast.lane.b32.xlu1 %v4427_v45, 256  ;;  %4443 = vbcast.lane.b32.xlu0 %v4441_v37, 256 }
0x1997   :  { %4436 = vbcast.lane.b32.xlu1 %v4434_v20, 256  ;;  %4457 = vbcast.lane.b32.xlu0 %v4455_v49, 256  ;;  %v10004_v20 = vld [vmem:[%s10557_s4 + $0x9] ss:$0 sm:$0xff] }
0x1998   :  { %v3389_v49 = vadd.f32 %v10004_v20, %v9538_v13 }
0x199b   :  { %4450 = vbcast.lane.b32.xlu1 %v4448_v21, 256  ;;  %v10011_v21 = vld [vmem:[%s10557_s4 + $0xb] ss:$0 sm:$0xff] }
0x199f   :  { %4464 = vbcast.lane.b32.xlu1 %v4462_v6, 256 }
0x19b6   :  { %4693 = vadd.xlane.f32.xlu0 %v9679_v35 }
0x19ba   :  { %4699 = vadd.xlane.f32.xlu0 %v9884_v3 }
0x19c3   :  { %4696 = vadd.xlane.f32.xlu1 %v9786_v56 }
0x1a01   :  { %v4423_v53 = vpop.permute.xlu1 %4422  ;;  %v4416_v30 = vpop.permute.xlu0 %4415 }
0x1a02   :  { %v4467_v12 = vmul.f32 %v4423_v53, %v9781_v51  ;;  %v4466_v0 = vmul.f32 %v4416_v30, %v9670_v60  ;;  %v10017_v53 = vld [vmem:[%s10557_s4 + $0xc] ss:$0 sm:$0xff] }
0x1a04   :  { %v4474_v22 = vadd.f32 %v4467_v12, %v4466_v0 }
0x1a05   :  { %v4430_v33 = vpop.permute.xlu1 %4429  ;;  %v4444_v28 = vpop.permute.xlu0 %4443 }
0x1a06   :  { %v4468_v46 = vmul.f32 %v4430_v33, %v9879_v27  ;;  %v4470_v35 = vmul.f32 %v4444_v28, %v9668_v39 }
0x1a08   :  { %v4475_v8 = vadd.f32 %v4474_v22, %v4468_v46 }
0x1a09   :  { %v4437_v47 = vpop.permute.xlu1 %4436  ;;  %v4458_v52 = vpop.permute.xlu0 %4457 }
0x1a0a   :  { %v4469_v16 = vmul.f32 %v4437_v47, %v9569_v32  ;;  %v4472_v41 = vmul.f32 %v4458_v52, %v9676_v7  ;;  %v8135_v32 = vld [vmem:[%s10556_s3 + $0xc0] sm:$0xff]   ;;  %v9973_v7 = vld [vmem:[%s10557_s4 + $0xe] ss:$0 sm:$0xff] }
0x1a0b   :  { %v4689_v43 = vmul.f32 %v9973_v7, %v9978_v19  ;;  %v4691_v29 = vmul.f32 %v9973_v7, %v9986_v59 }
0x1a0c   :  { %v4476_v42 = vadd.f32 %v4475_v8, %v4469_v16 }
0x1a0d   :  { %v4451_v2 = vpop.permute.xlu1 %4450  ;;  %v9983_v61 = vsel %vm69_vm0, %v4689_v43, 0.0  ;;  %v9991_v54 = vsel %vm69_vm0, %v4691_v29, 0.0 }
0x1a0e   :  { %v4471_v40 = vmul.f32 %v4451_v2, %v9588_v50  ;;  %v4477_v1 = vadd.f32 %v4476_v42, %v4470_v35  ;;  %v8136_v50 = vld [vmem:[%s10556_s3 + $0xc8] sm:$0xff]   ;;  %4708 = vadd.xlane.f32.xlu1 %v9983_v61 }
0x1a10   :  { %v4478_v60 = vadd.f32 %v4477_v1, %v4471_v40 }
0x1a11   :  { %v4465_v18 = vpop.permute.xlu1 %4464 }
0x1a12   :  { %v4473_v55 = vmul.f32 %v4465_v18, %v9596_v48  ;;  %v4479_v14 = vadd.f32 %v4478_v60, %v4472_v41  ;;  %v9968_v48 = vld [vmem:[#allocation2 + $0xa0] sm:$0xff]  ;;  %4714 = vadd.xlane.f32.xlu1 %v9991_v54  ;;  %v10023_v60 = vld [vmem:[%s10557_s4 + $0xd] ss:$0 sm:$0xff] }
0x1a13   :  { %v4688_v58 = vmul.f32 %v9973_v7, %v9968_v48 }
0x1a14   :  { %v9947_v5 = vadd.f32 %v4479_v14, %v4473_v55 }
0x1a15   :  { %v4704_v36 = vsel %vm69_vm0, %v4688_v58, 0.0 }
0x1a16   :  { %v4481_v39 = vpack.c.bf16 %v9947_v5, %v9947_v5  ;;  %4705 = vadd.xlane.f32.xlu0 %v4704_v36 }
0x1a18   :  { %7849 = vmatmul.mubr.msk.bf16.vlgmr.msra.gmra.mrb[88].mxu1 %vm69_vm0, %v4481_v39  ;;  %7857 = vmatmul.mubr.msk.bf16.vlgmr.msra.gmra.mrb[76].mxu0 %vm69_vm0, %v4481_v39 }
0x1a19   :  { %7861 = vmatpush3.bf16.msra.mxu1 %v8135_v32  ;;  %7864 = vmatprep.mubr.msk.bf16.mxu1 %vm8450_vm9, %v10574_v26 }
0x1a1a   :  { %7862 = vmatprep.subr.bf16.mxu1 %v10574_v26  ;;  %7872 = vmatprep.mubr.msk.bf16.mxu0 %vm8450_vm9, %v10574_v26 }
0x1a1d   :  { %7863 = vmatpush3.bf16.msra.mxu1 %v8136_v50 }
0x1a1e   :  { %7876 = vmatprep.subr.bf16.mxu1 %v10574_v26 }
0x1a20   :  { %7865 = vmatmul.mubr.msk.bf16.vlgmr.msra.gmra.mrb[92].mxu1 %vm69_vm0, %v4481_v39 }
0x1a21   :  { %7880 = vmatprep.mubr.msk.bf16.mxu1 %vm8450_vm9, %v10574_v26 }
0x1aeb   :  { %v4535_v45 = vpop.f32.mrb[88].mxu1  ;;  %v4591_v37 = vpop.f32.mrb[76].mxu0 }
0x1aec   :  { %v4536_v6 = vadd.f32 %v10011_v21, %v4535_v45  ;;  %v4592_v63 = vadd.f32 %v10017_v53, %v4591_v37  ;;  %v7850_v30 = vpop.f32.mrb[89].mxu1  ;;  %v7858_v12 = vpop.f32.mrb[77].mxu0  ;;  %v10029_v45 = vld [vmem:[#allocation2 + $0xb0] sm:$0xff] }
0x1aed   :  { %v4538_v0 = vpop.f32.mrb[90].mxu1  ;;  %v4594_v33 = vpop.f32.mrb[78].mxu0 }
0x1aee   :  { %v4653_v46 = vadd.f32 %v4536_v6, %v3299_v34  ;;  %v4660_v13 = vadd.f32 %v4592_v63, %v3389_v49  ;;  %v7851_v28 = vpop.f32.mrb[91].mxu1  ;;  %v7859_v22 = vpop.f32.mrb[79].mxu0 }
0x1aef   :  { %v4694_v6 = vpop.xlane.xlu0 %4693  ;;  %v4697_v30 = vpop.xlane.xlu1 %4696 }
0x1af0   :  { %v7180_v47 = vmul.f32 -1.442695, %v4653_v46  ;;  %v7181_v35 = vmul.f32 -1.442695, %v4660_v13  ;;  %v4731_v0 = vrot.slane %v4697_v30, %v8744_v25  ;;  %v4727_v46 = vrot.slane %v4694_v6, %v8744_v25 }
0x1af2   :  { %8323 = vpow2.f32 %v7180_v47  ;;  %v4756_v13 = vsel %vm631_vm1, %v4731_v0, %v4727_v46 }
0x1af3   :  { %v4647_v8 = vpop.f32.mrb[92].mxu1  ;;  %8325 = vpow2.f32 %v7181_v35  ;;  %v4700_v63 = vpop.xlane.xlu0 %4699 }
0x1af4   :  { %v7866_v16 = vpop.f32.mrb[93].mxu1  ;;  %v4648_v18 = vadd.f32 %v10023_v60, %v4647_v8  ;;  %v4709_v33 = vpop.xlane.xlu1 %4708  ;;  %v4735_v28 = vrot.slane %v4700_v63, %v8744_v25 }
0x1af5   :  { %v4650_v42 = vpop.f32.mrb[94].mxu1  ;;  %v4747_v8 = vrot.slane %v4709_v33, %v8744_v25  ;;  %v8416_v16 = vld [vmem:[%s10555_s2 + $0x20] sm:$0xff] }
0x1af6   :  { %v7867_v52 = vpop.f32.mrb[95].mxu1  ;;  %v3185_v35 = vmul.f32 %v8416_v16, %v9695_v44 }
0x1af7   :  { %v4706_v12 = vpop.xlane.xlu0 %4705 }
0x1af8   :  { %v4715_v42 = vpop.xlane.xlu1 %4714  ;;  %v4743_v52 = vrot.slane %v4706_v12, %v8744_v25 }
0x1afc   :  { %v8324_v2 = vpop.eup %8323 }
0x1afd   :  { %v4657_v40 = vadd.f32 1.0, %v8324_v2  ;;  %v8326_v1 = vpop.eup %8325  ;;  %v4757_v2 = vsel %vm633_vm2, %v4735_v28, %v4756_v13 }
0x1afe   :  { %v4664_v41 = vadd.f32 1.0, %v8326_v1 }
0x1aff   :  { %8327 = vrcp.f32 %v4657_v40 }
0x1b00   :  { %8329 = vrcp.f32 %v4664_v41 }
0x1b09   :  { %v8328_v55 = vpop.eup %8327 }
0x1b0a   :  { %v4667_v14 = vmul.f32 %v8328_v55, %v4648_v18  ;;  %v8330_v39 = vpop.eup %8329  ;;  %v4755_v18 = vrot.slane %v4715_v42, %v8744_v25 }
0x1b0b   :  { %v4670_v50 = vsub.f32 1.0, %v8330_v39  ;;  %v4672_v36 = vmul.f32 %v8330_v39, %v9947_v5 }
0x1b0c   :  { %v4668_v32 = vadd.f32 %v4667_v14, %v9655_v4  ;;  %v4690_v4 = vmul.f32 %v9973_v7, %v10029_v45 }
0x1b0e   :  { %8331 = vtanh.f32 %v4668_v32  ;;  %v10042_v5 = vsel %vm69_vm0, %v4690_v4, 0.0  ;;  %v8417_v32 = vld [vmem:[%s10555_s2 + $0x60] sm:$0xff] }
0x1b0f   :  { %v3192_v39 = vadd.f32 %v8417_v32, %v3185_v35 }
0x1b18   :  { %v8332_v58 = vpop.eup %8331 }
0x1b19   :  { %v4671_v43 = vmul.f32 %v8332_v58, %v4670_v50 }
0x1b1b   :  { %v4673_v29 = vadd.f32 %v4672_v36, %v4671_v43 }
0x1b1d   :  { %4675 = vst.msk [vmem:[#allocation2 + $0x98] sm:$0xff] %vm69_vm0, %v4673_v29 }
0x1b24   :  { %v10031_v37 = vld [vmem:[#allocation2 + $0x98] sm:$0xff] }
0x1b25   :  { %v4687_v34 = vmul.f32 %v9973_v7, %v10031_v37 }
0x1b27   :  { %v10038_v49 = vsel %vm69_vm0, %v4687_v34, 0.0 }
0x1b28   :  { %4702 = vadd.xlane.f32.xlu0 %v10038_v49 }
0x1b2c   :  { %4711 = vadd.xlane.f32.xlu0 %v10042_v5 }
0x1bb5   :  { %v4703_v22 = vpop.xlane.xlu0 %4702 }
0x1bb6   :  { %v4739_v47 = vrot.slane %v4703_v22, %v8744_v25 }
0x1bb8   :  { %v4758_v40 = vsel %vm635_vm3, %v4739_v47, %v4757_v2 }
0x1bb9   :  { %v4759_v1 = vsel %vm637_vm4, %v4743_v52, %v4758_v40  ;;  %v4712_v41 = vpop.xlane.xlu0 %4711  ;;  %v8137_v40 = vld [vmem:[%s10556_s3 + $0xa0] sm:$0xff]  }
0x1bba   :  { %v4760_v55 = vsel %vm639_vm5, %v4747_v8, %v4759_v1  ;;  %v4751_v14 = vrot.slane %v4712_v41, %v8744_v25  ;;  %v8138_v1 = vld [vmem:[%s10556_s3 + $0xb0] sm:$0xff]   ;;  %7869 = vmatpush3.bf16.msra.mxu0 %v8137_v40 }
0x1bbb   :  { %7877 = vmatpush3.bf16.msra.mxu1 %v8138_v1  ;;  %7870 = vmatprep.subr.bf16.mxu0 %v10574_v26 }
0x1bbc   :  { %v4761_v50 = vsel %vm641_vm6, %v4751_v14, %v4760_v55  ;;  %v8139_v55 = vld [vmem:[%s10556_s3 + $0xa8] sm:$0xff]   ;;  %7878 = vmatprep.subr.bf16.mxu1 %v10574_v26  ;;  %v8140_v14 = vld [vmem:[%s10556_s3 + $0xb8] sm:$0xff]  }
0x1bbd   :  { %v4762_v58 = vsel %vm643_vm7, %v4755_v18, %v4761_v50 }
0x1bbe   :  { %v4764_v36 = vadd.f32 %v4762_v58, %v3192_v39  ;;  %7871 = vmatpush3.bf16.msra.mxu0 %v8139_v55 }
0x1bbf   :  { %7879 = vmatpush3.bf16.msra.mxu1 %v8140_v14  ;;  %7884 = vmatprep.subr.bf16.mxu0 %v10574_v26 }
0x1bc0   :  { %v4765_v43 = vsel %vm647_vm8, %v4764_v36, -inf  ;;  %7892 = vmatprep.subr.bf16.mxu1 %v10574_v26 }
0x1bc1   :  { %v4766_v29 = vrot.slane %v4765_v43, 4 }
0x1bc3   :  { %v4767_v34 = vmax.f32 %v4765_v43, %v4766_v29 }
0x1bc5   :  { %v4768_v4 = vrot.slane %v4767_v34, 2 }
0x1bc7   :  { %v4769_v6 = vmax.f32 %v4767_v34, %v4768_v4 }
0x1bc9   :  { %v4770_v63 = vrot.slane %v4769_v6, 1 }
0x1bcb   :  { %v4771_v30 = vmax.f32 %v4769_v6, %v4770_v63  ;;  %v8418_v63 = vld [vmem:[#allocation2 + $0x80] sm:$0xff] }
0x1bcd   :  { %v4772_v12 = vsub.f32 %v4764_v36, %v4771_v30  ;;  %v10093_v36 = vld [vmem:[#allocation2 + $0x80] sm:$0xff] }
0x1bce   :  { %v5058_v43 = vmul.f32 %v9973_v7, %v10093_v36 }
0x1bcf   :  { %v4773_v0 = vmul.f32 1.442695, %v4772_v12 }
0x1bd0   :  { %v10098_v29 = vsel %vm69_vm0, %v5058_v43, 0.0 }
0x1bd1   :  { %8333 = vpow2.f32 %v4773_v0 }
0x1bdb   :  { %v8334_v33 = vpop.eup %8333 }
0x1bdc   :  { %v4775_v46 = vsel %vm647_vm8, %v8334_v33, 0.0 }
0x1bdd   :  { %v4776_v13 = vrot.slane %v4775_v46, 4 }
0x1bdf   :  { %v4777_v28 = vadd.f32 %v4776_v13, %v4775_v46 }
0x1be1   :  { %v4778_v22 = vrot.slane %v4777_v28, 2 }
0x1be3   :  { %v4779_v47 = vadd.f32 %v4778_v22, %v4777_v28 }
0x1be5   :  { %v4780_v8 = vrot.slane %v4779_v47, 1 }
0x1be7   :  { %v4781_v16 = vadd.f32 %v4780_v8, %v4779_v47 }
0x1be9   :  { %8335 = vrcp.f32 %v4781_v16 }
0x1bf3   :  { %v8336_v35 = vpop.eup %8335 }
0x1bf4   :  { %v4783_v42 = vmul.f32 %v8336_v35, %v8334_v33 }
0x1bf6   :  { %v4794_v52 = vrot.slane %v4783_v42, %v8776_v57  ;;  %v4787_v2 = vrot.slane %v4783_v42, %v8779_v9  ;;  %v4801_v41 = vrot.slane %v4783_v42, %v8785_v62  ;;  %v4815_v18 = vrot.slane %v4783_v42, %v8788_v11 }
0x1bf7   :  { %v4808_v32 = vrot.slane %v4783_v42, %v8799_v23  ;;  %v4829_v39 = vrot.slane %v4783_v42, %v8802_v31  ;;  %v4822_v50 = vrot.slane %v4783_v42, %v8812_v38  ;;  %v4836_v58 = vrot.slane %v4783_v42, %v8820_v10 }
0x1bf8   :  { %4796 = vbcast.lane.b32.xlu1 %v4794_v52, 256  ;;  %4789 = vbcast.lane.b32.xlu0 %v4787_v2, 256 }
0x1bfc   :  { %4803 = vbcast.lane.b32.xlu1 %v4801_v41, 256  ;;  %4817 = vbcast.lane.b32.xlu0 %v4815_v18, 256  ;;  %v8141_v41 = vld [vmem:[%s10556_s3 + $0xc0] sm:$0xff]  }
0x1c00   :  { %4810 = vbcast.lane.b32.xlu1 %v4808_v32, 256  ;;  %4831 = vbcast.lane.b32.xlu0 %v4829_v39, 256  ;;  %v3304_v32 = vadd.f32 %v9997_v17, %v9632_v15  ;;  %v3394_v39 = vadd.f32 %v10004_v20, %v9634_v24 }
0x1c04   :  { %4824 = vbcast.lane.b32.xlu1 %v4822_v50, 256 }
0x1c08   :  { %4838 = vbcast.lane.b32.xlu1 %v4836_v58, 256 }
0x1c1f   :  { %5067 = vadd.xlane.f32.xlu0 %v10098_v29 }
0x1c23   :  { %5073 = vadd.xlane.f32.xlu0 %v9884_v3 }
0x1c27   :  { %5076 = vadd.xlane.f32.xlu0 %v10038_v49 }
0x1c2c   :  { %5070 = vadd.xlane.f32.xlu1 %v9786_v56 }
0x1c30   :  { %5082 = vadd.xlane.f32.xlu1 %v9983_v61 }
0x1c34   :  { %5088 = vadd.xlane.f32.xlu1 %v9991_v54 }
0x1c6a   :  { %v4797_v34 = vpop.permute.xlu1 %4796  ;;  %v4790_v4 = vpop.permute.xlu0 %4789 }
0x1c6b   :  { %v4841_v6 = vmul.f32 %v4797_v34, %v9781_v51  ;;  %v4840_v30 = vmul.f32 %v8418_v63, %v4790_v4 }
0x1c6d   :  { %v4848_v46 = vadd.f32 %v4841_v6, %v4840_v30 }
0x1c6e   :  { %v4804_v12 = vpop.permute.xlu1 %4803  ;;  %v4818_v33 = vpop.permute.xlu0 %4817 }
0x1c6f   :  { %v4842_v0 = vmul.f32 %v4804_v12, %v9879_v27  ;;  %v4844_v56 = vmul.f32 %v4818_v33, %v9968_v48  ;;  %v8142_v48 = vld [vmem:[%s10556_s3 + $0xc8] sm:$0xff]  }
0x1c71   :  { %v4849_v28 = vadd.f32 %v4848_v46, %v4842_v0 }
0x1c72   :  { %v4811_v13 = vpop.permute.xlu1 %4810  ;;  %v4832_v47 = vpop.permute.xlu0 %4831 }
0x1c73   :  { %v4843_v22 = vmul.f32 %v4811_v13, %v10031_v37  ;;  %v4846_v51 = vmul.f32 %v4832_v47, %v10029_v45 }
0x1c75   :  { %v4850_v61 = vadd.f32 %v4849_v28, %v4843_v22 }
0x1c76   :  { %v4825_v8 = vpop.permute.xlu1 %4824 }
0x1c77   :  { %v4845_v16 = vmul.f32 %v4825_v8, %v9978_v19  ;;  %v4851_v35 = vadd.f32 %v4850_v61, %v4844_v56 }
0x1c79   :  { %v4852_v42 = vadd.f32 %v4851_v35, %v4845_v16 }
0x1c7a   :  { %v4839_v52 = vpop.permute.xlu1 %4838 }
0x1c7b   :  { %v4847_v2 = vmul.f32 %v4839_v52, %v9986_v59  ;;  %v4853_v40 = vadd.f32 %v4852_v42, %v4846_v51  ;;  %v10590_v51 = vld [vmem:[#allocation17_spill] sm:$0xff] }
0x1c7d   :  { %v4854_v1 = vadd.f32 %v4853_v40, %v4847_v2 }
0x1c7f   :  { %v4855_v18 = vpack.c.bf16 %v4854_v1, %v4854_v1 }
0x1c81   :  { %7873 = vmatmul.mubr.msk.bf16.vlgmr.msra.gmra.mrb[80].mxu0 %vm69_vm0, %v4855_v18  ;;  %7881 = vmatmul.mubr.msk.bf16.vlgmr.msra.gmra.mrb[96].mxu1 %vm69_vm0, %v4855_v18 }
0x1c82   :  { %7885 = vmatpush3.bf16.msra.mxu0 %v8141_v41  ;;  %7888 = vmatprep.mubr.msk.bf16.mxu0 %vm8450_vm9, %v10574_v26 }
0x1c83   :  { %7886 = vmatprep.subr.bf16.mxu0 %v10574_v26  ;;  %7896 = vmatprep.mubr.msk.bf16.mxu1 %vm8450_vm9, %v10574_v26 }
0x1c86   :  { %7887 = vmatpush3.bf16.msra.mxu0 %v8142_v48 }
0x1c87   :  { %7900 = vmatprep.subr.bf16.mxu0 %v10574_v26 }
0x1c89   :  { %7889 = vmatmul.mubr.msk.bf16.vlgmr.msra.gmra.mrb[84].mxu0 %vm69_vm0, %v4855_v18 }
0x1c8a   :  { %7904 = vmatprep.mubr.msk.bf16.mxu0 %vm8450_vm9, %v10574_v26 }
0x1d54   :  { %v4909_v55 = vpop.f32.mrb[80].mxu0  ;;  %v4965_v14 = vpop.f32.mrb[96].mxu1 }
0x1d55   :  { %v4910_v50 = vadd.f32 %v10011_v21, %v4909_v55  ;;  %v4966_v58 = vadd.f32 %v10017_v53, %v4965_v14  ;;  %v7874_v43 = vpop.f32.mrb[81].mxu0  ;;  %v7882_v34 = vpop.f32.mrb[97].mxu1 }
0x1d56   :  { %v4912_v4 = vpop.f32.mrb[82].mxu0  ;;  %v4968_v6 = vpop.f32.mrb[98].mxu1 }
0x1d57   :  { %v5027_v63 = vadd.f32 %v4910_v50, %v3304_v32  ;;  %v5034_v30 = vadd.f32 %v4966_v58, %v3394_v39  ;;  %v7875_v12 = vpop.f32.mrb[83].mxu0  ;;  %v7883_v0 = vpop.f32.mrb[99].mxu1 }
0x1d58   :  { %v5068_v39 = vpop.xlane.xlu0 %5067  ;;  %v5071_v50 = vpop.xlane.xlu1 %5070 }
0x1d59   :  { %v7203_v33 = vmul.f32 -1.442695, %v5027_v63  ;;  %v7204_v15 = vmul.f32 -1.442695, %v5034_v30  ;;  %v5101_v43 = vrot.slane %v5068_v39, %v8744_v25 }
0x1d5b   :  { %8337 = vpow2.f32 %v7203_v33 }
0x1d5c   :  { %v5021_v46 = vpop.f32.mrb[84].mxu0  ;;  %8339 = vpow2.f32 %v7204_v15  ;;  %v5074_v58 = vpop.xlane.xlu0 %5073 }
0x1d5d   :  { %v7890_v13 = vpop.f32.mrb[85].mxu0  ;;  %v5022_v8 = vadd.f32 %v10023_v60, %v5021_v46  ;;  %v5083_v34 = vpop.xlane.xlu1 %5082  ;;  %v5109_v63 = vrot.slane %v5074_v58, %v8744_v25  ;;  %v8419_v46 = vld [vmem:[%s10555_s2 + $0x28] sm:$0xff] }
0x1d5e   :  { %v5024_v28 = vpop.f32.mrb[86].mxu0  ;;  %v3186_v13 = vmul.f32 %v8419_v46, %v9695_v44 }
0x1d5f   :  { %v7891_v22 = vpop.f32.mrb[87].mxu0 }
0x1d60   :  { %v5077_v4 = vpop.xlane.xlu0 %5076  ;;  %v5121_v22 = vrot.slane %v5083_v34, %v8744_v25 }
0x1d61   :  { %v5113_v12 = vrot.slane %v5077_v4, %v8744_v25  ;;  %v5089_v15 = vpop.xlane.xlu1 %5088 }
0x1d65   :  { %v8338_v24 = vpop.eup %8337 }
0x1d66   :  { %v5031_v56 = vadd.f32 1.0, %v8338_v24  ;;  %v8340_v61 = vpop.eup %8339 }
0x1d67   :  { %v5038_v47 = vadd.f32 1.0, %v8340_v61  ;;  %v5129_v61 = vrot.slane %v5089_v15, %v8744_v25  ;;  %v8143_v15 = vld [vmem:[%s10556_s3 + $0xa0] sm:$0xff]  }
0x1d68   :  { %8341 = vrcp.f32 %v5031_v56  ;;  %7893 = vmatpush3.bf16.msra.mxu1 %v8143_v15  ;;  %v8147_v15 = vld [vmem:[%s10556_s3 + $0xc0] sm:$0xff]  }
0x1d69   :  { %8343 = vrcp.f32 %v5038_v47  ;;  %7894 = vmatprep.subr.bf16.mxu1 %v10574_v26 }
0x1d72   :  { %v8342_v16 = vpop.eup %8341 }
0x1d73   :  { %v5041_v35 = vmul.f32 %v8342_v16, %v5022_v8  ;;  %v8344_v52 = vpop.eup %8343  ;;  %v8420_v8 = vld [vmem:[%s10555_s2 + $0x68] sm:$0xff] }
0x1d74   :  { %v5044_v2 = vsub.f32 1.0, %v8344_v52  ;;  %v5046_v41 = vmul.f32 %v8344_v52, %v4854_v1  ;;  %v5105_v1 = vrot.slane %v5071_v50, %v8744_v25  ;;  %v3193_v16 = vadd.f32 %v8420_v8, %v3186_v13 }
0x1d75   :  { %v5042_v42 = vadd.f32 %v5041_v35, %v10590_v51 }
0x1d76   :  { %v5130_v6 = vsel %vm631_vm1, %v5105_v1, %v5101_v43 }
0x1d77   :  { %8345 = vtanh.f32 %v5042_v42  ;;  %v5131_v30 = vsel %vm633_vm2, %v5109_v63, %v5130_v6 }
0x1d78   :  { %v5132_v28 = vsel %vm635_vm3, %v5113_v12, %v5131_v30 }
0x1d81   :  { %v8346_v40 = vpop.eup %8345 }
0x1d82   :  { %v5045_v18 = vmul.f32 %v8346_v40, %v5044_v2 }
0x1d84   :  { %v5047_v48 = vadd.f32 %v5046_v41, %v5045_v18 }
0x1d86   :  { %5049 = vst.msk [vmem:[#allocation2 + $0xa0] sm:$0xff] %vm69_vm0, %v5047_v48 }
0x1d8d   :  { %v10139_v55 = vld [vmem:[#allocation2 + $0xa0] sm:$0xff] }
0x1d8e   :  { %v5062_v14 = vmul.f32 %v9973_v7, %v10139_v55 }
0x1d90   :  { %v10144_v32 = vsel %vm69_vm0, %v5062_v14, 0.0 }
0x1d91   :  { %5079 = vadd.xlane.f32.xlu0 %v10144_v32 }
0x1d95   :  { %5085 = vadd.xlane.f32.xlu0 %v10042_v5 }
0x1e1e   :  { %v5080_v0 = vpop.xlane.xlu0 %5079 }
0x1e1f   :  { %v5117_v33 = vrot.slane %v5080_v0, %v8744_v25 }
0x1e21   :  { %v5133_v24 = vsel %vm637_vm4, %v5117_v33, %v5132_v28  ;;  %v8144_v28 = vld [vmem:[%s10556_s3 + $0xb0] sm:$0xff]  }
0x1e22   :  { %v5086_v56 = vpop.xlane.xlu0 %5085  ;;  %v5134_v35 = vsel %vm639_vm5, %v5121_v22, %v5133_v24  ;;  %7901 = vmatpush3.bf16.msra.mxu0 %v8144_v28 }
0x1e23   :  { %v5125_v47 = vrot.slane %v5086_v56, %v8744_v25  ;;  %v8145_v56 = vld [vmem:[%s10556_s3 + $0xa8] sm:$0xff]   ;;  %7902 = vmatprep.subr.bf16.mxu0 %v10574_v26 }
0x1e24   :  { %7895 = vmatpush3.bf16.msra.mxu1 %v8145_v56  ;;  %v10591_v56 = vld [vmem:[#allocation14_spill] sm:$0xff] }
0x1e25   :  { %v5135_v51 = vsel %vm641_vm6, %v5125_v47, %v5134_v35  ;;  %7908 = vmatprep.subr.bf16.mxu1 %v10574_v26 }
0x1e26   :  { %v5136_v42 = vsel %vm643_vm7, %v5129_v61, %v5135_v51  ;;  %v8146_v61 = vld [vmem:[%s10556_s3 + $0xb8] sm:$0xff]   ;;  %v10198_v51 = vld [vmem:[#allocation2 + $0x88] sm:$0xff] }
0x1e27   :  { %v5138_v52 = vadd.f32 %v5136_v42, %v3193_v16  ;;  %7903 = vmatpush3.bf16.msra.mxu0 %v8146_v61  ;;  %v5433_v42 = vmul.f32 %v9973_v7, %v10198_v51  ;;  %v3307_v61 = vadd.f32 %v9997_v17, %v10591_v56 }
0x1e28   :  { %7916 = vmatprep.subr.bf16.mxu0 %v10574_v26 }
0x1e29   :  { %v5139_v2 = vsel %vm647_vm8, %v5138_v52, -inf }
0x1e2a   :  { %v5140_v40 = vrot.slane %v5139_v2, 4 }
0x1e2c   :  { %v5141_v41 = vmax.f32 %v5139_v2, %v5140_v40 }
0x1e2e   :  { %v5142_v18 = vrot.slane %v5141_v41, 2 }
0x1e30   :  { %v5143_v48 = vmax.f32 %v5141_v41, %v5142_v18  ;;  %v8421_v41 = vld [vmem:[#allocation2 + $0x88] sm:$0xff] }
0x1e32   :  { %v5144_v14 = vrot.slane %v5143_v48, 1 }
0x1e34   :  { %v5145_v39 = vmax.f32 %v5143_v48, %v5144_v14 }
0x1e36   :  { %v5146_v50 = vsub.f32 %v5138_v52, %v5145_v39  ;;  %v10205_v52 = vsel %vm69_vm0, %v5433_v42, 0.0 }
0x1e38   :  { %v5147_v58 = vmul.f32 1.442695, %v5146_v50 }
0x1e3a   :  { %8347 = vpow2.f32 %v5147_v58 }
0x1e44   :  { %v8348_v1 = vpop.eup %8347 }
0x1e45   :  { %v5149_v43 = vsel %vm647_vm8, %v8348_v1, 0.0 }
0x1e46   :  { %v5150_v34 = vrot.slane %v5149_v43, 4 }
0x1e48   :  { %v5151_v4 = vadd.f32 %v5150_v34, %v5149_v43 }
0x1e4a   :  { %v5152_v6 = vrot.slane %v5151_v4, 2 }
0x1e4c   :  { %v5153_v63 = vadd.f32 %v5152_v6, %v5151_v4 }
0x1e4e   :  { %v5154_v30 = vrot.slane %v5153_v63, 1 }
0x1e50   :  { %v5155_v12 = vadd.f32 %v5154_v30, %v5153_v63 }
0x1e52   :  { %8349 = vrcp.f32 %v5155_v12 }
0x1e5c   :  { %v8350_v0 = vpop.eup %8349 }
0x1e5d   :  { %v5157_v33 = vmul.f32 %v8350_v0, %v8348_v1 }
0x1e5f   :  { %v5168_v46 = vrot.slane %v5157_v33, %v8776_v57  ;;  %v5161_v13 = vrot.slane %v5157_v33, %v8779_v9  ;;  %v5175_v22 = vrot.slane %v5157_v33, %v8785_v62  ;;  %v5189_v24 = vrot.slane %v5157_v33, %v8788_v11 }
0x1e60   :  { %v5182_v47 = vrot.slane %v5157_v33, %v8799_v23  ;;  %v5203_v8 = vrot.slane %v5157_v33, %v8802_v31  ;;  %v5196_v16 = vrot.slane %v5157_v33, %v8812_v38  ;;  %v5210_v35 = vrot.slane %v5157_v33, %v8820_v10 }
0x1e61   :  { %5170 = vbcast.lane.b32.xlu1 %v5168_v46, 256  ;;  %5163 = vbcast.lane.b32.xlu0 %v5161_v13, 256 }
0x1e65   :  { %5177 = vbcast.lane.b32.xlu1 %v5175_v22, 256  ;;  %5191 = vbcast.lane.b32.xlu0 %v5189_v24, 256 }
0x1e69   :  { %5184 = vbcast.lane.b32.xlu1 %v5182_v47, 256  ;;  %5205 = vbcast.lane.b32.xlu0 %v5203_v8, 256  ;;  %v10592_v47 = vld [vmem:[#allocation15_spill] sm:$0xff] }
0x1e6a   :  { %v3397_v8 = vadd.f32 %v10004_v20, %v10592_v47 }
0x1e6d   :  { %5198 = vbcast.lane.b32.xlu1 %v5196_v16, 256 }
0x1e71   :  { %5212 = vbcast.lane.b32.xlu1 %v5210_v35, 256 }
0x1e88   :  { %5441 = vadd.xlane.f32.xlu0 %v10098_v29 }
0x1e8c   :  { %5447 = vadd.xlane.f32.xlu0 %v9884_v3 }
0x1e90   :  { %5450 = vadd.xlane.f32.xlu0 %v10038_v49 }
0x1e94   :  { %5453 = vadd.xlane.f32.xlu0 %v10144_v32 }
0x1e95   :  { %5444 = vadd.xlane.f32.xlu1 %v10205_v52 }
0x1e98   :  { %5459 = vadd.xlane.f32.xlu0 %v10042_v5 }
0x1ed3   :  { %v5171_v2 = vpop.permute.xlu1 %5170  ;;  %v5164_v40 = vpop.permute.xlu0 %5163 }
0x1ed4   :  { %v5215_v3 = vmul.f32 %v8421_v41, %v5171_v2  ;;  %v5214_v18 = vmul.f32 %v5164_v40, %v10093_v36 }
0x1ed6   :  { %v5222_v50 = vadd.f32 %v5215_v3, %v5214_v18 }
0x1ed7   :  { %v5178_v48 = vpop.permute.xlu1 %5177  ;;  %v5192_v39 = vpop.permute.xlu0 %5191 }
0x1ed8   :  { %v5216_v14 = vmul.f32 %v5178_v48, %v9879_v27  ;;  %v5218_v34 = vmul.f32 %v5192_v39, %v10139_v55 }
0x1eda   :  { %v5223_v1 = vadd.f32 %v5222_v50, %v5216_v14 }
0x1edb   :  { %v5185_v58 = vpop.permute.xlu1 %5184  ;;  %v5206_v6 = vpop.permute.xlu0 %5205 }
0x1edc   :  { %v5217_v43 = vmul.f32 %v5185_v58, %v10031_v37  ;;  %v5220_v12 = vmul.f32 %v5206_v6, %v10029_v45 }
0x1ede   :  { %v5224_v4 = vadd.f32 %v5223_v1, %v5217_v43 }
0x1edf   :  { %v5199_v5 = vpop.permute.xlu1 %5198 }
0x1ee0   :  { %v5219_v63 = vmul.f32 %v5199_v5, %v9978_v19  ;;  %v5225_v30 = vadd.f32 %v5224_v4, %v5218_v34  ;;  %v8148_v19 = vld [vmem:[%s10556_s3 + $0xc8] sm:$0xff]  }
0x1ee2   :  { %v5226_v0 = vadd.f32 %v5225_v30, %v5219_v63 }
0x1ee3   :  { %v5213_v33 = vpop.permute.xlu1 %5212 }
0x1ee4   :  { %v5221_v27 = vmul.f32 %v5213_v33, %v9986_v59  ;;  %v5227_v46 = vadd.f32 %v5226_v0, %v5220_v12  ;;  %v10593_v33 = vld [vmem:[#allocation19_spill] sm:$0xff] }
0x1ee6   :  { %v5228_v13 = vadd.f32 %v5227_v46, %v5221_v27 }
0x1ee8   :  { %v5229_v28 = vpack.c.bf16 %v5228_v13, %v5228_v13 }
0x1eea   :  { %7897 = vmatmul.mubr.msk.bf16.vlgmr.msra.gmra.mrb[100].mxu1 %vm69_vm0, %v5229_v28  ;;  %7905 = vmatmul.mubr.msk.bf16.vlgmr.msra.gmra.mrb[88].mxu0 %vm69_vm0, %v5229_v28 }
0x1eeb   :  { %7909 = vmatpush3.bf16.msra.mxu1 %v8147_v15  ;;  %7912 = vmatprep.mubr.msk.bf16.mxu1 %vm8450_vm9, %v10574_v26 }
0x1eec   :  { %7910 = vmatprep.subr.bf16.mxu1 %v10574_v26  ;;  %7920 = vmatprep.mubr.msk.bf16.mxu0 %vm8450_vm9, %v10574_v26 }
0x1eef   :  { %7911 = vmatpush3.bf16.msra.mxu1 %v8148_v19 }
0x1ef0   :  { %7924 = vmatprep.subr.bf16.mxu1 %v10574_v26 }
0x1ef2   :  { %7913 = vmatmul.mubr.msk.bf16.vlgmr.msra.gmra.mrb[104].mxu1 %vm69_vm0, %v5229_v28 }
0x1ef3   :  { %7928 = vmatprep.mubr.msk.bf16.mxu1 %vm8450_vm9, %v10574_v26 }
0x1fbd   :  { %v5283_v22 = vpop.f32.mrb[100].mxu1  ;;  %v5339_v24 = vpop.f32.mrb[88].mxu0 }
0x1fbe   :  { %v5284_v16 = vadd.f32 %v10011_v21, %v5283_v22  ;;  %v5340_v35 = vadd.f32 %v10017_v53, %v5339_v24  ;;  %v7898_v42 = vpop.f32.mrb[101].mxu1  ;;  %v7906_v2 = vpop.f32.mrb[89].mxu0 }
0x1fbf   :  { %v5286_v40 = vpop.f32.mrb[102].mxu1  ;;  %v5342_v41 = vpop.f32.mrb[90].mxu0 }
0x1fc0   :  { %v5401_v3 = vadd.f32 %v5284_v16, %v3307_v61  ;;  %v5408_v18 = vadd.f32 %v5340_v35, %v3397_v8  ;;  %v7899_v48 = vpop.f32.mrb[103].mxu1  ;;  %v7907_v14 = vpop.f32.mrb[91].mxu0 }
0x1fc1   :  { %v5442_v8 = vpop.xlane.xlu0 %5441  ;;  %v5445_v35 = vpop.xlane.xlu1 %5444 }
0x1fc2   :  { %v7226_v39 = vmul.f32 -1.442695, %v5401_v3  ;;  %v7227_v1 = vmul.f32 -1.442695, %v5408_v18  ;;  %v5479_v42 = vrot.slane %v5445_v35, %v8744_v25  ;;  %v5475_v2 = vrot.slane %v5442_v8, %v8744_v25 }
0x1fc4   :  { %8351 = vpow2.f32 %v7226_v39  ;;  %v5504_v40 = vsel %vm631_vm1, %v5479_v42, %v5475_v2 }
0x1fc5   :  { %v5395_v50 = vpop.f32.mrb[104].mxu1  ;;  %8353 = vpow2.f32 %v7227_v1  ;;  %v5448_v16 = vpop.xlane.xlu0 %5447 }
0x1fc6   :  { %v7914_v58 = vpop.f32.mrb[105].mxu1  ;;  %v5396_v30 = vadd.f32 %v10023_v60, %v5395_v50  ;;  %v5483_v41 = vrot.slane %v5448_v16, %v8744_v25 }
0x1fc7   :  { %v5398_v43 = vpop.f32.mrb[106].mxu1  ;;  %v8422_v58 = vld [vmem:[%s10555_s2 + $0x30] sm:$0xff] }
0x1fc8   :  { %v7915_v34 = vpop.f32.mrb[107].mxu1  ;;  %v5505_v18 = vsel %vm633_vm2, %v5483_v41, %v5504_v40  ;;  %v3187_v1 = vmul.f32 %v8422_v58, %v9695_v44  ;;  %v8150_v58 = vld [vmem:[%s10556_s3 + $0xb0] sm:$0xff]  }
0x1fc9   :  { %7925 = vmatpush3.bf16.msra.mxu1 %v8150_v58 }
0x1fca   :  { %7926 = vmatprep.subr.bf16.mxu1 %v10574_v26 }
0x1fce   :  { %v8352_v4 = vpop.eup %8351 }
0x1fcf   :  { %v5405_v6 = vadd.f32 1.0, %v8352_v4  ;;  %v8354_v5 = vpop.eup %8353 }
0x1fd0   :  { %v5412_v63 = vadd.f32 1.0, %v8354_v5  ;;  %v8423_v5 = vld [vmem:[%s10555_s2 + $0x70] sm:$0xff] }
0x1fd1   :  { %8355 = vrcp.f32 %v5405_v6 }
0x1fd2   :  { %8357 = vrcp.f32 %v5412_v63  ;;  %v3194_v63 = vadd.f32 %v8423_v5, %v3187_v1 }
0x1fdb   :  { %v8356_v12 = vpop.eup %8355 }
0x1fdc   :  { %v5415_v0 = vmul.f32 %v8356_v12, %v5396_v30  ;;  %v8358_v46 = vpop.eup %8357 }
0x1fdd   :  { %v5418_v15 = vsub.f32 1.0, %v8358_v46  ;;  %v5420_v19 = vmul.f32 %v8358_v46, %v5228_v13  ;;  %v5451_v13 = vpop.xlane.xlu0 %5450 }
0x1fde   :  { %v5416_v27 = vadd.f32 %v5415_v0, %v10593_v33  ;;  %v5487_v48 = vrot.slane %v5451_v13, %v8744_v25 }
0x1fe0   :  { %8359 = vtanh.f32 %v5416_v27  ;;  %v5506_v14 = vsel %vm635_vm3, %v5487_v48, %v5505_v18 }
0x1fe1   :  { %v5454_v3 = vpop.xlane.xlu0 %5453 }
0x1fe2   :  { %v5491_v39 = vrot.slane %v5454_v3, %v8744_v25 }
0x1fe4   :  { %v5507_v34 = vsel %vm637_vm4, %v5491_v39, %v5506_v14 }
0x1fea   :  { %v8360_v28 = vpop.eup %8359 }
0x1feb   :  { %v5419_v22 = vmul.f32 %v8360_v28, %v5418_v15 }
0x1fed   :  { %v5421_v24 = vadd.f32 %v5420_v19, %v5419_v22 }
0x1fef   :  { %5423 = vst.msk [vmem:[#allocation2 + $0xa8] sm:$0xff] %vm69_vm0, %v5421_v24 }
0x1ff6   :  { %v10242_v56 = vld [vmem:[#allocation2 + $0xa8] sm:$0xff] }
0x1ff7   :  { %v5437_v61 = vmul.f32 %v9973_v7, %v10242_v56 }
0x1ff9   :  { %v10247_v47 = vsel %vm69_vm0, %v5437_v61, 0.0 }
0x1ffa   :  { %5456 = vadd.xlane.f32.xlu1 %v10247_v47 }
0x1ffe   :  { %5462 = vadd.xlane.f32.xlu1 %v9991_v54  ;;  %v5460_v54 = vpop.xlane.xlu0 %5459 }
0x1fff   :  { %v5499_v4 = vrot.slane %v5460_v54, %v8744_v25 }
0x2087   :  { %v5457_v50 = vpop.xlane.xlu1 %5456 }
0x2088   :  { %v5495_v43 = vrot.slane %v5457_v50, %v8744_v25  ;;  %v8149_v50 = vld [vmem:[%s10556_s3 + $0xa0] sm:$0xff]  }
0x2089   :  { %7917 = vmatpush3.bf16.msra.mxu0 %v8149_v50 }
0x208a   :  { %v5508_v6 = vsel %vm639_vm5, %v5495_v43, %v5507_v34  ;;  %7918 = vmatprep.subr.bf16.mxu0 %v10574_v26  ;;  %v8151_v34 = vld [vmem:[%s10556_s3 + $0xa8] sm:$0xff]  }
0x208b   :  { %v5463_v30 = vpop.xlane.xlu1 %5462  ;;  %v5509_v0 = vsel %vm641_vm6, %v5499_v4, %v5508_v6  ;;  %v8152_v4 = vld [vmem:[%s10556_s3 + $0xb8] sm:$0xff]  }
0x208c   :  { %v5503_v12 = vrot.slane %v5463_v30, %v8744_v25  ;;  %7927 = vmatpush3.bf16.msra.mxu1 %v8152_v4 }
0x208d   :  { %7919 = vmatpush3.bf16.msra.mxu0 %v8151_v34  ;;  %7940 = vmatprep.subr.bf16.mxu1 %v10574_v26  ;;  %v10595_v34 = vld [vmem:[#allocation13_spill] sm:$0xff] }
0x208e   :  { %v5510_v33 = vsel %vm643_vm7, %v5503_v12, %v5509_v0  ;;  %7932 = vmatprep.subr.bf16.mxu0 %v10574_v26  ;;  %v10299_v12 = vld [vmem:[#allocation2 + $0x90] sm:$0xff]  ;;  %v3402_v4 = vadd.f32 %v10004_v20, %v10595_v34 }
0x208f   :  { %v5512_v27 = vadd.f32 %v5510_v33, %v3194_v63  ;;  %v5808_v0 = vmul.f32 %v9973_v7, %v10299_v12 }
0x2091   :  { %v5513_v46 = vsel %vm647_vm8, %v5512_v27, -inf  ;;  %v5820_v33 = vsel %vm69_vm0, %v5808_v0, 0.0 }
0x2092   :  { %v5514_v15 = vrot.slane %v5513_v46, 4 }
0x2094   :  { %v5515_v28 = vmax.f32 %v5513_v46, %v5514_v15 }
0x2096   :  { %v5516_v19 = vrot.slane %v5515_v28, 2 }
0x2098   :  { %v5517_v22 = vmax.f32 %v5515_v28, %v5516_v19 }
0x209a   :  { %v5518_v24 = vrot.slane %v5517_v22, 1 }
0x209c   :  { %v5519_v61 = vmax.f32 %v5517_v22, %v5518_v24  ;;  %v8424_v22 = vld [vmem:[#allocation2 + $0x90] sm:$0xff] }
0x209e   :  { %v5520_v8 = vsub.f32 %v5512_v27, %v5519_v61 }
0x20a0   :  { %v5521_v16 = vmul.f32 1.442695, %v5520_v8 }
0x20a2   :  { %8361 = vpow2.f32 %v5521_v16 }
0x20ac   :  { %v8362_v35 = vpop.eup %8361 }
0x20ad   :  { %v5523_v13 = vsel %vm647_vm8, %v8362_v35, 0.0 }
0x20ae   :  { %v5524_v42 = vrot.slane %v5523_v13, 4 }
0x20b0   :  { %v5525_v2 = vadd.f32 %v5524_v42, %v5523_v13 }
0x20b2   :  { %v5526_v40 = vrot.slane %v5525_v2, 2 }
0x20b4   :  { %v5527_v41 = vadd.f32 %v5526_v40, %v5525_v2 }
0x20b6   :  { %v5528_v3 = vrot.slane %v5527_v41, 1 }
0x20b8   :  { %v5529_v18 = vadd.f32 %v5528_v3, %v5527_v41 }
0x20ba   :  { %8363 = vrcp.f32 %v5529_v18 }
0x20c4   :  { %v8364_v48 = vpop.eup %8363 }
0x20c5   :  { %v5531_v14 = vmul.f32 %v8364_v48, %v8362_v35 }
0x20c7   :  { %v5542_v54 = vrot.slane %v5531_v14, %v8776_v57  ;;  %v5535_v39 = vrot.slane %v5531_v14, %v8779_v9  ;;  %v5549_v1 = vrot.slane %v5531_v14, %v8785_v62  ;;  %v5563_v43 = vrot.slane %v5531_v14, %v8788_v11 }
0x20c8   :  { %v5556_v6 = vrot.slane %v5531_v14, %v8799_v23  ;;  %v5577_v5 = vrot.slane %v5531_v14, %v8802_v31  ;;  %v5570_v63 = vrot.slane %v5531_v14, %v8812_v38  ;;  %v5584_v30 = vrot.slane %v5531_v14, %v8820_v10 }
0x20c9   :  { %5544 = vbcast.lane.b32.xlu1 %v5542_v54, 256  ;;  %5537 = vbcast.lane.b32.xlu0 %v5535_v39, 256 }
0x20cd   :  { %5551 = vbcast.lane.b32.xlu1 %v5549_v1, 256  ;;  %5565 = vbcast.lane.b32.xlu0 %v5563_v43, 256  ;;  %v10594_v1 = vld [vmem:[#allocation10_spill] sm:$0xff] }
0x20ce   :  { %v3312_v43 = vadd.f32 %v9997_v17, %v10594_v1 }
0x20d1   :  { %5558 = vbcast.lane.b32.xlu1 %v5556_v6, 256  ;;  %5579 = vbcast.lane.b32.xlu0 %v5577_v5, 256 }
0x20d5   :  { %5572 = vbcast.lane.b32.xlu1 %v5570_v63, 256 }
0x20d9   :  { %5586 = vbcast.lane.b32.xlu1 %v5584_v30, 256 }
0x20f0   :  { %5815 = vadd.xlane.f32.xlu0 %v10098_v29 }
0x20f4   :  { %5821 = vadd.xlane.f32.xlu0 %v5820_v33 }
0x20f8   :  { %5824 = vadd.xlane.f32.xlu0 %v10038_v49 }
0x20fc   :  { %5827 = vadd.xlane.f32.xlu0 %v10144_v32 }
0x20fd   :  { %5818 = vadd.xlane.f32.xlu1 %v10205_v52 }
0x2101   :  { %5830 = vadd.xlane.f32.xlu1 %v10247_v47 }
0x213b   :  { %v5545_v27 = vpop.permute.xlu1 %5544  ;;  %v5538_v46 = vpop.permute.xlu0 %5537 }
0x213c   :  { %v5589_v15 = vmul.f32 %v5545_v27, %v10198_v51  ;;  %v5588_v28 = vmul.f32 %v5538_v46, %v10093_v36 }
0x213e   :  { %v5596_v61 = vadd.f32 %v5589_v15, %v5588_v28 }
0x213f   :  { %v5552_v19 = vpop.permute.xlu1 %5551  ;;  %v5566_v24 = vpop.permute.xlu0 %5565 }
0x2140   :  { %v5590_v29 = vmul.f32 %v8424_v22, %v5552_v19  ;;  %v5592_v32 = vmul.f32 %v5566_v24, %v10139_v55 }
0x2142   :  { %v5597_v16 = vadd.f32 %v5596_v61, %v5590_v29 }
0x2143   :  { %v5559_v8 = vpop.permute.xlu1 %5558  ;;  %v5580_v35 = vpop.permute.xlu0 %5579 }
0x2144   :  { %v5591_v49 = vmul.f32 %v5559_v8, %v10031_v37  ;;  %v5594_v2 = vmul.f32 %v5580_v35, %v10029_v45  ;;  %v8153_v37 = vld [vmem:[%s10556_s3 + $0xc0] sm:$0xff]   ;;  %v8154_v45 = vld [vmem:[%s10556_s3 + $0xc8] sm:$0xff]  }
0x2146   :  { %v5598_v52 = vadd.f32 %v5597_v16, %v5591_v49 }
0x2147   :  { %v5573_v47 = vpop.permute.xlu1 %5572 }
0x2148   :  { %v5593_v13 = vmul.f32 %v5573_v47, %v10242_v56  ;;  %v5599_v42 = vadd.f32 %v5598_v52, %v5592_v32  ;;  %v10596_v32 = vld [vmem:[#allocation16_spill] sm:$0xff] }
0x214a   :  { %v5600_v40 = vadd.f32 %v5599_v42, %v5593_v13 }
0x214b   :  { %v5587_v41 = vpop.permute.xlu1 %5586 }
0x214c   :  { %v5595_v3 = vmul.f32 %v5587_v41, %v9986_v59  ;;  %v5601_v18 = vadd.f32 %v5600_v40, %v5594_v2  ;;  %v10333_v59 = vld [vmem:[#allocation2 + $0xb8] sm:$0xff] }
0x214d   :  { %v5813_v54 = vmul.f32 %v9973_v7, %v10333_v59 }
0x214e   :  { %v5602_v48 = vadd.f32 %v5601_v18, %v5595_v3 }
0x214f   :  { %v5835_v39 = vsel %vm69_vm0, %v5813_v54, 0.0 }
0x2150   :  { %v5603_v14 = vpack.c.bf16 %v5602_v48, %v5602_v48  ;;  %5836 = vadd.xlane.f32.xlu1 %v5835_v39 }
0x2152   :  { %7921 = vmatmul.mubr.msk.bf16.vlgmr.msra.gmra.mrb[92].mxu0 %vm69_vm0, %v5603_v14  ;;  %7929 = vmatmul.mubr.msk.bf16.vlgmr.msra.gmra.mrb[108].mxu1 %vm69_vm0, %v5603_v14 }
0x2153   :  { %7933 = vmatpush3.bf16.msra.mxu0 %v8153_v37  ;;  %7936 = vmatprep.mubr.msk.bf16.mxu0 %vm8450_vm9, %v10574_v26 }
0x2154   :  { %7934 = vmatprep.subr.bf16.mxu0 %v10574_v26  ;;  %7944 = vmatprep.mubr.msk.bf16.mxu1 %vm8450_vm9, %v10574_v26 }
0x2157   :  { %7935 = vmatpush3.bf16.msra.mxu0 %v8154_v45 }
0x2158   :  { %7948 = vmatprep.subr.bf16.mxu0 %v10574_v26 }
0x215a   :  { %7937 = vmatmul.mubr.msk.bf16.vlgmr.msra.gmra.mrb[96].mxu0 %vm69_vm0, %v5603_v14 }
0x215b   :  { %7952 = vmatprep.mubr.msk.bf16.mxu0 %vm8450_vm9, %v10574_v26 }
0x217d   :  { %v5816_v37 = vpop.xlane.xlu0 %5815 }
0x217e   :  { %v5849_v54 = vrot.slane %v5816_v37, %v8744_v25 }
0x2181   :  { %v5822_v14 = vpop.xlane.xlu0 %5821 }
0x2185   :  { %v5825_v39 = vpop.xlane.xlu0 %5824 }
0x2186   :  { %v5861_v34 = vrot.slane %v5825_v39, %v8744_v25  ;;  %v8159_v39 = vld [vmem:[%s10556_s3 + $0xd0] sm:$0xff]  }
0x218a   :  { %v5819_v45 = vpop.xlane.xlu1 %5818 }
0x2225   :  { %v5657_v50 = vpop.f32.mrb[92].mxu0  ;;  %v5713_v58 = vpop.f32.mrb[108].mxu1 }
0x2226   :  { %v5658_v6 = vadd.f32 %v10011_v21, %v5657_v50  ;;  %v5714_v5 = vadd.f32 %v10017_v53, %v5713_v58  ;;  %v7922_v63 = vpop.f32.mrb[93].mxu0  ;;  %v7930_v30 = vpop.f32.mrb[109].mxu1  ;;  %v5857_v58 = vrot.slane %v5822_v14, %v8744_v25  ;;  %v8155_v14 = vld [vmem:[%s10556_s3 + $0xa0] sm:$0xff]  }
0x2227   :  { %v5660_v0 = vpop.f32.mrb[94].mxu0  ;;  %v5716_v33 = vpop.f32.mrb[110].mxu1  ;;  %v8426_v63 = vld [vmem:[%s10555_s2 + $0x38] sm:$0xff]  ;;  %7941 = vmatpush3.bf16.msra.mxu1 %v8155_v14  ;;  %v6360_v14 = vld [vmem:[#allocation2 + $0x40] sm:$0xff] }
0x2228   :  { %v5775_v7 = vadd.f32 %v5658_v6, %v3312_v43  ;;  %v5782_v27 = vadd.f32 %v5714_v5, %v3402_v4  ;;  %v7923_v46 = vpop.f32.mrb[95].mxu0  ;;  %v7931_v15 = vpop.f32.mrb[111].mxu1  ;;  %v3188_v30 = vmul.f32 %v8426_v63, %v9695_v44  ;;  %7942 = vmatprep.subr.bf16.mxu1 %v10574_v26 }
0x2229   :  { %v5831_v43 = vpop.xlane.xlu1 %5830  ;;  %v5828_v4 = vpop.xlane.xlu0 %5827 }
0x222a   :  { %v7249_v28 = vmul.f32 -1.442695, %v5775_v7  ;;  %v7250_v17 = vmul.f32 -1.442695, %v5782_v27  ;;  %v5865_v5 = vrot.slane %v5828_v4, %v8744_v25  ;;  %v5869_v33 = vrot.slane %v5831_v43, %v8744_v25 }
0x222c   :  { %8365 = vpow2.f32 %v7249_v28  ;;  %v8427_v28 = vld [vmem:[%s10555_s2 + $0x78] sm:$0xff] }
0x222d   :  { %v5769_v19 = vpop.f32.mrb[96].mxu0  ;;  %8367 = vpow2.f32 %v7250_v17  ;;  %v5837_v0 = vpop.xlane.xlu1 %5836 }
0x222e   :  { %v7938_v22 = vpop.f32.mrb[97].mxu0  ;;  %v5770_v8 = vadd.f32 %v10023_v60, %v5769_v19  ;;  %v8425_v60 = vld [vmem:[%s10557_s4 + $0xe] ss:$0 sm:$0xff]  ;;  %v5877_v46 = vrot.slane %v5837_v0, %v8744_v25  ;;  %v3195_v19 = vadd.f32 %v8427_v28, %v3188_v30  ;;  %v8428_v0 = vld [vmem:[#allocation2 + $0x98] sm:$0xff] }
0x222f   :  { %v5772_v29 = vpop.f32.mrb[98].mxu0 }
0x2230   :  { %v7939_v24 = vpop.f32.mrb[99].mxu0 }
0x2236   :  { %v8366_v20 = vpop.eup %8365 }
0x2237   :  { %v5779_v21 = vadd.f32 1.0, %v8366_v20  ;;  %v8368_v53 = vpop.eup %8367 }
0x2238   :  { %v5786_v61 = vadd.f32 1.0, %v8368_v53 }
0x2239   :  { %8369 = vrcp.f32 %v5779_v21 }
0x223a   :  { %8371 = vrcp.f32 %v5786_v61 }
0x2243   :  { %v8370_v16 = vpop.eup %8369 }
0x2244   :  { %v5789_v49 = vmul.f32 %v8370_v16, %v5770_v8  ;;  %v8372_v35 = vpop.eup %8371 }
0x2245   :  { %v5792_v47 = vsub.f32 1.0, %v8372_v35  ;;  %v5794_v42 = vmul.f32 %v8372_v35, %v5602_v48  ;;  %v5853_v48 = vrot.slane %v5819_v45, %v8744_v25  ;;  %v8156_v45 = vld [vmem:[%s10556_s3 + $0xb0] sm:$0xff]  }
0x2246   :  { %v5790_v52 = vadd.f32 %v5789_v49, %v10596_v32  ;;  %7949 = vmatpush3.bf16.msra.mxu0 %v8156_v45 }
0x2247   :  { %v5878_v50 = vsel %vm631_vm1, %v5853_v48, %v5849_v54  ;;  %7950 = vmatprep.subr.bf16.mxu0 %v10574_v26 }
0x2248   :  { %8373 = vtanh.f32 %v5790_v52  ;;  %v5879_v1 = vsel %vm633_vm2, %v5857_v58, %v5878_v50 }
0x2249   :  { %v5880_v6 = vsel %vm635_vm3, %v5861_v34, %v5879_v1 }
0x224a   :  { %v5881_v7 = vsel %vm637_vm4, %v5865_v5, %v5880_v6 }
0x224b   :  { %v5882_v22 = vsel %vm639_vm5, %v5869_v33, %v5881_v7 }
0x2252   :  { %v8374_v13 = vpop.eup %8373 }
0x2253   :  { %v5793_v2 = vmul.f32 %v8374_v13, %v5792_v47 }
0x2255   :  { %v5795_v40 = vadd.f32 %v5794_v42, %v5793_v2 }
0x2257   :  { %5797 = vst.msk [vmem:[#allocation2 + $0xb0] sm:$0xff] %vm69_vm0, %v5795_v40 }
0x225e   :  { %v10347_v41 = vld [vmem:[#allocation2 + $0xb0] sm:$0xff] }
0x225f   :  { %v5812_v3 = vmul.f32 %v8425_v60, %v10347_v41 }
0x2261   :  { %v5832_v18 = vsel %vm69_vm0, %v5812_v3, 0.0 }
0x2262   :  { %5833 = vadd.xlane.f32.xlu0 %v5832_v18 }
0x22ef   :  { %v5834_v27 = vpop.xlane.xlu0 %5833 }
0x22f0   :  { %v5873_v15 = vrot.slane %v5834_v27, %v8744_v25 }
0x22f2   :  { %v5883_v17 = vsel %vm641_vm6, %v5873_v15, %v5882_v22 }
0x22f3   :  { %v5884_v44 = vsel %vm643_vm7, %v5877_v46, %v5883_v17 }
0x22f4   :  { %v5886_v29 = vadd.f32 %v5884_v44, %v3195_v19 }
0x22f6   :  { %v5887_v24 = vsel %vm647_vm8, %v5886_v29, -inf }
0x22f7   :  { %v5888_v20 = vrot.slane %v5887_v24, 4 }
0x22f9   :  { %v5889_v21 = vmax.f32 %v5887_v24, %v5888_v20  ;;  %v6177_v20 = vld [vmem:[#allocation2] sm:$0xff] }
0x22fb   :  { %v5890_v53 = vrot.slane %v5889_v21, 2 }
0x22fd   :  { %v5891_v61 = vmax.f32 %v5889_v21, %v5890_v53  ;;  %v8161_v21 = vld [vmem:[%s10556_s3 + $0xd8] sm:$0xff]   ;;  %v8162_v53 = vld [vmem:[%s10556_s3 + $0xc8] sm:$0xff]  }
0x22ff   :  { %v5892_v8 = vrot.slane %v5891_v61, 1 }
0x2301   :  { %v5893_v25 = vmax.f32 %v5891_v61, %v5892_v8  ;;  %v8163_v61 = vld [vmem:[%s10556_s3 + $0x100] sm:$0xff]   ;;  %v6180_v8 = vld [vmem:[#allocation2 + $0x18] sm:$0xff] }
0x2303   :  { %v5894_v16 = vsub.f32 %v5886_v29, %v5893_v25  ;;  %v8160_v29 = vld [vmem:[%s10556_s3 + $0xc0] sm:$0xff]  }
0x2304   :  { %v6181_v25 = vld [vmem:[#allocation2 + $0x20] sm:$0xff] }
0x2305   :  { %v5895_v49 = vmul.f32 1.442695, %v5894_v16  ;;  %v6182_v16 = vld [vmem:[#allocation2 + $0x28] sm:$0xff] }
0x2307   :  { %8375 = vpow2.f32 %v5895_v49  ;;  %v6179_v49 = vld [vmem:[#allocation2 + $0x10] sm:$0xff] }
0x2311   :  { %v8376_v32 = vpop.eup %8375 }
0x2312   :  { %v5897_v52 = vsel %vm647_vm8, %v8376_v32, 0.0 }
0x2313   :  { %v5898_v35 = vrot.slane %v5897_v52, 4 }
0x2315   :  { %v5899_v47 = vadd.f32 %v5898_v35, %v5897_v52  ;;  %v8164_v52 = vld [vmem:[%s10556_s3 + $0x108] sm:$0xff]   ;;  %v6187_v35 = vpack.c.bf16 %v6182_v16, %v6181_v25 }
0x2317   :  { %v5900_v13 = vrot.slane %v5899_v47, 2 }
0x2319   :  { %v5901_v42 = vadd.f32 %v5900_v13, %v5899_v47  ;;  %v6183_v47 = vld [vmem:[#allocation2 + $0x30] sm:$0xff]  ;;  %v6184_v13 = vld [vmem:[#allocation2 + $0x38] sm:$0xff] }
0x231b   :  { %v5902_v2 = vrot.slane %v5901_v42, 1 }
0x231d   :  { %v5903_v40 = vadd.f32 %v5902_v2, %v5901_v42  ;;  %v6188_v42 = vpack.c.bf16 %v6184_v13, %v6183_v47  ;;  %v10597_v2 = vld [vmem:[#allocation6_spill] sm:$0xff] }
0x231f   :  { %8377 = vrcp.f32 %v5903_v40  ;;  %v8166_v40 = vld [vmem:[%s10556_s3 + $0xe8] sm:$0xff]  }
0x2329   :  { %v8378_v60 = vpop.eup %8377 }
0x232a   :  { %v5905_v3 = vmul.f32 %v8378_v60, %v8376_v32  ;;  %v6186_v32 = vpack.c.bf16 %v6180_v8, %v6179_v49  ;;  %v10598_v60 = vld [vmem:[#allocation7_spill] sm:$0xff] }
0x232c   :  { %v5916_v18 = vrot.slane %v5905_v3, %v8776_v57  ;;  %v5909_v37 = vrot.slane %v5905_v3, %v8779_v9  ;;  %v5923_v48 = vrot.slane %v5905_v3, %v8785_v62  ;;  %v5937_v54 = vrot.slane %v5905_v3, %v8788_v11  ;;  %v8157_v57 = vld [vmem:[%s10556_s3 + $0xa8] sm:$0xff]   ;;  %v8158_v9 = vld [vmem:[%s10556_s3 + $0xb8] sm:$0xff]  }
0x232d   :  { %v5930_v62 = vrot.slane %v5905_v3, %v8799_v23  ;;  %v5951_v11 = vrot.slane %v5905_v3, %v8802_v31  ;;  %7943 = vmatpush3.bf16.msra.mxu1 %v8157_v57  ;;  %7951 = vmatpush3.bf16.msra.mxu0 %v8158_v9  ;;  %v5944_v50 = vrot.slane %v5905_v3, %v8812_v38  ;;  %v6365_v57 = vld [vmem:[#allocation2 + $0x68] sm:$0xff]  ;;  %v6362_v9 = vld [vmem:[#allocation2 + $0x50] sm:$0xff] }
0x232e   :  { %5918 = vbcast.lane.b32.xlu1 %v5916_v18, 256  ;;  %5911 = vbcast.lane.b32.xlu0 %v5909_v37, 256  ;;  %v5958_v58 = vrot.slane %v5905_v3, %v8820_v10  ;;  %v10599_v3 = vld [vmem:[#allocation8_spill] sm:$0xff]  ;;  %v6361_v37 = vld [vmem:[#allocation2 + $0x48] sm:$0xff] }
0x232f   :  { %7956 = vmatprep.subr.bf16.mxu1 %v10574_v26  ;;  %7964 = vmatprep.subr.bf16.mxu0 %v8159_v39  ;;  %v8167_v18 = vld [vmem:[%s10556_s3 + $0xf0] sm:$0xff]   ;;  %v6368_v45 = vpack.c.bf16 %v6361_v37, %v6360_v14 }
0x2332   :  { %5925 = vbcast.lane.b32.xlu1 %v5923_v48, 256  ;;  %5939 = vbcast.lane.b32.xlu0 %v5937_v54, 256  ;;  %v10600_v48 = vld [vmem:[#allocation9_spill] sm:$0xff] }
0x2333   :  { %v6363_v54 = vld [vmem:[#allocation2 + $0x58] sm:$0xff] }
0x2336   :  { %5932 = vbcast.lane.b32.xlu1 %v5930_v62, 256  ;;  %5953 = vbcast.lane.b32.xlu0 %v5951_v11, 256  ;;  %v6369_v62 = vpack.c.bf16 %v6363_v54, %v6362_v9  ;;  %v6364_v11 = vld [vmem:[#allocation2 + $0x60] sm:$0xff] }
0x233a   :  { %5946 = vbcast.lane.b32.xlu1 %v5944_v50, 256  ;;  %v6370_v50 = vpack.c.bf16 %v6365_v57, %v6364_v11 }
0x233e   :  { %5960 = vbcast.lane.b32.xlu1 %v5958_v58, 256  ;;  %v6367_v58 = vld [vmem:[#allocation2 + $0x78] sm:$0xff] }
0x23a0   :  { %v5919_v23 = vpop.permute.xlu1 %5918  ;;  %v5912_v1 = vpop.permute.xlu0 %5911 }
0x23a1   :  { %v5963_v31 = vmul.f32 %v5919_v23, %v10198_v51  ;;  %v5962_v43 = vmul.f32 %v5912_v1, %v10093_v36  ;;  %v6366_v23 = vld [vmem:[#allocation2 + $0x70] sm:$0xff] }
0x23a2   :  { %v6371_v1 = vpack.c.bf16 %v6367_v58, %v6366_v23 }
0x23a3   :  { %v5970_v5 = vadd.f32 %v5963_v31, %v5962_v43  ;;  %v6474_v31 = vld [vmem:[#allocation2 + $0x80] sm:$0xff] }
0x23a4   :  { %v5926_v34 = vpop.permute.xlu1 %5925  ;;  %v5940_v6 = vpop.permute.xlu0 %5939  ;;  %v6482_v43 = vpack.c.bf16 %v10198_v51, %v6474_v31  ;;  %v8170_v51 = vld [vmem:[%s10556_s3 + $0x118] sm:$0xff]  }
0x23a5   :  { %v5964_v4 = vmul.f32 %v5926_v34, %v10299_v12  ;;  %v5966_v33 = vmul.f32 %v5940_v6, %v10139_v55  ;;  %v6178_v55 = vld [vmem:[#allocation2 + $0x8] sm:$0xff]  ;;  %v6477_v34 = vld [vmem:[#allocation2 + $0x98] sm:$0xff]  ;;  %v6478_v6 = vld [vmem:[#allocation2 + $0xa0] sm:$0xff] }
0x23a7   :  { %v5971_v30 = vadd.f32 %v5970_v5, %v5964_v4  ;;  %v6483_v4 = vpack.c.bf16 %v6477_v34, %v10299_v12  ;;  %v6484_v5 = vpack.c.bf16 %v10242_v56, %v6478_v6  ;;  %v8171_v6 = vld [vmem:[%s10556_s3 + $0x120] sm:$0xff]  }
0x23a8   :  { %v5933_v63 = vpop.permute.xlu1 %5932  ;;  %v5954_v10 = vpop.permute.xlu0 %5953 }
0x23a9   :  { %v5965_v38 = vmul.f32 %v8428_v0, %v5933_v63  ;;  %v5968_v28 = vmul.f32 %v5954_v10, %v10347_v41  ;;  %v8169_v63 = vld [vmem:[%s10556_s3 + $0x110] sm:$0xff]   ;;  %v10601_v0 = vld [vmem:[#allocation11_spill] sm:$0xff] }
0x23ab   :  { %v5972_v7 = vadd.f32 %v5971_v30, %v5965_v38 }
0x23ac   :  { %v5947_v27 = vpop.permute.xlu1 %5946 }
0x23ad   :  { %v5967_v46 = vmul.f32 %v5947_v27, %v10242_v56  ;;  %v5973_v15 = vadd.f32 %v5972_v7, %v5966_v33  ;;  %v8429_v56 = vld [vmem:[%s10557_s4 + $0x8] ss:$0 sm:$0xff]  ;;  %v8430_v33 = vld [vmem:[%s10557_s4 + $0x9] ss:$0 sm:$0xff]  ;;  %v10602_v7 = vld [vmem:[#allocation12_spill] sm:$0xff] }
0x23ae   :  { %v3315_v38 = vadd.f32 %v8429_v56, %v10601_v0  ;;  %v3405_v10 = vadd.f32 %v8430_v33, %v10602_v7  ;;  %v8431_v27 = vld [vmem:[%s10557_s4 + $0xb] ss:$0 sm:$0xff] }
0x23af   :  { %v5974_v36 = vadd.f32 %v5973_v15, %v5967_v46  ;;  %v8432_v15 = vld [vmem:[%s10557_s4 + $0xc] ss:$0 sm:$0xff] }
0x23b0   :  { %v5961_v19 = vpop.permute.xlu1 %5960 }
0x23b1   :  { %v5969_v22 = vmul.f32 %v5961_v19, %v10333_v59  ;;  %v5975_v17 = vadd.f32 %v5974_v36, %v5968_v28  ;;  %v6185_v59 = vpack.c.bf16 %v6178_v55, %v6177_v20 }
0x23b3   :  { %v10411_v44 = vadd.f32 %v5975_v17, %v5969_v22 }
0x23b5   :  { %v5977_v24 = vpack.c.bf16 %v10411_v44, %v10411_v44 }
0x23b7   :  { %7945 = vmatmul.mubr.msk.bf16.vlgmr.msra.gmra.mrb[112].mxu1 %vm69_vm0, %v5977_v24  ;;  %7953 = vmatmul.mubr.msk.bf16.vlgmr.msra.gmra.mrb[100].mxu0 %vm69_vm0, %v5977_v24 }
0x23b8   :  { %7957 = vmatpush3.bf16.msra.mxu1 %v8160_v29  ;;  %7965 = vmatpush3.bf16.msra.mxu0 %v8159_v39  ;;  %v8168_v39 = vld [vmem:[%s10556_s3 + $0xf8] sm:$0xff]  }
0x23b9   :  { %7968 = vmatprep.mubr.msk.bf16.mxu0 %vm69_vm0, %v6185_v59  ;;  %7958 = vmatprep.subr.bf16.mxu1 %v10574_v26 }
0x23ba   :  { %7966 = vmatprep.subr.bf16.mxu0 %v8161_v21  ;;  %7960 = vmatprep.mubr.msk.bf16.mxu1 %vm8450_vm9, %v10574_v26  ;;  %v8165_v26 = vld [vmem:[%s10556_s3 + $0xe0] sm:$0xff]  }
0x23bc   :  { %7959 = vmatpush3.bf16.msra.mxu1 %v8162_v53  ;;  %7967 = vmatpush3.bf16.msra.mxu0 %v8161_v21 }
0x23bd   :  { %7976 = vmatprep.subr.bf16.mxu0 %v8163_v61  ;;  %8012 = vmatprep.subr.bf16.mxu1 %v8169_v63 }
0x23bf   :  { %7961 = vmatmul.mubr.msk.bf16.vlgmr.msra.gmra.mrb[116].mxu1 %vm69_vm0, %v5977_v24  ;;  %7969 = vmatmul.mubr.msk.bf16.vlgmr.msra.gmra.mrb[104].mxu0 %vm69_vm0, %v6186_v32 }
0x23c0   :  { %7972 = vmatprep.mubr.msk.bf16.mxu0 %vm69_vm0, %v6187_v35  ;;  %7977 = vmatpush3.bf16.msra.mxu0 %v8163_v61  ;;  %v8433_v35 = vld [vmem:[%s10557_s4 + $0xd] ss:$0 sm:$0xff] }
0x23c1   :  { %7978 = vmatprep.subr.bf16.mxu0 %v8164_v52  ;;  %8013 = vmatpush3.bf16.msra.mxu1 %v8169_v63 }
0x23c2   :  { %8014 = vmatprep.subr.bf16.mxu1 %v8170_v51 }
0x23c4   :  { %7979 = vmatpush3.bf16.msra.mxu0 %v8164_v52 }
0x23c5   :  { %7988 = vmatprep.subr.bf16.mxu0 %v8165_v26  ;;  %8015 = vmatpush3.bf16.msra.mxu1 %v8170_v51 }
0x23c6   :  { %8024 = vmatprep.subr.bf16.mxu1 %v8171_v6 }
0x23c7   :  { %7973 = vmatmul.mubr.msk.bf16.gmra.mrb[108].mxu0 %vm69_vm0, %v6188_v42  ;;  %v10603_v42 = vld [vmem:[#allocation18_spill] sm:$0xff] }
0x23c8   :  { %7980 = vmatprep.mubr.msk.bf16.mxu0 %vm69_vm0, %v10597_v2 }
0x23cf   :  { %7981 = vmatmul.mubr.msk.bf16.vlgmr.msra.gmra.mrb[104].mxu0 %vm69_vm0, %v10598_v60 }
0x23d0   :  { %7984 = vmatprep.mubr.msk.bf16.mxu0 %vm69_vm0, %v10599_v3  ;;  %7989 = vmatpush3.bf16.msra.mxu0 %v8165_v26 }
0x23d1   :  { %7990 = vmatprep.subr.bf16.mxu0 %v8166_v40 }
0x23d4   :  { %7991 = vmatpush3.bf16.msra.mxu0 %v8166_v40 }
0x23d5   :  { %8000 = vmatprep.subr.bf16.mxu0 %v8167_v18 }
0x23d7   :  { %7985 = vmatmul.mubr.msk.bf16.gmra.mrb[108].mxu0 %vm69_vm0, %v10600_v48 }
0x23d8   :  { %7992 = vmatprep.mubr.msk.bf16.mxu0 %vm69_vm0, %v6368_v45  ;;  %v7315_v45 = vld [vmem:[%s10557_s4 + $0xf] ss:$0 sm:$0xff] }
0x23df   :  { %7993 = vmatmul.mubr.msk.bf16.vlgmr.msra.gmra.mrb[104].mxu0 %vm69_vm0, %v6369_v62 }
0x23e0   :  { %7996 = vmatprep.mubr.msk.bf16.mxu0 %vm69_vm0, %v6370_v50  ;;  %8001 = vmatpush3.bf16.msra.mxu0 %v8167_v18 }
0x23e1   :  { %8002 = vmatprep.subr.bf16.mxu0 %v8168_v39 }
0x23e4   :  { %8003 = vmatpush3.bf16.msra.mxu0 %v8168_v39 }
0x23e7   :  { %7997 = vmatmul.mubr.msk.bf16.gmra.mrb[108].mxu0 %vm69_vm0, %v6371_v1 }
0x23e8   :  { %8004 = vmatprep.mubr.msk.bf16.mxu0 %vm69_vm0, %v6482_v43 }
0x23ef   :  { %8005 = vmatmul.mubr.msk.bf16.vlgmr.msra.gmra.mrb[104].mxu0 %vm69_vm0, %v6483_v4 }
0x23f0   :  { %8008 = vmatprep.mubr.msk.bf16.mxu0 %vm69_vm0, %v6484_v5 }
0x248a   :  { %v6031_v12 = vpop.f32.mrb[112].mxu1  ;;  %v6087_v30 = vpop.f32.mrb[100].mxu0 }
0x248b   :  { %v6032_v46 = vadd.f32 %v8431_v27, %v6031_v12  ;;  %v6088_v28 = vadd.f32 %v8432_v15, %v6087_v30  ;;  %v7946_v36 = vpop.f32.mrb[113].mxu1  ;;  %v7954_v19 = vpop.f32.mrb[101].mxu0 }
0x248c   :  { %v6034_v22 = vpop.f32.mrb[114].mxu1  ;;  %v6090_v17 = vpop.f32.mrb[102].mxu0 }
0x248d   :  { %v6149_v29 = vadd.f32 %v6032_v46, %v3315_v38  ;;  %v6156_v55 = vadd.f32 %v6088_v28, %v3405_v10  ;;  %v7947_v24 = vpop.f32.mrb[115].mxu1  ;;  %v7955_v20 = vpop.f32.mrb[103].mxu0  ;;  %v7321_v10 = vld [vmem:[%s10557_s4 + $0x10] ss:$0 sm:$0xff] }
0x248f   :  { %v7272_v21 = vmul.f32 -1.442695, %v6149_v29  ;;  %v7273_v61 = vmul.f32 -1.442695, %v6156_v55 }
0x2491   :  { %8379 = vpow2.f32 %v7272_v21 }
0x2492   :  { %v6143_v59 = vpop.f32.mrb[116].mxu1  ;;  %8381 = vpow2.f32 %v7273_v61 }
0x2493   :  { %v7962_v53 = vpop.f32.mrb[117].mxu1  ;;  %v6144_v26 = vadd.f32 %v8433_v35, %v6143_v59 }
0x2494   :  { %v6146_v8 = vpop.f32.mrb[118].mxu1 }
0x2495   :  { %v7963_v25 = vpop.f32.mrb[119].mxu1 }
0x249b   :  { %v8380_v16 = vpop.eup %8379 }
0x249c   :  { %v6153_v49 = vadd.f32 1.0, %v8380_v16  ;;  %v8382_v32 = vpop.eup %8381 }
0x249d   :  { %v6160_v52 = vadd.f32 1.0, %v8382_v32 }
0x249e   :  { %8383 = vrcp.f32 %v6153_v49 }
0x249f   :  { %8385 = vrcp.f32 %v6160_v52 }
0x24a8   :  { %v8384_v47 = vpop.eup %8383 }
0x24a9   :  { %v6163_v13 = vmul.f32 %v8384_v47, %v6144_v26  ;;  %v8386_v40 = vpop.eup %8385 }
0x24aa   :  { %v6166_v60 = vsub.f32 1.0, %v8386_v40  ;;  %v6168_v18 = vmul.f32 %v8386_v40, %v10411_v44 }
0x24ab   :  { %v6164_v2 = vadd.f32 %v6163_v13, %v10603_v42 }
0x24ad   :  { %8387 = vtanh.f32 %v6164_v2 }
0x24b7   :  { %v8388_v3 = vpop.eup %8387 }
0x24b8   :  { %v6167_v37 = vmul.f32 %v8388_v3, %v6166_v60  ;;  %v7333_v3 = vld [vmem:[%s10557_s4 + $0x11] ss:$0 sm:$0xff] }
0x24ba   :  { %v6169_v14 = vadd.f32 %v6168_v18, %v6167_v37 }
0x24bc   :  { %6171 = vst.msk [vmem:[#allocation2 + $0xb8] sm:$0xff] %vm69_vm0, %v6169_v14 }
0x24c2   :  { %v8006_v48 = vpop.f32.mrb[104].mxu0 }
0x24c3   :  { %v6598_v54 = vadd.f32 %v8006_v48, %v7315_v45  ;;  %v6549_v57 = vpop.f32.mrb[105].mxu0  ;;  %v6481_v9 = vld [vmem:[#allocation2 + $0xb8] sm:$0xff] }
0x24c4   :  { %v6596_v62 = vadd.f32 %v7315_v45, %v6549_v57  ;;  %v8007_v11 = vpop.f32.mrb[106].mxu0  ;;  %v6485_v39 = vpack.c.bf16 %v6481_v9, %v10347_v41  ;;  %v8172_v41 = vld [vmem:[%s10556_s3 + $0x128] sm:$0xff]  }
0x24c5   :  { %v6599_v50 = vadd.f32 %v8007_v11, %v7315_v45  ;;  %v6552_v58 = vpop.f32.mrb[107].mxu0  ;;  %v6606_v44 = vmax.f32 %v6598_v54, 0.0 }
0x24c6   :  { %v6597_v23 = vadd.f32 %v7315_v45, %v6552_v58  ;;  %8009 = vmatmul.mubr.msk.bf16.gmra.mrb[108].mxu0 %vm69_vm0, %v6485_v39  ;;  %v6604_v31 = vmax.f32 %v6596_v62, 0.0 }
0x24c7   :  { %v6607_v1 = vmax.f32 %v6599_v50, 0.0 }
0x24c8   :  { %v6605_v43 = vmax.f32 %v6597_v23, 0.0 }
0x24c9   :  { %v6613_v34 = vpack.c.bf16 %v6607_v1, %v6606_v44 }
0x24ca   :  { %v6612_v4 = vpack.c.bf16 %v6605_v43, %v6604_v31 }
0x24cc   :  { %8016 = vmatprep.mubr.msk.bf16.mxu1 %vm69_vm0, %v6612_v4 }
0x24cd   :  { %8017 = vmatmul.mubr.msk.bf16.vlgmr.msra.gmra.mrb[120].mxu1 %vm69_vm0, %v6613_v34 }
0x24ce   :  { %8025 = vmatpush3.bf16.msra.mxu1 %v8171_v6 }
0x24cf   :  { %8026 = vmatprep.subr.bf16.mxu1 %v8172_v41 }
0x24d2   :  { %8027 = vmatpush3.bf16.msra.mxu1 %v8172_v41 }
0x2599   :  { %v8010_v5 = vpop.f32.mrb[108].mxu0 }
0x259a   :  { %v6602_v63 = vadd.f32 %v8010_v5, %v7315_v45  ;;  %v6565_v51 = vpop.f32.mrb[109].mxu0 }
0x259b   :  { %v6600_v12 = vadd.f32 %v7315_v45, %v6565_v51  ;;  %v8011_v30 = vpop.f32.mrb[110].mxu0 }
0x259c   :  { %v6603_v56 = vadd.f32 %v8011_v30, %v7315_v45  ;;  %v6568_v0 = vpop.f32.mrb[111].mxu0  ;;  %v6610_v33 = vmax.f32 %v6602_v63, 0.0 }
0x259d   :  { %v6601_v38 = vadd.f32 %v7315_v45, %v6568_v0  ;;  %v6608_v27 = vmax.f32 %v6600_v12, 0.0 }
0x259e   :  { %v6611_v7 = vmax.f32 %v6603_v56, 0.0 }
0x259f   :  { %v6609_v46 = vmax.f32 %v6601_v38, 0.0 }
0x25a0   :  { %v6615_v15 = vpack.c.bf16 %v6611_v7, %v6610_v33  ;;  %v8018_v28 = vpop.f32.mrb[120].mxu1 }
0x25a1   :  { %v6614_v36 = vpack.c.bf16 %v6609_v46, %v6608_v27  ;;  %v6696_v19 = vadd.f32 %v8018_v28, %v7321_v10  ;;  %v6687_v22 = vpop.f32.mrb[121].mxu1 }
0x25a2   :  { %v6688_v17 = vadd.f32 %v7321_v10, %v6687_v22  ;;  %v8019_v29 = vpop.f32.mrb[122].mxu1 }
0x25a3   :  { %v6699_v55 = vadd.f32 %v8019_v29, %v7321_v10  ;;  %v6690_v24 = vpop.f32.mrb[123].mxu1  ;;  %8020 = vmatprep.mubr.msk.bf16.mxu1 %vm69_vm0, %v6614_v36  ;;  %v6720_v21 = vmax.f32 %v6696_v19, 0.0 }
0x25a4   :  { %v6691_v20 = vadd.f32 %v7321_v10, %v6690_v24  ;;  %8021 = vmatmul.mubr.msk.bf16.gmra.mrb[124].mxu1 %vm69_vm0, %v6615_v15  ;;  %v6718_v53 = vmax.f32 %v6688_v17, 0.0 }
0x25a5   :  { %v6721_v59 = vmax.f32 %v6699_v55, 0.0 }
0x25a6   :  { %v6719_v61 = vmax.f32 %v6691_v20, 0.0 }
0x25a7   :  { %v6727_v8 = vpack.c.bf16 %v6721_v59, %v6720_v21 }
0x25a8   :  { %v6726_v25 = vpack.c.bf16 %v6719_v61, %v6718_v53 }
0x25aa   :  { %8028 = vmatprep.mubr.msk.bf16.mxu1 %vm69_vm0, %v6726_v25 }
0x25ac   :  { %8029 = vmatmul.mubr.msk.bf16.vlgmr.msra.gmra.mrb[128].mxu1 %vm69_vm0, %v6727_v8 }
0x2677   :  { %v8022_v16 = vpop.f32.mrb[124].mxu1 }
0x2678   :  { %v6712_v49 = vadd.f32 %v8022_v16, %v7321_v10  ;;  %v6703_v32 = vpop.f32.mrb[125].mxu1 }
0x2679   :  { %v6704_v52 = vadd.f32 %v7321_v10, %v6703_v32  ;;  %v8023_v35 = vpop.f32.mrb[126].mxu1 }
0x267a   :  { %v6715_v26 = vadd.f32 %v8023_v35, %v7321_v10  ;;  %v6706_v47 = vpop.f32.mrb[127].mxu1  ;;  %v6724_v42 = vmax.f32 %v6712_v49, 0.0 }
0x267b   :  { %v6707_v13 = vadd.f32 %v7321_v10, %v6706_v47  ;;  %v6722_v40 = vmax.f32 %v6704_v52, 0.0 }
0x267c   :  { %v6725_v2 = vmax.f32 %v6715_v26, 0.0 }
0x267d   :  { %v6723_v60 = vmax.f32 %v6707_v13, 0.0 }
0x267e   :  { %v6729_v18 = vpack.c.bf16 %v6725_v2, %v6724_v42 }
0x267f   :  { %v6728_v37 = vpack.c.bf16 %v6723_v60, %v6722_v40  ;;  %v8030_v14 = vpop.f32.mrb[128].mxu1 }
0x2680   :  { %v6810_v45 = vadd.f32 %v8030_v14, %v7333_v3  ;;  %v6801_v48 = vpop.f32.mrb[129].mxu1 }
0x2681   :  { %v6802_v54 = vadd.f32 %v7333_v3, %v6801_v48  ;;  %v8031_v57 = vpop.f32.mrb[130].mxu1  ;;  %8032 = vmatprep.mubr.msk.bf16.mxu1 %vm69_vm0, %v6728_v37 }
0x2682   :  { %6834 = vst.msk [vmem:[%s10558_s5 + $0x10] sm:$0xff] %vm69_vm0, %v6810_v45  ;;  %v6813_v9 = vadd.f32 %v8031_v57, %v7333_v3  ;;  %v6804_v62 = vpop.f32.mrb[131].mxu1  ;;  %8033 = vmatmul.mubr.msk.bf16.gmra.mrb[132].mxu1 %vm69_vm0, %v6729_v18 }
0x2683   :  { %6832 = vst.msk [vmem:[%s10558_s5] sm:$0xff] %vm69_vm0, %v6802_v54  ;;  %v6805_v11 = vadd.f32 %v7333_v3, %v6804_v62 }
0x2684   :  { %6835 = vst.msk [vmem:[%s10558_s5 + $0x18] sm:$0xff] %vm69_vm0, %v6813_v9 }
0x2685   :  { %6833 = vst.msk [vmem:[%s10558_s5 + $0x8] sm:$0xff] %vm69_vm0, %v6805_v11 }
0x2755   :  { %v8034_v39 = vpop.f32.mrb[132].mxu1 }
0x2756   :  { %v6826_v50 = vadd.f32 %v8034_v39, %v7333_v3  ;;  %v6817_v58 = vpop.f32.mrb[133].mxu1 }
0x2757   :  { %v6818_v23 = vadd.f32 %v7333_v3, %v6817_v58  ;;  %v8035_v44 = vpop.f32.mrb[134].mxu1 }
0x2758   :  { %6838 = vst.msk [vmem:[%s10558_s5 + $0x30] sm:$0xff] %vm69_vm0, %v6826_v50  ;;  %v6829_v1 = vadd.f32 %v8035_v44, %v7333_v3  ;;  %v6820_v31 = vpop.f32.mrb[135].mxu1 }
0x2759   :  { %6836 = vst.msk [vmem:[%s10558_s5 + $0x20] sm:$0xff] %vm69_vm0, %v6818_v23  ;;  %v6821_v43 = vadd.f32 %v7333_v3, %v6820_v31 }
0x275a   :  { %6839 = vst.msk [vmem:[%s10558_s5 + $0x38] sm:$0xff] %vm69_vm0, %v6829_v1 }
0x275b   :  { %6837 = vst.msk [vmem:[%s10558_s5 + $0x28] sm:$0xff] %vm69_vm0, %v6821_v43 }
0x275c   :  { %6844 = vsyncpa [#allocation4], 1 }

</bundles_post_ra>
